<compile_context>
chip_gen: v6e
topology: v6e:2x2x1
jax: 0.10.0
libtpu: 0.0.40
codegen_flags: <defaults>
</compile_context>

<pallas_src>
import functools
import math

import jax
import jax.numpy as jnp
from jax.experimental import pallas as pl
from jax.experimental.pallas import tpu as pltpu

_MXU_DTYPE = jnp.bfloat16   # MXU operand dtype (weights / im2col)
_ACT_DTYPE = jnp.bfloat16   # inter-layer activation storage dtype

_G3 = (3, 3, 1, 1, 1)       # (kh, kw, stride_h, pad_h, pad_w) of the 3x3 convs


def _rup8(x):
    return ((x + 7) // 8) * 8


def _out_hw(h, w, geom):
    kh, kw, sh, ph, pw = geom            # stride_w == 1 for every conv here
    return (h + 2 * ph - kh) // sh + 1, (w + 2 * pw - kw) + 1


# ----------------------------------------------------------------------------
# In-kernel conv helper (operates on VMEM values, channel-major layout)
# ----------------------------------------------------------------------------
def _conv_apply(x, h, w, geom, wmat, bias, relu):
    """One conv + folded BN on VMEM values.

    x    : (cin_p, h*w)          bf16  — channels on sublanes, flat spatial on lanes
    wmat : (cout_p, kh*kw*cin_p) bf16  — BN scale folded in
    bias : (cout_p, 1)           f32
    returns (cout_p, ho*wo) f32 (post-bias, optionally post-ReLU), lane-dense.
    """
    kh, kw, sh, ph, pw = geom
    cin_p = x.shape[0]
    hp, wp = h + 2 * ph, w + 2 * pw
    ho = (hp - kh) // sh + 1
    wo = wp - kw + 1
    m = (hp - kh) * wp + wo              # stride-1 flat output length (junk cols incl.)
    dt = x.dtype

    # Zero-pad spatially, entirely in VMEM (no HBM pad pass).
    if ph == 0 and pw == 0:
        xp = x
    elif pw == 0:
        z = jnp.zeros((cin_p, ph * wp), dt)
        xp = jnp.concatenate([z, x, z], axis=1)
    else:
        pieces = []
        if ph:
            pieces.append(jnp.zeros((cin_p, ph * wp), dt))
        zc = jnp.zeros((cin_p, pw), dt)
        for hh in range(h):
            pieces += [zc, x[:, hh * w:(hh + 1) * w], zc]
        if ph:
            pieces.append(jnp.zeros((cin_p, ph * wp), dt))
        xp = jnp.concatenate(pieces, axis=1)          # (cin_p, hp*wp)

    # VMEM-local im2col: concatenate the kh*kw lane-shifted tap slices along
    # the (8-aligned) channel axis -> one big-K GEMM, MXU-internal accumulation.
    if kh == 1 and kw == 1:
        a = xp[:, :m]
    else:
        a = jnp.concatenate(
            [xp[:, di * wp + dj: di * wp + dj + m]
             for di in range(kh) for dj in range(kw)], axis=0)

    # Lane-dense GEMM: output (cout_p, m) keeps the long spatial dim on lanes.
    y = jnp.dot(wmat, a, preferred_element_type=jnp.float32) + bias

    # Drop junk columns (w >= wo wraps across rows) and apply the H-stride via
    # row selection — a VMEM-local lane re-pack, never touches HBM.
    if sh == 1 and wo == wp:
        out = y
    else:
        out = jnp.concatenate(
            [y[:, hh * sh * wp: hh * sh * wp + wo] for hh in range(ho)], axis=1)
    if relu:
        out = jnp.maximum(out, 0.0)
    return out


# ----------------------------------------------------------------------------
# Pallas kernels
# ----------------------------------------------------------------------------
def _conv_kernel(x_ref, w_ref, b_ref, o_ref, *, h, w, geom, relu):
    """Single fused conv + BN (+ ReLU) for one batch element."""
    out = _conv_apply(x_ref[...], h, w, geom, w_ref[...], b_ref[...], relu)
    o_ref[...] = out.astype(o_ref.dtype)


def _double_conv_kernel(x_ref, w1_ref, b1_ref, w2_ref, b2_ref, *rest,
                        h, w, g1, g2, relu1, relu2, res_mode):
    """Two chained convs fully fused in VMEM; optional residual into conv #2.

    res_mode: "none"      plain conv -> conv chain
              "identity"  residual = block input             (BasicBlock)
              "down"      residual = 1x1 conv + BN of input  (BasicBlock w/ downsample)
    The residual is added before the final ReLU (BasicBlock semantics).
    """
    if res_mode == "down":
        wd_ref, bd_ref, o_ref = rest
    else:
        (o_ref,) = rest

    x = x_ref[...]
    a1 = _conv_apply(x, h, w, g1, w1_ref[...], b1_ref[...], relu1)
    h1, w1 = _out_hw(h, w, g1)
    y2 = _conv_apply(a1.astype(x.dtype), h1, w1, g2,
                     w2_ref[...], b2_ref[...], False)
    if res_mode == "identity":
        y2 = y2 + x.astype(jnp.float32)
    elif res_mode == "down":
        y2 = y2 + _conv_apply(x, h, w, (1, 1, 1, 0, 0),
                              wd_ref[...], bd_ref[...], False)
    if relu2:
        y2 = jnp.maximum(y2, 0.0)
    o_ref[...] = y2.astype(o_ref.dtype)


# ----------------------------------------------------------------------------
# pallas_call plumbing
# ----------------------------------------------------------------------------
def _imap_batched(nrest):
    def imap(b):
        return (b,) + (0,) * nrest
    return imap


def _imap_fixed(ndim):
    def imap(b):
        return (0,) * ndim
    return imap


def _act_spec(arr):        # per-batch activation block (None, C, M)
    return pl.BlockSpec((None,) + arr.shape[1:], _imap_batched(arr.ndim - 1))


def _fix_spec(arr):        # grid-invariant weight / bias block
    return pl.BlockSpec(arr.shape, _imap_fixed(arr.ndim))


def _launch(kernel, args, batched, out_shape, flops):
    n = out_shape.shape[0]
    in_specs = [_act_spec(a) if b else _fix_spec(a)
                for a, b in zip(args, batched)]
    bytes_accessed = (sum(int(a.size) * a.dtype.itemsize for a in args)
                      + math.prod(out_shape.shape) * out_shape.dtype.itemsize)
    return pl.pallas_call(
        kernel,
        out_shape=out_shape,
        grid=(n,),
        in_specs=in_specs,
        out_specs=pl.BlockSpec((None,) + out_shape.shape[1:],
                               _imap_batched(len(out_shape.shape) - 1)),
        compiler_params=pltpu.CompilerParams(
            dimension_semantics=("parallel",)),
        cost_estimate=pl.CostEstimate(flops=flops, transcendentals=0,
                                      bytes_accessed=bytes_accessed),
    )(*args)


# ----------------------------------------------------------------------------
# Layer wrappers (all reshapes here are free row-major views, no HBM passes)
# ----------------------------------------------------------------------------
def conv_bn_act(x, wb, geom, relu=True):
    """x: (n, cin_p, H, W) bf16 channel-padded NCHW; wb = (w_flat, bias)."""
    w_flat, bias = wb
    n, cin_p, h, w = x.shape
    cout_p = w_flat.shape[0]
    ho, wo = _out_hw(h, w, geom)
    x_flat = x.reshape(n, cin_p, h * w)
    flops = 2 * n * w_flat.shape[0] * w_flat.shape[1] * (ho * wo)
    kernel = functools.partial(_conv_kernel, h=h, w=w, geom=geom, relu=relu)
    out = _launch(kernel, [x_flat, w_flat, bias], [True, False, False],
                  jax.ShapeDtypeStruct((n, cout_p, ho * wo), _ACT_DTYPE), flops)
    return out.reshape(n, cout_p, ho, wo)


def double_conv(x, wb1, wb2, g1, g2, relu1, relu2, res_mode="none", wbd=None):
    """Two convs (and optional residual) fused into one pallas_call."""
    n, cin_p, h, w = x.shape
    w1f, b1 = wb1
    w2f, b2 = wb2
    h1, w1sp = _out_hw(h, w, g1)
    h2, w2sp = _out_hw(h1, w1sp, g2)
    cout_p = w2f.shape[0]
    x_flat = x.reshape(n, cin_p, h * w)

    args = [x_flat, w1f, b1, w2f, b2]
    batched = [True, False, False, False, False]
    flops = 2 * n * (w1f.shape[0] * w1f.shape[1] * (h1 * w1sp)
                     + w2f.shape[0] * w2f.shape[1] * (h2 * w2sp))
    if res_mode == "down":
        wdf, bd = wbd
        args += [wdf, bd]
        batched += [False, False]
        flops += 2 * n * wdf.shape[0] * wdf.shape[1] * (h * w)

    kernel = functools.partial(_double_conv_kernel, h=h, w=w, g1=g1, g2=g2,
                               relu1=relu1, relu2=relu2, res_mode=res_mode)
    out = _launch(kernel, args, batched,
                  jax.ShapeDtypeStruct((n, cout_p, h2 * w2sp), _ACT_DTYPE),
                  flops)
    return out.reshape(n, cout_p, h2, w2sp)


def basic_block(x, p):
    """conv3x3+BN+ReLU -> conv3x3+BN -> (+downsample/identity residual) -> ReLU,
    all inside a single Pallas kernel (intermediate stays in VMEM)."""
    if "down" in p:
        return double_conv(x, p["c1"], p["c2"], _G3, _G3, True, True,
                           res_mode="down", wbd=p["down"])
    return double_conv(x, p["c1"], p["c2"], _G3, _G3, True, True,
                       res_mode="identity")


def maxpool2x2(x, stride, padding):
    """MaxPool2d(kernel=2) as one fused XLA elementwise pass over 4 strided
    views (no HBM tap-stack, no extra pallas_call).
    # TODO(synk): fusing the pool into the adjacent Pallas conv kernels needs
    # stride-2 lane decimation support; kept as XLA for now."""
    sh, sw = stride
    ph, pw = padding
    if ph or pw:
        x = jnp.pad(x, ((0, 0), (0, 0), (ph, ph), (pw, pw)),
                    constant_values=-jnp.inf)
    n, c, hp, wp = x.shape
    ho = (hp - 2) // sh + 1
    wo = (wp - 2) // sw + 1
    out = None
    for i in range(2):
        for j in range(2):
            v = x[:, :, i:i + sh * ho:sh, j:j + sw * wo:sw]
            out = v if out is None else jnp.maximum(out, v)
    return out


# ----------------------------------------------------------------------------
# Parameter preparation (run once, outside the jitted forward)
# ----------------------------------------------------------------------------
def _prep_conv(w, bn):
    """(cout,cin,kh,kw) f32 weight + folded BN (scale,bias) ->
      ((cout_p, kh*kw*cin_p) bf16 weight with BN scale folded,
       (cout_p, 1) f32 bias).  Channel dims are zero-padded to multiples of 8
    so all sublane offsets in the in-kernel im2col / GEMM are tile-aligned."""
    scale, bias = bn
    cout, cin, kh, kw = w.shape
    cin_p, cout_p = _rup8(cin), _rup8(cout)
    wk = jnp.transpose(w, (2, 3, 1, 0)) * scale[None, None, None, :]
    wk = jnp.pad(wk, ((0, 0), (0, 0), (0, cin_p - cin), (0, cout_p - cout)))
    w_flat = wk.reshape(kh * kw * cin_p, cout_p).T.astype(_MXU_DTYPE)
    b = jnp.pad(bias, (0, cout_p - cout)).reshape(cout_p, 1).astype(jnp.float32)
    return w_flat, b


def prepare_params(P):
    KP = {}
    KP["conv0_1"] = _prep_conv(P["conv0_1"], P["bn0_1"])
    KP["conv0_2"] = _prep_conv(P["conv0_2"], P["bn0_2"])
    for name in ("conv1", "conv2", "conv3", "conv4_1", "conv4_2"):
        KP[name] = _prep_conv(P[name], P["bn" + name[4:]])
    for lname in ("layer1", "layer2", "layer3", "layer4"):
        blocks = []
        for p in P[lname]:
            d = {"c1": _prep_conv(p["conv1_w"], p["bn1"]),
                 "c2": _prep_conv(p["conv2_w"], p["bn2"])}
            if "down_w" in p:
                d["down"] = _prep_conv(p["down_w"], p["dbn"])
            blocks.append(d)
        KP[lname] = blocks
    return KP


# ----------------------------------------------------------------------------
# Parameter initialization (deterministic, synthetic, PyTorch layout)
# ----------------------------------------------------------------------------
def init_params(key, input_channel, output_channel, layers):
    keys = iter(jax.random.split(key, 256))

    def conv_w(cout, cin, kh, kw):
        fan_in = cin * kh * kw
        return (jax.random.normal(next(keys), (cout, cin, kh, kw), jnp.float32)
                * (2.0 / fan_in) ** 0.5)

    def bn(c):
        k1, k2, k3, k4 = jax.random.split(next(keys), 4)
        gamma = jax.random.uniform(k1, (c,), jnp.float32, 0.8, 1.2)
        beta = 0.1 * jax.random.normal(k2, (c,), jnp.float32)
        mean = 0.1 * jax.random.normal(k3, (c,), jnp.float32)
        var = jax.random.uniform(k4, (c,), jnp.float32, 0.5, 1.5)
        eps = 1e-5
        scale = gamma / jnp.sqrt(var + eps)
        bias = beta - mean * scale
        return scale, bias

    ocb = [output_channel // 4, output_channel // 2, output_channel, output_channel]
    inplanes = output_channel // 8

    P = {}
    P["conv0_1"] = conv_w(output_channel // 16, input_channel, 3, 3)
    P["bn0_1"] = bn(output_channel // 16)
    P["conv0_2"] = conv_w(inplanes, output_channel // 16, 3, 3)
    P["bn0_2"] = bn(inplanes)

    def make_layer(planes, blocks, inpl):
        layer = []
        for b in range(blocks):
            p = {
                "conv1_w": conv_w(planes, inpl, 3, 3),
                "bn1": bn(planes),
                "conv2_w": conv_w(planes, planes, 3, 3),
                "bn2": bn(planes),
            }
            if b == 0 and inpl != planes:   # stride is 1 everywhere here
                p["down_w"] = conv_w(planes, inpl, 1, 1)
                p["dbn"] = bn(planes)
            layer.append(p)
            inpl = planes
        return layer, inpl

    P["layer1"], inplanes = make_layer(ocb[0], layers[0], inplanes)
    P["conv1"] = conv_w(ocb[0], ocb[0], 3, 3)
    P["bn1"] = bn(ocb[0])
    P["layer2"], inplanes = make_layer(ocb[1], layers[1], inplanes)
    P["conv2"] = conv_w(ocb[1], ocb[1], 3, 3)
    P["bn2"] = bn(ocb[1])
    P["layer3"], inplanes = make_layer(ocb[2], layers[2], inplanes)
    P["conv3"] = conv_w(ocb[2], ocb[2], 3, 3)
    P["bn3"] = bn(ocb[2])
    P["layer4"], inplanes = make_layer(ocb[3], layers[3], inplanes)
    P["conv4_1"] = conv_w(ocb[3], ocb[3], 2, 2)
    P["bn4_1"] = bn(ocb[3])
    P["conv4_2"] = conv_w(ocb[3], ocb[3], 2, 2)
    P["bn4_2"] = bn(ocb[3])
    return P


# ----------------------------------------------------------------------------
# Full forward (mirrors ResNet.forward)
# ----------------------------------------------------------------------------
@functools.partial(jax.jit, static_argnames=("out_channels",))
def resnet_forward(x_nchw, KP, *, out_channels):
    x = x_nchw.astype(_ACT_DTYPE)
    n, cin, h, w = x.shape
    cin_p = _rup8(cin)
    if cin_p != cin:                       # one-time channel pad of the input
        x = jnp.pad(x, ((0, 0), (0, cin_p - cin), (0, 0), (0, 0)))

    # conv0_1 + conv0_2 fused into one kernel (intermediate never hits HBM)
    x = double_conv(x, KP["conv0_1"], KP["conv0_2"], _G3, _G3, True, True)
    x = maxpool2x2(x, (2, 2), (0, 0))

    for blk in KP["layer1"]:
        x = basic_block(x, blk)
    x = conv_bn_act(x, KP["conv1"], _G3)
    x = maxpool2x2(x, (2, 2), (0, 0))

    for blk in KP["layer2"]:
        x = basic_block(x, blk)
    x = conv_bn_act(x, KP["conv2"], _G3)
    x = maxpool2x2(x, (2, 1), (0, 1))

    for blk in KP["layer3"]:
        x = basic_block(x, blk)
    x = conv_bn_act(x, KP["conv3"], _G3)

    for blk in KP["layer4"]:
        x = basic_block(x, blk)

    # conv4_1 (2x2, stride (2,1), pad (0,1)) + conv4_2 (2x2, s1, p0) fused;
    # the H-stride is handled by row selection inside the kernel.
    x = double_conv(x, KP["conv4_1"], KP["conv4_2"],
                    (2, 2, 2, 0, 1), (2, 2, 1, 0, 0), True, True)

    return x[:, :out_channels].astype(jnp.float32)   # drop channel padding


# ----------------------------------------------------------------------------
if __name__ == "__main__":
    INPUT_CHANNEL = 4
    OUTPUT_CHANNEL = 32
    LAYERS = (1, 1, 1, 1)   # one BasicBlock per stage

    key = jax.random.PRNGKey(0)
    k_params, k_x = jax.random.split(key)
    params = init_params(k_params, INPUT_CHANNEL, OUTPUT_CHANNEL, LAYERS)
    kparams = prepare_params(params)      # kernel-ready, done once

    # NCHW input (batch=2, channels=4, H=32, W=16) — H=32 so the stride-(2,1)
    # tail convs are valid, like the original OCR feature extractor.
    x = jax.random.normal(k_x, (2, INPUT_CHANNEL, 32, 16), jnp.float32)

    y = resnet_forward(x, kparams, out_channels=OUTPUT_CHANNEL)
    y = jax.block_until_ready(y)

    assert y.shape == (2, OUTPUT_CHANNEL, 1, 5), y.shape
    assert bool(jnp.all(jnp.isfinite(y)))
    assert bool(jnp.all(y >= 0.0))   # final ReLU
    print("KERNEL_OK")
</pallas_src>

<mosaic_0001>
module attributes {stable_mosaic.version = 11 : i64} {
  func.func @_double_conv_kernel(%arg0: i32, %arg1: memref<1x8x512xbf16, #tpu.memory_space<vmem>>, %arg2: memref<8x72xbf16, #tpu.memory_space<vmem>>, %arg3: memref<8x1xf32, #tpu.memory_space<vmem>>, %arg4: memref<8x72xbf16, #tpu.memory_space<vmem>>, %arg5: memref<8x1xf32, #tpu.memory_space<vmem>>, %arg6: memref<1x8x512xbf16, #tpu.memory_space<vmem>>) attributes {dimension_semantics = [#tpu.dimension_semantics<parallel>], iteration_bounds = array<i64: 2>, scalar_prefetch = 0 : i64, scratch_operands = 0 : i64, tpu.core_type = #tpu.core_type<tc>, window_params = [{transform_indices = @transform_0, window_bounds = array<i64: 1, 8, 512>}, {pipeline_mode = #tpu.pipeline_mode<synchronous>, transform_indices = @transform_1, window_bounds = array<i64: 8, 72>}, {pipeline_mode = #tpu.pipeline_mode<synchronous>, transform_indices = @transform_2, window_bounds = array<i64: 8, 1>}, {pipeline_mode = #tpu.pipeline_mode<synchronous>, transform_indices = @transform_3, window_bounds = array<i64: 8, 72>}, {pipeline_mode = #tpu.pipeline_mode<synchronous>, transform_indices = @transform_4, window_bounds = array<i64: 8, 1>}, {transform_indices = @transform_5, window_bounds = array<i64: 1, 8, 512>}]} {
    %c0 = arith.constant 0 : index
    %c0_0 = arith.constant 0 : index
    %c0_1 = arith.constant 0 : index
    %0 = vector.load %arg1[%c0, %c0_0, %c0_1] : memref<1x8x512xbf16, #tpu.memory_space<vmem>>, vector<1x8x512xbf16>
    %1 = vector.shape_cast %0 : vector<1x8x512xbf16> to vector<8x512xbf16>
    %c0_2 = arith.constant 0 : index
    %c0_3 = arith.constant 0 : index
    %2 = vector.load %arg2[%c0_2, %c0_3] : memref<8x72xbf16, #tpu.memory_space<vmem>>, vector<8x72xbf16>
    %c0_4 = arith.constant 0 : index
    %c0_5 = arith.constant 0 : index
    %3 = vector.load %arg3[%c0_4, %c0_5] : memref<8x1xf32, #tpu.memory_space<vmem>>, vector<8x1xf32>
    %cst = arith.constant 0.000000e+00 : bf16
    %4 = vector.broadcast %cst : bf16 to vector<8x18xbf16>
    %cst_6 = arith.constant 0.000000e+00 : bf16
    %5 = vector.broadcast %cst_6 : bf16 to vector<8x1xbf16>
    %6 = vector.extract_strided_slice %1 {offsets = [0, 0], sizes = [8, 16], strides = [1, 1]} : vector<8x512xbf16> to vector<8x16xbf16>
    %7 = vector.extract_strided_slice %1 {offsets = [0, 16], sizes = [8, 16], strides = [1, 1]} : vector<8x512xbf16> to vector<8x16xbf16>
    %8 = vector.extract_strided_slice %1 {offsets = [0, 32], sizes = [8, 16], strides = [1, 1]} : vector<8x512xbf16> to vector<8x16xbf16>
    %9 = vector.extract_strided_slice %1 {offsets = [0, 48], sizes = [8, 16], strides = [1, 1]} : vector<8x512xbf16> to vector<8x16xbf16>
    %10 = vector.extract_strided_slice %1 {offsets = [0, 64], sizes = [8, 16], strides = [1, 1]} : vector<8x512xbf16> to vector<8x16xbf16>
    %11 = vector.extract_strided_slice %1 {offsets = [0, 80], sizes = [8, 16], strides = [1, 1]} : vector<8x512xbf16> to vector<8x16xbf16>
    %12 = vector.extract_strided_slice %1 {offsets = [0, 96], sizes = [8, 16], strides = [1, 1]} : vector<8x512xbf16> to vector<8x16xbf16>
    %13 = vector.extract_strided_slice %1 {offsets = [0, 112], sizes = [8, 16], strides = [1, 1]} : vector<8x512xbf16> to vector<8x16xbf16>
    %14 = vector.extract_strided_slice %1 {offsets = [0, 128], sizes = [8, 16], strides = [1, 1]} : vector<8x512xbf16> to vector<8x16xbf16>
    %15 = vector.extract_strided_slice %1 {offsets = [0, 144], sizes = [8, 16], strides = [1, 1]} : vector<8x512xbf16> to vector<8x16xbf16>
    %16 = vector.extract_strided_slice %1 {offsets = [0, 160], sizes = [8, 16], strides = [1, 1]} : vector<8x512xbf16> to vector<8x16xbf16>
    %17 = vector.extract_strided_slice %1 {offsets = [0, 176], sizes = [8, 16], strides = [1, 1]} : vector<8x512xbf16> to vector<8x16xbf16>
    %18 = vector.extract_strided_slice %1 {offsets = [0, 192], sizes = [8, 16], strides = [1, 1]} : vector<8x512xbf16> to vector<8x16xbf16>
    %19 = vector.extract_strided_slice %1 {offsets = [0, 208], sizes = [8, 16], strides = [1, 1]} : vector<8x512xbf16> to vector<8x16xbf16>
    %20 = vector.extract_strided_slice %1 {offsets = [0, 224], sizes = [8, 16], strides = [1, 1]} : vector<8x512xbf16> to vector<8x16xbf16>
    %21 = vector.extract_strided_slice %1 {offsets = [0, 240], sizes = [8, 16], strides = [1, 1]} : vector<8x512xbf16> to vector<8x16xbf16>
    %22 = vector.extract_strided_slice %1 {offsets = [0, 256], sizes = [8, 16], strides = [1, 1]} : vector<8x512xbf16> to vector<8x16xbf16>
    %23 = vector.extract_strided_slice %1 {offsets = [0, 272], sizes = [8, 16], strides = [1, 1]} : vector<8x512xbf16> to vector<8x16xbf16>
    %24 = vector.extract_strided_slice %1 {offsets = [0, 288], sizes = [8, 16], strides = [1, 1]} : vector<8x512xbf16> to vector<8x16xbf16>
    %25 = vector.extract_strided_slice %1 {offsets = [0, 304], sizes = [8, 16], strides = [1, 1]} : vector<8x512xbf16> to vector<8x16xbf16>
    %26 = vector.extract_strided_slice %1 {offsets = [0, 320], sizes = [8, 16], strides = [1, 1]} : vector<8x512xbf16> to vector<8x16xbf16>
    %27 = vector.extract_strided_slice %1 {offsets = [0, 336], sizes = [8, 16], strides = [1, 1]} : vector<8x512xbf16> to vector<8x16xbf16>
    %28 = vector.extract_strided_slice %1 {offsets = [0, 352], sizes = [8, 16], strides = [1, 1]} : vector<8x512xbf16> to vector<8x16xbf16>
    %29 = vector.extract_strided_slice %1 {offsets = [0, 368], sizes = [8, 16], strides = [1, 1]} : vector<8x512xbf16> to vector<8x16xbf16>
    %30 = vector.extract_strided_slice %1 {offsets = [0, 384], sizes = [8, 16], strides = [1, 1]} : vector<8x512xbf16> to vector<8x16xbf16>
    %31 = vector.extract_strided_slice %1 {offsets = [0, 400], sizes = [8, 16], strides = [1, 1]} : vector<8x512xbf16> to vector<8x16xbf16>
    %32 = vector.extract_strided_slice %1 {offsets = [0, 416], sizes = [8, 16], strides = [1, 1]} : vector<8x512xbf16> to vector<8x16xbf16>
    %33 = vector.extract_strided_slice %1 {offsets = [0, 432], sizes = [8, 16], strides = [1, 1]} : vector<8x512xbf16> to vector<8x16xbf16>
    %34 = vector.extract_strided_slice %1 {offsets = [0, 448], sizes = [8, 16], strides = [1, 1]} : vector<8x512xbf16> to vector<8x16xbf16>
    %35 = vector.extract_strided_slice %1 {offsets = [0, 464], sizes = [8, 16], strides = [1, 1]} : vector<8x512xbf16> to vector<8x16xbf16>
    %36 = vector.extract_strided_slice %1 {offsets = [0, 480], sizes = [8, 16], strides = [1, 1]} : vector<8x512xbf16> to vector<8x16xbf16>
    %37 = vector.extract_strided_slice %1 {offsets = [0, 496], sizes = [8, 16], strides = [1, 1]} : vector<8x512xbf16> to vector<8x16xbf16>
    %cst_7 = arith.constant 0.000000e+00 : bf16
    %38 = vector.broadcast %cst_7 : bf16 to vector<8x18xbf16>
    %39 = tpu.concatenate %4, %5, %6, %5, %5, %7, %5, %5, %8, %5, %5, %9, %5, %5, %10, %5 in 1 : vector<8x18xbf16>, vector<8x1xbf16>, vector<8x16xbf16>, vector<8x1xbf16>, vector<8x1xbf16>, vector<8x16xbf16>, vector<8x1xbf16>, vector<8x1xbf16>, vector<8x16xbf16>, vector<8x1xbf16>, vector<8x1xbf16>, vector<8x16xbf16>, vector<8x1xbf16>, vector<8x1xbf16>, vector<8x16xbf16>, vector<8x1xbf16> -> vector<8x108xbf16>
    %40 = tpu.concatenate %5, %11, %5, %5, %12, %5, %5, %13, %5, %5, %14, %5, %5, %15, %5, %5 in 1 : vector<8x1xbf16>, vector<8x16xbf16>, vector<8x1xbf16>, vector<8x1xbf16>, vector<8x16xbf16>, vector<8x1xbf16>, vector<8x1xbf16>, vector<8x16xbf16>, vector<8x1xbf16>, vector<8x1xbf16>, vector<8x16xbf16>, vector<8x1xbf16>, vector<8x1xbf16>, vector<8x16xbf16>, vector<8x1xbf16>, vector<8x1xbf16> -> vector<8x91xbf16>
    %41 = tpu.concatenate %16, %5, %5, %17, %5, %5, %18, %5, %5, %19, %5, %5, %20, %5, %5, %21 in 1 : vector<8x16xbf16>, vector<8x1xbf16>, vector<8x1xbf16>, vector<8x16xbf16>, vector<8x1xbf16>, vector<8x1xbf16>, vector<8x16xbf16>, vector<8x1xbf16>, vector<8x1xbf16>, vector<8x16xbf16>, vector<8x1xbf16>, vector<8x1xbf16>, vector<8x16xbf16>, vector<8x1xbf16>, vector<8x1xbf16>, vector<8x16xbf16> -> vector<8x106xbf16>
    %42 = tpu.concatenate %5, %5, %22, %5, %5, %23, %5, %5, %24, %5, %5, %25, %5, %5, %26, %5 in 1 : vector<8x1xbf16>, vector<8x1xbf16>, vector<8x16xbf16>, vector<8x1xbf16>, vector<8x1xbf16>, vector<8x16xbf16>, vector<8x1xbf16>, vector<8x1xbf16>, vector<8x16xbf16>, vector<8x1xbf16>, vector<8x1xbf16>, vector<8x16xbf16>, vector<8x1xbf16>, vector<8x1xbf16>, vector<8x16xbf16>, vector<8x1xbf16> -> vector<8x91xbf16>
    %43 = tpu.concatenate %5, %27, %5, %5, %28, %5, %5, %29, %5, %5, %30, %5, %5, %31, %5, %5 in 1 : vector<8x1xbf16>, vector<8x16xbf16>, vector<8x1xbf16>, vector<8x1xbf16>, vector<8x16xbf16>, vector<8x1xbf16>, vector<8x1xbf16>, vector<8x16xbf16>, vector<8x1xbf16>, vector<8x1xbf16>, vector<8x16xbf16>, vector<8x1xbf16>, vector<8x1xbf16>, vector<8x16xbf16>, vector<8x1xbf16>, vector<8x1xbf16> -> vector<8x91xbf16>
    %44 = tpu.concatenate %32, %5, %5, %33, %5, %5, %34, %5, %5, %35, %5, %5, %36, %5, %5, %37 in 1 : vector<8x16xbf16>, vector<8x1xbf16>, vector<8x1xbf16>, vector<8x16xbf16>, vector<8x1xbf16>, vector<8x1xbf16>, vector<8x16xbf16>, vector<8x1xbf16>, vector<8x1xbf16>, vector<8x16xbf16>, vector<8x1xbf16>, vector<8x1xbf16>, vector<8x16xbf16>, vector<8x1xbf16>, vector<8x1xbf16>, vector<8x16xbf16> -> vector<8x106xbf16>
    %45 = tpu.concatenate %5, %38 in 1 : vector<8x1xbf16>, vector<8x18xbf16> -> vector<8x19xbf16>
    %46 = tpu.concatenate %39, %40, %41, %42, %43, %44, %45 in 1 : vector<8x108xbf16>, vector<8x91xbf16>, vector<8x106xbf16>, vector<8x91xbf16>, vector<8x91xbf16>, vector<8x106xbf16>, vector<8x19xbf16> -> vector<8x612xbf16>
    %47 = vector.extract_strided_slice %46 {offsets = [0, 0], sizes = [8, 574], strides = [1, 1]} : vector<8x612xbf16> to vector<8x574xbf16>
    %48 = vector.extract_strided_slice %46 {offsets = [0, 1], sizes = [8, 574], strides = [1, 1]} : vector<8x612xbf16> to vector<8x574xbf16>
    %49 = vector.extract_strided_slice %46 {offsets = [0, 2], sizes = [8, 574], strides = [1, 1]} : vector<8x612xbf16> to vector<8x574xbf16>
    %50 = vector.extract_strided_slice %46 {offsets = [0, 18], sizes = [8, 574], strides = [1, 1]} : vector<8x612xbf16> to vector<8x574xbf16>
    %51 = vector.extract_strided_slice %46 {offsets = [0, 19], sizes = [8, 574], strides = [1, 1]} : vector<8x612xbf16> to vector<8x574xbf16>
    %52 = vector.extract_strided_slice %46 {offsets = [0, 20], sizes = [8, 574], strides = [1, 1]} : vector<8x612xbf16> to vector<8x574xbf16>
    %53 = vector.extract_strided_slice %46 {offsets = [0, 36], sizes = [8, 574], strides = [1, 1]} : vector<8x612xbf16> to vector<8x574xbf16>
    %54 = vector.extract_strided_slice %46 {offsets = [0, 37], sizes = [8, 574], strides = [1, 1]} : vector<8x612xbf16> to vector<8x574xbf16>
    %55 = vector.extract_strided_slice %46 {offsets = [0, 38], sizes = [8, 574], strides = [1, 1]} : vector<8x612xbf16> to vector<8x574xbf16>
    %56 = tpu.concatenate %47, %48, %49, %50, %51, %52, %53, %54, %55 in 0 : vector<8x574xbf16>, vector<8x574xbf16>, vector<8x574xbf16>, vector<8x574xbf16>, vector<8x574xbf16>, vector<8x574xbf16>, vector<8x574xbf16>, vector<8x574xbf16>, vector<8x574xbf16> -> vector<72x574xbf16>
    %cst_8 = arith.constant dense<0.000000e+00> : vector<8x574xf32>
    %57 = tpu.matmul %2, %56, %cst_8 {dimension_numbers = #tpu.dot_dimension_numbers<[1], [0], [0], [1], [0, 0, 1, 1], [], []>} : vector<8x72xbf16>, vector<72x574xbf16>, vector<8x574xf32> -> vector<8x574xf32>
    %58 = vector.broadcast %3 : vector<8x1xf32> to vector<8x574xf32>
    %59 = arith.addf %57, %58 : vector<8x574xf32>
    %60 = vector.extract_strided_slice %59 {offsets = [0, 0], sizes = [8, 16], strides = [1, 1]} : vector<8x574xf32> to vector<8x16xf32>
    %61 = vector.extract_strided_slice %59 {offsets = [0, 18], sizes = [8, 16], strides = [1, 1]} : vector<8x574xf32> to vector<8x16xf32>
    %62 = vector.extract_strided_slice %59 {offsets = [0, 36], sizes = [8, 16], strides = [1, 1]} : vector<8x574xf32> to vector<8x16xf32>
    %63 = vector.extract_strided_slice %59 {offsets = [0, 54], sizes = [8, 16], strides = [1, 1]} : vector<8x574xf32> to vector<8x16xf32>
    %64 = vector.extract_strided_slice %59 {offsets = [0, 72], sizes = [8, 16], strides = [1, 1]} : vector<8x574xf32> to vector<8x16xf32>
    %65 = vector.extract_strided_slice %59 {offsets = [0, 90], sizes = [8, 16], strides = [1, 1]} : vector<8x574xf32> to vector<8x16xf32>
    %66 = vector.extract_strided_slice %59 {offsets = [0, 108], sizes = [8, 16], strides = [1, 1]} : vector<8x574xf32> to vector<8x16xf32>
    %67 = vector.extract_strided_slice %59 {offsets = [0, 126], sizes = [8, 16], strides = [1, 1]} : vector<8x574xf32> to vector<8x16xf32>
    %68 = vector.extract_strided_slice %59 {offsets = [0, 144], sizes = [8, 16], strides = [1, 1]} : vector<8x574xf32> to vector<8x16xf32>
    %69 = vector.extract_strided_slice %59 {offsets = [0, 162], sizes = [8, 16], strides = [1, 1]} : vector<8x574xf32> to vector<8x16xf32>
    %70 = vector.extract_strided_slice %59 {offsets = [0, 180], sizes = [8, 16], strides = [1, 1]} : vector<8x574xf32> to vector<8x16xf32>
    %71 = vector.extract_strided_slice %59 {offsets = [0, 198], sizes = [8, 16], strides = [1, 1]} : vector<8x574xf32> to vector<8x16xf32>
    %72 = vector.extract_strided_slice %59 {offsets = [0, 216], sizes = [8, 16], strides = [1, 1]} : vector<8x574xf32> to vector<8x16xf32>
    %73 = vector.extract_strided_slice %59 {offsets = [0, 234], sizes = [8, 16], strides = [1, 1]} : vector<8x574xf32> to vector<8x16xf32>
    %74 = vector.extract_strided_slice %59 {offsets = [0, 252], sizes = [8, 16], strides = [1, 1]} : vector<8x574xf32> to vector<8x16xf32>
    %75 = vector.extract_strided_slice %59 {offsets = [0, 270], sizes = [8, 16], strides = [1, 1]} : vector<8x574xf32> to vector<8x16xf32>
    %76 = vector.extract_strided_slice %59 {offsets = [0, 288], sizes = [8, 16], strides = [1, 1]} : vector<8x574xf32> to vector<8x16xf32>
    %77 = vector.extract_strided_slice %59 {offsets = [0, 306], sizes = [8, 16], strides = [1, 1]} : vector<8x574xf32> to vector<8x16xf32>
    %78 = vector.extract_strided_slice %59 {offsets = [0, 324], sizes = [8, 16], strides = [1, 1]} : vector<8x574xf32> to vector<8x16xf32>
    %79 = vector.extract_strided_slice %59 {offsets = [0, 342], sizes = [8, 16], strides = [1, 1]} : vector<8x574xf32> to vector<8x16xf32>
    %80 = vector.extract_strided_slice %59 {offsets = [0, 360], sizes = [8, 16], strides = [1, 1]} : vector<8x574xf32> to vector<8x16xf32>
    %81 = vector.extract_strided_slice %59 {offsets = [0, 378], sizes = [8, 16], strides = [1, 1]} : vector<8x574xf32> to vector<8x16xf32>
    %82 = vector.extract_strided_slice %59 {offsets = [0, 396], sizes = [8, 16], strides = [1, 1]} : vector<8x574xf32> to vector<8x16xf32>
    %83 = vector.extract_strided_slice %59 {offsets = [0, 414], sizes = [8, 16], strides = [1, 1]} : vector<8x574xf32> to vector<8x16xf32>
    %84 = vector.extract_strided_slice %59 {offsets = [0, 432], sizes = [8, 16], strides = [1, 1]} : vector<8x574xf32> to vector<8x16xf32>
    %85 = vector.extract_strided_slice %59 {offsets = [0, 450], sizes = [8, 16], strides = [1, 1]} : vector<8x574xf32> to vector<8x16xf32>
    %86 = vector.extract_strided_slice %59 {offsets = [0, 468], sizes = [8, 16], strides = [1, 1]} : vector<8x574xf32> to vector<8x16xf32>
    %87 = vector.extract_strided_slice %59 {offsets = [0, 486], sizes = [8, 16], strides = [1, 1]} : vector<8x574xf32> to vector<8x16xf32>
    %88 = vector.extract_strided_slice %59 {offsets = [0, 504], sizes = [8, 16], strides = [1, 1]} : vector<8x574xf32> to vector<8x16xf32>
    %89 = vector.extract_strided_slice %59 {offsets = [0, 522], sizes = [8, 16], strides = [1, 1]} : vector<8x574xf32> to vector<8x16xf32>
    %90 = vector.extract_strided_slice %59 {offsets = [0, 540], sizes = [8, 16], strides = [1, 1]} : vector<8x574xf32> to vector<8x16xf32>
    %91 = vector.extract_strided_slice %59 {offsets = [0, 558], sizes = [8, 16], strides = [1, 1]} : vector<8x574xf32> to vector<8x16xf32>
    %92 = tpu.concatenate %60, %61, %62, %63, %64, %65, %66, %67, %68, %69, %70, %71, %72, %73, %74, %75 in 1 : vector<8x16xf32>, vector<8x16xf32>, vector<8x16xf32>, vector<8x16xf32>, vector<8x16xf32>, vector<8x16xf32>, vector<8x16xf32>, vector<8x16xf32>, vector<8x16xf32>, vector<8x16xf32>, vector<8x16xf32>, vector<8x16xf32>, vector<8x16xf32>, vector<8x16xf32>, vector<8x16xf32>, vector<8x16xf32> -> vector<8x256xf32>
    %93 = tpu.concatenate %76, %77, %78, %79, %80, %81, %82, %83, %84, %85, %86, %87, %88, %89, %90, %91 in 1 : vector<8x16xf32>, vector<8x16xf32>, vector<8x16xf32>, vector<8x16xf32>, vector<8x16xf32>, vector<8x16xf32>, vector<8x16xf32>, vector<8x16xf32>, vector<8x16xf32>, vector<8x16xf32>, vector<8x16xf32>, vector<8x16xf32>, vector<8x16xf32>, vector<8x16xf32>, vector<8x16xf32>, vector<8x16xf32> -> vector<8x256xf32>
    %94 = tpu.concatenate %92, %93 in 1 : vector<8x256xf32>, vector<8x256xf32> -> vector<8x512xf32>
    %cst_9 = arith.constant 0.000000e+00 : f32
    %95 = vector.broadcast %cst_9 : f32 to vector<8x512xf32>
    %96 = arith.maximumf %94, %95 : vector<8x512xf32>
    %97 = arith.truncf %96 : vector<8x512xf32> to vector<8x512xbf16>
    %c0_10 = arith.constant 0 : index
    %c0_11 = arith.constant 0 : index
    %98 = vector.load %arg4[%c0_10, %c0_11] : memref<8x72xbf16, #tpu.memory_space<vmem>>, vector<8x72xbf16>
    %c0_12 = arith.constant 0 : index
    %c0_13 = arith.constant 0 : index
    %99 = vector.load %arg5[%c0_12, %c0_13] : memref<8x1xf32, #tpu.memory_space<vmem>>, vector<8x1xf32>
    %cst_14 = arith.constant 0.000000e+00 : bf16
    %100 = vector.broadcast %cst_14 : bf16 to vector<8x18xbf16>
    %cst_15 = arith.constant 0.000000e+00 : bf16
    %101 = vector.broadcast %cst_15 : bf16 to vector<8x1xbf16>
    %102 = vector.extract_strided_slice %97 {offsets = [0, 0], sizes = [8, 16], strides = [1, 1]} : vector<8x512xbf16> to vector<8x16xbf16>
    %103 = vector.extract_strided_slice %97 {offsets = [0, 16], sizes = [8, 16], strides = [1, 1]} : vector<8x512xbf16> to vector<8x16xbf16>
    %104 = vector.extract_strided_slice %97 {offsets = [0, 32], sizes = [8, 16], strides = [1, 1]} : vector<8x512xbf16> to vector<8x16xbf16>
    %105 = vector.extract_strided_slice %97 {offsets = [0, 48], sizes = [8, 16], strides = [1, 1]} : vector<8x512xbf16> to vector<8x16xbf16>
    %106 = vector.extract_strided_slice %97 {offsets = [0, 64], sizes = [8, 16], strides = [1, 1]} : vector<8x512xbf16> to vector<8x16xbf16>
    %107 = vector.extract_strided_slice %97 {offsets = [0, 80], sizes = [8, 16], strides = [1, 1]} : vector<8x512xbf16> to vector<8x16xbf16>
    %108 = vector.extract_strided_slice %97 {offsets = [0, 96], sizes = [8, 16], strides = [1, 1]} : vector<8x512xbf16> to vector<8x16xbf16>
    %109 = vector.extract_strided_slice %97 {offsets = [0, 112], sizes = [8, 16], strides = [1, 1]} : vector<8x512xbf16> to vector<8x16xbf16>
    %110 = vector.extract_strided_slice %97 {offsets = [0, 128], sizes = [8, 16], strides = [1, 1]} : vector<8x512xbf16> to vector<8x16xbf16>
    %111 = vector.extract_strided_slice %97 {offsets = [0, 144], sizes = [8, 16], strides = [1, 1]} : vector<8x512xbf16> to vector<8x16xbf16>
    %112 = vector.extract_strided_slice %97 {offsets = [0, 160], sizes = [8, 16], strides = [1, 1]} : vector<8x512xbf16> to vector<8x16xbf16>
    %113 = vector.extract_strided_slice %97 {offsets = [0, 176], sizes = [8, 16], strides = [1, 1]} : vector<8x512xbf16> to vector<8x16xbf16>
    %114 = vector.extract_strided_slice %97 {offsets = [0, 192], sizes = [8, 16], strides = [1, 1]} : vector<8x512xbf16> to vector<8x16xbf16>
    %115 = vector.extract_strided_slice %97 {offsets = [0, 208], sizes = [8, 16], strides = [1, 1]} : vector<8x512xbf16> to vector<8x16xbf16>
    %116 = vector.extract_strided_slice %97 {offsets = [0, 224], sizes = [8, 16], strides = [1, 1]} : vector<8x512xbf16> to vector<8x16xbf16>
    %117 = vector.extract_strided_slice %97 {offsets = [0, 240], sizes = [8, 16], strides = [1, 1]} : vector<8x512xbf16> to vector<8x16xbf16>
    %118 = vector.extract_strided_slice %97 {offsets = [0, 256], sizes = [8, 16], strides = [1, 1]} : vector<8x512xbf16> to vector<8x16xbf16>
    %119 = vector.extract_strided_slice %97 {offsets = [0, 272], sizes = [8, 16], strides = [1, 1]} : vector<8x512xbf16> to vector<8x16xbf16>
    %120 = vector.extract_strided_slice %97 {offsets = [0, 288], sizes = [8, 16], strides = [1, 1]} : vector<8x512xbf16> to vector<8x16xbf16>
    %121 = vector.extract_strided_slice %97 {offsets = [0, 304], sizes = [8, 16], strides = [1, 1]} : vector<8x512xbf16> to vector<8x16xbf16>
    %122 = vector.extract_strided_slice %97 {offsets = [0, 320], sizes = [8, 16], strides = [1, 1]} : vector<8x512xbf16> to vector<8x16xbf16>
    %123 = vector.extract_strided_slice %97 {offsets = [0, 336], sizes = [8, 16], strides = [1, 1]} : vector<8x512xbf16> to vector<8x16xbf16>
    %124 = vector.extract_strided_slice %97 {offsets = [0, 352], sizes = [8, 16], strides = [1, 1]} : vector<8x512xbf16> to vector<8x16xbf16>
    %125 = vector.extract_strided_slice %97 {offsets = [0, 368], sizes = [8, 16], strides = [1, 1]} : vector<8x512xbf16> to vector<8x16xbf16>
    %126 = vector.extract_strided_slice %97 {offsets = [0, 384], sizes = [8, 16], strides = [1, 1]} : vector<8x512xbf16> to vector<8x16xbf16>
    %127 = vector.extract_strided_slice %97 {offsets = [0, 400], sizes = [8, 16], strides = [1, 1]} : vector<8x512xbf16> to vector<8x16xbf16>
    %128 = vector.extract_strided_slice %97 {offsets = [0, 416], sizes = [8, 16], strides = [1, 1]} : vector<8x512xbf16> to vector<8x16xbf16>
    %129 = vector.extract_strided_slice %97 {offsets = [0, 432], sizes = [8, 16], strides = [1, 1]} : vector<8x512xbf16> to vector<8x16xbf16>
    %130 = vector.extract_strided_slice %97 {offsets = [0, 448], sizes = [8, 16], strides = [1, 1]} : vector<8x512xbf16> to vector<8x16xbf16>
    %131 = vector.extract_strided_slice %97 {offsets = [0, 464], sizes = [8, 16], strides = [1, 1]} : vector<8x512xbf16> to vector<8x16xbf16>
    %132 = vector.extract_strided_slice %97 {offsets = [0, 480], sizes = [8, 16], strides = [1, 1]} : vector<8x512xbf16> to vector<8x16xbf16>
    %133 = vector.extract_strided_slice %97 {offsets = [0, 496], sizes = [8, 16], strides = [1, 1]} : vector<8x512xbf16> to vector<8x16xbf16>
    %cst_16 = arith.constant 0.000000e+00 : bf16
    %134 = vector.broadcast %cst_16 : bf16 to vector<8x18xbf16>
    %135 = tpu.concatenate %100, %101, %102, %101, %101, %103, %101, %101, %104, %101, %101, %105, %101, %101, %106, %101 in 1 : vector<8x18xbf16>, vector<8x1xbf16>, vector<8x16xbf16>, vector<8x1xbf16>, vector<8x1xbf16>, vector<8x16xbf16>, vector<8x1xbf16>, vector<8x1xbf16>, vector<8x16xbf16>, vector<8x1xbf16>, vector<8x1xbf16>, vector<8x16xbf16>, vector<8x1xbf16>, vector<8x1xbf16>, vector<8x16xbf16>, vector<8x1xbf16> -> vector<8x108xbf16>
    %136 = tpu.concatenate %101, %107, %101, %101, %108, %101, %101, %109, %101, %101, %110, %101, %101, %111, %101, %101 in 1 : vector<8x1xbf16>, vector<8x16xbf16>, vector<8x1xbf16>, vector<8x1xbf16>, vector<8x16xbf16>, vector<8x1xbf16>, vector<8x1xbf16>, vector<8x16xbf16>, vector<8x1xbf16>, vector<8x1xbf16>, vector<8x16xbf16>, vector<8x1xbf16>, vector<8x1xbf16>, vector<8x16xbf16>, vector<8x1xbf16>, vector<8x1xbf16> -> vector<8x91xbf16>
    %137 = tpu.concatenate %112, %101, %101, %113, %101, %101, %114, %101, %101, %115, %101, %101, %116, %101, %101, %117 in 1 : vector<8x16xbf16>, vector<8x1xbf16>, vector<8x1xbf16>, vector<8x16xbf16>, vector<8x1xbf16>, vector<8x1xbf16>, vector<8x16xbf16>, vector<8x1xbf16>, vector<8x1xbf16>, vector<8x16xbf16>, vector<8x1xbf16>, vector<8x1xbf16>, vector<8x16xbf16>, vector<8x1xbf16>, vector<8x1xbf16>, vector<8x16xbf16> -> vector<8x106xbf16>
    %138 = tpu.concatenate %101, %101, %118, %101, %101, %119, %101, %101, %120, %101, %101, %121, %101, %101, %122, %101 in 1 : vector<8x1xbf16>, vector<8x1xbf16>, vector<8x16xbf16>, vector<8x1xbf16>, vector<8x1xbf16>, vector<8x16xbf16>, vector<8x1xbf16>, vector<8x1xbf16>, vector<8x16xbf16>, vector<8x1xbf16>, vector<8x1xbf16>, vector<8x16xbf16>, vector<8x1xbf16>, vector<8x1xbf16>, vector<8x16xbf16>, vector<8x1xbf16> -> vector<8x91xbf16>
    %139 = tpu.concatenate %101, %123, %101, %101, %124, %101, %101, %125, %101, %101, %126, %101, %101, %127, %101, %101 in 1 : vector<8x1xbf16>, vector<8x16xbf16>, vector<8x1xbf16>, vector<8x1xbf16>, vector<8x16xbf16>, vector<8x1xbf16>, vector<8x1xbf16>, vector<8x16xbf16>, vector<8x1xbf16>, vector<8x1xbf16>, vector<8x16xbf16>, vector<8x1xbf16>, vector<8x1xbf16>, vector<8x16xbf16>, vector<8x1xbf16>, vector<8x1xbf16> -> vector<8x91xbf16>
    %140 = tpu.concatenate %128, %101, %101, %129, %101, %101, %130, %101, %101, %131, %101, %101, %132, %101, %101, %133 in 1 : vector<8x16xbf16>, vector<8x1xbf16>, vector<8x1xbf16>, vector<8x16xbf16>, vector<8x1xbf16>, vector<8x1xbf16>, vector<8x16xbf16>, vector<8x1xbf16>, vector<8x1xbf16>, vector<8x16xbf16>, vector<8x1xbf16>, vector<8x1xbf16>, vector<8x16xbf16>, vector<8x1xbf16>, vector<8x1xbf16>, vector<8x16xbf16> -> vector<8x106xbf16>
    %141 = tpu.concatenate %101, %134 in 1 : vector<8x1xbf16>, vector<8x18xbf16> -> vector<8x19xbf16>
    %142 = tpu.concatenate %135, %136, %137, %138, %139, %140, %141 in 1 : vector<8x108xbf16>, vector<8x91xbf16>, vector<8x106xbf16>, vector<8x91xbf16>, vector<8x91xbf16>, vector<8x106xbf16>, vector<8x19xbf16> -> vector<8x612xbf16>
    %143 = vector.extract_strided_slice %142 {offsets = [0, 0], sizes = [8, 574], strides = [1, 1]} : vector<8x612xbf16> to vector<8x574xbf16>
    %144 = vector.extract_strided_slice %142 {offsets = [0, 1], sizes = [8, 574], strides = [1, 1]} : vector<8x612xbf16> to vector<8x574xbf16>
    %145 = vector.extract_strided_slice %142 {offsets = [0, 2], sizes = [8, 574], strides = [1, 1]} : vector<8x612xbf16> to vector<8x574xbf16>
    %146 = vector.extract_strided_slice %142 {offsets = [0, 18], sizes = [8, 574], strides = [1, 1]} : vector<8x612xbf16> to vector<8x574xbf16>
    %147 = vector.extract_strided_slice %142 {offsets = [0, 19], sizes = [8, 574], strides = [1, 1]} : vector<8x612xbf16> to vector<8x574xbf16>
    %148 = vector.extract_strided_slice %142 {offsets = [0, 20], sizes = [8, 574], strides = [1, 1]} : vector<8x612xbf16> to vector<8x574xbf16>
    %149 = vector.extract_strided_slice %142 {offsets = [0, 36], sizes = [8, 574], strides = [1, 1]} : vector<8x612xbf16> to vector<8x574xbf16>
    %150 = vector.extract_strided_slice %142 {offsets = [0, 37], sizes = [8, 574], strides = [1, 1]} : vector<8x612xbf16> to vector<8x574xbf16>
    %151 = vector.extract_strided_slice %142 {offsets = [0, 38], sizes = [8, 574], strides = [1, 1]} : vector<8x612xbf16> to vector<8x574xbf16>
    %152 = tpu.concatenate %143, %144, %145, %146, %147, %148, %149, %150, %151 in 0 : vector<8x574xbf16>, vector<8x574xbf16>, vector<8x574xbf16>, vector<8x574xbf16>, vector<8x574xbf16>, vector<8x574xbf16>, vector<8x574xbf16>, vector<8x574xbf16>, vector<8x574xbf16> -> vector<72x574xbf16>
    %cst_17 = arith.constant dense<0.000000e+00> : vector<8x574xf32>
    %153 = tpu.matmul %98, %152, %cst_17 {dimension_numbers = #tpu.dot_dimension_numbers<[1], [0], [0], [1], [0, 0, 1, 1], [], []>} : vector<8x72xbf16>, vector<72x574xbf16>, vector<8x574xf32> -> vector<8x574xf32>
    %154 = vector.broadcast %99 : vector<8x1xf32> to vector<8x574xf32>
    %155 = arith.addf %153, %154 : vector<8x574xf32>
    %156 = vector.extract_strided_slice %155 {offsets = [0, 0], sizes = [8, 16], strides = [1, 1]} : vector<8x574xf32> to vector<8x16xf32>
    %157 = vector.extract_strided_slice %155 {offsets = [0, 18], sizes = [8, 16], strides = [1, 1]} : vector<8x574xf32> to vector<8x16xf32>
    %158 = vector.extract_strided_slice %155 {offsets = [0, 36], sizes = [8, 16], strides = [1, 1]} : vector<8x574xf32> to vector<8x16xf32>
    %159 = vector.extract_strided_slice %155 {offsets = [0, 54], sizes = [8, 16], strides = [1, 1]} : vector<8x574xf32> to vector<8x16xf32>
    %160 = vector.extract_strided_slice %155 {offsets = [0, 72], sizes = [8, 16], strides = [1, 1]} : vector<8x574xf32> to vector<8x16xf32>
    %161 = vector.extract_strided_slice %155 {offsets = [0, 90], sizes = [8, 16], strides = [1, 1]} : vector<8x574xf32> to vector<8x16xf32>
    %162 = vector.extract_strided_slice %155 {offsets = [0, 108], sizes = [8, 16], strides = [1, 1]} : vector<8x574xf32> to vector<8x16xf32>
    %163 = vector.extract_strided_slice %155 {offsets = [0, 126], sizes = [8, 16], strides = [1, 1]} : vector<8x574xf32> to vector<8x16xf32>
    %164 = vector.extract_strided_slice %155 {offsets = [0, 144], sizes = [8, 16], strides = [1, 1]} : vector<8x574xf32> to vector<8x16xf32>
    %165 = vector.extract_strided_slice %155 {offsets = [0, 162], sizes = [8, 16], strides = [1, 1]} : vector<8x574xf32> to vector<8x16xf32>
    %166 = vector.extract_strided_slice %155 {offsets = [0, 180], sizes = [8, 16], strides = [1, 1]} : vector<8x574xf32> to vector<8x16xf32>
    %167 = vector.extract_strided_slice %155 {offsets = [0, 198], sizes = [8, 16], strides = [1, 1]} : vector<8x574xf32> to vector<8x16xf32>
    %168 = vector.extract_strided_slice %155 {offsets = [0, 216], sizes = [8, 16], strides = [1, 1]} : vector<8x574xf32> to vector<8x16xf32>
    %169 = vector.extract_strided_slice %155 {offsets = [0, 234], sizes = [8, 16], strides = [1, 1]} : vector<8x574xf32> to vector<8x16xf32>
    %170 = vector.extract_strided_slice %155 {offsets = [0, 252], sizes = [8, 16], strides = [1, 1]} : vector<8x574xf32> to vector<8x16xf32>
    %171 = vector.extract_strided_slice %155 {offsets = [0, 270], sizes = [8, 16], strides = [1, 1]} : vector<8x574xf32> to vector<8x16xf32>
    %172 = vector.extract_strided_slice %155 {offsets = [0, 288], sizes = [8, 16], strides = [1, 1]} : vector<8x574xf32> to vector<8x16xf32>
    %173 = vector.extract_strided_slice %155 {offsets = [0, 306], sizes = [8, 16], strides = [1, 1]} : vector<8x574xf32> to vector<8x16xf32>
    %174 = vector.extract_strided_slice %155 {offsets = [0, 324], sizes = [8, 16], strides = [1, 1]} : vector<8x574xf32> to vector<8x16xf32>
    %175 = vector.extract_strided_slice %155 {offsets = [0, 342], sizes = [8, 16], strides = [1, 1]} : vector<8x574xf32> to vector<8x16xf32>
    %176 = vector.extract_strided_slice %155 {offsets = [0, 360], sizes = [8, 16], strides = [1, 1]} : vector<8x574xf32> to vector<8x16xf32>
    %177 = vector.extract_strided_slice %155 {offsets = [0, 378], sizes = [8, 16], strides = [1, 1]} : vector<8x574xf32> to vector<8x16xf32>
    %178 = vector.extract_strided_slice %155 {offsets = [0, 396], sizes = [8, 16], strides = [1, 1]} : vector<8x574xf32> to vector<8x16xf32>
    %179 = vector.extract_strided_slice %155 {offsets = [0, 414], sizes = [8, 16], strides = [1, 1]} : vector<8x574xf32> to vector<8x16xf32>
    %180 = vector.extract_strided_slice %155 {offsets = [0, 432], sizes = [8, 16], strides = [1, 1]} : vector<8x574xf32> to vector<8x16xf32>
    %181 = vector.extract_strided_slice %155 {offsets = [0, 450], sizes = [8, 16], strides = [1, 1]} : vector<8x574xf32> to vector<8x16xf32>
    %182 = vector.extract_strided_slice %155 {offsets = [0, 468], sizes = [8, 16], strides = [1, 1]} : vector<8x574xf32> to vector<8x16xf32>
    %183 = vector.extract_strided_slice %155 {offsets = [0, 486], sizes = [8, 16], strides = [1, 1]} : vector<8x574xf32> to vector<8x16xf32>
    %184 = vector.extract_strided_slice %155 {offsets = [0, 504], sizes = [8, 16], strides = [1, 1]} : vector<8x574xf32> to vector<8x16xf32>
    %185 = vector.extract_strided_slice %155 {offsets = [0, 522], sizes = [8, 16], strides = [1, 1]} : vector<8x574xf32> to vector<8x16xf32>
    %186 = vector.extract_strided_slice %155 {offsets = [0, 540], sizes = [8, 16], strides = [1, 1]} : vector<8x574xf32> to vector<8x16xf32>
    %187 = vector.extract_strided_slice %155 {offsets = [0, 558], sizes = [8, 16], strides = [1, 1]} : vector<8x574xf32> to vector<8x16xf32>
    %188 = tpu.concatenate %156, %157, %158, %159, %160, %161, %162, %163, %164, %165, %166, %167, %168, %169, %170, %171 in 1 : vector<8x16xf32>, vector<8x16xf32>, vector<8x16xf32>, vector<8x16xf32>, vector<8x16xf32>, vector<8x16xf32>, vector<8x16xf32>, vector<8x16xf32>, vector<8x16xf32>, vector<8x16xf32>, vector<8x16xf32>, vector<8x16xf32>, vector<8x16xf32>, vector<8x16xf32>, vector<8x16xf32>, vector<8x16xf32> -> vector<8x256xf32>
    %189 = tpu.concatenate %172, %173, %174, %175, %176, %177, %178, %179, %180, %181, %182, %183, %184, %185, %186, %187 in 1 : vector<8x16xf32>, vector<8x16xf32>, vector<8x16xf32>, vector<8x16xf32>, vector<8x16xf32>, vector<8x16xf32>, vector<8x16xf32>, vector<8x16xf32>, vector<8x16xf32>, vector<8x16xf32>, vector<8x16xf32>, vector<8x16xf32>, vector<8x16xf32>, vector<8x16xf32>, vector<8x16xf32>, vector<8x16xf32> -> vector<8x256xf32>
    %190 = tpu.concatenate %188, %189 in 1 : vector<8x256xf32>, vector<8x256xf32> -> vector<8x512xf32>
    %cst_18 = arith.constant 0.000000e+00 : f32
    %191 = vector.broadcast %cst_18 : f32 to vector<8x512xf32>
    %192 = arith.maximumf %190, %191 : vector<8x512xf32>
    %193 = arith.truncf %192 : vector<8x512xf32> to vector<8x512xbf16>
    %c0_19 = arith.constant 0 : index
    %c0_20 = arith.constant 0 : index
    %c0_21 = arith.constant 0 : index
    %194 = vector.load %arg6[%c0_19, %c0_20, %c0_21] : memref<1x8x512xbf16, #tpu.memory_space<vmem>>, vector<1x8x512xbf16>
    %195 = vector.shape_cast %194 : vector<1x8x512xbf16> to vector<8x512xbf16>
    %196 = vector.shape_cast %193 : vector<8x512xbf16> to vector<1x8x512xbf16>
    tpu.vector_store %arg6[%c0_19, %c0_20, %c0_21], %196 {strides = array<i32>} : memref<1x8x512xbf16, #tpu.memory_space<vmem>>, vector<1x8x512xbf16>,
    return
  }
  func.func @transform_0(%arg0: i32) -> (i32, i32, i32) {
    %c0_i32 = arith.constant 0 : i32
    %c0_i32_0 = arith.constant 0 : i32
    %c0_i32_1 = arith.constant 0 : i32
    return %arg0, %c0_i32, %c0_i32_0 : i32, i32, i32
  }
  func.func @transform_1(%arg0: i32) -> (i32, i32) {
    %c0_i32 = arith.constant 0 : i32
    %c0_i32_0 = arith.constant 0 : i32
    %c0_i32_1 = arith.constant 0 : i32
    return %c0_i32, %c0_i32_0 : i32, i32
  }
  func.func @transform_2(%arg0: i32) -> (i32, i32) {
    %c0_i32 = arith.constant 0 : i32
    %c0_i32_0 = arith.constant 0 : i32
    %c0_i32_1 = arith.constant 0 : i32
    return %c0_i32, %c0_i32_0 : i32, i32
  }
  func.func @transform_3(%arg0: i32) -> (i32, i32) {
    %c0_i32 = arith.constant 0 : i32
    %c0_i32_0 = arith.constant 0 : i32
    %c0_i32_1 = arith.constant 0 : i32
    return %c0_i32, %c0_i32_0 : i32, i32
  }
  func.func @transform_4(%arg0: i32) -> (i32, i32) {
    %c0_i32 = arith.constant 0 : i32
    %c0_i32_0 = arith.constant 0 : i32
    %c0_i32_1 = arith.constant 0 : i32
    return %c0_i32, %c0_i32_0 : i32, i32
  }
  func.func @transform_5(%arg0: i32) -> (i32, i32, i32) {
    %c0_i32 = arith.constant 0 : i32
    %c0_i32_0 = arith.constant 0 : i32
    %c0_i32_1 = arith.constant 0 : i32
    return %arg0, %c0_i32, %c0_i32_0 : i32, i32, i32
  }
}

module attributes {stable_mosaic.version = 11 : i64} {
  func.func @_double_conv_kernel(%arg0: i32, %arg1: memref<1x8x128xbf16, #tpu.memory_space<vmem>>, %arg2: memref<8x72xbf16, #tpu.memory_space<vmem>>, %arg3: memref<8x1xf32, #tpu.memory_space<vmem>>, %arg4: memref<8x72xbf16, #tpu.memory_space<vmem>>, %arg5: memref<8x1xf32, #tpu.memory_space<vmem>>, %arg6: memref<8x8xbf16, #tpu.memory_space<vmem>>, %arg7: memref<8x1xf32, #tpu.memory_space<vmem>>, %arg8: memref<1x8x128xbf16, #tpu.memory_space<vmem>>) attributes {dimension_semantics = [#tpu.dimension_semantics<parallel>], iteration_bounds = array<i64: 2>, scalar_prefetch = 0 : i64, scratch_operands = 0 : i64, tpu.core_type = #tpu.core_type<tc>, window_params = [{transform_indices = @transform_0, window_bounds = array<i64: 1, 8, 128>}, {pipeline_mode = #tpu.pipeline_mode<synchronous>, transform_indices = @transform_1, window_bounds = array<i64: 8, 72>}, {pipeline_mode = #tpu.pipeline_mode<synchronous>, transform_indices = @transform_2, window_bounds = array<i64: 8, 1>}, {pipeline_mode = #tpu.pipeline_mode<synchronous>, transform_indices = @transform_3, window_bounds = array<i64: 8, 72>}, {pipeline_mode = #tpu.pipeline_mode<synchronous>, transform_indices = @transform_4, window_bounds = array<i64: 8, 1>}, {pipeline_mode = #tpu.pipeline_mode<synchronous>, transform_indices = @transform_5, window_bounds = array<i64: 8, 8>}, {pipeline_mode = #tpu.pipeline_mode<synchronous>, transform_indices = @transform_6, window_bounds = array<i64: 8, 1>}, {transform_indices = @transform_7, window_bounds = array<i64: 1, 8, 128>}]} {
    %c0 = arith.constant 0 : index
    %c0_0 = arith.constant 0 : index
    %c0_1 = arith.constant 0 : index
    %0 = vector.load %arg1[%c0, %c0_0, %c0_1] : memref<1x8x128xbf16, #tpu.memory_space<vmem>>, vector<1x8x128xbf16>
    %1 = vector.shape_cast %0 : vector<1x8x128xbf16> to vector<8x128xbf16>
    %c0_2 = arith.constant 0 : index
    %c0_3 = arith.constant 0 : index
    %2 = vector.load %arg2[%c0_2, %c0_3] : memref<8x72xbf16, #tpu.memory_space<vmem>>, vector<8x72xbf16>
    %c0_4 = arith.constant 0 : index
    %c0_5 = arith.constant 0 : index
    %3 = vector.load %arg3[%c0_4, %c0_5] : memref<8x1xf32, #tpu.memory_space<vmem>>, vector<8x1xf32>
    %cst = arith.constant 0.000000e+00 : bf16
    %4 = vector.broadcast %cst : bf16 to vector<8x10xbf16>
    %cst_6 = arith.constant 0.000000e+00 : bf16
    %5 = vector.broadcast %cst_6 : bf16 to vector<8x1xbf16>
    %6 = vector.extract_strided_slice %1 {offsets = [0, 0], sizes = [8, 8], strides = [1, 1]} : vector<8x128xbf16> to vector<8x8xbf16>
    %7 = vector.extract_strided_slice %1 {offsets = [0, 8], sizes = [8, 8], strides = [1, 1]} : vector<8x128xbf16> to vector<8x8xbf16>
    %8 = vector.extract_strided_slice %1 {offsets = [0, 16], sizes = [8, 8], strides = [1, 1]} : vector<8x128xbf16> to vector<8x8xbf16>
    %9 = vector.extract_strided_slice %1 {offsets = [0, 24], sizes = [8, 8], strides = [1, 1]} : vector<8x128xbf16> to vector<8x8xbf16>
    %10 = vector.extract_strided_slice %1 {offsets = [0, 32], sizes = [8, 8], strides = [1, 1]} : vector<8x128xbf16> to vector<8x8xbf16>
    %11 = vector.extract_strided_slice %1 {offsets = [0, 40], sizes = [8, 8], strides = [1, 1]} : vector<8x128xbf16> to vector<8x8xbf16>
    %12 = vector.extract_strided_slice %1 {offsets = [0, 48], sizes = [8, 8], strides = [1, 1]} : vector<8x128xbf16> to vector<8x8xbf16>
    %13 = vector.extract_strided_slice %1 {offsets = [0, 56], sizes = [8, 8], strides = [1, 1]} : vector<8x128xbf16> to vector<8x8xbf16>
    %14 = vector.extract_strided_slice %1 {offsets = [0, 64], sizes = [8, 8], strides = [1, 1]} : vector<8x128xbf16> to vector<8x8xbf16>
    %15 = vector.extract_strided_slice %1 {offsets = [0, 72], sizes = [8, 8], strides = [1, 1]} : vector<8x128xbf16> to vector<8x8xbf16>
    %16 = vector.extract_strided_slice %1 {offsets = [0, 80], sizes = [8, 8], strides = [1, 1]} : vector<8x128xbf16> to vector<8x8xbf16>
    %17 = vector.extract_strided_slice %1 {offsets = [0, 88], sizes = [8, 8], strides = [1, 1]} : vector<8x128xbf16> to vector<8x8xbf16>
    %18 = vector.extract_strided_slice %1 {offsets = [0, 96], sizes = [8, 8], strides = [1, 1]} : vector<8x128xbf16> to vector<8x8xbf16>
    %19 = vector.extract_strided_slice %1 {offsets = [0, 104], sizes = [8, 8], strides = [1, 1]} : vector<8x128xbf16> to vector<8x8xbf16>
    %20 = vector.extract_strided_slice %1 {offsets = [0, 112], sizes = [8, 8], strides = [1, 1]} : vector<8x128xbf16> to vector<8x8xbf16>
    %21 = vector.extract_strided_slice %1 {offsets = [0, 120], sizes = [8, 8], strides = [1, 1]} : vector<8x128xbf16> to vector<8x8xbf16>
    %cst_7 = arith.constant 0.000000e+00 : bf16
    %22 = vector.broadcast %cst_7 : bf16 to vector<8x10xbf16>
    %23 = tpu.concatenate %4, %5, %6, %5, %5, %7, %5, %5, %8, %5, %5, %9, %5, %5, %10, %5 in 1 : vector<8x10xbf16>, vector<8x1xbf16>, vector<8x8xbf16>, vector<8x1xbf16>, vector<8x1xbf16>, vector<8x8xbf16>, vector<8x1xbf16>, vector<8x1xbf16>, vector<8x8xbf16>, vector<8x1xbf16>, vector<8x1xbf16>, vector<8x8xbf16>, vector<8x1xbf16>, vector<8x1xbf16>, vector<8x8xbf16>, vector<8x1xbf16> -> vector<8x60xbf16>
    %24 = tpu.concatenate %5, %11, %5, %5, %12, %5, %5, %13, %5, %5, %14, %5, %5, %15, %5, %5 in 1 : vector<8x1xbf16>, vector<8x8xbf16>, vector<8x1xbf16>, vector<8x1xbf16>, vector<8x8xbf16>, vector<8x1xbf16>, vector<8x1xbf16>, vector<8x8xbf16>, vector<8x1xbf16>, vector<8x1xbf16>, vector<8x8xbf16>, vector<8x1xbf16>, vector<8x1xbf16>, vector<8x8xbf16>, vector<8x1xbf16>, vector<8x1xbf16> -> vector<8x51xbf16>
    %25 = tpu.concatenate %16, %5, %5, %17, %5, %5, %18, %5, %5, %19, %5, %5, %20, %5, %5, %21 in 1 : vector<8x8xbf16>, vector<8x1xbf16>, vector<8x1xbf16>, vector<8x8xbf16>, vector<8x1xbf16>, vector<8x1xbf16>, vector<8x8xbf16>, vector<8x1xbf16>, vector<8x1xbf16>, vector<8x8xbf16>, vector<8x1xbf16>, vector<8x1xbf16>, vector<8x8xbf16>, vector<8x1xbf16>, vector<8x1xbf16>, vector<8x8xbf16> -> vector<8x58xbf16>
    %26 = tpu.concatenate %5, %22 in 1 : vector<8x1xbf16>, vector<8x10xbf16> -> vector<8x11xbf16>
    %27 = tpu.concatenate %23, %24, %25, %26 in 1 : vector<8x60xbf16>, vector<8x51xbf16>, vector<8x58xbf16>, vector<8x11xbf16> -> vector<8x180xbf16>
    %28 = vector.extract_strided_slice %27 {offsets = [0, 0], sizes = [8, 158], strides = [1, 1]} : vector<8x180xbf16> to vector<8x158xbf16>
    %29 = vector.extract_strided_slice %27 {offsets = [0, 1], sizes = [8, 158], strides = [1, 1]} : vector<8x180xbf16> to vector<8x158xbf16>
    %30 = vector.extract_strided_slice %27 {offsets = [0, 2], sizes = [8, 158], strides = [1, 1]} : vector<8x180xbf16> to vector<8x158xbf16>
    %31 = vector.extract_strided_slice %27 {offsets = [0, 10], sizes = [8, 158], strides = [1, 1]} : vector<8x180xbf16> to vector<8x158xbf16>
    %32 = vector.extract_strided_slice %27 {offsets = [0, 11], sizes = [8, 158], strides = [1, 1]} : vector<8x180xbf16> to vector<8x158xbf16>
    %33 = vector.extract_strided_slice %27 {offsets = [0, 12], sizes = [8, 158], strides = [1, 1]} : vector<8x180xbf16> to vector<8x158xbf16>
    %34 = vector.extract_strided_slice %27 {offsets = [0, 20], sizes = [8, 158], strides = [1, 1]} : vector<8x180xbf16> to vector<8x158xbf16>
    %35 = vector.extract_strided_slice %27 {offsets = [0, 21], sizes = [8, 158], strides = [1, 1]} : vector<8x180xbf16> to vector<8x158xbf16>
    %36 = vector.extract_strided_slice %27 {offsets = [0, 22], sizes = [8, 158], strides = [1, 1]} : vector<8x180xbf16> to vector<8x158xbf16>
    %37 = tpu.concatenate %28, %29, %30, %31, %32, %33, %34, %35, %36 in 0 : vector<8x158xbf16>, vector<8x158xbf16>, vector<8x158xbf16>, vector<8x158xbf16>, vector<8x158xbf16>, vector<8x158xbf16>, vector<8x158xbf16>, vector<8x158xbf16>, vector<8x158xbf16> -> vector<72x158xbf16>
    %cst_8 = arith.constant dense<0.000000e+00> : vector<8x158xf32>
    %38 = tpu.matmul %2, %37, %cst_8 {dimension_numbers = #tpu.dot_dimension_numbers<[1], [0], [0], [1], [0, 0, 1, 1], [], []>} : vector<8x72xbf16>, vector<72x158xbf16>, vector<8x158xf32> -> vector<8x158xf32>
    %39 = vector.broadcast %3 : vector<8x1xf32> to vector<8x158xf32>
    %40 = arith.addf %38, %39 : vector<8x158xf32>
    %41 = vector.extract_strided_slice %40 {offsets = [0, 0], sizes = [8, 8], strides = [1, 1]} : vector<8x158xf32> to vector<8x8xf32>
    %42 = vector.extract_strided_slice %40 {offsets = [0, 10], sizes = [8, 8], strides = [1, 1]} : vector<8x158xf32> to vector<8x8xf32>
    %43 = vector.extract_strided_slice %40 {offsets = [0, 20], sizes = [8, 8], strides = [1, 1]} : vector<8x158xf32> to vector<8x8xf32>
    %44 = vector.extract_strided_slice %40 {offsets = [0, 30], sizes = [8, 8], strides = [1, 1]} : vector<8x158xf32> to vector<8x8xf32>
    %45 = vector.extract_strided_slice %40 {offsets = [0, 40], sizes = [8, 8], strides = [1, 1]} : vector<8x158xf32> to vector<8x8xf32>
    %46 = vector.extract_strided_slice %40 {offsets = [0, 50], sizes = [8, 8], strides = [1, 1]} : vector<8x158xf32> to vector<8x8xf32>
    %47 = vector.extract_strided_slice %40 {offsets = [0, 60], sizes = [8, 8], strides = [1, 1]} : vector<8x158xf32> to vector<8x8xf32>
    %48 = vector.extract_strided_slice %40 {offsets = [0, 70], sizes = [8, 8], strides = [1, 1]} : vector<8x158xf32> to vector<8x8xf32>
    %49 = vector.extract_strided_slice %40 {offsets = [0, 80], sizes = [8, 8], strides = [1, 1]} : vector<8x158xf32> to vector<8x8xf32>
    %50 = vector.extract_strided_slice %40 {offsets = [0, 90], sizes = [8, 8], strides = [1, 1]} : vector<8x158xf32> to vector<8x8xf32>
    %51 = vector.extract_strided_slice %40 {offsets = [0, 100], sizes = [8, 8], strides = [1, 1]} : vector<8x158xf32> to vector<8x8xf32>
    %52 = vector.extract_strided_slice %40 {offsets = [0, 110], sizes = [8, 8], strides = [1, 1]} : vector<8x158xf32> to vector<8x8xf32>
    %53 = vector.extract_strided_slice %40 {offsets = [0, 120], sizes = [8, 8], strides = [1, 1]} : vector<8x158xf32> to vector<8x8xf32>
    %54 = vector.extract_strided_slice %40 {offsets = [0, 130], sizes = [8, 8], strides = [1, 1]} : vector<8x158xf32> to vector<8x8xf32>
    %55 = vector.extract_strided_slice %40 {offsets = [0, 140], sizes = [8, 8], strides = [1, 1]} : vector<8x158xf32> to vector<8x8xf32>
    %56 = vector.extract_strided_slice %40 {offsets = [0, 150], sizes = [8, 8], strides = [1, 1]} : vector<8x158xf32> to vector<8x8xf32>
    %57 = tpu.concatenate %41, %42, %43, %44, %45, %46, %47, %48, %49, %50, %51, %52, %53, %54, %55, %56 in 1 : vector<8x8xf32>, vector<8x8xf32>, vector<8x8xf32>, vector<8x8xf32>, vector<8x8xf32>, vector<8x8xf32>, vector<8x8xf32>, vector<8x8xf32>, vector<8x8xf32>, vector<8x8xf32>, vector<8x8xf32>, vector<8x8xf32>, vector<8x8xf32>, vector<8x8xf32>, vector<8x8xf32>, vector<8x8xf32> -> vector<8x128xf32>
    %cst_9 = arith.constant 0.000000e+00 : f32
    %58 = vector.broadcast %cst_9 : f32 to vector<8x128xf32>
    %59 = arith.maximumf %57, %58 : vector<8x128xf32>
    %60 = arith.truncf %59 : vector<8x128xf32> to vector<8x128xbf16>
    %c0_10 = arith.constant 0 : index
    %c0_11 = arith.constant 0 : index
    %61 = vector.load %arg4[%c0_10, %c0_11] : memref<8x72xbf16, #tpu.memory_space<vmem>>, vector<8x72xbf16>
    %c0_12 = arith.constant 0 : index
    %c0_13 = arith.constant 0 : index
    %62 = vector.load %arg5[%c0_12, %c0_13] : memref<8x1xf32, #tpu.memory_space<vmem>>, vector<8x1xf32>
    %cst_14 = arith.constant 0.000000e+00 : bf16
    %63 = vector.broadcast %cst_14 : bf16 to vector<8x10xbf16>
    %cst_15 = arith.constant 0.000000e+00 : bf16
    %64 = vector.broadcast %cst_15 : bf16 to vector<8x1xbf16>
    %65 = vector.extract_strided_slice %60 {offsets = [0, 0], sizes = [8, 8], strides = [1, 1]} : vector<8x128xbf16> to vector<8x8xbf16>
    %66 = vector.extract_strided_slice %60 {offsets = [0, 8], sizes = [8, 8], strides = [1, 1]} : vector<8x128xbf16> to vector<8x8xbf16>
    %67 = vector.extract_strided_slice %60 {offsets = [0, 16], sizes = [8, 8], strides = [1, 1]} : vector<8x128xbf16> to vector<8x8xbf16>
    %68 = vector.extract_strided_slice %60 {offsets = [0, 24], sizes = [8, 8], strides = [1, 1]} : vector<8x128xbf16> to vector<8x8xbf16>
    %69 = vector.extract_strided_slice %60 {offsets = [0, 32], sizes = [8, 8], strides = [1, 1]} : vector<8x128xbf16> to vector<8x8xbf16>
    %70 = vector.extract_strided_slice %60 {offsets = [0, 40], sizes = [8, 8], strides = [1, 1]} : vector<8x128xbf16> to vector<8x8xbf16>
    %71 = vector.extract_strided_slice %60 {offsets = [0, 48], sizes = [8, 8], strides = [1, 1]} : vector<8x128xbf16> to vector<8x8xbf16>
    %72 = vector.extract_strided_slice %60 {offsets = [0, 56], sizes = [8, 8], strides = [1, 1]} : vector<8x128xbf16> to vector<8x8xbf16>
    %73 = vector.extract_strided_slice %60 {offsets = [0, 64], sizes = [8, 8], strides = [1, 1]} : vector<8x128xbf16> to vector<8x8xbf16>
    %74 = vector.extract_strided_slice %60 {offsets = [0, 72], sizes = [8, 8], strides = [1, 1]} : vector<8x128xbf16> to vector<8x8xbf16>
    %75 = vector.extract_strided_slice %60 {offsets = [0, 80], sizes = [8, 8], strides = [1, 1]} : vector<8x128xbf16> to vector<8x8xbf16>
    %76 = vector.extract_strided_slice %60 {offsets = [0, 88], sizes = [8, 8], strides = [1, 1]} : vector<8x128xbf16> to vector<8x8xbf16>
    %77 = vector.extract_strided_slice %60 {offsets = [0, 96], sizes = [8, 8], strides = [1, 1]} : vector<8x128xbf16> to vector<8x8xbf16>
    %78 = vector.extract_strided_slice %60 {offsets = [0, 104], sizes = [8, 8], strides = [1, 1]} : vector<8x128xbf16> to vector<8x8xbf16>
    %79 = vector.extract_strided_slice %60 {offsets = [0, 112], sizes = [8, 8], strides = [1, 1]} : vector<8x128xbf16> to vector<8x8xbf16>
    %80 = vector.extract_strided_slice %60 {offsets = [0, 120], sizes = [8, 8], strides = [1, 1]} : vector<8x128xbf16> to vector<8x8xbf16>
    %cst_16 = arith.constant 0.000000e+00 : bf16
    %81 = vector.broadcast %cst_16 : bf16 to vector<8x10xbf16>
    %82 = tpu.concatenate %63, %64, %65, %64, %64, %66, %64, %64, %67, %64, %64, %68, %64, %64, %69, %64 in 1 : vector<8x10xbf16>, vector<8x1xbf16>, vector<8x8xbf16>, vector<8x1xbf16>, vector<8x1xbf16>, vector<8x8xbf16>, vector<8x1xbf16>, vector<8x1xbf16>, vector<8x8xbf16>, vector<8x1xbf16>, vector<8x1xbf16>, vector<8x8xbf16>, vector<8x1xbf16>, vector<8x1xbf16>, vector<8x8xbf16>, vector<8x1xbf16> -> vector<8x60xbf16>
    %83 = tpu.concatenate %64, %70, %64, %64, %71, %64, %64, %72, %64, %64, %73, %64, %64, %74, %64, %64 in 1 : vector<8x1xbf16>, vector<8x8xbf16>, vector<8x1xbf16>, vector<8x1xbf16>, vector<8x8xbf16>, vector<8x1xbf16>, vector<8x1xbf16>, vector<8x8xbf16>, vector<8x1xbf16>, vector<8x1xbf16>, vector<8x8xbf16>, vector<8x1xbf16>, vector<8x1xbf16>, vector<8x8xbf16>, vector<8x1xbf16>, vector<8x1xbf16> -> vector<8x51xbf16>
    %84 = tpu.concatenate %75, %64, %64, %76, %64, %64, %77, %64, %64, %78, %64, %64, %79, %64, %64, %80 in 1 : vector<8x8xbf16>, vector<8x1xbf16>, vector<8x1xbf16>, vector<8x8xbf16>, vector<8x1xbf16>, vector<8x1xbf16>, vector<8x8xbf16>, vector<8x1xbf16>, vector<8x1xbf16>, vector<8x8xbf16>, vector<8x1xbf16>, vector<8x1xbf16>, vector<8x8xbf16>, vector<8x1xbf16>, vector<8x1xbf16>, vector<8x8xbf16> -> vector<8x58xbf16>
    %85 = tpu.concatenate %64, %81 in 1 : vector<8x1xbf16>, vector<8x10xbf16> -> vector<8x11xbf16>
    %86 = tpu.concatenate %82, %83, %84, %85 in 1 : vector<8x60xbf16>, vector<8x51xbf16>, vector<8x58xbf16>, vector<8x11xbf16> -> vector<8x180xbf16>
    %87 = vector.extract_strided_slice %86 {offsets = [0, 0], sizes = [8, 158], strides = [1, 1]} : vector<8x180xbf16> to vector<8x158xbf16>
    %88 = vector.extract_strided_slice %86 {offsets = [0, 1], sizes = [8, 158], strides = [1, 1]} : vector<8x180xbf16> to vector<8x158xbf16>
    %89 = vector.extract_strided_slice %86 {offsets = [0, 2], sizes = [8, 158], strides = [1, 1]} : vector<8x180xbf16> to vector<8x158xbf16>
    %90 = vector.extract_strided_slice %86 {offsets = [0, 10], sizes = [8, 158], strides = [1, 1]} : vector<8x180xbf16> to vector<8x158xbf16>
    %91 = vector.extract_strided_slice %86 {offsets = [0, 11], sizes = [8, 158], strides = [1, 1]} : vector<8x180xbf16> to vector<8x158xbf16>
    %92 = vector.extract_strided_slice %86 {offsets = [0, 12], sizes = [8, 158], strides = [1, 1]} : vector<8x180xbf16> to vector<8x158xbf16>
    %93 = vector.extract_strided_slice %86 {offsets = [0, 20], sizes = [8, 158], strides = [1, 1]} : vector<8x180xbf16> to vector<8x158xbf16>
    %94 = vector.extract_strided_slice %86 {offsets = [0, 21], sizes = [8, 158], strides = [1, 1]} : vector<8x180xbf16> to vector<8x158xbf16>
    %95 = vector.extract_strided_slice %86 {offsets = [0, 22], sizes = [8, 158], strides = [1, 1]} : vector<8x180xbf16> to vector<8x158xbf16>
    %96 = tpu.concatenate %87, %88, %89, %90, %91, %92, %93, %94, %95 in 0 : vector<8x158xbf16>, vector<8x158xbf16>, vector<8x158xbf16>, vector<8x158xbf16>, vector<8x158xbf16>, vector<8x158xbf16>, vector<8x158xbf16>, vector<8x158xbf16>, vector<8x158xbf16> -> vector<72x158xbf16>
    %cst_17 = arith.constant dense<0.000000e+00> : vector<8x158xf32>
    %97 = tpu.matmul %61, %96, %cst_17 {dimension_numbers = #tpu.dot_dimension_numbers<[1], [0], [0], [1], [0, 0, 1, 1], [], []>} : vector<8x72xbf16>, vector<72x158xbf16>, vector<8x158xf32> -> vector<8x158xf32>
    %98 = vector.broadcast %62 : vector<8x1xf32> to vector<8x158xf32>
    %99 = arith.addf %97, %98 : vector<8x158xf32>
    %100 = vector.extract_strided_slice %99 {offsets = [0, 0], sizes = [8, 8], strides = [1, 1]} : vector<8x158xf32> to vector<8x8xf32>
    %101 = vector.extract_strided_slice %99 {offsets = [0, 10], sizes = [8, 8], strides = [1, 1]} : vector<8x158xf32> to vector<8x8xf32>
    %102 = vector.extract_strided_slice %99 {offsets = [0, 20], sizes = [8, 8], strides = [1, 1]} : vector<8x158xf32> to vector<8x8xf32>
    %103 = vector.extract_strided_slice %99 {offsets = [0, 30], sizes = [8, 8], strides = [1, 1]} : vector<8x158xf32> to vector<8x8xf32>
    %104 = vector.extract_strided_slice %99 {offsets = [0, 40], sizes = [8, 8], strides = [1, 1]} : vector<8x158xf32> to vector<8x8xf32>
    %105 = vector.extract_strided_slice %99 {offsets = [0, 50], sizes = [8, 8], strides = [1, 1]} : vector<8x158xf32> to vector<8x8xf32>
    %106 = vector.extract_strided_slice %99 {offsets = [0, 60], sizes = [8, 8], strides = [1, 1]} : vector<8x158xf32> to vector<8x8xf32>
    %107 = vector.extract_strided_slice %99 {offsets = [0, 70], sizes = [8, 8], strides = [1, 1]} : vector<8x158xf32> to vector<8x8xf32>
    %108 = vector.extract_strided_slice %99 {offsets = [0, 80], sizes = [8, 8], strides = [1, 1]} : vector<8x158xf32> to vector<8x8xf32>
    %109 = vector.extract_strided_slice %99 {offsets = [0, 90], sizes = [8, 8], strides = [1, 1]} : vector<8x158xf32> to vector<8x8xf32>
    %110 = vector.extract_strided_slice %99 {offsets = [0, 100], sizes = [8, 8], strides = [1, 1]} : vector<8x158xf32> to vector<8x8xf32>
    %111 = vector.extract_strided_slice %99 {offsets = [0, 110], sizes = [8, 8], strides = [1, 1]} : vector<8x158xf32> to vector<8x8xf32>
    %112 = vector.extract_strided_slice %99 {offsets = [0, 120], sizes = [8, 8], strides = [1, 1]} : vector<8x158xf32> to vector<8x8xf32>
    %113 = vector.extract_strided_slice %99 {offsets = [0, 130], sizes = [8, 8], strides = [1, 1]} : vector<8x158xf32> to vector<8x8xf32>
    %114 = vector.extract_strided_slice %99 {offsets = [0, 140], sizes = [8, 8], strides = [1, 1]} : vector<8x158xf32> to vector<8x8xf32>
    %115 = vector.extract_strided_slice %99 {offsets = [0, 150], sizes = [8, 8], strides = [1, 1]} : vector<8x158xf32> to vector<8x8xf32>
    %116 = tpu.concatenate %100, %101, %102, %103, %104, %105, %106, %107, %108, %109, %110, %111, %112, %113, %114, %115 in 1 : vector<8x8xf32>, vector<8x8xf32>, vector<8x8xf32>, vector<8x8xf32>, vector<8x8xf32>, vector<8x8xf32>, vector<8x8xf32>, vector<8x8xf32>, vector<8x8xf32>, vector<8x8xf32>, vector<8x8xf32>, vector<8x8xf32>, vector<8x8xf32>, vector<8x8xf32>, vector<8x8xf32>, vector<8x8xf32> -> vector<8x128xf32>
    %c0_18 = arith.constant 0 : index
    %c0_19 = arith.constant 0 : index
    %117 = vector.load %arg6[%c0_18, %c0_19] : memref<8x8xbf16, #tpu.memory_space<vmem>>, vector<8x8xbf16>
    %c0_20 = arith.constant 0 : index
    %c0_21 = arith.constant 0 : index
    %118 = vector.load %arg7[%c0_20, %c0_21] : memref<8x1xf32, #tpu.memory_space<vmem>>, vector<8x1xf32>
    %cst_22 = arith.constant dense<0.000000e+00> : vector<8x128xf32>
    %119 = tpu.matmul %117, %1, %cst_22 {dimension_numbers = #tpu.dot_dimension_numbers<[1], [0], [0], [1], [0, 0, 1, 1], [], []>} : vector<8x8xbf16>, vector<8x128xbf16>, vector<8x128xf32> -> vector<8x128xf32>
    %120 = vector.broadcast %118 : vector<8x1xf32> to vector<8x128xf32>
    %121 = arith.addf %119, %120 : vector<8x128xf32>
    %122 = arith.addf %116, %121 : vector<8x128xf32>
    %cst_23 = arith.constant 0.000000e+00 : f32
    %123 = vector.broadcast %cst_23 : f32 to vector<8x128xf32>
    %124 = arith.maximumf %122, %123 : vector<8x128xf32>
    %125 = arith.truncf %124 : vector<8x128xf32> to vector<8x128xbf16>
    %c0_24 = arith.constant 0 : index
    %c0_25 = arith.constant 0 : index
    %c0_26 = arith.constant 0 : index
    %126 = vector.load %arg8[%c0_24, %c0_25, %c0_26] : memref<1x8x128xbf16, #tpu.memory_space<vmem>>, vector<1x8x128xbf16>
    %127 = vector.shape_cast %126 : vector<1x8x128xbf16> to vector<8x128xbf16>
    %128 = vector.shape_cast %125 : vector<8x128xbf16> to vector<1x8x128xbf16>
    tpu.vector_store %arg8[%c0_24, %c0_25, %c0_26], %128 {strides = array<i32>} : memref<1x8x128xbf16, #tpu.memory_space<vmem>>, vector<1x8x128xbf16>,
    return
  }
  func.func @transform_0(%arg0: i32) -> (i32, i32, i32) {
    %c0_i32 = arith.constant 0 : i32
    %c0_i32_0 = arith.constant 0 : i32
    %c0_i32_1 = arith.constant 0 : i32
    return %arg0, %c0_i32, %c0_i32_0 : i32, i32, i32
  }
  func.func @transform_1(%arg0: i32) -> (i32, i32) {
    %c0_i32 = arith.constant 0 : i32
    %c0_i32_0 = arith.constant 0 : i32
    %c0_i32_1 = arith.constant 0 : i32
    return %c0_i32, %c0_i32_0 : i32, i32
  }
  func.func @transform_2(%arg0: i32) -> (i32, i32) {
    %c0_i32 = arith.constant 0 : i32
    %c0_i32_0 = arith.constant 0 : i32
    %c0_i32_1 = arith.constant 0 : i32
    return %c0_i32, %c0_i32_0 : i32, i32
  }
  func.func @transform_3(%arg0: i32) -> (i32, i32) {
    %c0_i32 = arith.constant 0 : i32
    %c0_i32_0 = arith.constant 0 : i32
    %c0_i32_1 = arith.constant 0 : i32
    return %c0_i32, %c0_i32_0 : i32, i32
  }
  func.func @transform_4(%arg0: i32) -> (i32, i32) {
    %c0_i32 = arith.constant 0 : i32
    %c0_i32_0 = arith.constant 0 : i32
    %c0_i32_1 = arith.constant 0 : i32
    return %c0_i32, %c0_i32_0 : i32, i32
  }
  func.func @transform_5(%arg0: i32) -> (i32, i32) {
    %c0_i32 = arith.constant 0 : i32
    %c0_i32_0 = arith.constant 0 : i32
    %c0_i32_1 = arith.constant 0 : i32
    return %c0_i32, %c0_i32_0 : i32, i32
  }
  func.func @transform_6(%arg0: i32) -> (i32, i32) {
    %c0_i32 = arith.constant 0 : i32
    %c0_i32_0 = arith.constant 0 : i32
    %c0_i32_1 = arith.constant 0 : i32
    return %c0_i32, %c0_i32_0 : i32, i32
  }
  func.func @transform_7(%arg0: i32) -> (i32, i32, i32) {
    %c0_i32 = arith.constant 0 : i32
    %c0_i32_0 = arith.constant 0 : i32
    %c0_i32_1 = arith.constant 0 : i32
    return %arg0, %c0_i32, %c0_i32_0 : i32, i32, i32
  }
}

module attributes {stable_mosaic.version = 11 : i64} {
  func.func @_conv_kernel(%arg0: i32, %arg1: memref<1x8x128xbf16, #tpu.memory_space<vmem>>, %arg2: memref<8x72xbf16, #tpu.memory_space<vmem>>, %arg3: memref<8x1xf32, #tpu.memory_space<vmem>>, %arg4: memref<1x8x128xbf16, #tpu.memory_space<vmem>>) attributes {dimension_semantics = [#tpu.dimension_semantics<parallel>], iteration_bounds = array<i64: 2>, scalar_prefetch = 0 : i64, scratch_operands = 0 : i64, tpu.core_type = #tpu.core_type<tc>, window_params = [{transform_indices = @transform_0, window_bounds = array<i64: 1, 8, 128>}, {pipeline_mode = #tpu.pipeline_mode<synchronous>, transform_indices = @transform_1, window_bounds = array<i64: 8, 72>}, {pipeline_mode = #tpu.pipeline_mode<synchronous>, transform_indices = @transform_2, window_bounds = array<i64: 8, 1>}, {transform_indices = @transform_3, window_bounds = array<i64: 1, 8, 128>}]} {
    %c0 = arith.constant 0 : index
    %c0_0 = arith.constant 0 : index
    %c0_1 = arith.constant 0 : index
    %0 = vector.load %arg1[%c0, %c0_0, %c0_1] : memref<1x8x128xbf16, #tpu.memory_space<vmem>>, vector<1x8x128xbf16>
    %1 = vector.shape_cast %0 : vector<1x8x128xbf16> to vector<8x128xbf16>
    %c0_2 = arith.constant 0 : index
    %c0_3 = arith.constant 0 : index
    %2 = vector.load %arg2[%c0_2, %c0_3] : memref<8x72xbf16, #tpu.memory_space<vmem>>, vector<8x72xbf16>
    %c0_4 = arith.constant 0 : index
    %c0_5 = arith.constant 0 : index
    %3 = vector.load %arg3[%c0_4, %c0_5] : memref<8x1xf32, #tpu.memory_space<vmem>>, vector<8x1xf32>
    %cst = arith.constant 0.000000e+00 : bf16
    %4 = vector.broadcast %cst : bf16 to vector<8x10xbf16>
    %cst_6 = arith.constant 0.000000e+00 : bf16
    %5 = vector.broadcast %cst_6 : bf16 to vector<8x1xbf16>
    %6 = vector.extract_strided_slice %1 {offsets = [0, 0], sizes = [8, 8], strides = [1, 1]} : vector<8x128xbf16> to vector<8x8xbf16>
    %7 = vector.extract_strided_slice %1 {offsets = [0, 8], sizes = [8, 8], strides = [1, 1]} : vector<8x128xbf16> to vector<8x8xbf16>
    %8 = vector.extract_strided_slice %1 {offsets = [0, 16], sizes = [8, 8], strides = [1, 1]} : vector<8x128xbf16> to vector<8x8xbf16>
    %9 = vector.extract_strided_slice %1 {offsets = [0, 24], sizes = [8, 8], strides = [1, 1]} : vector<8x128xbf16> to vector<8x8xbf16>
    %10 = vector.extract_strided_slice %1 {offsets = [0, 32], sizes = [8, 8], strides = [1, 1]} : vector<8x128xbf16> to vector<8x8xbf16>
    %11 = vector.extract_strided_slice %1 {offsets = [0, 40], sizes = [8, 8], strides = [1, 1]} : vector<8x128xbf16> to vector<8x8xbf16>
    %12 = vector.extract_strided_slice %1 {offsets = [0, 48], sizes = [8, 8], strides = [1, 1]} : vector<8x128xbf16> to vector<8x8xbf16>
    %13 = vector.extract_strided_slice %1 {offsets = [0, 56], sizes = [8, 8], strides = [1, 1]} : vector<8x128xbf16> to vector<8x8xbf16>
    %14 = vector.extract_strided_slice %1 {offsets = [0, 64], sizes = [8, 8], strides = [1, 1]} : vector<8x128xbf16> to vector<8x8xbf16>
    %15 = vector.extract_strided_slice %1 {offsets = [0, 72], sizes = [8, 8], strides = [1, 1]} : vector<8x128xbf16> to vector<8x8xbf16>
    %16 = vector.extract_strided_slice %1 {offsets = [0, 80], sizes = [8, 8], strides = [1, 1]} : vector<8x128xbf16> to vector<8x8xbf16>
    %17 = vector.extract_strided_slice %1 {offsets = [0, 88], sizes = [8, 8], strides = [1, 1]} : vector<8x128xbf16> to vector<8x8xbf16>
    %18 = vector.extract_strided_slice %1 {offsets = [0, 96], sizes = [8, 8], strides = [1, 1]} : vector<8x128xbf16> to vector<8x8xbf16>
    %19 = vector.extract_strided_slice %1 {offsets = [0, 104], sizes = [8, 8], strides = [1, 1]} : vector<8x128xbf16> to vector<8x8xbf16>
    %20 = vector.extract_strided_slice %1 {offsets = [0, 112], sizes = [8, 8], strides = [1, 1]} : vector<8x128xbf16> to vector<8x8xbf16>
    %21 = vector.extract_strided_slice %1 {offsets = [0, 120], sizes = [8, 8], strides = [1, 1]} : vector<8x128xbf16> to vector<8x8xbf16>
    %cst_7 = arith.constant 0.000000e+00 : bf16
    %22 = vector.broadcast %cst_7 : bf16 to vector<8x10xbf16>
    %23 = tpu.concatenate %4, %5, %6, %5, %5, %7, %5, %5, %8, %5, %5, %9, %5, %5, %10, %5 in 1 : vector<8x10xbf16>, vector<8x1xbf16>, vector<8x8xbf16>, vector<8x1xbf16>, vector<8x1xbf16>, vector<8x8xbf16>, vector<8x1xbf16>, vector<8x1xbf16>, vector<8x8xbf16>, vector<8x1xbf16>, vector<8x1xbf16>, vector<8x8xbf16>, vector<8x1xbf16>, vector<8x1xbf16>, vector<8x8xbf16>, vector<8x1xbf16> -> vector<8x60xbf16>
    %24 = tpu.concatenate %5, %11, %5, %5, %12, %5, %5, %13, %5, %5, %14, %5, %5, %15, %5, %5 in 1 : vector<8x1xbf16>, vector<8x8xbf16>, vector<8x1xbf16>, vector<8x1xbf16>, vector<8x8xbf16>, vector<8x1xbf16>, vector<8x1xbf16>, vector<8x8xbf16>, vector<8x1xbf16>, vector<8x1xbf16>, vector<8x8xbf16>, vector<8x1xbf16>, vector<8x1xbf16>, vector<8x8xbf16>, vector<8x1xbf16>, vector<8x1xbf16> -> vector<8x51xbf16>
    %25 = tpu.concatenate %16, %5, %5, %17, %5, %5, %18, %5, %5, %19, %5, %5, %20, %5, %5, %21 in 1 : vector<8x8xbf16>, vector<8x1xbf16>, vector<8x1xbf16>, vector<8x8xbf16>, vector<8x1xbf16>, vector<8x1xbf16>, vector<8x8xbf16>, vector<8x1xbf16>, vector<8x1xbf16>, vector<8x8xbf16>, vector<8x1xbf16>, vector<8x1xbf16>, vector<8x8xbf16>, vector<8x1xbf16>, vector<8x1xbf16>, vector<8x8xbf16> -> vector<8x58xbf16>
    %26 = tpu.concatenate %5, %22 in 1 : vector<8x1xbf16>, vector<8x10xbf16> -> vector<8x11xbf16>
    %27 = tpu.concatenate %23, %24, %25, %26 in 1 : vector<8x60xbf16>, vector<8x51xbf16>, vector<8x58xbf16>, vector<8x11xbf16> -> vector<8x180xbf16>
    %28 = vector.extract_strided_slice %27 {offsets = [0, 0], sizes = [8, 158], strides = [1, 1]} : vector<8x180xbf16> to vector<8x158xbf16>
    %29 = vector.extract_strided_slice %27 {offsets = [0, 1], sizes = [8, 158], strides = [1, 1]} : vector<8x180xbf16> to vector<8x158xbf16>
    %30 = vector.extract_strided_slice %27 {offsets = [0, 2], sizes = [8, 158], strides = [1, 1]} : vector<8x180xbf16> to vector<8x158xbf16>
    %31 = vector.extract_strided_slice %27 {offsets = [0, 10], sizes = [8, 158], strides = [1, 1]} : vector<8x180xbf16> to vector<8x158xbf16>
    %32 = vector.extract_strided_slice %27 {offsets = [0, 11], sizes = [8, 158], strides = [1, 1]} : vector<8x180xbf16> to vector<8x158xbf16>
    %33 = vector.extract_strided_slice %27 {offsets = [0, 12], sizes = [8, 158], strides = [1, 1]} : vector<8x180xbf16> to vector<8x158xbf16>
    %34 = vector.extract_strided_slice %27 {offsets = [0, 20], sizes = [8, 158], strides = [1, 1]} : vector<8x180xbf16> to vector<8x158xbf16>
    %35 = vector.extract_strided_slice %27 {offsets = [0, 21], sizes = [8, 158], strides = [1, 1]} : vector<8x180xbf16> to vector<8x158xbf16>
    %36 = vector.extract_strided_slice %27 {offsets = [0, 22], sizes = [8, 158], strides = [1, 1]} : vector<8x180xbf16> to vector<8x158xbf16>
    %37 = tpu.concatenate %28, %29, %30, %31, %32, %33, %34, %35, %36 in 0 : vector<8x158xbf16>, vector<8x158xbf16>, vector<8x158xbf16>, vector<8x158xbf16>, vector<8x158xbf16>, vector<8x158xbf16>, vector<8x158xbf16>, vector<8x158xbf16>, vector<8x158xbf16> -> vector<72x158xbf16>
    %cst_8 = arith.constant dense<0.000000e+00> : vector<8x158xf32>
    %38 = tpu.matmul %2, %37, %cst_8 {dimension_numbers = #tpu.dot_dimension_numbers<[1], [0], [0], [1], [0, 0, 1, 1], [], []>} : vector<8x72xbf16>, vector<72x158xbf16>, vector<8x158xf32> -> vector<8x158xf32>
    %39 = vector.broadcast %3 : vector<8x1xf32> to vector<8x158xf32>
    %40 = arith.addf %38, %39 : vector<8x158xf32>
    %41 = vector.extract_strided_slice %40 {offsets = [0, 0], sizes = [8, 8], strides = [1, 1]} : vector<8x158xf32> to vector<8x8xf32>
    %42 = vector.extract_strided_slice %40 {offsets = [0, 10], sizes = [8, 8], strides = [1, 1]} : vector<8x158xf32> to vector<8x8xf32>
    %43 = vector.extract_strided_slice %40 {offsets = [0, 20], sizes = [8, 8], strides = [1, 1]} : vector<8x158xf32> to vector<8x8xf32>
    %44 = vector.extract_strided_slice %40 {offsets = [0, 30], sizes = [8, 8], strides = [1, 1]} : vector<8x158xf32> to vector<8x8xf32>
    %45 = vector.extract_strided_slice %40 {offsets = [0, 40], sizes = [8, 8], strides = [1, 1]} : vector<8x158xf32> to vector<8x8xf32>
    %46 = vector.extract_strided_slice %40 {offsets = [0, 50], sizes = [8, 8], strides = [1, 1]} : vector<8x158xf32> to vector<8x8xf32>
    %47 = vector.extract_strided_slice %40 {offsets = [0, 60], sizes = [8, 8], strides = [1, 1]} : vector<8x158xf32> to vector<8x8xf32>
    %48 = vector.extract_strided_slice %40 {offsets = [0, 70], sizes = [8, 8], strides = [1, 1]} : vector<8x158xf32> to vector<8x8xf32>
    %49 = vector.extract_strided_slice %40 {offsets = [0, 80], sizes = [8, 8], strides = [1, 1]} : vector<8x158xf32> to vector<8x8xf32>
    %50 = vector.extract_strided_slice %40 {offsets = [0, 90], sizes = [8, 8], strides = [1, 1]} : vector<8x158xf32> to vector<8x8xf32>
    %51 = vector.extract_strided_slice %40 {offsets = [0, 100], sizes = [8, 8], strides = [1, 1]} : vector<8x158xf32> to vector<8x8xf32>
    %52 = vector.extract_strided_slice %40 {offsets = [0, 110], sizes = [8, 8], strides = [1, 1]} : vector<8x158xf32> to vector<8x8xf32>
    %53 = vector.extract_strided_slice %40 {offsets = [0, 120], sizes = [8, 8], strides = [1, 1]} : vector<8x158xf32> to vector<8x8xf32>
    %54 = vector.extract_strided_slice %40 {offsets = [0, 130], sizes = [8, 8], strides = [1, 1]} : vector<8x158xf32> to vector<8x8xf32>
    %55 = vector.extract_strided_slice %40 {offsets = [0, 140], sizes = [8, 8], strides = [1, 1]} : vector<8x158xf32> to vector<8x8xf32>
    %56 = vector.extract_strided_slice %40 {offsets = [0, 150], sizes = [8, 8], strides = [1, 1]} : vector<8x158xf32> to vector<8x8xf32>
    %57 = tpu.concatenate %41, %42, %43, %44, %45, %46, %47, %48, %49, %50, %51, %52, %53, %54, %55, %56 in 1 : vector<8x8xf32>, vector<8x8xf32>, vector<8x8xf32>, vector<8x8xf32>, vector<8x8xf32>, vector<8x8xf32>, vector<8x8xf32>, vector<8x8xf32>, vector<8x8xf32>, vector<8x8xf32>, vector<8x8xf32>, vector<8x8xf32>, vector<8x8xf32>, vector<8x8xf32>, vector<8x8xf32>, vector<8x8xf32> -> vector<8x128xf32>
    %cst_9 = arith.constant 0.000000e+00 : f32
    %58 = vector.broadcast %cst_9 : f32 to vector<8x128xf32>
    %59 = arith.maximumf %57, %58 : vector<8x128xf32>
    %60 = arith.truncf %59 : vector<8x128xf32> to vector<8x128xbf16>
    %c0_10 = arith.constant 0 : index
    %c0_11 = arith.constant 0 : index
    %c0_12 = arith.constant 0 : index
    %61 = vector.load %arg4[%c0_10, %c0_11, %c0_12] : memref<1x8x128xbf16, #tpu.memory_space<vmem>>, vector<1x8x128xbf16>
    %62 = vector.shape_cast %61 : vector<1x8x128xbf16> to vector<8x128xbf16>
    %63 = vector.shape_cast %60 : vector<8x128xbf16> to vector<1x8x128xbf16>
    tpu.vector_store %arg4[%c0_10, %c0_11, %c0_12], %63 {strides = array<i32>} : memref<1x8x128xbf16, #tpu.memory_space<vmem>>, vector<1x8x128xbf16>,
    return
  }
  func.func @transform_0(%arg0: i32) -> (i32, i32, i32) {
    %c0_i32 = arith.constant 0 : i32
    %c0_i32_0 = arith.constant 0 : i32
    %c0_i32_1 = arith.constant 0 : i32
    return %arg0, %c0_i32, %c0_i32_0 : i32, i32, i32
  }
  func.func @transform_1(%arg0: i32) -> (i32, i32) {
    %c0_i32 = arith.constant 0 : i32
    %c0_i32_0 = arith.constant 0 : i32
    %c0_i32_1 = arith.constant 0 : i32
    return %c0_i32, %c0_i32_0 : i32, i32
  }
  func.func @transform_2(%arg0: i32) -> (i32, i32) {
    %c0_i32 = arith.constant 0 : i32
    %c0_i32_0 = arith.constant 0 : i32
    %c0_i32_1 = arith.constant 0 : i32
    return %c0_i32, %c0_i32_0 : i32, i32
  }
  func.func @transform_3(%arg0: i32) -> (i32, i32, i32) {
    %c0_i32 = arith.constant 0 : i32
    %c0_i32_0 = arith.constant 0 : i32
    %c0_i32_1 = arith.constant 0 : i32
    return %arg0, %c0_i32, %c0_i32_0 : i32, i32, i32
  }
}

module attributes {stable_mosaic.version = 11 : i64} {
  func.func @_double_conv_kernel(%arg0: i32, %arg1: memref<1x8x32xbf16, #tpu.memory_space<vmem>>, %arg2: memref<16x72xbf16, #tpu.memory_space<vmem>>, %arg3: memref<16x1xf32, #tpu.memory_space<vmem>>, %arg4: memref<16x144xbf16, #tpu.memory_space<vmem>>, %arg5: memref<16x1xf32, #tpu.memory_space<vmem>>, %arg6: memref<16x8xbf16, #tpu.memory_space<vmem>>, %arg7: memref<16x1xf32, #tpu.memory_space<vmem>>, %arg8: memref<1x16x32xbf16, #tpu.memory_space<vmem>>) attributes {dimension_semantics = [#tpu.dimension_semantics<parallel>], iteration_bounds = array<i64: 2>, scalar_prefetch = 0 : i64, scratch_operands = 0 : i64, tpu.core_type = #tpu.core_type<tc>, window_params = [{transform_indices = @transform_0, window_bounds = array<i64: 1, 8, 32>}, {pipeline_mode = #tpu.pipeline_mode<synchronous>, transform_indices = @transform_1, window_bounds = array<i64: 16, 72>}, {pipeline_mode = #tpu.pipeline_mode<synchronous>, transform_indices = @transform_2, window_bounds = array<i64: 16, 1>}, {pipeline_mode = #tpu.pipeline_mode<synchronous>, transform_indices = @transform_3, window_bounds = array<i64: 16, 144>}, {pipeline_mode = #tpu.pipeline_mode<synchronous>, transform_indices = @transform_4, window_bounds = array<i64: 16, 1>}, {pipeline_mode = #tpu.pipeline_mode<synchronous>, transform_indices = @transform_5, window_bounds = array<i64: 16, 8>}, {pipeline_mode = #tpu.pipeline_mode<synchronous>, transform_indices = @transform_6, window_bounds = array<i64: 16, 1>}, {transform_indices = @transform_7, window_bounds = array<i64: 1, 16, 32>}]} {
    %c0 = arith.constant 0 : index
    %c0_0 = arith.constant 0 : index
    %c0_1 = arith.constant 0 : index
    %0 = vector.load %arg1[%c0, %c0_0, %c0_1] : memref<1x8x32xbf16, #tpu.memory_space<vmem>>, vector<1x8x32xbf16>
    %1 = vector.shape_cast %0 : vector<1x8x32xbf16> to vector<8x32xbf16>
    %c0_2 = arith.constant 0 : index
    %c0_3 = arith.constant 0 : index
    %2 = vector.load %arg2[%c0_2, %c0_3] : memref<16x72xbf16, #tpu.memory_space<vmem>>, vector<16x72xbf16>
    %c0_4 = arith.constant 0 : index
    %c0_5 = arith.constant 0 : index
    %3 = vector.load %arg3[%c0_4, %c0_5] : memref<16x1xf32, #tpu.memory_space<vmem>>, vector<16x1xf32>
    %cst = arith.constant 0.000000e+00 : bf16
    %4 = vector.broadcast %cst : bf16 to vector<8x6xbf16>
    %cst_6 = arith.constant 0.000000e+00 : bf16
    %5 = vector.broadcast %cst_6 : bf16 to vector<8x1xbf16>
    %6 = vector.extract_strided_slice %1 {offsets = [0, 0], sizes = [8, 4], strides = [1, 1]} : vector<8x32xbf16> to vector<8x4xbf16>
    %7 = vector.extract_strided_slice %1 {offsets = [0, 4], sizes = [8, 4], strides = [1, 1]} : vector<8x32xbf16> to vector<8x4xbf16>
    %8 = vector.extract_strided_slice %1 {offsets = [0, 8], sizes = [8, 4], strides = [1, 1]} : vector<8x32xbf16> to vector<8x4xbf16>
    %9 = vector.extract_strided_slice %1 {offsets = [0, 12], sizes = [8, 4], strides = [1, 1]} : vector<8x32xbf16> to vector<8x4xbf16>
    %10 = vector.extract_strided_slice %1 {offsets = [0, 16], sizes = [8, 4], strides = [1, 1]} : vector<8x32xbf16> to vector<8x4xbf16>
    %11 = vector.extract_strided_slice %1 {offsets = [0, 20], sizes = [8, 4], strides = [1, 1]} : vector<8x32xbf16> to vector<8x4xbf16>
    %12 = vector.extract_strided_slice %1 {offsets = [0, 24], sizes = [8, 4], strides = [1, 1]} : vector<8x32xbf16> to vector<8x4xbf16>
    %13 = vector.extract_strided_slice %1 {offsets = [0, 28], sizes = [8, 4], strides = [1, 1]} : vector<8x32xbf16> to vector<8x4xbf16>
    %cst_7 = arith.constant 0.000000e+00 : bf16
    %14 = vector.broadcast %cst_7 : bf16 to vector<8x6xbf16>
    %15 = tpu.concatenate %4, %5, %6, %5, %5, %7, %5, %5, %8, %5, %5, %9, %5, %5, %10, %5 in 1 : vector<8x6xbf16>, vector<8x1xbf16>, vector<8x4xbf16>, vector<8x1xbf16>, vector<8x1xbf16>, vector<8x4xbf16>, vector<8x1xbf16>, vector<8x1xbf16>, vector<8x4xbf16>, vector<8x1xbf16>, vector<8x1xbf16>, vector<8x4xbf16>, vector<8x1xbf16>, vector<8x1xbf16>, vector<8x4xbf16>, vector<8x1xbf16> -> vector<8x36xbf16>
    %16 = tpu.concatenate %5, %11, %5, %5, %12, %5, %5, %13, %5, %14 in 1 : vector<8x1xbf16>, vector<8x4xbf16>, vector<8x1xbf16>, vector<8x1xbf16>, vector<8x4xbf16>, vector<8x1xbf16>, vector<8x1xbf16>, vector<8x4xbf16>, vector<8x1xbf16>, vector<8x6xbf16> -> vector<8x24xbf16>
    %17 = tpu.concatenate %15, %16 in 1 : vector<8x36xbf16>, vector<8x24xbf16> -> vector<8x60xbf16>
    %18 = vector.extract_strided_slice %17 {offsets = [0, 0], sizes = [8, 46], strides = [1, 1]} : vector<8x60xbf16> to vector<8x46xbf16>
    %19 = vector.extract_strided_slice %17 {offsets = [0, 1], sizes = [8, 46], strides = [1, 1]} : vector<8x60xbf16> to vector<8x46xbf16>
    %20 = vector.extract_strided_slice %17 {offsets = [0, 2], sizes = [8, 46], strides = [1, 1]} : vector<8x60xbf16> to vector<8x46xbf16>
    %21 = vector.extract_strided_slice %17 {offsets = [0, 6], sizes = [8, 46], strides = [1, 1]} : vector<8x60xbf16> to vector<8x46xbf16>
    %22 = vector.extract_strided_slice %17 {offsets = [0, 7], sizes = [8, 46], strides = [1, 1]} : vector<8x60xbf16> to vector<8x46xbf16>
    %23 = vector.extract_strided_slice %17 {offsets = [0, 8], sizes = [8, 46], strides = [1, 1]} : vector<8x60xbf16> to vector<8x46xbf16>
    %24 = vector.extract_strided_slice %17 {offsets = [0, 12], sizes = [8, 46], strides = [1, 1]} : vector<8x60xbf16> to vector<8x46xbf16>
    %25 = vector.extract_strided_slice %17 {offsets = [0, 13], sizes = [8, 46], strides = [1, 1]} : vector<8x60xbf16> to vector<8x46xbf16>
    %26 = vector.extract_strided_slice %17 {offsets = [0, 14], sizes = [8, 46], strides = [1, 1]} : vector<8x60xbf16> to vector<8x46xbf16>
    %27 = tpu.concatenate %18, %19, %20, %21, %22, %23, %24, %25, %26 in 0 : vector<8x46xbf16>, vector<8x46xbf16>, vector<8x46xbf16>, vector<8x46xbf16>, vector<8x46xbf16>, vector<8x46xbf16>, vector<8x46xbf16>, vector<8x46xbf16>, vector<8x46xbf16> -> vector<72x46xbf16>
    %cst_8 = arith.constant dense<0.000000e+00> : vector<16x46xf32>
    %28 = tpu.matmul %2, %27, %cst_8 {dimension_numbers = #tpu.dot_dimension_numbers<[1], [0], [0], [1], [0, 0, 1, 1], [], []>} : vector<16x72xbf16>, vector<72x46xbf16>, vector<16x46xf32> -> vector<16x46xf32>
    %29 = vector.broadcast %3 : vector<16x1xf32> to vector<16x46xf32>
    %30 = arith.addf %28, %29 : vector<16x46xf32>
    %31 = vector.extract_strided_slice %30 {offsets = [0, 0], sizes = [16, 4], strides = [1, 1]} : vector<16x46xf32> to vector<16x4xf32>
    %32 = vector.extract_strided_slice %30 {offsets = [0, 6], sizes = [16, 4], strides = [1, 1]} : vector<16x46xf32> to vector<16x4xf32>
    %33 = vector.extract_strided_slice %30 {offsets = [0, 12], sizes = [16, 4], strides = [1, 1]} : vector<16x46xf32> to vector<16x4xf32>
    %34 = vector.extract_strided_slice %30 {offsets = [0, 18], sizes = [16, 4], strides = [1, 1]} : vector<16x46xf32> to vector<16x4xf32>
    %35 = vector.extract_strided_slice %30 {offsets = [0, 24], sizes = [16, 4], strides = [1, 1]} : vector<16x46xf32> to vector<16x4xf32>
    %36 = vector.extract_strided_slice %30 {offsets = [0, 30], sizes = [16, 4], strides = [1, 1]} : vector<16x46xf32> to vector<16x4xf32>
    %37 = vector.extract_strided_slice %30 {offsets = [0, 36], sizes = [16, 4], strides = [1, 1]} : vector<16x46xf32> to vector<16x4xf32>
    %38 = vector.extract_strided_slice %30 {offsets = [0, 42], sizes = [16, 4], strides = [1, 1]} : vector<16x46xf32> to vector<16x4xf32>
    %39 = tpu.concatenate %31, %32, %33, %34, %35, %36, %37, %38 in 1 : vector<16x4xf32>, vector<16x4xf32>, vector<16x4xf32>, vector<16x4xf32>, vector<16x4xf32>, vector<16x4xf32>, vector<16x4xf32>, vector<16x4xf32> -> vector<16x32xf32>
    %cst_9 = arith.constant 0.000000e+00 : f32
    %40 = vector.broadcast %cst_9 : f32 to vector<16x32xf32>
    %41 = arith.maximumf %39, %40 : vector<16x32xf32>
    %42 = arith.truncf %41 : vector<16x32xf32> to vector<16x32xbf16>
    %c0_10 = arith.constant 0 : index
    %c0_11 = arith.constant 0 : index
    %43 = vector.load %arg4[%c0_10, %c0_11] : memref<16x144xbf16, #tpu.memory_space<vmem>>, vector<16x144xbf16>
    %c0_12 = arith.constant 0 : index
    %c0_13 = arith.constant 0 : index
    %44 = vector.load %arg5[%c0_12, %c0_13] : memref<16x1xf32, #tpu.memory_space<vmem>>, vector<16x1xf32>
    %cst_14 = arith.constant 0.000000e+00 : bf16
    %45 = vector.broadcast %cst_14 : bf16 to vector<16x6xbf16>
    %cst_15 = arith.constant 0.000000e+00 : bf16
    %46 = vector.broadcast %cst_15 : bf16 to vector<16x1xbf16>
    %47 = vector.extract_strided_slice %42 {offsets = [0, 0], sizes = [16, 4], strides = [1, 1]} : vector<16x32xbf16> to vector<16x4xbf16>
    %48 = vector.extract_strided_slice %42 {offsets = [0, 4], sizes = [16, 4], strides = [1, 1]} : vector<16x32xbf16> to vector<16x4xbf16>
    %49 = vector.extract_strided_slice %42 {offsets = [0, 8], sizes = [16, 4], strides = [1, 1]} : vector<16x32xbf16> to vector<16x4xbf16>
    %50 = vector.extract_strided_slice %42 {offsets = [0, 12], sizes = [16, 4], strides = [1, 1]} : vector<16x32xbf16> to vector<16x4xbf16>
    %51 = vector.extract_strided_slice %42 {offsets = [0, 16], sizes = [16, 4], strides = [1, 1]} : vector<16x32xbf16> to vector<16x4xbf16>
    %52 = vector.extract_strided_slice %42 {offsets = [0, 20], sizes = [16, 4], strides = [1, 1]} : vector<16x32xbf16> to vector<16x4xbf16>
    %53 = vector.extract_strided_slice %42 {offsets = [0, 24], sizes = [16, 4], strides = [1, 1]} : vector<16x32xbf16> to vector<16x4xbf16>
    %54 = vector.extract_strided_slice %42 {offsets = [0, 28], sizes = [16, 4], strides = [1, 1]} : vector<16x32xbf16> to vector<16x4xbf16>
    %cst_16 = arith.constant 0.000000e+00 : bf16
    %55 = vector.broadcast %cst_16 : bf16 to vector<16x6xbf16>
    %56 = tpu.concatenate %45, %46, %47, %46, %46, %48, %46, %46, %49, %46, %46, %50, %46, %46, %51, %46 in 1 : vector<16x6xbf16>, vector<16x1xbf16>, vector<16x4xbf16>, vector<16x1xbf16>, vector<16x1xbf16>, vector<16x4xbf16>, vector<16x1xbf16>, vector<16x1xbf16>, vector<16x4xbf16>, vector<16x1xbf16>, vector<16x1xbf16>, vector<16x4xbf16>, vector<16x1xbf16>, vector<16x1xbf16>, vector<16x4xbf16>, vector<16x1xbf16> -> vector<16x36xbf16>
    %57 = tpu.concatenate %46, %52, %46, %46, %53, %46, %46, %54, %46, %55 in 1 : vector<16x1xbf16>, vector<16x4xbf16>, vector<16x1xbf16>, vector<16x1xbf16>, vector<16x4xbf16>, vector<16x1xbf16>, vector<16x1xbf16>, vector<16x4xbf16>, vector<16x1xbf16>, vector<16x6xbf16> -> vector<16x24xbf16>
    %58 = tpu.concatenate %56, %57 in 1 : vector<16x36xbf16>, vector<16x24xbf16> -> vector<16x60xbf16>
    %59 = vector.extract_strided_slice %58 {offsets = [0, 0], sizes = [16, 46], strides = [1, 1]} : vector<16x60xbf16> to vector<16x46xbf16>
    %60 = vector.extract_strided_slice %58 {offsets = [0, 1], sizes = [16, 46], strides = [1, 1]} : vector<16x60xbf16> to vector<16x46xbf16>
    %61 = vector.extract_strided_slice %58 {offsets = [0, 2], sizes = [16, 46], strides = [1, 1]} : vector<16x60xbf16> to vector<16x46xbf16>
    %62 = vector.extract_strided_slice %58 {offsets = [0, 6], sizes = [16, 46], strides = [1, 1]} : vector<16x60xbf16> to vector<16x46xbf16>
    %63 = vector.extract_strided_slice %58 {offsets = [0, 7], sizes = [16, 46], strides = [1, 1]} : vector<16x60xbf16> to vector<16x46xbf16>
    %64 = vector.extract_strided_slice %58 {offsets = [0, 8], sizes = [16, 46], strides = [1, 1]} : vector<16x60xbf16> to vector<16x46xbf16>
    %65 = vector.extract_strided_slice %58 {offsets = [0, 12], sizes = [16, 46], strides = [1, 1]} : vector<16x60xbf16> to vector<16x46xbf16>
    %66 = vector.extract_strided_slice %58 {offsets = [0, 13], sizes = [16, 46], strides = [1, 1]} : vector<16x60xbf16> to vector<16x46xbf16>
    %67 = vector.extract_strided_slice %58 {offsets = [0, 14], sizes = [16, 46], strides = [1, 1]} : vector<16x60xbf16> to vector<16x46xbf16>
    %68 = tpu.concatenate %59, %60, %61, %62, %63, %64, %65, %66, %67 in 0 : vector<16x46xbf16>, vector<16x46xbf16>, vector<16x46xbf16>, vector<16x46xbf16>, vector<16x46xbf16>, vector<16x46xbf16>, vector<16x46xbf16>, vector<16x46xbf16>, vector<16x46xbf16> -> vector<144x46xbf16>
    %cst_17 = arith.constant dense<0.000000e+00> : vector<16x46xf32>
    %69 = tpu.matmul %43, %68, %cst_17 {dimension_numbers = #tpu.dot_dimension_numbers<[1], [0], [0], [1], [0, 0, 1, 1], [], []>} : vector<16x144xbf16>, vector<144x46xbf16>, vector<16x46xf32> -> vector<16x46xf32>
    %70 = vector.broadcast %44 : vector<16x1xf32> to vector<16x46xf32>
    %71 = arith.addf %69, %70 : vector<16x46xf32>
    %72 = vector.extract_strided_slice %71 {offsets = [0, 0], sizes = [16, 4], strides = [1, 1]} : vector<16x46xf32> to vector<16x4xf32>
    %73 = vector.extract_strided_slice %71 {offsets = [0, 6], sizes = [16, 4], strides = [1, 1]} : vector<16x46xf32> to vector<16x4xf32>
    %74 = vector.extract_strided_slice %71 {offsets = [0, 12], sizes = [16, 4], strides = [1, 1]} : vector<16x46xf32> to vector<16x4xf32>
    %75 = vector.extract_strided_slice %71 {offsets = [0, 18], sizes = [16, 4], strides = [1, 1]} : vector<16x46xf32> to vector<16x4xf32>
    %76 = vector.extract_strided_slice %71 {offsets = [0, 24], sizes = [16, 4], strides = [1, 1]} : vector<16x46xf32> to vector<16x4xf32>
    %77 = vector.extract_strided_slice %71 {offsets = [0, 30], sizes = [16, 4], strides = [1, 1]} : vector<16x46xf32> to vector<16x4xf32>
    %78 = vector.extract_strided_slice %71 {offsets = [0, 36], sizes = [16, 4], strides = [1, 1]} : vector<16x46xf32> to vector<16x4xf32>
    %79 = vector.extract_strided_slice %71 {offsets = [0, 42], sizes = [16, 4], strides = [1, 1]} : vector<16x46xf32> to vector<16x4xf32>
    %80 = tpu.concatenate %72, %73, %74, %75, %76, %77, %78, %79 in 1 : vector<16x4xf32>, vector<16x4xf32>, vector<16x4xf32>, vector<16x4xf32>, vector<16x4xf32>, vector<16x4xf32>, vector<16x4xf32>, vector<16x4xf32> -> vector<16x32xf32>
    %c0_18 = arith.constant 0 : index
    %c0_19 = arith.constant 0 : index
    %81 = vector.load %arg6[%c0_18, %c0_19] : memref<16x8xbf16, #tpu.memory_space<vmem>>, vector<16x8xbf16>
    %c0_20 = arith.constant 0 : index
    %c0_21 = arith.constant 0 : index
    %82 = vector.load %arg7[%c0_20, %c0_21] : memref<16x1xf32, #tpu.memory_space<vmem>>, vector<16x1xf32>
    %cst_22 = arith.constant dense<0.000000e+00> : vector<16x32xf32>
    %83 = tpu.matmul %81, %1, %cst_22 {dimension_numbers = #tpu.dot_dimension_numbers<[1], [0], [0], [1], [0, 0, 1, 1], [], []>} : vector<16x8xbf16>, vector<8x32xbf16>, vector<16x32xf32> -> vector<16x32xf32>
    %84 = vector.broadcast %82 : vector<16x1xf32> to vector<16x32xf32>
    %85 = arith.addf %83, %84 : vector<16x32xf32>
    %86 = arith.addf %80, %85 : vector<16x32xf32>
    %cst_23 = arith.constant 0.000000e+00 : f32
    %87 = vector.broadcast %cst_23 : f32 to vector<16x32xf32>
    %88 = arith.maximumf %86, %87 : vector<16x32xf32>
    %89 = arith.truncf %88 : vector<16x32xf32> to vector<16x32xbf16>
    %c0_24 = arith.constant 0 : index
    %c0_25 = arith.constant 0 : index
    %c0_26 = arith.constant 0 : index
    %90 = vector.load %arg8[%c0_24, %c0_25, %c0_26] : memref<1x16x32xbf16, #tpu.memory_space<vmem>>, vector<1x16x32xbf16>
    %91 = vector.shape_cast %90 : vector<1x16x32xbf16> to vector<16x32xbf16>
    %92 = vector.shape_cast %89 : vector<16x32xbf16> to vector<1x16x32xbf16>
    tpu.vector_store %arg8[%c0_24, %c0_25, %c0_26], %92 {strides = array<i32>} : memref<1x16x32xbf16, #tpu.memory_space<vmem>>, vector<1x16x32xbf16>,
    return
  }
  func.func @transform_0(%arg0: i32) -> (i32, i32, i32) {
    %c0_i32 = arith.constant 0 : i32
    %c0_i32_0 = arith.constant 0 : i32
    %c0_i32_1 = arith.constant 0 : i32
    return %arg0, %c0_i32, %c0_i32_0 : i32, i32, i32
  }
  func.func @transform_1(%arg0: i32) -> (i32, i32) {
    %c0_i32 = arith.constant 0 : i32
    %c0_i32_0 = arith.constant 0 : i32
    %c0_i32_1 = arith.constant 0 : i32
    return %c0_i32, %c0_i32_0 : i32, i32
  }
  func.func @transform_2(%arg0: i32) -> (i32, i32) {
    %c0_i32 = arith.constant 0 : i32
    %c0_i32_0 = arith.constant 0 : i32
    %c0_i32_1 = arith.constant 0 : i32
    return %c0_i32, %c0_i32_0 : i32, i32
  }
  func.func @transform_3(%arg0: i32) -> (i32, i32) {
    %c0_i32 = arith.constant 0 : i32
    %c0_i32_0 = arith.constant 0 : i32
    %c0_i32_1 = arith.constant 0 : i32
    return %c0_i32, %c0_i32_0 : i32, i32
  }
  func.func @transform_4(%arg0: i32) -> (i32, i32) {
    %c0_i32 = arith.constant 0 : i32
    %c0_i32_0 = arith.constant 0 : i32
    %c0_i32_1 = arith.constant 0 : i32
    return %c0_i32, %c0_i32_0 : i32, i32
  }
  func.func @transform_5(%arg0: i32) -> (i32, i32) {
    %c0_i32 = arith.constant 0 : i32
    %c0_i32_0 = arith.constant 0 : i32
    %c0_i32_1 = arith.constant 0 : i32
    return %c0_i32, %c0_i32_0 : i32, i32
  }
  func.func @transform_6(%arg0: i32) -> (i32, i32) {
    %c0_i32 = arith.constant 0 : i32
    %c0_i32_0 = arith.constant 0 : i32
    %c0_i32_1 = arith.constant 0 : i32
    return %c0_i32, %c0_i32_0 : i32, i32
  }
  func.func @transform_7(%arg0: i32) -> (i32, i32, i32) {
    %c0_i32 = arith.constant 0 : i32
    %c0_i32_0 = arith.constant 0 : i32
    %c0_i32_1 = arith.constant 0 : i32
    return %arg0, %c0_i32, %c0_i32_0 : i32, i32, i32
  }
}

module attributes {stable_mosaic.version = 11 : i64} {
  func.func @_conv_kernel(%arg0: i32, %arg1: memref<1x16x32xbf16, #tpu.memory_space<vmem>>, %arg2: memref<16x144xbf16, #tpu.memory_space<vmem>>, %arg3: memref<16x1xf32, #tpu.memory_space<vmem>>, %arg4: memref<1x16x32xbf16, #tpu.memory_space<vmem>>) attributes {dimension_semantics = [#tpu.dimension_semantics<parallel>], iteration_bounds = array<i64: 2>, scalar_prefetch = 0 : i64, scratch_operands = 0 : i64, tpu.core_type = #tpu.core_type<tc>, window_params = [{transform_indices = @transform_0, window_bounds = array<i64: 1, 16, 32>}, {pipeline_mode = #tpu.pipeline_mode<synchronous>, transform_indices = @transform_1, window_bounds = array<i64: 16, 144>}, {pipeline_mode = #tpu.pipeline_mode<synchronous>, transform_indices = @transform_2, window_bounds = array<i64: 16, 1>}, {transform_indices = @transform_3, window_bounds = array<i64: 1, 16, 32>}]} {
    %c0 = arith.constant 0 : index
    %c0_0 = arith.constant 0 : index
    %c0_1 = arith.constant 0 : index
    %0 = vector.load %arg1[%c0, %c0_0, %c0_1] : memref<1x16x32xbf16, #tpu.memory_space<vmem>>, vector<1x16x32xbf16>
    %1 = vector.shape_cast %0 : vector<1x16x32xbf16> to vector<16x32xbf16>
    %c0_2 = arith.constant 0 : index
    %c0_3 = arith.constant 0 : index
    %2 = vector.load %arg2[%c0_2, %c0_3] : memref<16x144xbf16, #tpu.memory_space<vmem>>, vector<16x144xbf16>
    %c0_4 = arith.constant 0 : index
    %c0_5 = arith.constant 0 : index
    %3 = vector.load %arg3[%c0_4, %c0_5] : memref<16x1xf32, #tpu.memory_space<vmem>>, vector<16x1xf32>
    %cst = arith.constant 0.000000e+00 : bf16
    %4 = vector.broadcast %cst : bf16 to vector<16x6xbf16>
    %cst_6 = arith.constant 0.000000e+00 : bf16
    %5 = vector.broadcast %cst_6 : bf16 to vector<16x1xbf16>
    %6 = vector.extract_strided_slice %1 {offsets = [0, 0], sizes = [16, 4], strides = [1, 1]} : vector<16x32xbf16> to vector<16x4xbf16>
    %7 = vector.extract_strided_slice %1 {offsets = [0, 4], sizes = [16, 4], strides = [1, 1]} : vector<16x32xbf16> to vector<16x4xbf16>
    %8 = vector.extract_strided_slice %1 {offsets = [0, 8], sizes = [16, 4], strides = [1, 1]} : vector<16x32xbf16> to vector<16x4xbf16>
    %9 = vector.extract_strided_slice %1 {offsets = [0, 12], sizes = [16, 4], strides = [1, 1]} : vector<16x32xbf16> to vector<16x4xbf16>
    %10 = vector.extract_strided_slice %1 {offsets = [0, 16], sizes = [16, 4], strides = [1, 1]} : vector<16x32xbf16> to vector<16x4xbf16>
    %11 = vector.extract_strided_slice %1 {offsets = [0, 20], sizes = [16, 4], strides = [1, 1]} : vector<16x32xbf16> to vector<16x4xbf16>
    %12 = vector.extract_strided_slice %1 {offsets = [0, 24], sizes = [16, 4], strides = [1, 1]} : vector<16x32xbf16> to vector<16x4xbf16>
    %13 = vector.extract_strided_slice %1 {offsets = [0, 28], sizes = [16, 4], strides = [1, 1]} : vector<16x32xbf16> to vector<16x4xbf16>
    %cst_7 = arith.constant 0.000000e+00 : bf16
    %14 = vector.broadcast %cst_7 : bf16 to vector<16x6xbf16>
    %15 = tpu.concatenate %4, %5, %6, %5, %5, %7, %5, %5, %8, %5, %5, %9, %5, %5, %10, %5 in 1 : vector<16x6xbf16>, vector<16x1xbf16>, vector<16x4xbf16>, vector<16x1xbf16>, vector<16x1xbf16>, vector<16x4xbf16>, vector<16x1xbf16>, vector<16x1xbf16>, vector<16x4xbf16>, vector<16x1xbf16>, vector<16x1xbf16>, vector<16x4xbf16>, vector<16x1xbf16>, vector<16x1xbf16>, vector<16x4xbf16>, vector<16x1xbf16> -> vector<16x36xbf16>
    %16 = tpu.concatenate %5, %11, %5, %5, %12, %5, %5, %13, %5, %14 in 1 : vector<16x1xbf16>, vector<16x4xbf16>, vector<16x1xbf16>, vector<16x1xbf16>, vector<16x4xbf16>, vector<16x1xbf16>, vector<16x1xbf16>, vector<16x4xbf16>, vector<16x1xbf16>, vector<16x6xbf16> -> vector<16x24xbf16>
    %17 = tpu.concatenate %15, %16 in 1 : vector<16x36xbf16>, vector<16x24xbf16> -> vector<16x60xbf16>
    %18 = vector.extract_strided_slice %17 {offsets = [0, 0], sizes = [16, 46], strides = [1, 1]} : vector<16x60xbf16> to vector<16x46xbf16>
    %19 = vector.extract_strided_slice %17 {offsets = [0, 1], sizes = [16, 46], strides = [1, 1]} : vector<16x60xbf16> to vector<16x46xbf16>
    %20 = vector.extract_strided_slice %17 {offsets = [0, 2], sizes = [16, 46], strides = [1, 1]} : vector<16x60xbf16> to vector<16x46xbf16>
    %21 = vector.extract_strided_slice %17 {offsets = [0, 6], sizes = [16, 46], strides = [1, 1]} : vector<16x60xbf16> to vector<16x46xbf16>
    %22 = vector.extract_strided_slice %17 {offsets = [0, 7], sizes = [16, 46], strides = [1, 1]} : vector<16x60xbf16> to vector<16x46xbf16>
    %23 = vector.extract_strided_slice %17 {offsets = [0, 8], sizes = [16, 46], strides = [1, 1]} : vector<16x60xbf16> to vector<16x46xbf16>
    %24 = vector.extract_strided_slice %17 {offsets = [0, 12], sizes = [16, 46], strides = [1, 1]} : vector<16x60xbf16> to vector<16x46xbf16>
    %25 = vector.extract_strided_slice %17 {offsets = [0, 13], sizes = [16, 46], strides = [1, 1]} : vector<16x60xbf16> to vector<16x46xbf16>
    %26 = vector.extract_strided_slice %17 {offsets = [0, 14], sizes = [16, 46], strides = [1, 1]} : vector<16x60xbf16> to vector<16x46xbf16>
    %27 = tpu.concatenate %18, %19, %20, %21, %22, %23, %24, %25, %26 in 0 : vector<16x46xbf16>, vector<16x46xbf16>, vector<16x46xbf16>, vector<16x46xbf16>, vector<16x46xbf16>, vector<16x46xbf16>, vector<16x46xbf16>, vector<16x46xbf16>, vector<16x46xbf16> -> vector<144x46xbf16>
    %cst_8 = arith.constant dense<0.000000e+00> : vector<16x46xf32>
    %28 = tpu.matmul %2, %27, %cst_8 {dimension_numbers = #tpu.dot_dimension_numbers<[1], [0], [0], [1], [0, 0, 1, 1], [], []>} : vector<16x144xbf16>, vector<144x46xbf16>, vector<16x46xf32> -> vector<16x46xf32>
    %29 = vector.broadcast %3 : vector<16x1xf32> to vector<16x46xf32>
    %30 = arith.addf %28, %29 : vector<16x46xf32>
    %31 = vector.extract_strided_slice %30 {offsets = [0, 0], sizes = [16, 4], strides = [1, 1]} : vector<16x46xf32> to vector<16x4xf32>
    %32 = vector.extract_strided_slice %30 {offsets = [0, 6], sizes = [16, 4], strides = [1, 1]} : vector<16x46xf32> to vector<16x4xf32>
    %33 = vector.extract_strided_slice %30 {offsets = [0, 12], sizes = [16, 4], strides = [1, 1]} : vector<16x46xf32> to vector<16x4xf32>
    %34 = vector.extract_strided_slice %30 {offsets = [0, 18], sizes = [16, 4], strides = [1, 1]} : vector<16x46xf32> to vector<16x4xf32>
    %35 = vector.extract_strided_slice %30 {offsets = [0, 24], sizes = [16, 4], strides = [1, 1]} : vector<16x46xf32> to vector<16x4xf32>
    %36 = vector.extract_strided_slice %30 {offsets = [0, 30], sizes = [16, 4], strides = [1, 1]} : vector<16x46xf32> to vector<16x4xf32>
    %37 = vector.extract_strided_slice %30 {offsets = [0, 36], sizes = [16, 4], strides = [1, 1]} : vector<16x46xf32> to vector<16x4xf32>
    %38 = vector.extract_strided_slice %30 {offsets = [0, 42], sizes = [16, 4], strides = [1, 1]} : vector<16x46xf32> to vector<16x4xf32>
    %39 = tpu.concatenate %31, %32, %33, %34, %35, %36, %37, %38 in 1 : vector<16x4xf32>, vector<16x4xf32>, vector<16x4xf32>, vector<16x4xf32>, vector<16x4xf32>, vector<16x4xf32>, vector<16x4xf32>, vector<16x4xf32> -> vector<16x32xf32>
    %cst_9 = arith.constant 0.000000e+00 : f32
    %40 = vector.broadcast %cst_9 : f32 to vector<16x32xf32>
    %41 = arith.maximumf %39, %40 : vector<16x32xf32>
    %42 = arith.truncf %41 : vector<16x32xf32> to vector<16x32xbf16>
    %c0_10 = arith.constant 0 : index
    %c0_11 = arith.constant 0 : index
    %c0_12 = arith.constant 0 : index
    %43 = vector.load %arg4[%c0_10, %c0_11, %c0_12] : memref<1x16x32xbf16, #tpu.memory_space<vmem>>, vector<1x16x32xbf16>
    %44 = vector.shape_cast %43 : vector<1x16x32xbf16> to vector<16x32xbf16>
    %45 = vector.shape_cast %42 : vector<16x32xbf16> to vector<1x16x32xbf16>
    tpu.vector_store %arg4[%c0_10, %c0_11, %c0_12], %45 {strides = array<i32>} : memref<1x16x32xbf16, #tpu.memory_space<vmem>>, vector<1x16x32xbf16>,
    return
  }
  func.func @transform_0(%arg0: i32) -> (i32, i32, i32) {
    %c0_i32 = arith.constant 0 : i32
    %c0_i32_0 = arith.constant 0 : i32
    %c0_i32_1 = arith.constant 0 : i32
    return %arg0, %c0_i32, %c0_i32_0 : i32, i32, i32
  }
  func.func @transform_1(%arg0: i32) -> (i32, i32) {
    %c0_i32 = arith.constant 0 : i32
    %c0_i32_0 = arith.constant 0 : i32
    %c0_i32_1 = arith.constant 0 : i32
    return %c0_i32, %c0_i32_0 : i32, i32
  }
  func.func @transform_2(%arg0: i32) -> (i32, i32) {
    %c0_i32 = arith.constant 0 : i32
    %c0_i32_0 = arith.constant 0 : i32
    %c0_i32_1 = arith.constant 0 : i32
    return %c0_i32, %c0_i32_0 : i32, i32
  }
  func.func @transform_3(%arg0: i32) -> (i32, i32, i32) {
    %c0_i32 = arith.constant 0 : i32
    %c0_i32_0 = arith.constant 0 : i32
    %c0_i32_1 = arith.constant 0 : i32
    return %arg0, %c0_i32, %c0_i32_0 : i32, i32, i32
  }
}

module attributes {stable_mosaic.version = 11 : i64} {
  func.func @_double_conv_kernel(%arg0: i32, %arg1: memref<1x16x20xbf16, #tpu.memory_space<vmem>>, %arg2: memref<32x144xbf16, #tpu.memory_space<vmem>>, %arg3: memref<32x1xf32, #tpu.memory_space<vmem>>, %arg4: memref<32x288xbf16, #tpu.memory_space<vmem>>, %arg5: memref<32x1xf32, #tpu.memory_space<vmem>>, %arg6: memref<32x16xbf16, #tpu.memory_space<vmem>>, %arg7: memref<32x1xf32, #tpu.memory_space<vmem>>, %arg8: memref<1x32x20xbf16, #tpu.memory_space<vmem>>) attributes {dimension_semantics = [#tpu.dimension_semantics<parallel>], iteration_bounds = array<i64: 2>, scalar_prefetch = 0 : i64, scratch_operands = 0 : i64, tpu.core_type = #tpu.core_type<tc>, window_params = [{transform_indices = @transform_0, window_bounds = array<i64: 1, 16, 20>}, {pipeline_mode = #tpu.pipeline_mode<synchronous>, transform_indices = @transform_1, window_bounds = array<i64: 32, 144>}, {pipeline_mode = #tpu.pipeline_mode<synchronous>, transform_indices = @transform_2, window_bounds = array<i64: 32, 1>}, {pipeline_mode = #tpu.pipeline_mode<synchronous>, transform_indices = @transform_3, window_bounds = array<i64: 32, 288>}, {pipeline_mode = #tpu.pipeline_mode<synchronous>, transform_indices = @transform_4, window_bounds = array<i64: 32, 1>}, {pipeline_mode = #tpu.pipeline_mode<synchronous>, transform_indices = @transform_5, window_bounds = array<i64: 32, 16>}, {pipeline_mode = #tpu.pipeline_mode<synchronous>, transform_indices = @transform_6, window_bounds = array<i64: 32, 1>}, {transform_indices = @transform_7, window_bounds = array<i64: 1, 32, 20>}]} {
    %c0 = arith.constant 0 : index
    %c0_0 = arith.constant 0 : index
    %c0_1 = arith.constant 0 : index
    %0 = vector.load %arg1[%c0, %c0_0, %c0_1] : memref<1x16x20xbf16, #tpu.memory_space<vmem>>, vector<1x16x20xbf16>
    %1 = vector.shape_cast %0 : vector<1x16x20xbf16> to vector<16x20xbf16>
    %c0_2 = arith.constant 0 : index
    %c0_3 = arith.constant 0 : index
    %2 = vector.load %arg2[%c0_2, %c0_3] : memref<32x144xbf16, #tpu.memory_space<vmem>>, vector<32x144xbf16>
    %c0_4 = arith.constant 0 : index
    %c0_5 = arith.constant 0 : index
    %3 = vector.load %arg3[%c0_4, %c0_5] : memref<32x1xf32, #tpu.memory_space<vmem>>, vector<32x1xf32>
    %cst = arith.constant 0.000000e+00 : bf16
    %4 = vector.broadcast %cst : bf16 to vector<16x7xbf16>
    %cst_6 = arith.constant 0.000000e+00 : bf16
    %5 = vector.broadcast %cst_6 : bf16 to vector<16x1xbf16>
    %6 = vector.extract_strided_slice %1 {offsets = [0, 0], sizes = [16, 5], strides = [1, 1]} : vector<16x20xbf16> to vector<16x5xbf16>
    %7 = vector.extract_strided_slice %1 {offsets = [0, 5], sizes = [16, 5], strides = [1, 1]} : vector<16x20xbf16> to vector<16x5xbf16>
    %8 = vector.extract_strided_slice %1 {offsets = [0, 10], sizes = [16, 5], strides = [1, 1]} : vector<16x20xbf16> to vector<16x5xbf16>
    %9 = vector.extract_strided_slice %1 {offsets = [0, 15], sizes = [16, 5], strides = [1, 1]} : vector<16x20xbf16> to vector<16x5xbf16>
    %cst_7 = arith.constant 0.000000e+00 : bf16
    %10 = vector.broadcast %cst_7 : bf16 to vector<16x7xbf16>
    %11 = tpu.concatenate %4, %5, %6, %5, %5, %7, %5, %5, %8, %5, %5, %9, %5, %10 in 1 : vector<16x7xbf16>, vector<16x1xbf16>, vector<16x5xbf16>, vector<16x1xbf16>, vector<16x1xbf16>, vector<16x5xbf16>, vector<16x1xbf16>, vector<16x1xbf16>, vector<16x5xbf16>, vector<16x1xbf16>, vector<16x1xbf16>, vector<16x5xbf16>, vector<16x1xbf16>, vector<16x7xbf16> -> vector<16x42xbf16>
    %12 = vector.extract_strided_slice %11 {offsets = [0, 0], sizes = [16, 26], strides = [1, 1]} : vector<16x42xbf16> to vector<16x26xbf16>
    %13 = vector.extract_strided_slice %11 {offsets = [0, 1], sizes = [16, 26], strides = [1, 1]} : vector<16x42xbf16> to vector<16x26xbf16>
    %14 = vector.extract_strided_slice %11 {offsets = [0, 2], sizes = [16, 26], strides = [1, 1]} : vector<16x42xbf16> to vector<16x26xbf16>
    %15 = vector.extract_strided_slice %11 {offsets = [0, 7], sizes = [16, 26], strides = [1, 1]} : vector<16x42xbf16> to vector<16x26xbf16>
    %16 = vector.extract_strided_slice %11 {offsets = [0, 8], sizes = [16, 26], strides = [1, 1]} : vector<16x42xbf16> to vector<16x26xbf16>
    %17 = vector.extract_strided_slice %11 {offsets = [0, 9], sizes = [16, 26], strides = [1, 1]} : vector<16x42xbf16> to vector<16x26xbf16>
    %18 = vector.extract_strided_slice %11 {offsets = [0, 14], sizes = [16, 26], strides = [1, 1]} : vector<16x42xbf16> to vector<16x26xbf16>
    %19 = vector.extract_strided_slice %11 {offsets = [0, 15], sizes = [16, 26], strides = [1, 1]} : vector<16x42xbf16> to vector<16x26xbf16>
    %20 = vector.extract_strided_slice %11 {offsets = [0, 16], sizes = [16, 26], strides = [1, 1]} : vector<16x42xbf16> to vector<16x26xbf16>
    %21 = tpu.concatenate %12, %13, %14, %15, %16, %17, %18, %19, %20 in 0 : vector<16x26xbf16>, vector<16x26xbf16>, vector<16x26xbf16>, vector<16x26xbf16>, vector<16x26xbf16>, vector<16x26xbf16>, vector<16x26xbf16>, vector<16x26xbf16>, vector<16x26xbf16> -> vector<144x26xbf16>
    %cst_8 = arith.constant dense<0.000000e+00> : vector<32x26xf32>
    %22 = tpu.matmul %2, %21, %cst_8 {dimension_numbers = #tpu.dot_dimension_numbers<[1], [0], [0], [1], [0, 0, 1, 1], [], []>} : vector<32x144xbf16>, vector<144x26xbf16>, vector<32x26xf32> -> vector<32x26xf32>
    %23 = vector.broadcast %3 : vector<32x1xf32> to vector<32x26xf32>
    %24 = arith.addf %22, %23 : vector<32x26xf32>
    %25 = vector.extract_strided_slice %24 {offsets = [0, 0], sizes = [32, 5], strides = [1, 1]} : vector<32x26xf32> to vector<32x5xf32>
    %26 = vector.extract_strided_slice %24 {offsets = [0, 7], sizes = [32, 5], strides = [1, 1]} : vector<32x26xf32> to vector<32x5xf32>
    %27 = vector.extract_strided_slice %24 {offsets = [0, 14], sizes = [32, 5], strides = [1, 1]} : vector<32x26xf32> to vector<32x5xf32>
    %28 = vector.extract_strided_slice %24 {offsets = [0, 21], sizes = [32, 5], strides = [1, 1]} : vector<32x26xf32> to vector<32x5xf32>
    %29 = tpu.concatenate %25, %26, %27, %28 in 1 : vector<32x5xf32>, vector<32x5xf32>, vector<32x5xf32>, vector<32x5xf32> -> vector<32x20xf32>
    %cst_9 = arith.constant 0.000000e+00 : f32
    %30 = vector.broadcast %cst_9 : f32 to vector<32x20xf32>
    %31 = arith.maximumf %29, %30 : vector<32x20xf32>
    %32 = arith.truncf %31 : vector<32x20xf32> to vector<32x20xbf16>
    %c0_10 = arith.constant 0 : index
    %c0_11 = arith.constant 0 : index
    %33 = vector.load %arg4[%c0_10, %c0_11] : memref<32x288xbf16, #tpu.memory_space<vmem>>, vector<32x288xbf16>
    %c0_12 = arith.constant 0 : index
    %c0_13 = arith.constant 0 : index
    %34 = vector.load %arg5[%c0_12, %c0_13] : memref<32x1xf32, #tpu.memory_space<vmem>>, vector<32x1xf32>
    %cst_14 = arith.constant 0.000000e+00 : bf16
    %35 = vector.broadcast %cst_14 : bf16 to vector<32x7xbf16>
    %cst_15 = arith.constant 0.000000e+00 : bf16
    %36 = vector.broadcast %cst_15 : bf16 to vector<32x1xbf16>
    %37 = vector.extract_strided_slice %32 {offsets = [0, 0], sizes = [32, 5], strides = [1, 1]} : vector<32x20xbf16> to vector<32x5xbf16>
    %38 = vector.extract_strided_slice %32 {offsets = [0, 5], sizes = [32, 5], strides = [1, 1]} : vector<32x20xbf16> to vector<32x5xbf16>
    %39 = vector.extract_strided_slice %32 {offsets = [0, 10], sizes = [32, 5], strides = [1, 1]} : vector<32x20xbf16> to vector<32x5xbf16>
    %40 = vector.extract_strided_slice %32 {offsets = [0, 15], sizes = [32, 5], strides = [1, 1]} : vector<32x20xbf16> to vector<32x5xbf16>
    %cst_16 = arith.constant 0.000000e+00 : bf16
    %41 = vector.broadcast %cst_16 : bf16 to vector<32x7xbf16>
    %42 = tpu.concatenate %35, %36, %37, %36, %36, %38, %36, %36, %39, %36, %36, %40, %36, %41 in 1 : vector<32x7xbf16>, vector<32x1xbf16>, vector<32x5xbf16>, vector<32x1xbf16>, vector<32x1xbf16>, vector<32x5xbf16>, vector<32x1xbf16>, vector<32x1xbf16>, vector<32x5xbf16>, vector<32x1xbf16>, vector<32x1xbf16>, vector<32x5xbf16>, vector<32x1xbf16>, vector<32x7xbf16> -> vector<32x42xbf16>
    %43 = vector.extract_strided_slice %42 {offsets = [0, 0], sizes = [32, 26], strides = [1, 1]} : vector<32x42xbf16> to vector<32x26xbf16>
    %44 = vector.extract_strided_slice %42 {offsets = [0, 1], sizes = [32, 26], strides = [1, 1]} : vector<32x42xbf16> to vector<32x26xbf16>
    %45 = vector.extract_strided_slice %42 {offsets = [0, 2], sizes = [32, 26], strides = [1, 1]} : vector<32x42xbf16> to vector<32x26xbf16>
    %46 = vector.extract_strided_slice %42 {offsets = [0, 7], sizes = [32, 26], strides = [1, 1]} : vector<32x42xbf16> to vector<32x26xbf16>
    %47 = vector.extract_strided_slice %42 {offsets = [0, 8], sizes = [32, 26], strides = [1, 1]} : vector<32x42xbf16> to vector<32x26xbf16>
    %48 = vector.extract_strided_slice %42 {offsets = [0, 9], sizes = [32, 26], strides = [1, 1]} : vector<32x42xbf16> to vector<32x26xbf16>
    %49 = vector.extract_strided_slice %42 {offsets = [0, 14], sizes = [32, 26], strides = [1, 1]} : vector<32x42xbf16> to vector<32x26xbf16>
    %50 = vector.extract_strided_slice %42 {offsets = [0, 15], sizes = [32, 26], strides = [1, 1]} : vector<32x42xbf16> to vector<32x26xbf16>
    %51 = vector.extract_strided_slice %42 {offsets = [0, 16], sizes = [32, 26], strides = [1, 1]} : vector<32x42xbf16> to vector<32x26xbf16>
    %52 = tpu.concatenate %43, %44, %45, %46, %47, %48, %49, %50, %51 in 0 : vector<32x26xbf16>, vector<32x26xbf16>, vector<32x26xbf16>, vector<32x26xbf16>, vector<32x26xbf16>, vector<32x26xbf16>, vector<32x26xbf16>, vector<32x26xbf16>, vector<32x26xbf16> -> vector<288x26xbf16>
    %cst_17 = arith.constant dense<0.000000e+00> : vector<32x26xf32>
    %53 = tpu.matmul %33, %52, %cst_17 {dimension_numbers = #tpu.dot_dimension_numbers<[1], [0], [0], [1], [0, 0, 1, 1], [], []>} : vector<32x288xbf16>, vector<288x26xbf16>, vector<32x26xf32> -> vector<32x26xf32>
    %54 = vector.broadcast %34 : vector<32x1xf32> to vector<32x26xf32>
    %55 = arith.addf %53, %54 : vector<32x26xf32>
    %56 = vector.extract_strided_slice %55 {offsets = [0, 0], sizes = [32, 5], strides = [1, 1]} : vector<32x26xf32> to vector<32x5xf32>
    %57 = vector.extract_strided_slice %55 {offsets = [0, 7], sizes = [32, 5], strides = [1, 1]} : vector<32x26xf32> to vector<32x5xf32>
    %58 = vector.extract_strided_slice %55 {offsets = [0, 14], sizes = [32, 5], strides = [1, 1]} : vector<32x26xf32> to vector<32x5xf32>
    %59 = vector.extract_strided_slice %55 {offsets = [0, 21], sizes = [32, 5], strides = [1, 1]} : vector<32x26xf32> to vector<32x5xf32>
    %60 = tpu.concatenate %56, %57, %58, %59 in 1 : vector<32x5xf32>, vector<32x5xf32>, vector<32x5xf32>, vector<32x5xf32> -> vector<32x20xf32>
    %c0_18 = arith.constant 0 : index
    %c0_19 = arith.constant 0 : index
    %61 = vector.load %arg6[%c0_18, %c0_19] : memref<32x16xbf16, #tpu.memory_space<vmem>>, vector<32x16xbf16>
    %c0_20 = arith.constant 0 : index
    %c0_21 = arith.constant 0 : index
    %62 = vector.load %arg7[%c0_20, %c0_21] : memref<32x1xf32, #tpu.memory_space<vmem>>, vector<32x1xf32>
    %cst_22 = arith.constant dense<0.000000e+00> : vector<32x20xf32>
    %63 = tpu.matmul %61, %1, %cst_22 {dimension_numbers = #tpu.dot_dimension_numbers<[1], [0], [0], [1], [0, 0, 1, 1], [], []>} : vector<32x16xbf16>, vector<16x20xbf16>, vector<32x20xf32> -> vector<32x20xf32>
    %64 = vector.broadcast %62 : vector<32x1xf32> to vector<32x20xf32>
    %65 = arith.addf %63, %64 : vector<32x20xf32>
    %66 = arith.addf %60, %65 : vector<32x20xf32>
    %cst_23 = arith.constant 0.000000e+00 : f32
    %67 = vector.broadcast %cst_23 : f32 to vector<32x20xf32>
    %68 = arith.maximumf %66, %67 : vector<32x20xf32>
    %69 = arith.truncf %68 : vector<32x20xf32> to vector<32x20xbf16>
    %c0_24 = arith.constant 0 : index
    %c0_25 = arith.constant 0 : index
    %c0_26 = arith.constant 0 : index
    %70 = vector.load %arg8[%c0_24, %c0_25, %c0_26] : memref<1x32x20xbf16, #tpu.memory_space<vmem>>, vector<1x32x20xbf16>
    %71 = vector.shape_cast %70 : vector<1x32x20xbf16> to vector<32x20xbf16>
    %72 = vector.shape_cast %69 : vector<32x20xbf16> to vector<1x32x20xbf16>
    tpu.vector_store %arg8[%c0_24, %c0_25, %c0_26], %72 {strides = array<i32>} : memref<1x32x20xbf16, #tpu.memory_space<vmem>>, vector<1x32x20xbf16>,
    return
  }
  func.func @transform_0(%arg0: i32) -> (i32, i32, i32) {
    %c0_i32 = arith.constant 0 : i32
    %c0_i32_0 = arith.constant 0 : i32
    %c0_i32_1 = arith.constant 0 : i32
    return %arg0, %c0_i32, %c0_i32_0 : i32, i32, i32
  }
  func.func @transform_1(%arg0: i32) -> (i32, i32) {
    %c0_i32 = arith.constant 0 : i32
    %c0_i32_0 = arith.constant 0 : i32
    %c0_i32_1 = arith.constant 0 : i32
    return %c0_i32, %c0_i32_0 : i32, i32
  }
  func.func @transform_2(%arg0: i32) -> (i32, i32) {
    %c0_i32 = arith.constant 0 : i32
    %c0_i32_0 = arith.constant 0 : i32
    %c0_i32_1 = arith.constant 0 : i32
    return %c0_i32, %c0_i32_0 : i32, i32
  }
  func.func @transform_3(%arg0: i32) -> (i32, i32) {
    %c0_i32 = arith.constant 0 : i32
    %c0_i32_0 = arith.constant 0 : i32
    %c0_i32_1 = arith.constant 0 : i32
    return %c0_i32, %c0_i32_0 : i32, i32
  }
  func.func @transform_4(%arg0: i32) -> (i32, i32) {
    %c0_i32 = arith.constant 0 : i32
    %c0_i32_0 = arith.constant 0 : i32
    %c0_i32_1 = arith.constant 0 : i32
    return %c0_i32, %c0_i32_0 : i32, i32
  }
  func.func @transform_5(%arg0: i32) -> (i32, i32) {
    %c0_i32 = arith.constant 0 : i32
    %c0_i32_0 = arith.constant 0 : i32
    %c0_i32_1 = arith.constant 0 : i32
    return %c0_i32, %c0_i32_0 : i32, i32
  }
  func.func @transform_6(%arg0: i32) -> (i32, i32) {
    %c0_i32 = arith.constant 0 : i32
    %c0_i32_0 = arith.constant 0 : i32
    %c0_i32_1 = arith.constant 0 : i32
    return %c0_i32, %c0_i32_0 : i32, i32
  }
  func.func @transform_7(%arg0: i32) -> (i32, i32, i32) {
    %c0_i32 = arith.constant 0 : i32
    %c0_i32_0 = arith.constant 0 : i32
    %c0_i32_1 = arith.constant 0 : i32
    return %arg0, %c0_i32, %c0_i32_0 : i32, i32, i32
  }
}

module attributes {stable_mosaic.version = 11 : i64} {
  func.func @_conv_kernel(%arg0: i32, %arg1: memref<1x32x20xbf16, #tpu.memory_space<vmem>>, %arg2: memref<32x288xbf16, #tpu.memory_space<vmem>>, %arg3: memref<32x1xf32, #tpu.memory_space<vmem>>, %arg4: memref<1x32x20xbf16, #tpu.memory_space<vmem>>) attributes {dimension_semantics = [#tpu.dimension_semantics<parallel>], iteration_bounds = array<i64: 2>, scalar_prefetch = 0 : i64, scratch_operands = 0 : i64, tpu.core_type = #tpu.core_type<tc>, window_params = [{transform_indices = @transform_0, window_bounds = array<i64: 1, 32, 20>}, {pipeline_mode = #tpu.pipeline_mode<synchronous>, transform_indices = @transform_1, window_bounds = array<i64: 32, 288>}, {pipeline_mode = #tpu.pipeline_mode<synchronous>, transform_indices = @transform_2, window_bounds = array<i64: 32, 1>}, {transform_indices = @transform_3, window_bounds = array<i64: 1, 32, 20>}]} {
    %c0 = arith.constant 0 : index
    %c0_0 = arith.constant 0 : index
    %c0_1 = arith.constant 0 : index
    %0 = vector.load %arg1[%c0, %c0_0, %c0_1] : memref<1x32x20xbf16, #tpu.memory_space<vmem>>, vector<1x32x20xbf16>
    %1 = vector.shape_cast %0 : vector<1x32x20xbf16> to vector<32x20xbf16>
    %c0_2 = arith.constant 0 : index
    %c0_3 = arith.constant 0 : index
    %2 = vector.load %arg2[%c0_2, %c0_3] : memref<32x288xbf16, #tpu.memory_space<vmem>>, vector<32x288xbf16>
    %c0_4 = arith.constant 0 : index
    %c0_5 = arith.constant 0 : index
    %3 = vector.load %arg3[%c0_4, %c0_5] : memref<32x1xf32, #tpu.memory_space<vmem>>, vector<32x1xf32>
    %cst = arith.constant 0.000000e+00 : bf16
    %4 = vector.broadcast %cst : bf16 to vector<32x7xbf16>
    %cst_6 = arith.constant 0.000000e+00 : bf16
    %5 = vector.broadcast %cst_6 : bf16 to vector<32x1xbf16>
    %6 = vector.extract_strided_slice %1 {offsets = [0, 0], sizes = [32, 5], strides = [1, 1]} : vector<32x20xbf16> to vector<32x5xbf16>
    %7 = vector.extract_strided_slice %1 {offsets = [0, 5], sizes = [32, 5], strides = [1, 1]} : vector<32x20xbf16> to vector<32x5xbf16>
    %8 = vector.extract_strided_slice %1 {offsets = [0, 10], sizes = [32, 5], strides = [1, 1]} : vector<32x20xbf16> to vector<32x5xbf16>
    %9 = vector.extract_strided_slice %1 {offsets = [0, 15], sizes = [32, 5], strides = [1, 1]} : vector<32x20xbf16> to vector<32x5xbf16>
    %cst_7 = arith.constant 0.000000e+00 : bf16
    %10 = vector.broadcast %cst_7 : bf16 to vector<32x7xbf16>
    %11 = tpu.concatenate %4, %5, %6, %5, %5, %7, %5, %5, %8, %5, %5, %9, %5, %10 in 1 : vector<32x7xbf16>, vector<32x1xbf16>, vector<32x5xbf16>, vector<32x1xbf16>, vector<32x1xbf16>, vector<32x5xbf16>, vector<32x1xbf16>, vector<32x1xbf16>, vector<32x5xbf16>, vector<32x1xbf16>, vector<32x1xbf16>, vector<32x5xbf16>, vector<32x1xbf16>, vector<32x7xbf16> -> vector<32x42xbf16>
    %12 = vector.extract_strided_slice %11 {offsets = [0, 0], sizes = [32, 26], strides = [1, 1]} : vector<32x42xbf16> to vector<32x26xbf16>
    %13 = vector.extract_strided_slice %11 {offsets = [0, 1], sizes = [32, 26], strides = [1, 1]} : vector<32x42xbf16> to vector<32x26xbf16>
    %14 = vector.extract_strided_slice %11 {offsets = [0, 2], sizes = [32, 26], strides = [1, 1]} : vector<32x42xbf16> to vector<32x26xbf16>
    %15 = vector.extract_strided_slice %11 {offsets = [0, 7], sizes = [32, 26], strides = [1, 1]} : vector<32x42xbf16> to vector<32x26xbf16>
    %16 = vector.extract_strided_slice %11 {offsets = [0, 8], sizes = [32, 26], strides = [1, 1]} : vector<32x42xbf16> to vector<32x26xbf16>
    %17 = vector.extract_strided_slice %11 {offsets = [0, 9], sizes = [32, 26], strides = [1, 1]} : vector<32x42xbf16> to vector<32x26xbf16>
    %18 = vector.extract_strided_slice %11 {offsets = [0, 14], sizes = [32, 26], strides = [1, 1]} : vector<32x42xbf16> to vector<32x26xbf16>
    %19 = vector.extract_strided_slice %11 {offsets = [0, 15], sizes = [32, 26], strides = [1, 1]} : vector<32x42xbf16> to vector<32x26xbf16>
    %20 = vector.extract_strided_slice %11 {offsets = [0, 16], sizes = [32, 26], strides = [1, 1]} : vector<32x42xbf16> to vector<32x26xbf16>
    %21 = tpu.concatenate %12, %13, %14, %15, %16, %17, %18, %19, %20 in 0 : vector<32x26xbf16>, vector<32x26xbf16>, vector<32x26xbf16>, vector<32x26xbf16>, vector<32x26xbf16>, vector<32x26xbf16>, vector<32x26xbf16>, vector<32x26xbf16>, vector<32x26xbf16> -> vector<288x26xbf16>
    %cst_8 = arith.constant dense<0.000000e+00> : vector<32x26xf32>
    %22 = tpu.matmul %2, %21, %cst_8 {dimension_numbers = #tpu.dot_dimension_numbers<[1], [0], [0], [1], [0, 0, 1, 1], [], []>} : vector<32x288xbf16>, vector<288x26xbf16>, vector<32x26xf32> -> vector<32x26xf32>
    %23 = vector.broadcast %3 : vector<32x1xf32> to vector<32x26xf32>
    %24 = arith.addf %22, %23 : vector<32x26xf32>
    %25 = vector.extract_strided_slice %24 {offsets = [0, 0], sizes = [32, 5], strides = [1, 1]} : vector<32x26xf32> to vector<32x5xf32>
    %26 = vector.extract_strided_slice %24 {offsets = [0, 7], sizes = [32, 5], strides = [1, 1]} : vector<32x26xf32> to vector<32x5xf32>
    %27 = vector.extract_strided_slice %24 {offsets = [0, 14], sizes = [32, 5], strides = [1, 1]} : vector<32x26xf32> to vector<32x5xf32>
    %28 = vector.extract_strided_slice %24 {offsets = [0, 21], sizes = [32, 5], strides = [1, 1]} : vector<32x26xf32> to vector<32x5xf32>
    %29 = tpu.concatenate %25, %26, %27, %28 in 1 : vector<32x5xf32>, vector<32x5xf32>, vector<32x5xf32>, vector<32x5xf32> -> vector<32x20xf32>
    %cst_9 = arith.constant 0.000000e+00 : f32
    %30 = vector.broadcast %cst_9 : f32 to vector<32x20xf32>
    %31 = arith.maximumf %29, %30 : vector<32x20xf32>
    %32 = arith.truncf %31 : vector<32x20xf32> to vector<32x20xbf16>
    %c0_10 = arith.constant 0 : index
    %c0_11 = arith.constant 0 : index
    %c0_12 = arith.constant 0 : index
    %33 = vector.load %arg4[%c0_10, %c0_11, %c0_12] : memref<1x32x20xbf16, #tpu.memory_space<vmem>>, vector<1x32x20xbf16>
    %34 = vector.shape_cast %33 : vector<1x32x20xbf16> to vector<32x20xbf16>
    %35 = vector.shape_cast %32 : vector<32x20xbf16> to vector<1x32x20xbf16>
    tpu.vector_store %arg4[%c0_10, %c0_11, %c0_12], %35 {strides = array<i32>} : memref<1x32x20xbf16, #tpu.memory_space<vmem>>, vector<1x32x20xbf16>,
    return
  }
  func.func @transform_0(%arg0: i32) -> (i32, i32, i32) {
    %c0_i32 = arith.constant 0 : i32
    %c0_i32_0 = arith.constant 0 : i32
    %c0_i32_1 = arith.constant 0 : i32
    return %arg0, %c0_i32, %c0_i32_0 : i32, i32, i32
  }
  func.func @transform_1(%arg0: i32) -> (i32, i32) {
    %c0_i32 = arith.constant 0 : i32
    %c0_i32_0 = arith.constant 0 : i32
    %c0_i32_1 = arith.constant 0 : i32
    return %c0_i32, %c0_i32_0 : i32, i32
  }
  func.func @transform_2(%arg0: i32) -> (i32, i32) {
    %c0_i32 = arith.constant 0 : i32
    %c0_i32_0 = arith.constant 0 : i32
    %c0_i32_1 = arith.constant 0 : i32
    return %c0_i32, %c0_i32_0 : i32, i32
  }
  func.func @transform_3(%arg0: i32) -> (i32, i32, i32) {
    %c0_i32 = arith.constant 0 : i32
    %c0_i32_0 = arith.constant 0 : i32
    %c0_i32_1 = arith.constant 0 : i32
    return %arg0, %c0_i32, %c0_i32_0 : i32, i32, i32
  }
}

module attributes {stable_mosaic.version = 11 : i64} {
  func.func @_double_conv_kernel(%arg0: i32, %arg1: memref<1x32x20xbf16, #tpu.memory_space<vmem>>, %arg2: memref<32x288xbf16, #tpu.memory_space<vmem>>, %arg3: memref<32x1xf32, #tpu.memory_space<vmem>>, %arg4: memref<32x288xbf16, #tpu.memory_space<vmem>>, %arg5: memref<32x1xf32, #tpu.memory_space<vmem>>, %arg6: memref<1x32x20xbf16, #tpu.memory_space<vmem>>) attributes {dimension_semantics = [#tpu.dimension_semantics<parallel>], iteration_bounds = array<i64: 2>, scalar_prefetch = 0 : i64, scratch_operands = 0 : i64, tpu.core_type = #tpu.core_type<tc>, window_params = [{transform_indices = @transform_0, window_bounds = array<i64: 1, 32, 20>}, {pipeline_mode = #tpu.pipeline_mode<synchronous>, transform_indices = @transform_1, window_bounds = array<i64: 32, 288>}, {pipeline_mode = #tpu.pipeline_mode<synchronous>, transform_indices = @transform_2, window_bounds = array<i64: 32, 1>}, {pipeline_mode = #tpu.pipeline_mode<synchronous>, transform_indices = @transform_3, window_bounds = array<i64: 32, 288>}, {pipeline_mode = #tpu.pipeline_mode<synchronous>, transform_indices = @transform_4, window_bounds = array<i64: 32, 1>}, {transform_indices = @transform_5, window_bounds = array<i64: 1, 32, 20>}]} {
    %c0 = arith.constant 0 : index
    %c0_0 = arith.constant 0 : index
    %c0_1 = arith.constant 0 : index
    %0 = vector.load %arg1[%c0, %c0_0, %c0_1] : memref<1x32x20xbf16, #tpu.memory_space<vmem>>, vector<1x32x20xbf16>
    %1 = vector.shape_cast %0 : vector<1x32x20xbf16> to vector<32x20xbf16>
    %c0_2 = arith.constant 0 : index
    %c0_3 = arith.constant 0 : index
    %2 = vector.load %arg2[%c0_2, %c0_3] : memref<32x288xbf16, #tpu.memory_space<vmem>>, vector<32x288xbf16>
    %c0_4 = arith.constant 0 : index
    %c0_5 = arith.constant 0 : index
    %3 = vector.load %arg3[%c0_4, %c0_5] : memref<32x1xf32, #tpu.memory_space<vmem>>, vector<32x1xf32>
    %cst = arith.constant 0.000000e+00 : bf16
    %4 = vector.broadcast %cst : bf16 to vector<32x7xbf16>
    %cst_6 = arith.constant 0.000000e+00 : bf16
    %5 = vector.broadcast %cst_6 : bf16 to vector<32x1xbf16>
    %6 = vector.extract_strided_slice %1 {offsets = [0, 0], sizes = [32, 5], strides = [1, 1]} : vector<32x20xbf16> to vector<32x5xbf16>
    %7 = vector.extract_strided_slice %1 {offsets = [0, 5], sizes = [32, 5], strides = [1, 1]} : vector<32x20xbf16> to vector<32x5xbf16>
    %8 = vector.extract_strided_slice %1 {offsets = [0, 10], sizes = [32, 5], strides = [1, 1]} : vector<32x20xbf16> to vector<32x5xbf16>
    %9 = vector.extract_strided_slice %1 {offsets = [0, 15], sizes = [32, 5], strides = [1, 1]} : vector<32x20xbf16> to vector<32x5xbf16>
    %cst_7 = arith.constant 0.000000e+00 : bf16
    %10 = vector.broadcast %cst_7 : bf16 to vector<32x7xbf16>
    %11 = tpu.concatenate %4, %5, %6, %5, %5, %7, %5, %5, %8, %5, %5, %9, %5, %10 in 1 : vector<32x7xbf16>, vector<32x1xbf16>, vector<32x5xbf16>, vector<32x1xbf16>, vector<32x1xbf16>, vector<32x5xbf16>, vector<32x1xbf16>, vector<32x1xbf16>, vector<32x5xbf16>, vector<32x1xbf16>, vector<32x1xbf16>, vector<32x5xbf16>, vector<32x1xbf16>, vector<32x7xbf16> -> vector<32x42xbf16>
    %12 = vector.extract_strided_slice %11 {offsets = [0, 0], sizes = [32, 26], strides = [1, 1]} : vector<32x42xbf16> to vector<32x26xbf16>
    %13 = vector.extract_strided_slice %11 {offsets = [0, 1], sizes = [32, 26], strides = [1, 1]} : vector<32x42xbf16> to vector<32x26xbf16>
    %14 = vector.extract_strided_slice %11 {offsets = [0, 2], sizes = [32, 26], strides = [1, 1]} : vector<32x42xbf16> to vector<32x26xbf16>
    %15 = vector.extract_strided_slice %11 {offsets = [0, 7], sizes = [32, 26], strides = [1, 1]} : vector<32x42xbf16> to vector<32x26xbf16>
    %16 = vector.extract_strided_slice %11 {offsets = [0, 8], sizes = [32, 26], strides = [1, 1]} : vector<32x42xbf16> to vector<32x26xbf16>
    %17 = vector.extract_strided_slice %11 {offsets = [0, 9], sizes = [32, 26], strides = [1, 1]} : vector<32x42xbf16> to vector<32x26xbf16>
    %18 = vector.extract_strided_slice %11 {offsets = [0, 14], sizes = [32, 26], strides = [1, 1]} : vector<32x42xbf16> to vector<32x26xbf16>
    %19 = vector.extract_strided_slice %11 {offsets = [0, 15], sizes = [32, 26], strides = [1, 1]} : vector<32x42xbf16> to vector<32x26xbf16>
    %20 = vector.extract_strided_slice %11 {offsets = [0, 16], sizes = [32, 26], strides = [1, 1]} : vector<32x42xbf16> to vector<32x26xbf16>
    %21 = tpu.concatenate %12, %13, %14, %15, %16, %17, %18, %19, %20 in 0 : vector<32x26xbf16>, vector<32x26xbf16>, vector<32x26xbf16>, vector<32x26xbf16>, vector<32x26xbf16>, vector<32x26xbf16>, vector<32x26xbf16>, vector<32x26xbf16>, vector<32x26xbf16> -> vector<288x26xbf16>
    %cst_8 = arith.constant dense<0.000000e+00> : vector<32x26xf32>
    %22 = tpu.matmul %2, %21, %cst_8 {dimension_numbers = #tpu.dot_dimension_numbers<[1], [0], [0], [1], [0, 0, 1, 1], [], []>} : vector<32x288xbf16>, vector<288x26xbf16>, vector<32x26xf32> -> vector<32x26xf32>
    %23 = vector.broadcast %3 : vector<32x1xf32> to vector<32x26xf32>
    %24 = arith.addf %22, %23 : vector<32x26xf32>
    %25 = vector.extract_strided_slice %24 {offsets = [0, 0], sizes = [32, 5], strides = [1, 1]} : vector<32x26xf32> to vector<32x5xf32>
    %26 = vector.extract_strided_slice %24 {offsets = [0, 7], sizes = [32, 5], strides = [1, 1]} : vector<32x26xf32> to vector<32x5xf32>
    %27 = vector.extract_strided_slice %24 {offsets = [0, 14], sizes = [32, 5], strides = [1, 1]} : vector<32x26xf32> to vector<32x5xf32>
    %28 = vector.extract_strided_slice %24 {offsets = [0, 21], sizes = [32, 5], strides = [1, 1]} : vector<32x26xf32> to vector<32x5xf32>
    %29 = tpu.concatenate %25, %26, %27, %28 in 1 : vector<32x5xf32>, vector<32x5xf32>, vector<32x5xf32>, vector<32x5xf32> -> vector<32x20xf32>
    %cst_9 = arith.constant 0.000000e+00 : f32
    %30 = vector.broadcast %cst_9 : f32 to vector<32x20xf32>
    %31 = arith.maximumf %29, %30 : vector<32x20xf32>
    %32 = arith.truncf %31 : vector<32x20xf32> to vector<32x20xbf16>
    %c0_10 = arith.constant 0 : index
    %c0_11 = arith.constant 0 : index
    %33 = vector.load %arg4[%c0_10, %c0_11] : memref<32x288xbf16, #tpu.memory_space<vmem>>, vector<32x288xbf16>
    %c0_12 = arith.constant 0 : index
    %c0_13 = arith.constant 0 : index
    %34 = vector.load %arg5[%c0_12, %c0_13] : memref<32x1xf32, #tpu.memory_space<vmem>>, vector<32x1xf32>
    %cst_14 = arith.constant 0.000000e+00 : bf16
    %35 = vector.broadcast %cst_14 : bf16 to vector<32x7xbf16>
    %cst_15 = arith.constant 0.000000e+00 : bf16
    %36 = vector.broadcast %cst_15 : bf16 to vector<32x1xbf16>
    %37 = vector.extract_strided_slice %32 {offsets = [0, 0], sizes = [32, 5], strides = [1, 1]} : vector<32x20xbf16> to vector<32x5xbf16>
    %38 = vector.extract_strided_slice %32 {offsets = [0, 5], sizes = [32, 5], strides = [1, 1]} : vector<32x20xbf16> to vector<32x5xbf16>
    %39 = vector.extract_strided_slice %32 {offsets = [0, 10], sizes = [32, 5], strides = [1, 1]} : vector<32x20xbf16> to vector<32x5xbf16>
    %40 = vector.extract_strided_slice %32 {offsets = [0, 15], sizes = [32, 5], strides = [1, 1]} : vector<32x20xbf16> to vector<32x5xbf16>
    %cst_16 = arith.constant 0.000000e+00 : bf16
    %41 = vector.broadcast %cst_16 : bf16 to vector<32x7xbf16>
    %42 = tpu.concatenate %35, %36, %37, %36, %36, %38, %36, %36, %39, %36, %36, %40, %36, %41 in 1 : vector<32x7xbf16>, vector<32x1xbf16>, vector<32x5xbf16>, vector<32x1xbf16>, vector<32x1xbf16>, vector<32x5xbf16>, vector<32x1xbf16>, vector<32x1xbf16>, vector<32x5xbf16>, vector<32x1xbf16>, vector<32x1xbf16>, vector<32x5xbf16>, vector<32x1xbf16>, vector<32x7xbf16> -> vector<32x42xbf16>
    %43 = vector.extract_strided_slice %42 {offsets = [0, 0], sizes = [32, 26], strides = [1, 1]} : vector<32x42xbf16> to vector<32x26xbf16>
    %44 = vector.extract_strided_slice %42 {offsets = [0, 1], sizes = [32, 26], strides = [1, 1]} : vector<32x42xbf16> to vector<32x26xbf16>
    %45 = vector.extract_strided_slice %42 {offsets = [0, 2], sizes = [32, 26], strides = [1, 1]} : vector<32x42xbf16> to vector<32x26xbf16>
    %46 = vector.extract_strided_slice %42 {offsets = [0, 7], sizes = [32, 26], strides = [1, 1]} : vector<32x42xbf16> to vector<32x26xbf16>
    %47 = vector.extract_strided_slice %42 {offsets = [0, 8], sizes = [32, 26], strides = [1, 1]} : vector<32x42xbf16> to vector<32x26xbf16>
    %48 = vector.extract_strided_slice %42 {offsets = [0, 9], sizes = [32, 26], strides = [1, 1]} : vector<32x42xbf16> to vector<32x26xbf16>
    %49 = vector.extract_strided_slice %42 {offsets = [0, 14], sizes = [32, 26], strides = [1, 1]} : vector<32x42xbf16> to vector<32x26xbf16>
    %50 = vector.extract_strided_slice %42 {offsets = [0, 15], sizes = [32, 26], strides = [1, 1]} : vector<32x42xbf16> to vector<32x26xbf16>
    %51 = vector.extract_strided_slice %42 {offsets = [0, 16], sizes = [32, 26], strides = [1, 1]} : vector<32x42xbf16> to vector<32x26xbf16>
    %52 = tpu.concatenate %43, %44, %45, %46, %47, %48, %49, %50, %51 in 0 : vector<32x26xbf16>, vector<32x26xbf16>, vector<32x26xbf16>, vector<32x26xbf16>, vector<32x26xbf16>, vector<32x26xbf16>, vector<32x26xbf16>, vector<32x26xbf16>, vector<32x26xbf16> -> vector<288x26xbf16>
    %cst_17 = arith.constant dense<0.000000e+00> : vector<32x26xf32>
    %53 = tpu.matmul %33, %52, %cst_17 {dimension_numbers = #tpu.dot_dimension_numbers<[1], [0], [0], [1], [0, 0, 1, 1], [], []>} : vector<32x288xbf16>, vector<288x26xbf16>, vector<32x26xf32> -> vector<32x26xf32>
    %54 = vector.broadcast %34 : vector<32x1xf32> to vector<32x26xf32>
    %55 = arith.addf %53, %54 : vector<32x26xf32>
    %56 = vector.extract_strided_slice %55 {offsets = [0, 0], sizes = [32, 5], strides = [1, 1]} : vector<32x26xf32> to vector<32x5xf32>
    %57 = vector.extract_strided_slice %55 {offsets = [0, 7], sizes = [32, 5], strides = [1, 1]} : vector<32x26xf32> to vector<32x5xf32>
    %58 = vector.extract_strided_slice %55 {offsets = [0, 14], sizes = [32, 5], strides = [1, 1]} : vector<32x26xf32> to vector<32x5xf32>
    %59 = vector.extract_strided_slice %55 {offsets = [0, 21], sizes = [32, 5], strides = [1, 1]} : vector<32x26xf32> to vector<32x5xf32>
    %60 = tpu.concatenate %56, %57, %58, %59 in 1 : vector<32x5xf32>, vector<32x5xf32>, vector<32x5xf32>, vector<32x5xf32> -> vector<32x20xf32>
    %61 = arith.extf %1 : vector<32x20xbf16> to vector<32x20xf32>
    %62 = arith.addf %60, %61 : vector<32x20xf32>
    %cst_18 = arith.constant 0.000000e+00 : f32
    %63 = vector.broadcast %cst_18 : f32 to vector<32x20xf32>
    %64 = arith.maximumf %62, %63 : vector<32x20xf32>
    %65 = arith.truncf %64 : vector<32x20xf32> to vector<32x20xbf16>
    %c0_19 = arith.constant 0 : index
    %c0_20 = arith.constant 0 : index
    %c0_21 = arith.constant 0 : index
    %66 = vector.load %arg6[%c0_19, %c0_20, %c0_21] : memref<1x32x20xbf16, #tpu.memory_space<vmem>>, vector<1x32x20xbf16>
    %67 = vector.shape_cast %66 : vector<1x32x20xbf16> to vector<32x20xbf16>
    %68 = vector.shape_cast %65 : vector<32x20xbf16> to vector<1x32x20xbf16>
    tpu.vector_store %arg6[%c0_19, %c0_20, %c0_21], %68 {strides = array<i32>} : memref<1x32x20xbf16, #tpu.memory_space<vmem>>, vector<1x32x20xbf16>,
    return
  }
  func.func @transform_0(%arg0: i32) -> (i32, i32, i32) {
    %c0_i32 = arith.constant 0 : i32
    %c0_i32_0 = arith.constant 0 : i32
    %c0_i32_1 = arith.constant 0 : i32
    return %arg0, %c0_i32, %c0_i32_0 : i32, i32, i32
  }
  func.func @transform_1(%arg0: i32) -> (i32, i32) {
    %c0_i32 = arith.constant 0 : i32
    %c0_i32_0 = arith.constant 0 : i32
    %c0_i32_1 = arith.constant 0 : i32
    return %c0_i32, %c0_i32_0 : i32, i32
  }
  func.func @transform_2(%arg0: i32) -> (i32, i32) {
    %c0_i32 = arith.constant 0 : i32
    %c0_i32_0 = arith.constant 0 : i32
    %c0_i32_1 = arith.constant 0 : i32
    return %c0_i32, %c0_i32_0 : i32, i32
  }
  func.func @transform_3(%arg0: i32) -> (i32, i32) {
    %c0_i32 = arith.constant 0 : i32
    %c0_i32_0 = arith.constant 0 : i32
    %c0_i32_1 = arith.constant 0 : i32
    return %c0_i32, %c0_i32_0 : i32, i32
  }
  func.func @transform_4(%arg0: i32) -> (i32, i32) {
    %c0_i32 = arith.constant 0 : i32
    %c0_i32_0 = arith.constant 0 : i32
    %c0_i32_1 = arith.constant 0 : i32
    return %c0_i32, %c0_i32_0 : i32, i32
  }
  func.func @transform_5(%arg0: i32) -> (i32, i32, i32) {
    %c0_i32 = arith.constant 0 : i32
    %c0_i32_0 = arith.constant 0 : i32
    %c0_i32_1 = arith.constant 0 : i32
    return %arg0, %c0_i32, %c0_i32_0 : i32, i32, i32
  }
}

module attributes {stable_mosaic.version = 11 : i64} {
  func.func @_double_conv_kernel(%arg0: i32, %arg1: memref<1x32x20xbf16, #tpu.memory_space<vmem>>, %arg2: memref<32x128xbf16, #tpu.memory_space<vmem>>, %arg3: memref<32x1xf32, #tpu.memory_space<vmem>>, %arg4: memref<32x128xbf16, #tpu.memory_space<vmem>>, %arg5: memref<32x1xf32, #tpu.memory_space<vmem>>, %arg6: memref<1x32x5xbf16, #tpu.memory_space<vmem>>) attributes {dimension_semantics = [#tpu.dimension_semantics<parallel>], iteration_bounds = array<i64: 2>, scalar_prefetch = 0 : i64, scratch_operands = 0 : i64, tpu.core_type = #tpu.core_type<tc>, window_params = [{transform_indices = @transform_0, window_bounds = array<i64: 1, 32, 20>}, {pipeline_mode = #tpu.pipeline_mode<synchronous>, transform_indices = @transform_1, window_bounds = array<i64: 32, 128>}, {pipeline_mode = #tpu.pipeline_mode<synchronous>, transform_indices = @transform_2, window_bounds = array<i64: 32, 1>}, {pipeline_mode = #tpu.pipeline_mode<synchronous>, transform_indices = @transform_3, window_bounds = array<i64: 32, 128>}, {pipeline_mode = #tpu.pipeline_mode<synchronous>, transform_indices = @transform_4, window_bounds = array<i64: 32, 1>}, {transform_indices = @transform_5, window_bounds = array<i64: 1, 32, 5>}]} {
    %c0 = arith.constant 0 : index
    %c0_0 = arith.constant 0 : index
    %c0_1 = arith.constant 0 : index
    %0 = vector.load %arg1[%c0, %c0_0, %c0_1] : memref<1x32x20xbf16, #tpu.memory_space<vmem>>, vector<1x32x20xbf16>
    %1 = vector.shape_cast %0 : vector<1x32x20xbf16> to vector<32x20xbf16>
    %c0_2 = arith.constant 0 : index
    %c0_3 = arith.constant 0 : index
    %2 = vector.load %arg2[%c0_2, %c0_3] : memref<32x128xbf16, #tpu.memory_space<vmem>>, vector<32x128xbf16>
    %c0_4 = arith.constant 0 : index
    %c0_5 = arith.constant 0 : index
    %3 = vector.load %arg3[%c0_4, %c0_5] : memref<32x1xf32, #tpu.memory_space<vmem>>, vector<32x1xf32>
    %cst = arith.constant 0.000000e+00 : bf16
    %4 = vector.broadcast %cst : bf16 to vector<32x1xbf16>
    %5 = vector.extract_strided_slice %1 {offsets = [0, 0], sizes = [32, 5], strides = [1, 1]} : vector<32x20xbf16> to vector<32x5xbf16>
    %6 = vector.extract_strided_slice %1 {offsets = [0, 5], sizes = [32, 5], strides = [1, 1]} : vector<32x20xbf16> to vector<32x5xbf16>
    %7 = vector.extract_strided_slice %1 {offsets = [0, 10], sizes = [32, 5], strides = [1, 1]} : vector<32x20xbf16> to vector<32x5xbf16>
    %8 = vector.extract_strided_slice %1 {offsets = [0, 15], sizes = [32, 5], strides = [1, 1]} : vector<32x20xbf16> to vector<32x5xbf16>
    %9 = tpu.concatenate %4, %5, %4, %4, %6, %4, %4, %7, %4, %4, %8, %4 in 1 : vector<32x1xbf16>, vector<32x5xbf16>, vector<32x1xbf16>, vector<32x1xbf16>, vector<32x5xbf16>, vector<32x1xbf16>, vector<32x1xbf16>, vector<32x5xbf16>, vector<32x1xbf16>, vector<32x1xbf16>, vector<32x5xbf16>, vector<32x1xbf16> -> vector<32x28xbf16>
    %10 = vector.extract_strided_slice %9 {offsets = [0, 0], sizes = [32, 20], strides = [1, 1]} : vector<32x28xbf16> to vector<32x20xbf16>
    %11 = vector.extract_strided_slice %9 {offsets = [0, 1], sizes = [32, 20], strides = [1, 1]} : vector<32x28xbf16> to vector<32x20xbf16>
    %12 = vector.extract_strided_slice %9 {offsets = [0, 7], sizes = [32, 20], strides = [1, 1]} : vector<32x28xbf16> to vector<32x20xbf16>
    %13 = vector.extract_strided_slice %9 {offsets = [0, 8], sizes = [32, 20], strides = [1, 1]} : vector<32x28xbf16> to vector<32x20xbf16>
    %14 = tpu.concatenate %10, %11, %12, %13 in 0 : vector<32x20xbf16>, vector<32x20xbf16>, vector<32x20xbf16>, vector<32x20xbf16> -> vector<128x20xbf16>
    %cst_6 = arith.constant dense<0.000000e+00> : vector<32x20xf32>
    %15 = tpu.matmul %2, %14, %cst_6 {dimension_numbers = #tpu.dot_dimension_numbers<[1], [0], [0], [1], [0, 0, 1, 1], [], []>} : vector<32x128xbf16>, vector<128x20xbf16>, vector<32x20xf32> -> vector<32x20xf32>
    %16 = vector.broadcast %3 : vector<32x1xf32> to vector<32x20xf32>
    %17 = arith.addf %15, %16 : vector<32x20xf32>
    %18 = vector.extract_strided_slice %17 {offsets = [0, 0], sizes = [32, 6], strides = [1, 1]} : vector<32x20xf32> to vector<32x6xf32>
    %19 = vector.extract_strided_slice %17 {offsets = [0, 14], sizes = [32, 6], strides = [1, 1]} : vector<32x20xf32> to vector<32x6xf32>
    %20 = tpu.concatenate %18, %19 in 1 : vector<32x6xf32>, vector<32x6xf32> -> vector<32x12xf32>
    %cst_7 = arith.constant 0.000000e+00 : f32
    %21 = vector.broadcast %cst_7 : f32 to vector<32x12xf32>
    %22 = arith.maximumf %20, %21 : vector<32x12xf32>
    %23 = arith.truncf %22 : vector<32x12xf32> to vector<32x12xbf16>
    %c0_8 = arith.constant 0 : index
    %c0_9 = arith.constant 0 : index
    %24 = vector.load %arg4[%c0_8, %c0_9] : memref<32x128xbf16, #tpu.memory_space<vmem>>, vector<32x128xbf16>
    %c0_10 = arith.constant 0 : index
    %c0_11 = arith.constant 0 : index
    %25 = vector.load %arg5[%c0_10, %c0_11] : memref<32x1xf32, #tpu.memory_space<vmem>>, vector<32x1xf32>
    %26 = vector.extract_strided_slice %23 {offsets = [0, 0], sizes = [32, 5], strides = [1, 1]} : vector<32x12xbf16> to vector<32x5xbf16>
    %27 = vector.extract_strided_slice %23 {offsets = [0, 1], sizes = [32, 5], strides = [1, 1]} : vector<32x12xbf16> to vector<32x5xbf16>
    %28 = vector.extract_strided_slice %23 {offsets = [0, 6], sizes = [32, 5], strides = [1, 1]} : vector<32x12xbf16> to vector<32x5xbf16>
    %29 = vector.extract_strided_slice %23 {offsets = [0, 7], sizes = [32, 5], strides = [1, 1]} : vector<32x12xbf16> to vector<32x5xbf16>
    %30 = tpu.concatenate %26, %27, %28, %29 in 0 : vector<32x5xbf16>, vector<32x5xbf16>, vector<32x5xbf16>, vector<32x5xbf16> -> vector<128x5xbf16>
    %cst_12 = arith.constant dense<0.000000e+00> : vector<32x5xf32>
    %31 = tpu.matmul %24, %30, %cst_12 {dimension_numbers = #tpu.dot_dimension_numbers<[1], [0], [0], [1], [0, 0, 1, 1], [], []>} : vector<32x128xbf16>, vector<128x5xbf16>, vector<32x5xf32> -> vector<32x5xf32>
    %32 = vector.broadcast %25 : vector<32x1xf32> to vector<32x5xf32>
    %33 = arith.addf %31, %32 : vector<32x5xf32>
    %cst_13 = arith.constant 0.000000e+00 : f32
    %34 = vector.broadcast %cst_13 : f32 to vector<32x5xf32>
    %35 = arith.maximumf %33, %34 : vector<32x5xf32>
    %36 = arith.truncf %35 : vector<32x5xf32> to vector<32x5xbf16>
    %c0_14 = arith.constant 0 : index
    %c0_15 = arith.constant 0 : index
    %c0_16 = arith.constant 0 : index
    %37 = vector.load %arg6[%c0_14, %c0_15, %c0_16] : memref<1x32x5xbf16, #tpu.memory_space<vmem>>, vector<1x32x5xbf16>
    %38 = vector.shape_cast %37 : vector<1x32x5xbf16> to vector<32x5xbf16>
    %39 = vector.shape_cast %36 : vector<32x5xbf16> to vector<1x32x5xbf16>
    tpu.vector_store %arg6[%c0_14, %c0_15, %c0_16], %39 {strides = array<i32>} : memref<1x32x5xbf16, #tpu.memory_space<vmem>>, vector<1x32x5xbf16>,
    return
  }
  func.func @transform_0(%arg0: i32) -> (i32, i32, i32) {
    %c0_i32 = arith.constant 0 : i32
    %c0_i32_0 = arith.constant 0 : i32
    %c0_i32_1 = arith.constant 0 : i32
    return %arg0, %c0_i32, %c0_i32_0 : i32, i32, i32
  }
  func.func @transform_1(%arg0: i32) -> (i32, i32) {
    %c0_i32 = arith.constant 0 : i32
    %c0_i32_0 = arith.constant 0 : i32
    %c0_i32_1 = arith.constant 0 : i32
    return %c0_i32, %c0_i32_0 : i32, i32
  }
  func.func @transform_2(%arg0: i32) -> (i32, i32) {
    %c0_i32 = arith.constant 0 : i32
    %c0_i32_0 = arith.constant 0 : i32
    %c0_i32_1 = arith.constant 0 : i32
    return %c0_i32, %c0_i32_0 : i32, i32
  }
  func.func @transform_3(%arg0: i32) -> (i32, i32) {
    %c0_i32 = arith.constant 0 : i32
    %c0_i32_0 = arith.constant 0 : i32
    %c0_i32_1 = arith.constant 0 : i32
    return %c0_i32, %c0_i32_0 : i32, i32
  }
  func.func @transform_4(%arg0: i32) -> (i32, i32) {
    %c0_i32 = arith.constant 0 : i32
    %c0_i32_0 = arith.constant 0 : i32
    %c0_i32_1 = arith.constant 0 : i32
    return %c0_i32, %c0_i32_0 : i32, i32
  }
  func.func @transform_5(%arg0: i32) -> (i32, i32, i32) {
    %c0_i32 = arith.constant 0 : i32
    %c0_i32_0 = arith.constant 0 : i32
    %c0_i32_1 = arith.constant 0 : i32
    return %arg0, %c0_i32, %c0_i32_0 : i32, i32, i32
  }
}

</mosaic_0001>

<bundles_post_ra>
// kernel: resnet_forward.9
= control target key start
LH: loop header
LB: loop body
LE: loop exit
PB: predicated region body
PF: predicated region fallthrough
CT: control target
= control target key end

     0   :  { %s2040_s18 = smov 0   ;;  %s2871_s0 = inlined_call_operand.vmem [shape: bf16[2,8,512], index: 0, kind: input, shape index: {}]   ;;  %s2872_s1 = inlined_call_operand.vmem [shape: bf16[8,72], index: 1, kind: input, shape index: {}]   ;;  %s2873_s2 = inlined_call_operand.vmem [shape: f32[8,1], index: 2, kind: input, shape index: {}]   ;;  %s2874_s3 = inlined_call_operand.vmem [shape: bf16[8,72], index: 3, kind: input, shape index: {}]   ;;  %s2875_s4 = inlined_call_operand.vmem [shape: f32[8,1], index: 4, kind: input, shape index: {}]   ;;  %s2876_s5 = inlined_call_operand.vmem [shape: bf16[2,8,512], index: 5, kind: output, shape index: {}]  }
   0x1 LB: > { %s1766_s19 = sadd.s32 4294967295, %s1952_s18   ;;  %p1770_p0 = scmp.ge.s32.totalorder %s1952_s18, 1  ;;  %s1952_s18 = sphi %s2040_s18, %s15_s18  }
   0x2   : > { %p187_p1 = scmp.lt.s32.totalorder %s1952_s18, 3 }
   0x4   : > { %p188_p2 = pnand %p1770_p0, %p187_p1 }
   0x5   : > { %p215_p3 = scmp.lt.s32.totalorder (!%p188_p2), %s1766_s19, 1  ;;  %s1954_s24 = smov (!%p188_p2), 2  }
   0x6   : > { %191 = sbr.rel (%p188_p2) target bundleno = 1655 (0x677), region = 40  ;;  %s1955_s25 = smov (!%p188_p2), 49  }
   0x7   : > { %s1956_s26 = smov (!%p188_p2), 98   ;;  %s1957_s27 = smov (!%p188_p2), 96  }
   0x8   : > { %s1958_s28 = smov (!%p188_p2), 51   ;;  %s1959_s29 = smov (!%p188_p2), 4  }
   0x9   : > { %s1960_s30 = smov (!%p188_p2), 100   ;;  %s1961_s6 = smov (!%p188_p2), 53  }
   0xa   : > { %s1962_s7 = smov (!%p188_p2), 102   ;;  %s1963_s8 = smov (!%p188_p2), 6  }
   0xb   : > { %s3127_s19 = smov (!%p215_p3, %s1766_s19), 1  ;;  %v1964_v6 = vmov 0   ;;  %s1965_s9 = smov 8   ;;  %vm324_vm0 = vcmask 130048   ;;  %vm2883_vm1 = vcmask 7168   ;;  %vm2882_vm2 = vcmask 138240  }
   0xc   : > { %s2886_s20 = sshll.u32 %s3127_s19, 4  ;;  %748 = vmatprep.mubr.bf16.mxu0 %v1964_v6  ;;  %789 = vmatprep.mubr.bf16.mxu1 %v1964_v6  ;;  %s2904_s10 = smov 55   ;;  %vm2881_vm3 = vcmask 15360   ;;  %vm2878_vm4 = vcmask 146432   ;;  %vm2879_vm5 = vcmask 277504   ;;  %vm245_vm6 = vcmask 154624  }
   0xd   : > { %s219_s23 = scalar_lea.vmem %s2871_s0, %s2886_s20  ;;  %1901 = vset.pattern.permute.xlu0 %v1964_v6  ;;  %s1967_s11 = smov 104   ;;  %vm248_vm7 = vcmask 285696   ;;  %vm2877_vm8 = vcmask 162816   ;;  %vm250_vm9 = vcmask 293888   ;;  %vm2884_vm10 = vcmask 424960  }
   0xe   : > { %v227_v0 = vld [vmem:[%s219_s23 + $0x8] sm:$0xff]  ;;  %v226_v1 = vld [vmem:[%s219_s23] sm:$0xff]  ;;  %s2906_s12 = smov 57   ;;  %s1969_s13 = smov 106   ;;  %vm252_vm11 = vcmask 302080   ;;  %vm2913_vm12 = vcmask 433152  }
   0xf   : > { %v1777_v2 = vcombine.low %v227_v0, %v227_v0  ;;  %v1775_v3 = vcombine.low %v226_v1, %v226_v1  ;;  %v1776_v4 = vcombine.high %v226_v1, %v226_v1  ;;  %v1778_v5 = vcombine.high %v227_v0, %v227_v0  ;;  %s1970_s14 = smov 10   ;;  %s2903_s15 = smov 19  }
  0x10   : > { %s2897_s16 = smov 23   ;;  %s2900_s17 = smov 21   ;;  %vm2880_vm13 = vcmask 310272   ;;  %vm257_vm14 = vcmask 441344   ;;  %vm2891_vm15 = vcmask 572416  }
  0x11   : > { %353 = vrot.lane.b32.xlu1 %v1777_v2, %s1954_s24  ;;  %278 = vrot.lane.b32.xlu0 %v1775_v3, %s1955_s25  ;;  %s2888_s21 = smov 27   ;;  %s2896_s22 = smov 25  }
  0x12   : > { %s1976_s23 = smov 81   ;;  %s1978_s20 = smov 108  }
  0x15   : > { %314 = vrot.lane.b32.xlu1 %v1776_v4, %s1956_s26  ;;  %312 = vrot.lane.b32.xlu0 %v1776_v4, %s1957_s27 }
  0x19   : > { %280 = vrot.lane.b32.xlu1 %v1775_v3, %s1958_s28  ;;  %387 = vrot.lane.b32.xlu0 %v1777_v2, %s1955_s25 }
  0x1d   : > { %355 = vrot.lane.b32.xlu1 %v1777_v2, %s1959_s29  ;;  %419 = vrot.lane.b32.xlu0 %v1778_v5, %s1957_s27 }
  0x21   : > { %389 = vrot.lane.b32.xlu1 %v1777_v2, %s1958_s28  ;;  %316 = vrot.lane.b32.xlu0 %v1776_v4, %s1960_s30 }
  0x25   : > { %282 = vrot.lane.b32.xlu1 %v1775_v3, %s1961_s6  ;;  %421 = vrot.lane.b32.xlu0 %v1778_v5, %s1956_s26 }
  0x29   : > { %318 = vrot.lane.b32.xlu1 %v1776_v4, %s1962_s7  ;;  %357 = vrot.lane.b32.xlu0 %v1777_v2, %s1963_s8 }
  0x2d   : > { %423 = vrot.lane.b32.xlu1 %v1778_v5, %s1960_s30  ;;  %391 = vrot.lane.b32.xlu0 %v1777_v2, %s1961_s6 }
  0x31   : > { %359 = vrot.lane.b32.xlu1 %v1777_v2, %s1965_s9  ;;  %286 = vrot.lane.b32.xlu0 %v1776_v4, %s2904_s10 }
  0x35   : > { %395 = vrot.lane.b32.xlu1 %v1778_v5, %s2904_s10  ;;  %320 = vrot.lane.b32.xlu0 %v1776_v4, %s1967_s11  ;;  %s2919_s10 = smov 120  }
  0x39   : > { %288 = vrot.lane.b32.xlu1 %v1776_v4, %s2906_s12  ;;  %425 = vrot.lane.b32.xlu0 %v1778_v5, %s1962_s7 }
  0x3d   : > { %322 = vrot.lane.b32.xlu1 %v1776_v4, %s1969_s13  ;;  %361 = vrot.lane.b32.xlu0 %v1777_v2, %s1970_s14 }
  0x41   : > { %427 = vrot.lane.b32.xlu1 %v1778_v5, %s1967_s11  ;;  %397 = vrot.lane.b32.xlu0 %v1778_v5, %s2906_s12  ;;  %s2922_s12 = smov 116  }
  0x45   : > { %429 = vrot.lane.b32.xlu0 %v1778_v5, %s1969_s13  ;;  %233 = vrot.lane.b32.xlu1 %v1775_v3, %s2903_s15  ;;  %s2915_s15 = smov 127  }
  0x49   : > { %237 = vrot.lane.b32.xlu1 %v1775_v3, %s2897_s16  ;;  %235 = vrot.lane.b32.xlu0 %v1775_v3, %s2900_s17  ;;  %s2920_s16 = smov 126   ;;  %s2917_s17 = smov 91  }
  0x4d   : > { %241 = vrot.lane.b32.xlu1 %v1775_v3, %s2888_s21  ;;  %239 = vrot.lane.b32.xlu0 %v1775_v3, %s2896_s22  ;;  %s2893_s21 = smov 103   ;;  %s2901_s22 = smov 109  }
  0x51   : > { %468 = vrot.lane.b32.xlu1 %v1964_v6, %s1976_s23  ;;  %s2887_s23 = smov 71  }
  0x83   : > { %v354_v7 = vpop.permute.xlu1 %353  ;;  %v279_v8 = vpop.permute.xlu0 %278 }
  0x84   : > { %v292_v17 = vsel %vm2883_vm1, 0, %v279_v8  ;;  %v365_v20 = vsel %vm2881_vm3, 0, %v354_v7  ;;  %vm2890_vm3 = vcmask 719872  }
  0x85   : > { %v294_v22 = vsel %vm2882_vm2, %v292_v17, 0  ;;  %v366_v23 = vsel %vm2878_vm4, %v365_v20, 0 }
  0x86   : > { %v295_v28 = vsel %vm2878_vm4, %v294_v22, 0  ;;  %v367_v29 = vsel %vm245_vm6, %v366_v23, 0 }
  0x87   : > { %v315_v9 = vpop.permute.xlu1 %314  ;;  %v313_v10 = vpop.permute.xlu0 %312 }
  0x88   : > { %v326_v13 = vsel %vm324_vm0, %v313_v10, 0 }
  0x89   : > { %v327_v16 = vsel %vm2882_vm2, %v326_v13, 0 }
  0x8a   : > { %v329_v21 = vsel %vm2878_vm4, %v327_v16, %v315_v9 }
  0x8b   : > { %v281_v11 = vpop.permute.xlu1 %280  ;;  %v388_v12 = vpop.permute.xlu0 %387  ;;  %v331_v24 = vsel %vm2879_vm5, %v329_v21, 0 }
  0x8c   : > { %v400_v27 = vsel %vm2883_vm1, 0, %v388_v12  ;;  %v297_v30 = vsel %vm245_vm6, %v295_v28, %v281_v11  ;;  %v332_v31 = vsel %vm248_vm7, %v331_v24, 0  ;;  %vm2892_vm1 = vcmask 728064  }
  0x8d   : > { %v401_v32 = vsel %vm2882_vm2, %v400_v27, 0  ;;  %v298_v38 = vsel %vm248_vm7, %v297_v30, 0 }
  0x8e   : > { %v402_v39 = vsel %vm2878_vm4, %v401_v32, 0  ;;  %v299_v47 = vsel %vm250_vm9, %v298_v38, 0 }
  0x8f   : > { %v356_v14 = vpop.permute.xlu1 %355  ;;  %v420_v15 = vpop.permute.xlu0 %419 }
  0x90   : > { %v370_v33 = vsel %vm2877_vm8, %v367_v29, %v356_v14  ;;  %v432_v34 = vsel %vm324_vm0, %v420_v15, 0  ;;  %vm2912_vm8 = vcmask 580608  }
  0x91   : > { %v371_v40 = vsel %vm250_vm9, %v370_v33, 0  ;;  %v433_v41 = vsel %vm2882_vm2, %v432_v34, 0  ;;  %vm2911_vm2 = vcmask 596992  }
  0x92   : > { %v372_v48 = vsel %vm252_vm11, %v371_v40, 0 }
  0x93   : > { %v390_v18 = vpop.permute.xlu1 %389  ;;  %v317_v19 = vpop.permute.xlu0 %316 }
  0x94   : > { %v334_v35 = vsel %vm250_vm9, %v332_v31, %v317_v19  ;;  %v404_v43 = vsel %vm245_vm6, %v402_v39, %v390_v18 }
  0x95   : > { %v336_v42 = vsel %vm2884_vm10, %v334_v35, 0  ;;  %v405_v51 = vsel %vm248_vm7, %v404_v43, 0 }
  0x96   : > { %v337_v49 = vsel %vm2913_vm12, %v336_v42, 0  ;;  %v406_v58 = vsel %vm250_vm9, %v405_v51, 0 }
  0x97   : > { %v283_v25 = vpop.permute.xlu1 %282  ;;  %v422_v26 = vpop.permute.xlu0 %421 }
  0x98   : > { %v435_v44 = vsel %vm2878_vm4, %v433_v41, %v422_v26  ;;  %v301_v50 = vsel %vm252_vm11, %v299_v47, %v283_v25  ;;  %vm2946_vm4 = vcmask 449536  }
  0x99   : > { %v436_v52 = vsel %vm2879_vm5, %v435_v44, 0  ;;  %v302_v57 = vsel %vm2913_vm12, %v301_v50, 0  ;;  %vm2885_vm5 = vcmask 457728  }
  0x9a   : > { %v437_v59 = vsel %vm248_vm7, %v436_v52, 0  ;;  %v303_v0 = vsel %vm257_vm14, %v302_v57, 0 }
  0x9b   : > { %v319_v36 = vpop.permute.xlu1 %318  ;;  %v358_v37 = vpop.permute.xlu0 %357 }
  0x9c   : > { %v339_v53 = vsel %vm257_vm14, %v337_v49, %v319_v36  ;;  %v375_v54 = vsel %vm2880_vm13, %v372_v48, %v358_v37  ;;  %vm264_vm13 = vcmask 588800  }
  0x9d   : > { %v341_v60 = vsel %vm2891_vm15, %v339_v53, 0  ;;  %v376_v61 = vsel %vm257_vm14, %v375_v54, 0 }
  0x9e   : > { %v342_v3 = vsel %vm2912_vm8, %v341_v60, 0  ;;  %v377_v4 = vsel %vm2946_vm4, %v376_v61, 0 }
  0x9f   : > { %v424_v45 = vpop.permute.xlu1 %423  ;;  %v392_v46 = vpop.permute.xlu0 %391 }
  0xa0   : > { %v439_v62 = vsel %vm250_vm9, %v437_v59, %v424_v45  ;;  %v408_v63 = vsel %vm252_vm11, %v406_v58, %v392_v46 }
  0xa1   : > { %v440_v7 = vsel %vm2884_vm10, %v439_v62, 0  ;;  %v409_v8 = vsel %vm2913_vm12, %v408_v63, 0  ;;  %vm2889_vm10 = vcmask 605184  }
  0xa2   : > { %v441_v14 = vsel %vm2913_vm12, %v440_v7, 0  ;;  %v410_v15 = vsel %vm257_vm14, %v409_v8, 0 }
  0xa3   : > { %v360_v55 = vpop.permute.xlu1 %359  ;;  %v287_v56 = vpop.permute.xlu0 %286 }
  0xa4   : > { %v305_v5 = vsel %vm2946_vm4, %v303_v0, %v287_v56  ;;  %v380_v9 = vsel %vm2885_vm5, %v377_v4, %v360_v55  ;;  %vm2910_vm5 = vcmask 736256  }
  0xa5   : > { %v306_v11 = vsel %vm2912_vm8, %v305_v5, 0  ;;  %v381_v16 = vsel %vm264_vm13, %v380_v9, 0 }
  0xa6   : > { %v307_v20 = vsel %vm264_vm13, %v306_v11, 0  ;;  %v382_v21 = vsel %vm2911_vm2, %v381_v16, 0 }
  0xa7   : > { %v396_v1 = vpop.permute.xlu1 %395  ;;  %v321_v2 = vpop.permute.xlu0 %320 }
  0xa8   : > { %v344_v10 = vsel %vm264_vm13, %v342_v3, %v321_v2  ;;  %v412_v18 = vsel %vm2946_vm4, %v410_v15, %v396_v1 }
  0xa9   : > { %v346_v17 = vsel %vm2890_vm3, %v344_v10, 0  ;;  %v413_v26 = vsel %vm2912_vm8, %v412_v18, 0  ;;  %v229_v18 = vld [vmem:[%s2873_s2] sm:$0xff] }
  0xaa   : > { %v347_v22 = vsel %vm2892_vm1, %v346_v17, 0  ;;  %v414_v32 = vsel %vm264_vm13, %v413_v26, 0 }
  0xab   : > { %v289_v12 = vpop.permute.xlu1 %288  ;;  %v426_v13 = vpop.permute.xlu0 %425 }
  0xac   : > { %v443_v19 = vsel %vm257_vm14, %v441_v14, %v426_v13  ;;  %v309_v23 = vsel %vm2911_vm2, %v307_v20, %v289_v12 }
  0xad   : > { %v444_v27 = vsel %vm2891_vm15, %v443_v19, 0  ;;  %v310_v31 = vsel %vm2892_vm1, %v309_v23, 0  ;;  %vm2944_vm15 = vcmask 883712  }
  0xae   : > { %v445_v33 = vsel %vm2912_vm8, %v444_v27, 0  ;;  %v311_v39 = vsel %vm2910_vm5, %v310_v31, 0 }
  0xaf   : > { %v323_v24 = vpop.permute.xlu1 %322  ;;  %v362_v25 = vpop.permute.xlu0 %361 }
  0xb0   : > { %v385_v28 = vsel %vm2889_vm10, %v382_v21, %v362_v25  ;;  %v349_v29 = vsel %vm2910_vm5, %v347_v22, %v323_v24  ;;  %vm2945_vm10 = vcmask 744448  }
  0xb1   : > { %456 = vrot.lane.b32.xlu1 %v349_v29, %s2887_s23  ;;  %v386_v30 = vsel %vm2910_vm5, %v385_v28, 0  ;;  %s2894_s23 = smov 12  }
  0xb2   : > { %459 = vrot.lane.b32.xlu0 %v386_v30, %s1955_s25 }
  0xb3   : > { %v428_v34 = vpop.permute.xlu1 %427  ;;  %v398_v35 = vpop.permute.xlu0 %397 }
  0xb4   : > { %v447_v36 = vsel %vm264_vm13, %v445_v33, %v428_v34  ;;  %v416_v37 = vsel %vm2911_vm2, %v414_v32, %v398_v35 }
  0xb5   : > { %v448_v38 = vsel %vm2890_vm3, %v447_v36, 0  ;;  %v417_v40 = vsel %vm2892_vm1, %v416_v37, 0  ;;  %vm2895_vm3 = vcmask 875520  }
  0xb6   : > { %v449_v41 = vsel %vm2892_vm1, %v448_v38, 0  ;;  %453 = vrot.lane.b32.xlu0 %v311_v39, %s1978_s20  ;;  %v418_v42 = vsel %vm2910_vm5, %v417_v40, 0 }
  0xb7   : > { %462 = vrot.lane.b32.xlu1 %v418_v42, %s2894_s23  ;;  %v430_v43 = vpop.permute.xlu0 %429  ;;  %v234_v45 = vpop.permute.xlu1 %233  ;;  %s1982_s23 = smov 92  }
  0xb8   : > { %v451_v44 = vsel %vm2910_vm5, %v449_v41, %v430_v43  ;;  %v247_v46 = vsel %vm245_vm6, 0, %v234_v45 }
  0xb9   : > { %v249_v47 = vsel %vm248_vm7, %v247_v46, 0 }
  0xba   : > { %465 = vrot.lane.b32.xlu0 %v451_v44, %s2893_s21  ;;  %v251_v48 = vsel %vm250_vm9, %v249_v47, 0  ;;  %s2931_s21 = smov 90  }
  0xbb   : > { %v236_v49 = vpop.permute.xlu0 %235  ;;  %v238_v53 = vpop.permute.xlu1 %237 }
  0xbc   : > { %v254_v50 = vsel %vm252_vm11, %v251_v48, %v236_v49 }
  0xbd   : > { %v256_v51 = vsel %vm2913_vm12, %v254_v50, 0  ;;  %vm2914_vm12 = vcmask 1039360  }
  0xbe   : > { %v258_v52 = vsel %vm257_vm14, %v256_v51, 0 }
  0xbf   : > { %v261_v54 = vsel %vm2946_vm4, %v258_v52, %v238_v53  ;;  %v240_v57 = vpop.permute.xlu0 %239  ;;  %v242_v58 = vpop.permute.xlu1 %241  ;;  %vm2948_vm4 = vcmask 818176  }
  0xc0   : > { %v263_v55 = vsel %vm2912_vm8, %v261_v54, 0 }
  0xc1   : > { %v265_v56 = vsel %vm264_vm13, %v263_v55, 0 }
  0xc2   : > { %v268_v59 = vsel %vm2911_vm2, %v265_v56, %v240_v57  ;;  %vm2939_vm2 = vcmask 900096  }
  0xc3   : > { %v270_v60 = vsel %vm2892_vm1, %v268_v59, 0  ;;  %v2182_v61 = vpop.permute.xlu1 %468  ;;  %vm2899_vm1 = vcmask 400384  }
  0xc4   : > { %v272_v62 = vsel %vm2910_vm5, %v270_v60, 0 }
  0xc5   : > { %v275_v0 = vsel %vm2945_vm10, %v272_v62, %v242_v58 }
  0xc6   : > { %v277_v2 = vsel %vm2895_vm3, %v275_v0, 0  ;;  %vm2898_vm3 = vcmask 662528  }
 0x123   : > { %v457_v1 = vpop.permute.xlu1 %456 }
 0x124   : > { %v460_v63 = vpop.permute.xlu0 %459 }
 0x125   : > { %v2198_v7 = vsel %vm2899_vm1, %v457_v1, %v460_v63  ;;  %vm2908_vm1 = vcmask 842752  }
 0x126   : > { %v494_v13 = vrot.slane %v2198_v7, 4 }
 0x128   : > { %v454_v3 = vpop.permute.xlu0 %453 }
 0x129   : > { %v2188_v4 = vsel %vm2944_vm15, %v277_v2, %v454_v3  ;;  %v2191_v5 = vsel %vm2912_vm8, %v454_v3, %v457_v1  ;;  %v463_v10 = vpop.permute.xlu1 %462  ;;  %vm2940_vm8 = vcmask 1031168  }
 0x12a   : > { %604 = vrot.lane.b32.xlu1 %v2191_v5, %s2931_s21  ;;  %602 = vrot.lane.b32.xlu0 %v2188_v4, %s2931_s21  ;;  %v492_v14 = vrot.slane %v2188_v4, 4  ;;  %v493_v16 = vrot.slane %v2191_v5, 4 }
 0x12c   : > { %v466_v8 = vpop.permute.xlu0 %465 }
 0x12d   : > { %v2210_v9 = vsel %vm2898_vm3, %v466_v8, %v2182_v61  ;;  %vm2909_vm3 = vcmask 97280  }
 0x12e   : > { %574 = vrot.lane.b32.xlu1 %v2191_v5, %s1982_s23  ;;  %606 = vrot.lane.b32.xlu0 %v2198_v7, %s2931_s21  ;;  %v480_v11 = vsel %vm2909_vm3, %v460_v63, %v463_v10  ;;  %v496_v15 = vrot.slane %v2210_v9, 4  ;;  %vm2942_vm3 = vcmask 752640  }
 0x12f   : > { %v2230_v12 = vsel %vm2908_vm1, %v480_v11, %v466_v8  ;;  %vm2943_vm1 = vcmask 1043456  }
 0x130   : > { %v495_v17 = vrot.slane %v2230_v12, 4 }
 0x132   : > { %572 = vrot.lane.b32.xlu1 %v2188_v4, %s1982_s23  ;;  %576 = vrot.lane.b32.xlu0 %v2198_v7, %s1982_s23 }
 0x136   : > { %544 = vrot.lane.b32.xlu1 %v2191_v5, %s2901_s22  ;;  %610 = vrot.lane.b32.xlu0 %v2210_v9, %s2931_s21 }
 0x13a   : > { %542 = vrot.lane.b32.xlu1 %v2188_v4, %s2901_s22  ;;  %580 = vrot.lane.b32.xlu0 %v2210_v9, %s1982_s23 }
 0x13e   : > { %514 = vrot.lane.b32.xlu1 %v2191_v5, %s2920_s16  ;;  %546 = vrot.lane.b32.xlu0 %v2198_v7, %s2901_s22 }
 0x142   : > { %512 = vrot.lane.b32.xlu1 %v2188_v4, %s2920_s16  ;;  %550 = vrot.lane.b32.xlu0 %v2210_v9, %s2901_s22 }
 0x146   : > { %516 = vrot.lane.b32.xlu0 %v2198_v7, %s2920_s16  ;;  %608 = vrot.lane.b32.xlu1 %v2230_v12, %s2931_s21 }
 0x14a   : > { %520 = vrot.lane.b32.xlu0 %v2210_v9, %s2920_s16  ;;  %578 = vrot.lane.b32.xlu1 %v2230_v12, %s1982_s23 }
 0x14e   : > { %591 = vrot.lane.b32.xlu0 %v494_v13, %s2917_s17  ;;  %548 = vrot.lane.b32.xlu1 %v2230_v12, %s2901_s22  ;;  %s2929_s22 = smov 110  }
 0x152   : > { %587 = vrot.lane.b32.xlu0 %v492_v14, %s2917_s17  ;;  %518 = vrot.lane.b32.xlu1 %v2230_v12, %s2920_s16 }
 0x156   : > { %595 = vrot.lane.b32.xlu0 %v496_v15, %s2917_s17  ;;  %589 = vrot.lane.b32.xlu1 %v493_v16, %s2917_s17 }
 0x15a   : > { %561 = vrot.lane.b32.xlu0 %v494_v13, %s1978_s20  ;;  %559 = vrot.lane.b32.xlu1 %v493_v16, %s1978_s20 }
 0x15e   : > { %557 = vrot.lane.b32.xlu0 %v492_v14, %s1978_s20  ;;  %529 = vrot.lane.b32.xlu1 %v493_v16, %s2929_s22 }
 0x162   : > { %565 = vrot.lane.b32.xlu0 %v496_v15, %s1978_s20  ;;  %499 = vrot.lane.b32.xlu1 %v493_v16, %s2915_s15 }
 0x166   : > { %531 = vrot.lane.b32.xlu0 %v494_v13, %s2929_s22  ;;  %497 = vrot.lane.b32.xlu1 %v492_v14, %s2915_s15 }
 0x16a   : > { %527 = vrot.lane.b32.xlu0 %v492_v14, %s2929_s22  ;;  %593 = vrot.lane.b32.xlu1 %v495_v17, %s2917_s17  ;;  %s2923_s17 = smov 94  }
 0x16e   : > { %535 = vrot.lane.b32.xlu0 %v496_v15, %s2929_s22  ;;  %563 = vrot.lane.b32.xlu1 %v495_v17, %s1978_s20 }
 0x172   : > { %501 = vrot.lane.b32.xlu0 %v494_v13, %s2915_s15  ;;  %533 = vrot.lane.b32.xlu1 %v495_v17, %s2929_s22 }
 0x176   : > { %503 = vrot.lane.b32.xlu0 %v495_v17, %s2915_s15  ;;  %505 = vrot.lane.b32.xlu1 %v496_v15, %s2915_s15  ;;  %s2928_s15 = smov 124  }
 0x17a   : > { %695 = vperm.xlu0 %1901, %v229_v18  }
 0x19c   : > { %v605_v19 = vpop.permute.xlu1 %604  ;;  %v603_v20 = vpop.permute.xlu0 %602 }
 0x19d   : > { %v613_v21 = vsel %vm2910_vm5, %v603_v20, %v605_v19 }
 0x19e   : > { %v702_v25 = vsel %vm2943_vm1, %v613_v21, 0 }
 0x1a0   : > { %v575_v22 = vpop.permute.xlu1 %574  ;;  %v607_v23 = vpop.permute.xlu0 %606 }
 0x1a1   : > { %v614_v24 = vsel %vm2910_vm5, %v605_v19, %v607_v23 }
 0x1a2   : > { %1779 = vmatprep.subr.msk.bf16.mxu0 %vm2943_vm1, %v614_v24 }
 0x1a3   : > { %723 = vmatpush1.bf16.msra.mxu0 %v702_v25 }
 0x1a4   : > { %v573_v26 = vpop.permute.xlu1 %572  ;;  %v577_v27 = vpop.permute.xlu0 %576 }
 0x1a5   : > { %v583_v49 = vsel %vm2942_vm3, %v573_v26, %v575_v22  ;;  %v584_v50 = vsel %vm2942_vm3, %v575_v22, %v577_v27 }
 0x1a8   : > { %v545_v28 = vpop.permute.xlu1 %544  ;;  %v2276_v29 = vpop.permute.xlu0 %610 }
 0x1ac   : > { %v543_v30 = vpop.permute.xlu1 %542  ;;  %v2278_v31 = vpop.permute.xlu0 %580 }
 0x1b0   : > { %v515_v32 = vpop.permute.xlu1 %514  ;;  %v2280_v33 = vpop.permute.xlu0 %546 }
 0x1b4   : > { %v513_v34 = vpop.permute.xlu1 %512  ;;  %v2282_v35 = vpop.permute.xlu0 %550 }
 0x1b5   : > { %v523_v15 = vsel %vm2940_vm8, %v513_v34, %v515_v32 }
 0x1b8   : > { %v609_v36 = vpop.permute.xlu1 %608  ;;  %v2284_v37 = vpop.permute.xlu0 %516 }
 0x1b9   : > { %v616_v38 = vsel %vm2910_vm5, %v609_v36, %v2276_v29  ;;  %v615_v39 = vsel %vm2910_vm5, %v607_v23, %v609_v36  ;;  %vm2941_vm5 = vcmask 891904   ;;  %v524_v11 = vsel %vm2940_vm8, %v515_v32, %v2284_v37 }
 0x1ba   : > { %1781 = vmatprep.subr.msk.bf16.mxu1 %vm2943_vm1, %v616_v38  ;;  %v708_v40 = vsel %vm2943_vm1, %v615_v39, 0  ;;  %v554_v57 = vsel %vm2941_vm5, %v545_v28, %v2280_v33  ;;  %v553_v63 = vsel %vm2941_vm5, %v543_v30, %v545_v28 }
 0x1bb   : > { %764 = vmatpush1.bf16.msra.mxu1 %v708_v40 }
 0x1bc   : > { %v579_v41 = vpop.permute.xlu1 %578  ;;  %v2291_v42 = vpop.permute.xlu0 %520 }
 0x1bd   : > { %v585_v16 = vsel %vm2942_vm3, %v577_v27, %v579_v41  ;;  %v586_v19 = vsel %vm2942_vm3, %v579_v41, %v2278_v31  ;;  %vm2950_vm3 = vcmask 785408  }
 0x1c0   : > { %v549_v43 = vpop.permute.xlu1 %548  ;;  %v592_v44 = vpop.permute.xlu0 %591 }
 0x1c1   : > { %v555_v28 = vsel %vm2941_vm5, %v2280_v33, %v549_v43  ;;  %v556_v30 = vsel %vm2941_vm5, %v549_v43, %v2282_v35  ;;  %vm2951_vm5 = vcmask 654336  }
 0x1c4   : > { %v2293_v45 = vpop.permute.xlu1 %518  ;;  %v588_v46 = vpop.permute.xlu0 %587 }
 0x1c5   : > { %v525_v39 = vsel %vm2940_vm8, %v2284_v37, %v2293_v45  ;;  %v526_v43 = vsel %vm2940_vm8, %v2293_v45, %v2291_v42  ;;  %vm2953_vm8 = vcmask 523264  }
 0x1c8   : > { %v590_v47 = vpop.permute.xlu1 %589  ;;  %v2295_v48 = vpop.permute.xlu0 %595 }
 0x1c9   : > { %v598_v51 = vsel %vm2945_vm10, %v588_v46, %v590_v47  ;;  %v599_v52 = vsel %vm2945_vm10, %v590_v47, %v592_v44 }
 0x1ca   : > { %v679_v53 = vsel %vm2943_vm1, %v584_v50, %v599_v52  ;;  %v675_v54 = vsel %vm2943_vm1, %v583_v49, %v598_v51 }
 0x1cb   : > { %724 = vmatprep.subr.bf16.mxu0 %v679_v53  ;;  %v228_v53 = vld [vmem:[%s2872_s1] sm:$0xf] }
 0x1cc   : > { %v560_v55 = vpop.permute.xlu1 %559  ;;  %725 = vmatpush1.bf16.msra.mxu0 %v675_v54  ;;  %v562_v56 = vpop.permute.xlu0 %561 }
 0x1cd   : > { %v569_v58 = vsel %vm2944_vm15, %v560_v55, %v562_v56 }
 0x1ce   : > { %v659_v59 = vsel %vm2943_vm1, %v554_v57, %v569_v58  ;;  %v714_v57 = vsel %vm2943_vm1, %v2276_v29, 0 }
 0x1cf   : > { %726 = vmatprep.subr.bf16.mxu0 %v659_v59 }
 0x1d0   : > { %v530_v60 = vpop.permute.xlu1 %529  ;;  %v558_v62 = vpop.permute.xlu0 %557 }
 0x1d1   : > { %v568_v0 = vsel %vm2944_vm15, %v558_v62, %v560_v55  ;;  %v1988_v55 = vmov 0.0  }
 0x1d2   : > { %v655_v1 = vsel %vm2943_vm1, %v553_v63, %v568_v0 }
 0x1d3   : > { %727 = vmatpush1.bf16.msra.mxu0 %v655_v1 }
 0x1d4   : > { %v500_v2 = vpop.permute.xlu1 %499  ;;  %v2310_v3 = vpop.permute.xlu0 %565 }
 0x1d8   : > { %v498_v8 = vpop.permute.xlu1 %497  ;;  %v532_v10 = vpop.permute.xlu0 %531 }
 0x1d9   : > { %v539_v13 = vsel %vm2939_vm2, %v530_v60, %v532_v10  ;;  %v508_v40 = vsel %vm2914_vm12, %v498_v8, %v500_v2 }
 0x1da   : > { %v639_v14 = vsel %vm2943_vm1, %v524_v11, %v539_v13  ;;  %v619_v51 = vsel %vm2943_vm1, %v2188_v4, %v508_v40 }
 0x1db   : > { %728 = vmatprep.subr.bf16.mxu0 %v639_v14 }
 0x1dc   : > { %v594_v17 = vpop.permute.xlu1 %593  ;;  %v528_v18 = vpop.permute.xlu0 %527 }
 0x1dd   : > { %v600_v20 = vsel %vm2945_vm10, %v592_v44, %v594_v17  ;;  %v601_v21 = vsel %vm2945_vm10, %v594_v17, %v2295_v48  ;;  %v538_v22 = vsel %vm2939_vm2, %v528_v18, %v530_v60  ;;  %vm2947_vm10 = vcmask 703488  }
 0x1de   : > { %v635_v23 = vsel %vm2943_vm1, %v523_v15, %v538_v22  ;;  %v687_v24 = vsel %vm2943_vm1, %v586_v19, %v601_v21  ;;  %v683_v25 = vsel %vm2943_vm1, %v585_v16, %v600_v20 }
 0x1df   : > { %729 = vmatpush1.bf16.msra.mxu0 %v635_v23  ;;  %765 = vmatprep.subr.bf16.mxu1 %v687_v24 }
 0x1e0   : > { %v564_v26 = vpop.permute.xlu1 %563  ;;  %766 = vmatpush1.bf16.msra.mxu1 %v683_v25  ;;  %v536_v27 = vpop.permute.xlu0 %535 }
 0x1e1   : > { %v570_v32 = vsel %vm2944_vm15, %v562_v56, %v564_v26  ;;  %v571_v34 = vsel %vm2944_vm15, %v564_v26, %v2310_v3  ;;  %v651_v29 = vsel %vm2943_vm1, %v2291_v42, %v536_v27  ;;  %vm2949_vm15 = vcmask 916480  }
 0x1e2   : > { %v667_v36 = vsel %vm2943_vm1, %v556_v30, %v571_v34  ;;  %v663_v38 = vsel %vm2943_vm1, %v555_v28, %v570_v32 }
 0x1e3   : > { %767 = vmatprep.subr.bf16.mxu1 %v667_v36 }
 0x1e4   : > { %v534_v33 = vpop.permute.xlu1 %533  ;;  %768 = vmatpush1.bf16.msra.mxu1 %v663_v38  ;;  %v502_v41 = vpop.permute.xlu0 %501 }
 0x1e5   : > { %v540_v44 = vsel %vm2939_vm2, %v532_v10, %v534_v33  ;;  %v541_v46 = vsel %vm2939_vm2, %v534_v33, %v536_v27  ;;  %v509_v47 = vsel %vm2914_vm12, %v500_v2, %v502_v41  ;;  %vm2954_vm2 = vcmask 392192  }
 0x1e6   : > { %v622_v49 = vsel %vm2943_vm1, %v2191_v5, %v509_v47  ;;  %v647_v37 = vsel %vm2943_vm1, %v526_v43, %v541_v46  ;;  %v643_v50 = vsel %vm2943_vm1, %v525_v39, %v540_v44 }
 0x1e7   : > { %730 = vmatprep.subr.bf16.mxu0 %v622_v49  ;;  %769 = vmatprep.subr.bf16.mxu1 %v647_v37 }
 0x1e8   : > { %v506_v52 = vpop.permute.xlu1 %505  ;;  %731 = vmatpush1.bf16.msra.mxu0 %v619_v51  ;;  %770 = vmatpush1.bf16.msra.mxu1 %v643_v50  ;;  %v504_v45 = vpop.permute.xlu0 %503 }
 0x1e9   : > { %v510_v54 = vsel %vm2914_vm12, %v502_v41, %v504_v45  ;;  %v511_v5 = vsel %vm2914_vm12, %v504_v45, %v506_v52  ;;  %1809 = vmatprep.subr.bf16.mxu0 %v1988_v55  ;;  %vm2938_vm12 = vmmov 0  }
 0x1ea   : > { %v628_v56 = vsel %vm2943_vm1, %v2230_v12, %v511_v5  ;;  %v625_v4 = vsel %vm2943_vm1, %v2198_v7, %v510_v54  ;;  %v691_v7 = vsel %vm2943_vm1, %v2278_v31, %v2295_v48  ;;  %v671_v12 = vsel %vm2943_vm1, %v2282_v35, %v2310_v3 }
 0x1eb   : > { %1780 = vmatmul.mubr.msk.bf16.vlgmr.msra.gmra.mxu0 %vm264_vm13, %v228_v53  ;;  %771 = vmatprep.subr.bf16.mxu1 %v628_v56  ;;  %v631_v31 = vsel %vm2943_vm1, %v2210_v9, %v506_v52  ;;  %vm2952_vm1 = vcmask 932864  }
 0x1ec   : > { %772 = vmatpush1.bf16.msra.mxu1 %v625_v4  ;;  %1810 = vmatpush3.bf16.msra.mxu0 %v714_v57 }
 0x1ed   : > { %1811 = vmatprep.subr.bf16.mxu0 %v1988_v55  ;;  %1819 = vmatprep.mubr.msk.bf16.mxu0 %vm2938_vm12, %v1988_v55  ;;  %vm2955_vm12 = vcmask 261120  }
 0x1ef   : > { %1782 = vmatmul.mubr.msk.bf16.vlgmr.msra.gmra.mxu1 %vm264_vm13, %v228_v53 }
 0x1f0   : > { %1812 = vmatpush3.bf16.msra.mxu0 %v691_v7  ;;  %1461 = vmatprep.mubr.bf16.mxu1 %v1964_v6 }
 0x1f1   : > { %1813 = vmatprep.subr.bf16.mxu0 %v1988_v55 }
 0x1f4   : > { %1814 = vmatpush3.bf16.msra.mxu0 %v671_v12 }
 0x1f5   : > { %1815 = vmatprep.subr.bf16.mxu0 %v1988_v55  ;;  %v696_v48 = vpop.permute.xlu0 %695 }
 0x1f8   : > { %1816 = vmatpush3.bf16.msra.mxu0 %v651_v29 }
 0x1f9   : > { %1817 = vmatprep.subr.bf16.mxu0 %v1988_v55 }
 0x1fc   : > { %1818 = vmatpush3.bf16.msra.mxu0 %v631_v31 }
 0x1ff   : > { %1820 = vmatmul.mubr.msk.bf16.vlgmr.msra.gmra.mxu0 %vm264_vm13, %v228_v53 }
 0x200   : > { %1502 = vmatprep.mubr.bf16.mxu0 %v1964_v6 }
 0x2ab   : > { %v750_v58 = vpop.f32.mrf.mxu0 }
 0x2ac   : > { %v2385_v35 = vadd.f32 %v750_v58, %v696_v48 }
 0x2ad   : > { %v752_v59 = vpop.f32.mrf.mxu0 }
 0x2ae   : > { %848 = vrot.lane.b32.xlu0 %v2385_v35, %s2919_s10  ;;  %839 = vrot.lane.b32.xlu1 %v2385_v35, %s2920_s16  ;;  %s2927_s10 = smov 122   ;;  %s2925_s16 = smov 118   ;;  %v753_v8 = vadd.f32 %v752_v59, %v696_v48 }
 0x2af   : > { %v754_v42 = vpop.f32.mrf.mxu0  ;;  %v791_v60 = vpop.f32.mrf.mxu1 }
 0x2b0   : > { %v792_v63 = vadd.f32 %v791_v60, %v696_v48  ;;  %v1907_v14 = vpack.i.bf16 %v753_v8, %v2385_v35 }
 0x2b1   : > { %v755_v9 = vpop.f32.mrf.mxu0  ;;  %v793_v62 = vpop.f32.mrf.mxu1 }
 0x2b2   : > { %854 = vrot.lane.b32.xlu0 %v2385_v35, %s2922_s12  ;;  %842 = vrot.lane.b32.xlu1 %v2385_v35, %s2928_s15  ;;  %s2924_s12 = smov 88   ;;  %v1902_v11 = vpack.i.bf16 %v792_v63, %v753_v8  ;;  %v794_v13 = vadd.f32 %v793_v62, %v696_v48  ;;  %s2937_s15 = smov 84  }
 0x2b3   : > { %v795_v6 = vpop.f32.mrf.mxu1 }
 0x2b4   : > { %v1912_v15 = vpack.i.bf16 %v794_v13, %v792_v63 }
 0x2b5   : > { %v796_v0 = vpop.f32.mrf.mxu1 }
 0x2b6   : > { %917 = vrot.lane.b32.xlu0 %v792_v63, %s2923_s17  ;;  %845 = vrot.lane.b32.xlu1 %v2385_v35, %s2927_s10  ;;  %s2926_s17 = smov 112   ;;  %s2936_s10 = smov 78  }
 0x2ba   : > { %923 = vrot.lane.b32.xlu0 %v792_v63, %s2931_s21  ;;  %851 = vrot.lane.b32.xlu1 %v2385_v35, %s2925_s16  ;;  %s2934_s16 = smov 82   ;;  %s2004_s21 = smov 80  }
 0x2be   : > { %926 = vrot.lane.b32.xlu0 %v792_v63, %s2924_s12  ;;  %914 = vrot.lane.b32.xlu1 %v792_v63, %s1957_s27  ;;  %s2933_s12 = smov 114  }
 0x2bf   : > { %v832_v1 = vpop.f32.mrf.mxu0 }
 0x2c0   : > { %v833_v16 = vadd.f32 %v832_v1, %v696_v48 }
 0x2c1   : > { %v1821_v2 = vpop.f32.mrf.mxu0 }
 0x2c2   : > { %891 = vrot.lane.b32.xlu0 %v792_v63, %s1956_s26  ;;  %920 = vrot.lane.b32.xlu1 %v792_v63, %s1982_s23  ;;  %v1917_v17 = vpack.i.bf16 %v833_v16, %v794_v13 }
 0x2c3   : > { %v835_v3 = vpop.f32.mrf.mxu0 }
 0x2c5   : > { %v1822_v10 = vpop.f32.mrf.mxu0 }
 0x2c6   : > { %868 = vrot.lane.b32.xlu0 %v753_v8, %s2929_s22  ;;  %865 = vrot.lane.b32.xlu1 %v753_v8, %s2926_s17  ;;  %s2935_s17 = smov 86   ;;  %s2003_s22 = smov 74  }
 0x2ca   : > { %871 = vrot.lane.b32.xlu0 %v753_v8, %s1978_s20  ;;  %877 = vrot.lane.b32.xlu1 %v753_v8, %s1967_s11 }
 0x2ce   : > { %874 = vrot.lane.b32.xlu0 %v753_v8, %s1969_s13  ;;  %1903 = vrot.lane.b32.xlu1 %v1902_v11, %s1960_s30 }
 0x2d2   : > { %880 = vrot.lane.b32.xlu0 %v753_v8, %s1962_s7  ;;  %1908 = vrot.lane.b32.xlu1 %v1907_v14, %s2933_s12  ;;  %s2005_s12 = smov 70  }
 0x2d6   : > { %940 = vrot.lane.b32.xlu0 %v794_v13, %s2934_s16  ;;  %1913 = vrot.lane.b32.xlu1 %v1912_v15, %s2935_s17  ;;  %s2006_s16 = smov 76   ;;  %s2007_s17 = smov 66  }
 0x2da   : > { %946 = vrot.lane.b32.xlu0 %v794_v13, %s2936_s10  ;;  %937 = vrot.lane.b32.xlu1 %v794_v13, %s2937_s15  ;;  %s2008_s10 = smov 72   ;;  %s2009_s15 = smov 68  }
 0x2de   : > { %952 = vrot.lane.b32.xlu0 %v794_v13, %s2003_s22  ;;  %943 = vrot.lane.b32.xlu1 %v794_v13, %s2004_s21 }
 0x2e2   : > { %962 = vrot.lane.b32.xlu0 %v833_v16, %s2005_s12  ;;  %949 = vrot.lane.b32.xlu1 %v794_v13, %s2006_s16 }
 0x2e6   : > { %968 = vrot.lane.b32.xlu0 %v833_v16, %s2007_s17  ;;  %1918 = vrot.lane.b32.xlu1 %v1917_v17, %s2008_s10 }
 0x2ea   : > { %965 = vrot.lane.b32.xlu1 %v833_v16, %s2009_s15 }
 0x320   : > { %v849_v18 = vpop.permute.xlu0 %848  ;;  %v840_v19 = vpop.permute.xlu1 %839 }
 0x321   : > { %v894_v39 = vsel %vm324_vm0, %v2385_v35, %v840_v19 }
 0x324   : > { %v855_v20 = vpop.permute.xlu0 %854  ;;  %v843_v21 = vpop.permute.xlu1 %842 }
 0x325   : > { %v896_v40 = vsel %vm2955_vm12, %v894_v39, %v843_v21 }
 0x328   : > { %v918_v22 = vpop.permute.xlu0 %917  ;;  %v846_v23 = vpop.permute.xlu1 %845 }
 0x329   : > { %v898_v33 = vsel %vm2954_vm2, %v896_v40, %v846_v23 }
 0x32a   : > { %v900_v44 = vsel %vm2953_vm8, %v898_v33, %v849_v18 }
 0x32c   : > { %v924_v24 = vpop.permute.xlu0 %923  ;;  %v852_v25 = vpop.permute.xlu1 %851 }
 0x32d   : > { %v902_v46 = vsel %vm2951_vm5, %v900_v44, %v852_v25 }
 0x32e   : > { %v904_v45 = vsel %vm2950_vm3, %v902_v46, %v855_v20 }
 0x330   : > { %v927_v26 = vpop.permute.xlu0 %926  ;;  %v915_v27 = vpop.permute.xlu1 %914 }
 0x331   : > { %v971_v47 = vsel %vm324_vm0, %v915_v27, %v918_v22 }
 0x334   : > { %v892_v28 = vpop.permute.xlu0 %891  ;;  %v921_v30 = vpop.permute.xlu1 %920 }
 0x335   : > { %v972_v37 = vsel %vm2955_vm12, %v971_v47, %v921_v30 }
 0x336   : > { %v973_v56 = vsel %vm2954_vm2, %v972_v37, %v924_v24 }
 0x337   : > { %v974_v42 = vsel %vm2953_vm8, %v973_v56, %v927_v26 }
 0x338   : > { %v869_v32 = vpop.permute.xlu0 %868  ;;  %v866_v34 = vpop.permute.xlu1 %865 }
 0x339   : > { %v907_v52 = vsel %vm324_vm0, %v866_v34, %v869_v32 }
 0x33c   : > { %v872_v36 = vpop.permute.xlu0 %871  ;;  %v878_v38 = vpop.permute.xlu1 %877 }
 0x33d   : > { %v908_v53 = vsel %vm2955_vm12, %v907_v52, %v872_v36 }
 0x340   : > { %v1904_v41 = vpop.permute.xlu1 %1903  ;;  %v875_v43 = vpop.permute.xlu0 %874 }
 0x341   : > { %v909_v4 = vsel %vm2954_vm2, %v908_v53, %v875_v43  ;;  %v1906_v48 = vunpack.i.h.bf16 %v1904_v41  ;;  %v1905_v58 = vunpack.i.l.bf16 %v1904_v41 }
 0x342   : > { %v910_v35 = vsel %vm2953_vm8, %v909_v4, %v878_v38 }
 0x343   : > { %v889_v1 = vsel %vm2948_vm4, %v1905_v58, %v1906_v48  ;;  %vm2964_vm4 = vcmask 138240  }
 0x344   : > { %v1909_v49 = vpop.permute.xlu1 %1908  ;;  %v881_v54 = vpop.permute.xlu0 %880 }
 0x345   : > { %v1911_v50 = vunpack.i.h.bf16 %v1909_v49  ;;  %v1910_v51 = vunpack.i.l.bf16 %v1909_v49  ;;  %v911_v9 = vsel %vm2951_vm5, %v910_v35, %v881_v54 }
 0x346   : > { %v912_v3 = vsel %vm2950_vm3, %v911_v9, %v889_v1 }
 0x347   : > { %v863_v5 = vsel %vm2952_vm1, %v1910_v51, %v1911_v50  ;;  %v913_v13 = vsel %vm2949_vm15, %v912_v3, %v892_v28  ;;  %vm2968_vm1 = vcmask 162816  }
 0x348   : > { %v906_v57 = vsel %vm2949_vm15, %v904_v45, %v863_v5  ;;  %v1914_v7 = vpop.permute.xlu1 %1913  ;;  %v941_v63 = vpop.permute.xlu0 %940  ;;  %v986_v16 = vmax.f32 %v913_v13, 0.0 }
 0x349   : > { %v985_v12 = vmax.f32 %v906_v57, 0.0  ;;  %v1916_v29 = vunpack.i.h.bf16 %v1914_v7  ;;  %v1915_v31 = vunpack.i.l.bf16 %v1914_v7 }
 0x34a   : > { %v990_v19 = vpack.c.bf16 %v986_v16, %v986_v16 }
 0x34b   : > { %v2441_v59 = vpack.c.bf16 %v985_v12, %v985_v12  ;;  %v935_v60 = vsel %vm2947_vm10, %v1915_v31, %v1916_v29  ;;  %vm2963_vm10 = vcmask 7168  }
 0x34c   : > { %v938_v62 = vpop.permute.xlu1 %937  ;;  %v975_v6 = vsel %vm2951_vm5, %v974_v42, %v935_v60  ;;  %v947_v14 = vpop.permute.xlu0 %946 }
 0x34d   : > { %v976_v0 = vsel %vm2950_vm3, %v975_v6, %v938_v62  ;;  %1029 = vrot.lane.b32.xlu0 %v2441_v59, %s1961_s6  ;;  %1025 = vrot.lane.b32.xlu1 %v2441_v59, %s1955_s25 }
 0x34e   : > { %v977_v2 = vsel %vm2949_vm15, %v976_v0, %v941_v63 }
 0x34f   : > { %v987_v8 = vmax.f32 %v977_v2, 0.0 }
 0x350   : > { %v944_v10 = vpop.permute.xlu1 %943  ;;  %v953_v20 = vpop.permute.xlu0 %952 }
 0x351   : > { %v991_v11 = vpack.c.bf16 %v987_v8, %v987_v8  ;;  %1027 = vrot.lane.b32.xlu1 %v2441_v59, %s1958_s28  ;;  %v978_v17 = vsel %vm324_vm0, %v944_v10, %v947_v14 }
 0x353   : > { %1092 = vrot.lane.b32.xlu0 %v991_v11, %s1959_s29  ;;  %s2957_s29 = smov 55  }
 0x354   : > { %v950_v15 = vpop.permute.xlu1 %949  ;;  %v963_v27 = vpop.permute.xlu0 %962 }
 0x355   : > { %1090 = vrot.lane.b32.xlu1 %v991_v11, %s1954_s24  ;;  %v979_v21 = vsel %vm2955_vm12, %v978_v17, %v950_v15  ;;  %s2956_s24 = smov 57  }
 0x356   : > { %v980_v25 = vsel %vm2954_vm2, %v979_v21, %v953_v20  ;;  %vm2984_vm2 = vcmask 138240  }
 0x357   : > { %1096 = vrot.lane.b32.xlu0 %v991_v11, %s1965_s9  ;;  %s2960_s9 = smov 23  }
 0x358   : > { %v1919_v18 = vpop.permute.xlu1 %1918  ;;  %v969_v34 = vpop.permute.xlu0 %968 }
 0x359   : > { %v1921_v22 = vunpack.i.h.bf16 %v1919_v18  ;;  %v1920_v23 = vunpack.i.l.bf16 %v1919_v18  ;;  %1094 = vrot.lane.b32.xlu1 %v991_v11, %s1963_s8  ;;  %s2958_s8 = smov 19  }
 0x35b   : > { %v960_v24 = vsel %vm264_vm13, %v1920_v23, %v1921_v22  ;;  %1056 = vrot.lane.b32.xlu0 %v990_v19, %s1957_s27 }
 0x35c   : > { %v981_v26 = vsel %vm2953_vm8, %v980_v25, %v960_v24  ;;  %v966_v28 = vpop.permute.xlu1 %965  ;;  %vm2979_vm8 = vcmask 7168  }
 0x35d   : > { %1098 = vrot.lane.b32.xlu1 %v991_v11, %s1970_s14  ;;  %v982_v30 = vsel %vm2951_vm5, %v981_v26, %v963_v27  ;;  %s2962_s14 = smov 27  }
 0x35e   : > { %v983_v32 = vsel %vm2950_vm3, %v982_v30, %v966_v28  ;;  %vm2966_vm3 = vcmask 146432  }
 0x35f   : > { %1058 = vrot.lane.b32.xlu0 %v990_v19, %s1956_s26  ;;  %v984_v36 = vsel %vm2949_vm15, %v983_v32, %v969_v34  ;;  %vm2965_vm15 = vcmask 15360   ;;  %vm2967_vm5 = vmmov %vm2966_vm3 }
 0x360   : > { %v988_v38 = vmax.f32 %v984_v36, 0.0 }
 0x361   : > { %1119 = vrot.lane.b32.xlu1 %v991_v11, %s1955_s25 }
 0x362   : > { %v992_v39 = vpack.c.bf16 %v988_v38, %v988_v38 }
 0x363   : > { %1062 = vrot.lane.b32.xlu0 %v990_v19, %s1962_s7 }
 0x365   : > { %1060 = vrot.lane.b32.xlu1 %v990_v19, %s1960_s30 }
 0x367   : > { %1034 = vrot.lane.b32.xlu0 %v990_v19, %s2956_s24 }
 0x369   : > { %1032 = vrot.lane.b32.xlu1 %v990_v19, %s2957_s29 }
 0x36b   : > { %1066 = vrot.lane.b32.xlu0 %v990_v19, %s1969_s13 }
 0x36d   : > { %1064 = vrot.lane.b32.xlu1 %v990_v19, %s1967_s11 }
 0x36f   : > { %1150 = vrot.lane.b32.xlu0 %v992_v39, %s1957_s27 }
 0x371   : > { %1121 = vrot.lane.b32.xlu1 %v991_v11, %s1958_s28  ;;  %s2959_s28 = smov 21  }
 0x373   : > { %1152 = vrot.lane.b32.xlu0 %v992_v39, %s1956_s26 }
 0x375   : > { %1123 = vrot.lane.b32.xlu1 %v991_v11, %s1961_s6  ;;  %s2961_s6 = smov 25  }
 0x377   : > { %1154 = vrot.lane.b32.xlu0 %v992_v39, %s1960_s30 }
 0x379   : > { %1126 = vrot.lane.b32.xlu1 %v992_v39, %s2957_s29  ;;  %s3011_s29 = smov 103  }
 0x37b   : > { %1156 = vrot.lane.b32.xlu0 %v992_v39, %s1962_s7 }
 0x37d   : > { %1128 = vrot.lane.b32.xlu1 %v992_v39, %s2956_s24  ;;  %s2992_s24 = smov 71  }
 0x37f   : > { %1158 = vrot.lane.b32.xlu0 %v992_v39, %s1967_s11 }
 0x381   : > { %1160 = vrot.lane.b32.xlu1 %v992_v39, %s1969_s13 }
 0x383   : > { %996 = vrot.lane.b32.xlu0 %v2441_v59, %s2958_s8  ;;  %s3020_s8 = smov 90  }
 0x385   : > { %998 = vrot.lane.b32.xlu1 %v2441_v59, %s2959_s28  ;;  %s3022_s28 = smov 109  }
 0x387   : > { %1000 = vrot.lane.b32.xlu0 %v2441_v59, %s2960_s9  ;;  %s3023_s9 = smov 126  }
 0x389   : > { %1002 = vrot.lane.b32.xlu1 %v2441_v59, %s2961_s6  ;;  %s3025_s6 = smov 91  }
 0x38b   : > { %1004 = vrot.lane.b32.xlu0 %v2441_v59, %s2962_s14  ;;  %s3026_s14 = smov 110  }
 0x3bf   : > { %v1026_v40 = vpop.permute.xlu1 %1025  ;;  %v1030_v33 = vpop.permute.xlu0 %1029 }
 0x3c0   : > { %v1037_v41 = vsel %vm2963_vm10, 0, %v1026_v40  ;;  %vm2972_vm10 = vcmask 449536  }
 0x3c1   : > { %v1038_v46 = vsel %vm2964_vm4, %v1037_v41, 0 }
 0x3c2   : > { %v1039_v37 = vsel %vm2966_vm3, %v1038_v46, 0  ;;  %vm2969_vm3 = vcmask 310272  }
 0x3c3   : > { %v1028_v43 = vpop.permute.xlu1 %1027 }
 0x3c4   : > { %v1041_v54 = vsel %vm245_vm6, %v1039_v37, %v1028_v43 }
 0x3c5   : > { %v1093_v44 = vpop.permute.xlu0 %1092  ;;  %v1042_v7 = vsel %vm248_vm7, %v1041_v54, 0 }
 0x3c6   : > { %v1043_v58 = vsel %vm250_vm9, %v1042_v7, 0 }
 0x3c7   : > { %v1091_v47 = vpop.permute.xlu1 %1090  ;;  %v1045_v62 = vsel %vm252_vm11, %v1043_v58, %v1030_v33 }
 0x3c8   : > { %v1101_v49 = vsel %vm2965_vm15, 0, %v1091_v47  ;;  %vm2973_vm15 = vcmask 433152  }
 0x3c9   : > { %v1102_v50 = vsel %vm2967_vm5, %v1101_v49, 0  ;;  %v1097_v51 = vpop.permute.xlu0 %1096  ;;  %v1046_v2 = vsel %vm2973_vm15, %v1045_v62, 0 }
 0x3ca   : > { %v1103_v52 = vsel %vm245_vm6, %v1102_v50, 0  ;;  %v1047_v13 = vsel %vm257_vm14, %v1046_v2, 0 }
 0x3cb   : > { %v1105_v45 = vsel %vm2968_vm1, %v1103_v52, %v1093_v44  ;;  %v1095_v53 = vpop.permute.xlu1 %1094  ;;  %vm2970_vm1 = vmmov %vm2967_vm5  ;;  %vm2971_vm5 = vcmask 277504  }
 0x3cc   : > { %v1106_v5 = vsel %vm250_vm9, %v1105_v45, 0 }
 0x3cd   : > { %v1107_v56 = vsel %vm252_vm11, %v1106_v5, 0  ;;  %v1057_v4 = vpop.permute.xlu0 %1056 }
 0x3ce   : > { %v1069_v57 = vsel %vm324_vm0, %v1057_v4, 0  ;;  %v1109_v29 = vsel %vm2969_vm3, %v1107_v56, %v1095_v53  ;;  %vm2974_vm3 = vcmask 457728  }
 0x3cf   : > { %v1099_v12 = vpop.permute.xlu1 %1098  ;;  %v1070_v31 = vsel %vm2964_vm4, %v1069_v57, 0  ;;  %v1110_v59 = vsel %vm257_vm14, %v1109_v29, 0  ;;  %vm2975_vm4 = vcmask 424960  }
 0x3d0   : > { %v1111_v6 = vsel %vm2972_vm10, %v1110_v59, 0 }
 0x3d1   : > { %v1059_v48 = vpop.permute.xlu0 %1058  ;;  %v1113_v3 = vsel %vm2974_vm3, %v1111_v6, %v1097_v51  ;;  %vm2981_vm3 = vcmask 596992  }
 0x3d2   : > { %v1072_v35 = vsel %vm2970_vm1, %v1070_v31, %v1059_v48  ;;  %vm2976_vm1 = vmmov %vm2973_vm15  ;;  %v1114_v16 = vsel %vm264_vm13, %v1113_v3, 0  ;;  %vm2980_vm15 = vcmask 580608  }
 0x3d3   : > { %v1120_v42 = vpop.permute.xlu1 %1119  ;;  %v1073_v60 = vsel %vm2971_vm5, %v1072_v35, 0  ;;  %vm2977_vm5 = vmmov %vm2972_vm10  ;;  %vm2978_vm10 = vcmask 572416   ;;  %v1115_v23 = vsel %vm2981_vm3, %v1114_v16, 0 }
 0x3d4   : > { %v1074_v63 = vsel %vm248_vm7, %v1073_v60, 0  ;;  %v1131_v19 = vsel %vm2979_vm8, 0, %v1120_v42  ;;  %vm2987_vm8 = vcmask 736256  }
 0x3d5   : > { %v1063_v9 = vpop.permute.xlu0 %1062  ;;  %v1132_v27 = vsel %vm2984_vm2, %v1131_v19, 0  ;;  %vm2991_vm2 = vmmov %vm2987_vm8 }
 0x3d7   : > { %v1061_v0 = vpop.permute.xlu1 %1060 }
 0x3d8   : > { %v1076_v1 = vsel %vm250_vm9, %v1074_v63, %v1061_v0 }
 0x3d9   : > { %v1077_v8 = vsel %vm2975_vm4, %v1076_v1, 0  ;;  %v1035_v10 = vpop.permute.xlu0 %1034  ;;  %vm2982_vm4 = vmmov %vm2980_vm15 }
 0x3da   : > { %v1078_v11 = vsel %vm2976_vm1, %v1077_v8, 0  ;;  %vm2983_vm1 = vmmov %vm2981_vm3  ;;  %vm2990_vm3 = vcmask 146432  }
 0x3db   : > { %v1033_v14 = vpop.permute.xlu1 %1032  ;;  %v1080_v15 = vsel %vm257_vm14, %v1078_v11, %v1063_v9  ;;  %v1133_v33 = vsel %vm2990_vm3, %v1132_v27, 0 }
 0x3dc   : > { %v1049_v17 = vsel %vm2977_vm5, %v1047_v13, %v1033_v14  ;;  %v1081_v18 = vsel %vm2978_vm10, %v1080_v15, 0  ;;  %vm2985_vm5 = vcmask 728064   ;;  %vm2986_vm10 = vcmask 719872  }
 0x3dd   : > { %v1050_v20 = vsel %vm2980_vm15, %v1049_v17, 0  ;;  %v1067_v21 = vpop.permute.xlu0 %1066  ;;  %v1082_v25 = vsel %vm2982_vm4, %v1081_v18, 0  ;;  %vm2988_vm15 = vcmask 605184   ;;  %vm2989_vm12 = vmmov %vm2985_vm5 }
 0x3de   : > { %v1051_v22 = vsel %vm264_vm13, %v1050_v20, 0  ;;  %v1117_v38 = vsel %vm2988_vm15, %v1115_v23, %v1099_v12  ;;  %vm2993_vm4 = vmmov %vm2991_vm2 }
 0x3df   : > { %v1065_v24 = vpop.permute.xlu1 %1064  ;;  %v1053_v26 = vsel %vm2983_vm1, %v1051_v22, %v1035_v10  ;;  %v1118_v46 = vsel %vm2993_vm4, %v1117_v38, 0  ;;  %vm2994_vm1 = vcmask 138240   ;;  %vm3002_vm4 = vcmask 572416  }
 0x3e0   : > { %v1084_v28 = vsel %vm264_vm13, %v1082_v25, %v1065_v24  ;;  %v1054_v30 = vsel %vm2985_vm5, %v1053_v26, 0  ;;  %vm2996_vm5 = vcmask 277504  }
 0x3e1   : > { %v1085_v32 = vsel %vm2986_vm10, %v1084_v28, 0  ;;  %v1151_v34 = vpop.permute.xlu0 %1150  ;;  %v1055_v36 = vsel %vm2987_vm8, %v1054_v30, 0  ;;  %vm2997_vm10 = vcmask 433152   ;;  %vm2998_vm8 = vcmask 424960  }
 0x3e2   : > { %v1086_v39 = vsel %vm2989_vm12, %v1085_v32, 0  ;;  %v1163_v40 = vsel %vm324_vm0, %v1151_v34, 0  ;;  %1184 = vrot.lane.b32.xlu1 %v1055_v36, %s1978_s20  ;;  %vm2995_vm12 = vmmov %vm2990_vm3  ;;  %vm3000_vm3 = vcmask 449536  }
 0x3e3   : > { %v1122_v41 = vpop.permute.xlu1 %1121  ;;  %v1088_v43 = vsel %vm2991_vm2, %v1086_v39, %v1067_v21  ;;  %v1164_v47 = vsel %vm2994_vm1, %v1163_v40, 0  ;;  %vm2999_vm15 = vmmov %vm2997_vm10  ;;  %vm3001_vm2 = vcmask 580608  }
 0x3e4   : > { %v1135_v44 = vsel %vm245_vm6, %v1133_v33, %v1122_v41  ;;  %1187 = vrot.lane.b32.xlu0 %v1088_v43, %s2992_s24  ;;  %vm3003_vm1 = vmmov %vm3001_vm2  ;;  %s3027_s24 = smov 127  }
 0x3e5   : > { %v1136_v49 = vsel %vm248_vm7, %v1135_v44, 0  ;;  %v1153_v37 = vpop.permute.xlu0 %1152 }
 0x3e6   : > { %v1137_v50 = vsel %vm250_vm9, %v1136_v49, 0  ;;  %v1166_v51 = vsel %vm2995_vm12, %v1164_v47, %v1153_v37  ;;  %1190 = vrot.lane.b32.xlu1 %v1118_v46, %s1955_s25  ;;  %vm3004_vm12 = vcmask 596992   ;;  %s3008_s25 = smov 12  }
 0x3e7   : > { %v1167_v52 = vsel %vm2996_vm5, %v1166_v51, 0  ;;  %v1124_v45 = vpop.permute.xlu1 %1123  ;;  %vm3005_vm5 = vcmask 728064  }
 0x3e8   : > { %v1168_v53 = vsel %vm248_vm7, %v1167_v52, 0  ;;  %v1139_v54 = vsel %vm252_vm11, %v1137_v50, %v1124_v45  ;;  %v994_v52 = vld [vmem:[%s2875_s4] sm:$0xff] }
 0x3e9   : > { %v1140_v5 = vsel %vm2997_vm10, %v1139_v54, 0  ;;  %v1155_v56 = vpop.permute.xlu0 %1154  ;;  %vm3006_vm10 = vcmask 736256  }
 0x3ea   : > { %v1141_v4 = vsel %vm257_vm14, %v1140_v5, 0  ;;  %v1170_v57 = vsel %vm250_vm9, %v1168_v53, %v1155_v56 }
 0x3eb   : > { %v1171_v7 = vsel %vm2998_vm8, %v1170_v57, 0  ;;  %v1127_v12 = vpop.permute.xlu1 %1126  ;;  %vm3007_vm8 = vcmask 719872  }
 0x3ec   : > { %v1172_v29 = vsel %vm2999_vm15, %v1171_v7, 0  ;;  %v1143_v31 = vsel %vm3000_vm3, %v1141_v4, %v1127_v12  ;;  %vm3009_vm15 = vmmov %vm3005_vm5 }
 0x3ed   : > { %v1144_v48 = vsel %vm3001_vm2, %v1143_v31, 0  ;;  %v1157_v58 = vpop.permute.xlu0 %1156  ;;  %vm3010_vm3 = vmmov %vm3006_vm10  ;;  %vm3012_vm2 = vcmask 433152  }
 0x3ee   : > { %v1145_v35 = vsel %vm264_vm13, %v1144_v48, 0  ;;  %v1174_v59 = vsel %vm257_vm14, %v1172_v29, %v1157_v58 }
 0x3ef   : > { %v1175_v42 = vsel %vm3002_vm4, %v1174_v59, 0  ;;  %v1129_v60 = vpop.permute.xlu1 %1128  ;;  %vm3013_vm4 = vcmask 449536  }
 0x3f0   : > { %v1176_v9 = vsel %vm3003_vm1, %v1175_v42, 0  ;;  %v1147_v62 = vsel %vm3004_vm12, %v1145_v35, %v1129_v60 }
 0x3f1   : > { %v1148_v6 = vsel %vm3005_vm5, %v1147_v62, 0  ;;  %v1159_v63 = vpop.permute.xlu0 %1158 }
 0x3f2   : > { %v1178_v0 = vsel %vm264_vm13, %v1176_v9, %v1159_v63  ;;  %v1149_v1 = vsel %vm3006_vm10, %v1148_v6, 0  ;;  %vm3024_vm10 = vmmov %vm3003_vm1 }
 0x3f3   : > { %v1179_v2 = vsel %vm3007_vm8, %v1178_v0, 0  ;;  %v1161_v3 = vpop.permute.xlu1 %1160  ;;  %1193 = vrot.lane.b32.xlu0 %v1149_v1, %s3008_s25  ;;  %vm3028_vm8 = vcmask 97280   ;;  %s3087_s25 = smov 122  }
 0x3f4   : > { %v1180_v8 = vsel %vm3009_vm15, %v1179_v2, 0  ;;  %vm3029_vm15 = vcmask 842752  }
 0x3f5   : > { %v1182_v10 = vsel %vm3010_vm3, %v1180_v8, %v1161_v3  ;;  %v997_v11 = vpop.permute.xlu0 %996 }
 0x3f6   : > { %1196 = vrot.lane.b32.xlu1 %v1182_v10, %s3011_s29  ;;  %v1007_v13 = vsel %vm245_vm6, 0, %v997_v11  ;;  %vm3014_vm6 = vmmov %vm3004_vm12  ;;  %vm3018_vm12 = vcmask 875520   ;;  %s3088_s29 = smov 120  }
 0x3f7   : > { %v1008_v14 = vsel %vm248_vm7, %v1007_v13, 0  ;;  %v999_v16 = vpop.permute.xlu1 %998  ;;  %vm3015_vm7 = vmmov %vm3005_vm5  ;;  %vm3021_vm5 = vcmask 400384  }
 0x3f8   : > { %v1009_v15 = vsel %vm250_vm9, %v1008_v14, 0  ;;  %vm3016_vm9 = vmmov %vm3010_vm3  ;;  %vm3030_vm3 = vcmask 662528  }
 0x3f9   : > { %v1011_v17 = vsel %vm252_vm11, %v1009_v15, %v999_v16  ;;  %v1001_v20 = vpop.permute.xlu0 %1000  ;;  %vm3017_vm11 = vcmask 744448  }
 0x3fa   : > { %v1012_v18 = vsel %vm3012_vm2, %v1011_v17, 0  ;;  %vm3031_vm2 = vmmov %vm3016_vm9 }
 0x3fb   : > { %v1013_v19 = vsel %vm257_vm14, %v1012_v18, 0  ;;  %v1003_v24 = vpop.permute.xlu1 %1002  ;;  %vm3019_vm14 = vcmask 883712  }
 0x3fc   : > { %v1015_v21 = vsel %vm3013_vm4, %v1013_v19, %v1001_v20  ;;  %vm3032_vm4 = vmmov %vm3031_vm2 }
 0x3fd   : > { %v1016_v22 = vsel %vm3003_vm1, %v1015_v21, 0  ;;  %v1005_v28 = vpop.permute.xlu0 %1004  ;;  %vm3033_vm1 = vcmask 1043456  }
 0x3fe   : > { %v1017_v23 = vsel %vm264_vm13, %v1016_v22, 0 }
 0x3ff   : > { %v1019_v25 = vsel %vm3014_vm6, %v1017_v23, %v1003_v24  ;;  %vm3034_vm6 = vmmov %vm3033_vm1 }
 0x400   : > { %v1020_v26 = vsel %vm3015_vm7, %v1019_v25, 0  ;;  %vm3035_vm7 = vcmask 752640  }
 0x401   : > { %v1021_v27 = vsel %vm3016_vm9, %v1020_v26, 0  ;;  %vm3036_vm9 = vmmov %vm3035_vm7 }
 0x402   : > { %v1023_v30 = vsel %vm3017_vm11, %v1021_v27, %v1005_v28 }
 0x403   : > { %v1024_v32 = vsel %vm3018_vm12, %v1023_v30, 0  ;;  %vm3037_vm12 = vmmov %vm3017_vm11 }
 0x454   : > { %v1185_v34 = vpop.permute.xlu1 %1184 }
 0x455   : > { %v2594_v36 = vsel %vm3019_vm14, %v1024_v32, %v1185_v34  ;;  %vm3038_vm14 = vmmov %vm3033_vm1 }
 0x456   : > { %1289 = vrot.lane.b32.xlu1 %v2594_v36, %s1982_s23  ;;  %1317 = vrot.lane.b32.xlu0 %v2594_v36, %s3020_s8  ;;  %v1188_v38 = vpop.permute.xlu0 %1187  ;;  %v1214_v33 = vrot.slane %v2594_v36, 4 }
 0x457   : > { %v2613_v41 = vsel %vm3024_vm10, %v1185_v34, %v1188_v38  ;;  %vm3040_vm10 = vcmask 891904  }
 0x458   : > { %v1191_v39 = vpop.permute.xlu1 %1190  ;;  %v1215_v44 = vrot.slane %v2613_v41, 4 }
 0x459   : > { %v2601_v40 = vsel %vm3021_vm5, %v1188_v38, %v1191_v39  ;;  %vm3039_vm5 = vmmov %vm3033_vm1 }
 0x45a   : > { %1261 = vrot.lane.b32.xlu1 %v2594_v36, %s3022_s28  ;;  %1321 = vrot.lane.b32.xlu0 %v2601_v40, %s3020_s8  ;;  %v1216_v43 = vrot.slane %v2601_v40, 4 }
 0x45e   : > { %1233 = vrot.lane.b32.xlu1 %v2594_v36, %s3023_s9  ;;  %1293 = vrot.lane.b32.xlu0 %v2601_v40, %s1982_s23 }
 0x462   : > { %1303 = vrot.lane.b32.xlu0 %v1214_v33, %s3025_s6  ;;  %1319 = vrot.lane.b32.xlu1 %v2613_v41, %s3020_s8 }
 0x465   : > { %v1194_v46 = vpop.permute.xlu0 %1193 }
 0x466   : > { %1265 = vrot.lane.b32.xlu0 %v2601_v40, %s3022_s28  ;;  %1291 = vrot.lane.b32.xlu1 %v2613_v41, %s1982_s23  ;;  %v1205_v49 = vsel %vm3028_vm8, %v1191_v39, %v1194_v46  ;;  %vm3041_vm8 = vmmov %vm3040_vm10 }
 0x468   : > { %v1197_v47 = vpop.permute.xlu1 %1196 }
 0x469   : > { %v2643_v37 = vsel %vm3029_vm15, %v1205_v49, %v1197_v47  ;;  %v2647_v50 = vsel %vm3030_vm3, %v1197_v47, %v2182_v61  ;;  %vm3042_vm15 = vcmask 883712  }
 0x46a   : > { %1275 = vrot.lane.b32.xlu0 %v1214_v33, %s1978_s20  ;;  %1263 = vrot.lane.b32.xlu1 %v2613_v41, %s3022_s28  ;;  %v1218_v61 = vrot.slane %v2647_v50, 4  ;;  %v1217_v51 = vrot.slane %v2643_v37, 4  ;;  %vm3043_vm3 = vmmov %vm3042_vm15 }
 0x46e   : > { %1237 = vrot.lane.b32.xlu0 %v2601_v40, %s3023_s9  ;;  %1235 = vrot.lane.b32.xlu1 %v2613_v41, %s3023_s9 }
 0x472   : > { %1247 = vrot.lane.b32.xlu0 %v1214_v33, %s3026_s14  ;;  %1219 = vrot.lane.b32.xlu1 %v1214_v33, %s3027_s24 }
 0x476   : > { %1307 = vrot.lane.b32.xlu0 %v1216_v43, %s3025_s6  ;;  %1305 = vrot.lane.b32.xlu1 %v1215_v44, %s3025_s6 }
 0x47a   : > { %1279 = vrot.lane.b32.xlu0 %v1216_v43, %s1978_s20  ;;  %1277 = vrot.lane.b32.xlu1 %v1215_v44, %s1978_s20 }
 0x47e   : > { %1251 = vrot.lane.b32.xlu0 %v1216_v43, %s3026_s14  ;;  %1249 = vrot.lane.b32.xlu1 %v1215_v44, %s3026_s14 }
 0x482   : > { %1223 = vrot.lane.b32.xlu0 %v1216_v43, %s3027_s24  ;;  %1221 = vrot.lane.b32.xlu1 %v1215_v44, %s3027_s24  ;;  %v2730_v44 = vld [vmem:[%s2874_s3] sm:$0xf] }
 0x486   : > { %1325 = vrot.lane.b32.xlu1 %v2647_v50, %s3020_s8  ;;  %1323 = vrot.lane.b32.xlu0 %v2643_v37, %s3020_s8 }
 0x48a   : > { %1297 = vrot.lane.b32.xlu1 %v2647_v50, %s1982_s23  ;;  %1295 = vrot.lane.b32.xlu0 %v2643_v37, %s1982_s23 }
 0x48e   : > { %1269 = vrot.lane.b32.xlu1 %v2647_v50, %s3022_s28  ;;  %1267 = vrot.lane.b32.xlu0 %v2643_v37, %s3022_s28  ;;  %s3089_s28 = smov 112  }
 0x492   : > { %1241 = vrot.lane.b32.xlu1 %v2647_v50, %s3023_s9  ;;  %1239 = vrot.lane.b32.xlu0 %v2643_v37, %s3023_s9 }
 0x496   : > { %1311 = vrot.lane.b32.xlu1 %v1218_v61, %s3025_s6  ;;  %1309 = vrot.lane.b32.xlu0 %v1217_v51, %s3025_s6  ;;  %s3090_s6 = smov 118  }
 0x49a   : > { %1283 = vrot.lane.b32.xlu1 %v1218_v61, %s1978_s20  ;;  %1281 = vrot.lane.b32.xlu0 %v1217_v51, %s1978_s20 }
 0x49e   : > { %1255 = vrot.lane.b32.xlu1 %v1218_v61, %s3026_s14  ;;  %1253 = vrot.lane.b32.xlu0 %v1217_v51, %s3026_s14 }
 0x4a2   : > { %1227 = vrot.lane.b32.xlu1 %v1218_v61, %s3027_s24  ;;  %1225 = vrot.lane.b32.xlu0 %v1217_v51, %s3027_s24  ;;  %s3086_s24 = smov 124  }
 0x4a6   : > { %1408 = vperm.xlu0 %1901, %v994_v52  }
 0x4c8   : > { %v1290_v45 = vpop.permute.xlu1 %1289  ;;  %v1318_v53 = vpop.permute.xlu0 %1317 }
 0x4cc   : > { %v1262_v54 = vpop.permute.xlu1 %1261  ;;  %v1322_v5 = vpop.permute.xlu0 %1321 }
 0x4d0   : > { %v1234_v56 = vpop.permute.xlu1 %1233  ;;  %v2678_v4 = vpop.permute.xlu0 %1293 }
 0x4d4   : > { %v1320_v57 = vpop.permute.xlu1 %1319  ;;  %v1304_v7 = vpop.permute.xlu0 %1303 }
 0x4d5   : > { %v1327_v12 = vsel %vm3031_vm2, %v1318_v53, %v1320_v57  ;;  %v1328_v29 = vsel %vm3032_vm4, %v1320_v57, %v1322_v5  ;;  %vm3044_vm2 = vmmov %vm3033_vm1 }
 0x4d6   : > { %v1415_v31 = vsel %vm3033_vm1, %v1327_v12, 0  ;;  %1784 = vmatprep.subr.msk.bf16.mxu1 %vm3034_vm6, %v1328_v29  ;;  %vm3045_vm4 = vmmov %vm3033_vm1  ;;  %vm3046_vm1 = vcmask 1031168  }
 0x4d7   : > { %1436 = vmatpush1.bf16.msra.mxu1 %v1415_v31  ;;  %vm3047_vm6 = vmmov %vm3046_vm1 }
 0x4d8   : > { %v1292_v48 = vpop.permute.xlu1 %1291  ;;  %v2684_v58 = vpop.permute.xlu0 %1265 }
 0x4d9   : > { %v1299_v0 = vsel %vm3035_vm7, %v1290_v45, %v1292_v48  ;;  %v1300_v1 = vsel %vm3036_vm9, %v1292_v48, %v2678_v4  ;;  %vm3048_vm7 = vcmask 900096  }
 0x4da   : > { %vm3049_vm9 = vmmov %vm3048_vm7 }
 0x4dc   : > { %v1264_v35 = vpop.permute.xlu1 %1263  ;;  %v1276_v59 = vpop.permute.xlu0 %1275 }
 0x4dd   : > { %v1271_v14 = vsel %vm3040_vm10, %v1262_v54, %v1264_v35  ;;  %v1272_v15 = vsel %vm3041_vm8, %v1264_v35, %v2684_v58  ;;  %vm3054_vm10 = vmmov %vm3044_vm2 }
 0x4de   : > { %vm3055_vm8 = vmmov %vm3044_vm2 }
 0x4e0   : > { %v1236_v42 = vpop.permute.xlu1 %1235  ;;  %v2686_v60 = vpop.permute.xlu0 %1237 }
 0x4e1   : > { %v1243_v22 = vsel %vm3046_vm1, %v1234_v56, %v1236_v42  ;;  %v1244_v23 = vsel %vm3047_vm6, %v1236_v42, %v2686_v60  ;;  %vm3059_vm1 = vmmov %vm3044_vm2  ;;  %vm3060_vm6 = vmmov 0  }
 0x4e4   : > { %v1220_v9 = vpop.permute.xlu1 %1219  ;;  %v1248_v62 = vpop.permute.xlu0 %1247 }
 0x4e8   : > { %v1306_v6 = vpop.permute.xlu1 %1305  ;;  %v2688_v63 = vpop.permute.xlu0 %1307 }
 0x4e9   : > { %v1313_v2 = vsel %vm3017_vm11, %v1304_v7, %v1306_v6  ;;  %v1314_v3 = vsel %vm3037_vm12, %v1306_v6, %v2688_v63  ;;  %vm3050_vm11 = vmmov %vm3044_vm2 }
 0x4ea   : > { %v1392_v8 = vsel %vm3038_vm14, %v1300_v1, %v1314_v3  ;;  %v1388_v10 = vsel %vm3039_vm5, %v1299_v0, %v1313_v2  ;;  %vm3051_vm12 = vmmov %vm3044_vm2  ;;  %vm3052_vm14 = vcmask 1039360  }
 0x4eb   : > { %1437 = vmatprep.subr.bf16.mxu1 %v1392_v8  ;;  %vm3053_vm5 = vmmov %vm3052_vm14 }
 0x4ec   : > { %v1278_v11 = vpop.permute.xlu1 %1277  ;;  %1438 = vmatpush1.bf16.msra.mxu1 %v1388_v10  ;;  %v2698_v13 = vpop.permute.xlu0 %1279 }
 0x4ed   : > { %v1285_v16 = vsel %vm3042_vm15, %v1276_v59, %v1278_v11  ;;  %v1286_v17 = vsel %vm3043_vm3, %v1278_v11, %v2698_v13  ;;  %vm3056_vm15 = vcmask 736256  }
 0x4ee   : > { %v1372_v18 = vsel %vm3044_vm2, %v1272_v15, %v1286_v17  ;;  %v1368_v19 = vsel %vm3045_vm4, %v1271_v14, %v1285_v16  ;;  %vm3057_vm3 = vmmov %vm3056_vm15 }
 0x4ef   : > { %1439 = vmatprep.subr.bf16.mxu1 %v1372_v18  ;;  %vm3058_vm4 = vmmov %vm3044_vm2 }
 0x4f0   : > { %v1250_v20 = vpop.permute.xlu1 %1249  ;;  %1440 = vmatpush1.bf16.msra.mxu1 %v1368_v19  ;;  %v2708_v21 = vpop.permute.xlu0 %1251 }
 0x4f1   : > { %v1257_v24 = vsel %vm3048_vm7, %v1248_v62, %v1250_v20  ;;  %v1258_v25 = vsel %vm3049_vm9, %v1250_v20, %v2708_v21  ;;  %vm3061_vm7 = vcmask 752640  }
 0x4f2   : > { %v1352_v26 = vsel %vm3050_vm11, %v1244_v23, %v1258_v25  ;;  %v1348_v27 = vsel %vm3051_vm12, %v1243_v22, %v1257_v24  ;;  %vm3062_vm9 = vmmov %vm3061_vm7  ;;  %vm3064_vm12 = vcmask 744448  }
 0x4f3   : > { %1441 = vmatprep.subr.bf16.mxu1 %v1352_v26  ;;  %vm3063_vm11 = vmmov %vm3059_vm1 }
 0x4f4   : > { %v1222_v28 = vpop.permute.xlu1 %1221  ;;  %1442 = vmatpush1.bf16.msra.mxu1 %v1348_v27  ;;  %v2718_v30 = vpop.permute.xlu0 %1223 }
 0x4f5   : > { %v1229_v32 = vsel %vm3052_vm14, %v1220_v9, %v1222_v28  ;;  %v1230_v34 = vsel %vm3053_vm5, %v1222_v28, %v2718_v30  ;;  %vm3065_vm14 = vmmov %vm3064_vm12 }
 0x4f6   : > { %v1335_v38 = vsel %vm3054_vm10, %v2613_v41, %v1230_v34  ;;  %v1332_v39 = vsel %vm3055_vm8, %v2594_v36, %v1229_v32  ;;  %vm3066_vm5 = vmmov %vm3059_vm1  ;;  %vm3068_vm8 = vcmask 891904  }
 0x4f7   : > { %1443 = vmatprep.subr.bf16.mxu1 %v1335_v38  ;;  %vm3067_vm10 = vmmov %vm3059_vm1 }
 0x4f8   : > { %v1326_v33 = vpop.permute.xlu1 %1325  ;;  %1444 = vmatpush1.bf16.msra.mxu1 %v1332_v39  ;;  %v1324_v43 = vpop.permute.xlu0 %1323 }
 0x4f9   : > { %v1329_v46 = vsel %vm3056_vm15, %v1322_v5, %v1324_v43  ;;  %v1330_v47 = vsel %vm3057_vm3, %v1324_v43, %v1326_v33  ;;  %1823 = vmatprep.subr.bf16.mxu1 %v1988_v55  ;;  %v1427_v36 = vsel %vm3059_vm1, %v1326_v33, 0  ;;  %vm3069_vm15 = vmmov %vm3068_vm8 }
 0x4fa   : > { %v1421_v41 = vsel %vm3044_vm2, %v1329_v46, 0  ;;  %1786 = vmatprep.subr.msk.bf16.mxu0 %vm3058_vm4, %v1330_v47  ;;  %vm3070_vm3 = vmmov %vm3059_vm1  ;;  %vm3071_vm2 = vcmask 883712  }
 0x4fb   : > { %1785 = vmatmul.mubr.msk.bf16.vlgmr.msra.gmra.mxu1 %vm264_vm13, %v2730_v44  ;;  %1477 = vmatpush1.bf16.msra.mxu0 %v1421_v41  ;;  %vm3072_vm4 = vmmov %vm3071_vm2 }
 0x4fc   : > { %v1298_v49 = vpop.permute.xlu1 %1297  ;;  %1824 = vmatpush3.bf16.msra.mxu1 %v1427_v36  ;;  %v1296_v61 = vpop.permute.xlu0 %1295  ;;  %1833 = vmatprep.mubr.msk.bf16.mxu1 %vm3060_vm6, %v1988_v55  ;;  %vm3073_vm6 = vmmov %vm3059_vm1 }
 0x4fd   : > { %1825 = vmatprep.subr.bf16.mxu1 %v1988_v55  ;;  %v1301_v54 = vsel %vm3061_vm7, %v2678_v4, %v1296_v61  ;;  %v1302_v57 = vsel %vm3062_vm9, %v1296_v61, %v1298_v49  ;;  %vm3074_vm7 = vcmask 1031168  }
 0x4fe   : > { %vm3075_vm9 = vmmov %vm3074_vm7 }
 0x500   : > { %v1270_v51 = vpop.permute.xlu1 %1269  ;;  %v1268_v52 = vpop.permute.xlu0 %1267 }
 0x501   : > { %v1273_v4 = vsel %vm3068_vm8, %v2684_v58, %v1268_v52  ;;  %v1274_v42 = vsel %vm3069_vm15, %v1268_v52, %v1270_v51  ;;  %vm3081_vm8 = vmmov %vm3059_vm1  ;;  %vm3082_vm15 = vcmask 1039360  }
 0x504   : > { %v1242_v45 = vpop.permute.xlu1 %1241  ;;  %v1240_v53 = vpop.permute.xlu0 %1239 }
 0x505   : > { %v1245_v58 = vsel %vm3074_vm7, %v2686_v60, %v1240_v53  ;;  %v1246_v3 = vsel %vm3075_vm9, %v1240_v53, %v1242_v45  ;;  %vm3101_vm7 = vcmask 392192  }
 0x506   : > { %vm3102_vm9 = vmmov %vm3101_vm7 }
 0x508   : > { %v1312_v5 = vpop.permute.xlu1 %1311  ;;  %v1310_v56 = vpop.permute.xlu0 %1309 }
 0x509   : > { %v1404_v7 = vsel %vm3063_vm11, %v1298_v49, %v1312_v5  ;;  %v1315_v12 = vsel %vm3064_vm12, %v2688_v63, %v1310_v56  ;;  %v1316_v29 = vsel %vm3065_vm14, %v1310_v56, %v1312_v5  ;;  %vm3076_vm11 = vmmov %vm3059_vm1  ;;  %vm3077_vm12 = vcmask 900096  }
 0x50a   : > { %1826 = vmatpush3.bf16.msra.mxu1 %v1404_v7  ;;  %v1400_v31 = vsel %vm3066_vm5, %v1302_v57, %v1316_v29  ;;  %v1396_v48 = vsel %vm3067_vm10, %v1301_v54, %v1315_v12  ;;  %vm3078_vm14 = vmmov %vm3077_vm12 }
 0x50b   : > { %1478 = vmatprep.subr.bf16.mxu0 %v1400_v31  ;;  %1827 = vmatprep.subr.bf16.mxu1 %v1988_v55  ;;  %vm3079_vm5 = vmmov %vm3059_vm1 }
 0x50c   : > { %v1284_v35 = vpop.permute.xlu1 %1283  ;;  %1479 = vmatpush1.bf16.msra.mxu0 %v1396_v48  ;;  %v1282_v59 = vpop.permute.xlu0 %1281  ;;  %vm3080_vm10 = vmmov %vm3059_vm1 }
 0x50d   : > { %v1384_v9 = vsel %vm3070_vm3, %v1270_v51, %v1284_v35  ;;  %v1287_v62 = vsel %vm3071_vm2, %v2698_v13, %v1282_v59  ;;  %v1288_v6 = vsel %vm3072_vm4, %v1282_v59, %v1284_v35  ;;  %vm3083_vm3 = vmmov %vm3082_vm15 }
 0x50e   : > { %1828 = vmatpush3.bf16.msra.mxu1 %v1384_v9  ;;  %v1380_v63 = vsel %vm3059_vm1, %v1274_v42, %v1288_v6  ;;  %v1376_v0 = vsel %vm3073_vm6, %v1273_v4, %v1287_v62  ;;  %vm3084_vm2 = vmmov %vm3059_vm1 }
 0x50f   : > { %1480 = vmatprep.subr.bf16.mxu0 %v1380_v63  ;;  %1829 = vmatprep.subr.bf16.mxu1 %v1988_v55  ;;  %vm3085_vm4 = vmmov %vm3059_vm1  ;;  %vm3099_vm1 = vcmask 261120  }
 0x510   : > { %v1256_v1 = vpop.permute.xlu1 %1255  ;;  %1481 = vmatpush1.bf16.msra.mxu0 %v1376_v0  ;;  %v1254_v2 = vpop.permute.xlu0 %1253  ;;  %vm3100_vm6 = vmmov %vm3099_vm1 }
 0x511   : > { %v1364_v8 = vsel %vm3076_vm11, %v1242_v45, %v1256_v1  ;;  %v1259_v10 = vsel %vm3077_vm12, %v2708_v21, %v1254_v2  ;;  %v1260_v11 = vsel %vm3078_vm14, %v1254_v2, %v1256_v1  ;;  %vm3103_vm11 = vcmask 523264  }
 0x512   : > { %1830 = vmatpush3.bf16.msra.mxu1 %v1364_v8  ;;  %v1360_v13 = vsel %vm3079_vm5, %v1246_v3, %v1260_v11  ;;  %v1356_v14 = vsel %vm3080_vm10, %v1245_v58, %v1259_v10  ;;  %vm3104_vm12 = vcmask 932864   ;;  %vm3105_vm14 = vmmov %vm3103_vm11  ;;  %vm3106_vm5 = vcmask 654336  }
 0x513   : > { %1482 = vmatprep.subr.bf16.mxu0 %v1360_v13  ;;  %1831 = vmatprep.subr.bf16.mxu1 %v1988_v55  ;;  %vm3107_vm10 = vcmask 785408  }
 0x514   : > { %v1228_v60 = vpop.permute.xlu1 %1227  ;;  %1483 = vmatpush1.bf16.msra.mxu0 %v1356_v14  ;;  %v1226_v15 = vpop.permute.xlu0 %1225 }
 0x515   : > { %v1344_v16 = vsel %vm3081_vm8, %v2647_v50, %v1228_v60  ;;  %v1231_v17 = vsel %vm3082_vm15, %v2718_v30, %v1226_v15  ;;  %v1232_v18 = vsel %vm3083_vm3, %v1226_v15, %v1228_v60  ;;  %vm3108_vm8 = vcmask 916480   ;;  %vm3109_vm15 = vmmov %vm3106_vm5 }
 0x516   : > { %1832 = vmatpush3.bf16.msra.mxu1 %v1344_v16  ;;  %v1341_v19 = vsel %vm3084_vm2, %v2643_v37, %v1232_v18  ;;  %v1338_v20 = vsel %vm3085_vm4, %v2601_v40, %v1231_v17  ;;  %vm3110_vm3 = vcmask 818176   ;;  %vm3111_vm2 = vmmov %vm3107_vm10 }
 0x517   : > { %1484 = vmatprep.subr.bf16.mxu0 %v1341_v19  ;;  %vm3112_vm4 = vmmov %vm3108_vm8 }
 0x518   : > { %1485 = vmatpush1.bf16.msra.mxu0 %v1338_v20 }
 0x519   : > { %1834 = vmatmul.mubr.msk.bf16.vlgmr.msra.gmra.mxu1 %vm264_vm13, %v2730_v44 }
 0x51b   : > { %1787 = vmatmul.mubr.msk.bf16.vlgmr.msra.gmra.mxu0 %vm264_vm13, %v2730_v44 }
 0x521   : > { %v1409_v55 = vpop.permute.xlu0 %1408 }
 0x5bb   : > { %v1463_v50 = vpop.f32.mrf.mxu1 }
 0x5bc   : > { %v2786_v21 = vadd.f32 %v1463_v50, %v1409_v55 }
 0x5bd   : > { %v1465_v22 = vpop.f32.mrf.mxu1 }
 0x5be   : > { %1555 = vrot.lane.b32.xlu0 %v2786_v21, %s3086_s24  ;;  %1552 = vrot.lane.b32.xlu1 %v2786_v21, %s3023_s9  ;;  %v1466_v23 = vadd.f32 %v1465_v22, %v1409_v55  ;;  %s3091_s24 = smov 116   ;;  %s3092_s9 = smov 114  }
 0x5bf   : > { %v1467_v40 = vpop.f32.mrf.mxu1 }
 0x5c0   : > { %v1922_v24 = vpack.i.bf16 %v1466_v23, %v2786_v21 }
 0x5c1   : > { %v1468_v37 = vpop.f32.mrf.mxu1 }
 0x5c2   : > { %1558 = vrot.lane.b32.xlu0 %v2786_v21, %s3087_s25  ;;  %1561 = vrot.lane.b32.xlu1 %v2786_v21, %s3088_s29 }
 0x5c6   : > { %1577 = vrot.lane.b32.xlu0 %v1466_v23, %s3089_s28  ;;  %1564 = vrot.lane.b32.xlu1 %v2786_v21, %s3090_s6 }
 0x5ca   : > { %1589 = vrot.lane.b32.xlu0 %v1466_v23, %s1967_s11  ;;  %1567 = vrot.lane.b32.xlu1 %v2786_v21, %s3091_s24  ;;  %s3093_s11 = smov 94  }
 0x5ce   : > { %1592 = vrot.lane.b32.xlu0 %v1466_v23, %s1962_s7  ;;  %1580 = vrot.lane.b32.xlu1 %v1466_v23, %s3026_s14  ;;  %s3094_s7 = smov 88  }
 0x5d2   : > { %1923 = vrot.lane.b32.xlu0 %v1922_v24, %s3092_s9  ;;  %1583 = vrot.lane.b32.xlu1 %v1466_v23, %s1978_s20  ;;  %s3095_s20 = smov 86  }
 0x5d6   : > { %1586 = vrot.lane.b32.xlu1 %v1466_v23, %s1969_s13  ;;  %s3113_s13 = sshll.u32 %s3127_s19, 4 }
 0x5d9   : > { %v1545_v25 = vpop.f32.mrf.mxu1 }
 0x5da   : > { %v1546_v46 = vadd.f32 %v1545_v25, %v1409_v55 }
 0x5db   : > { %v1504_v26 = vpop.f32.mrf.mxu0  ;;  %v1835_v27 = vpop.f32.mrf.mxu1 }
 0x5dc   : > { %v1505_v28 = vadd.f32 %v1504_v26, %v1409_v55 }
 0x5dd   : > { %v1506_v30 = vpop.f32.mrf.mxu0  ;;  %v1548_v32 = vpop.f32.mrf.mxu1 }
 0x5de   : > { %1619 = vrot.lane.b32.xlu0 %v1505_v28, %s1957_s27  ;;  %1622 = vrot.lane.b32.xlu1 %v1505_v28, %s3093_s11  ;;  %v1927_v33 = vpack.i.bf16 %v1505_v28, %v1466_v23  ;;  %v1507_v43 = vadd.f32 %v1506_v30, %v1409_v55  ;;  %s3096_s27 = smov 78  }
 0x5df   : > { %v1508_v34 = vpop.f32.mrf.mxu0  ;;  %v1836_v38 = vpop.f32.mrf.mxu1 }
 0x5e0   : > { %v1932_v44 = vpack.i.bf16 %v1507_v43, %v1505_v28  ;;  %v1937_v47 = vpack.i.bf16 %v1546_v46, %v1507_v43 }
 0x5e1   : > { %v1509_v39 = vpop.f32.mrf.mxu0 }
 0x5e2   : > { %1625 = vrot.lane.b32.xlu0 %v1505_v28, %s1982_s23  ;;  %1631 = vrot.lane.b32.xlu1 %v1505_v28, %s3094_s7 }
 0x5e6   : > { %1628 = vrot.lane.b32.xlu0 %v1505_v28, %s3020_s8  ;;  %1928 = vrot.lane.b32.xlu1 %v1927_v33, %s1960_s30  ;;  %s3097_s30 = smov 84  }
 0x5ea   : > { %1647 = vrot.lane.b32.xlu0 %v1507_v43, %s2004_s21  ;;  %1602 = vrot.lane.b32.xlu1 %v1505_v28, %s1956_s26  ;;  %s3098_s26 = smov 82  }
 0x5ee   : > { %1933 = vrot.lane.b32.xlu0 %v1932_v44, %s3095_s20  ;;  %1650 = vrot.lane.b32.xlu1 %v1507_v43, %s3096_s27 }
 0x5f2   : > { %1938 = vrot.lane.b32.xlu0 %v1937_v47, %s2008_s10  ;;  %1653 = vrot.lane.b32.xlu1 %v1507_v43, %s2006_s16 }
 0x5f6   : > { %1666 = vrot.lane.b32.xlu0 %v1546_v46, %s2005_s12  ;;  %1656 = vrot.lane.b32.xlu1 %v1507_v43, %s2003_s22 }
 0x5fa   : > { %1669 = vrot.lane.b32.xlu0 %v1546_v46, %s2009_s15  ;;  %1641 = vrot.lane.b32.xlu1 %v1507_v43, %s3097_s30 }
 0x5fe   : > { %1644 = vrot.lane.b32.xlu0 %v1507_v43, %s3098_s26  ;;  %1672 = vrot.lane.b32.xlu1 %v1546_v46, %s2007_s17  ;;  %s2848_s17 = scalar_lea.vmem %s2876_s5, %s3113_s13 }
 0x630   : > { %v1556_v41 = vpop.permute.xlu0 %1555  ;;  %v1553_v36 = vpop.permute.xlu1 %1552 }
 0x631   : > { %v1605_v31 = vsel %vm324_vm0, %v2786_v21, %v1553_v36 }
 0x632   : > { %v1606_v4 = vsel %vm3099_vm1, %v1605_v31, %v1556_v41 }
 0x634   : > { %v1559_v49 = vpop.permute.xlu0 %1558  ;;  %v1562_v61 = vpop.permute.xlu1 %1561 }
 0x635   : > { %v1607_v6 = vsel %vm3101_vm7, %v1606_v4, %v1559_v49 }
 0x636   : > { %v1608_v0 = vsel %vm3103_vm11, %v1607_v6, %v1562_v61 }
 0x638   : > { %v1565_v51 = vpop.permute.xlu1 %1564  ;;  %v1578_v52 = vpop.permute.xlu0 %1577 }
 0x639   : > { %v1609_v8 = vsel %vm3106_vm5, %v1608_v0, %v1565_v51 }
 0x63c   : > { %v1568_v45 = vpop.permute.xlu1 %1567  ;;  %v1590_v53 = vpop.permute.xlu0 %1589 }
 0x63d   : > { %v1610_v13 = vsel %vm3107_vm10, %v1609_v8, %v1568_v45  ;;  %vm3123_vm10 = vmmov %vm3111_vm2 }
 0x640   : > { %v1581_v54 = vpop.permute.xlu1 %1580  ;;  %v1593_v5 = vpop.permute.xlu0 %1592 }
 0x641   : > { %v1612_v48 = vsel %vm324_vm0, %v1578_v52, %v1581_v54 }
 0x644   : > { %v1584_v56 = vpop.permute.xlu1 %1583  ;;  %v1924_v57 = vpop.permute.xlu0 %1923 }
 0x645   : > { %v1926_v35 = vunpack.i.h.bf16 %v1924_v57  ;;  %v1925_v59 = vunpack.i.l.bf16 %v1924_v57  ;;  %v1613_v42 = vsel %vm3100_vm6, %v1612_v48, %v1584_v56  ;;  %vm3114_vm6 = vmmov %vm3101_vm7 }
 0x646   : > { %vm3115_vm7 = vmmov %vm3099_vm1 }
 0x647   : > { %v1575_v58 = vsel %vm3104_vm12, %v1925_v59, %v1926_v35  ;;  %vm3118_vm12 = vcmask 703488  }
 0x648   : > { %v1587_v7 = vpop.permute.xlu1 %1586  ;;  %v1611_v14 = vsel %vm3108_vm8, %v1610_v13, %v1575_v58  ;;  %vm3124_vm8 = vmmov %vm3112_vm4 }
 0x649   : > { %v1614_v63 = vsel %vm3102_vm9, %v1613_v42, %v1587_v7  ;;  %v1689_v20 = vmax.f32 %v1611_v14, 0.0  ;;  %vm3116_vm9 = vmmov %vm3103_vm11 }
 0x64a   : > { %v1615_v1 = vsel %vm3105_vm14, %v1614_v63, %v1590_v53  ;;  %vm3117_vm11 = vmmov %vm3114_vm6 }
 0x64b   : > { %v1616_v60 = vsel %vm3109_vm15, %v1615_v1, %v1593_v5  ;;  %vm3119_vm14 = vmmov %vm3106_vm5 }
 0x64c   : > { %vm3120_vm5 = vmmov %vm3116_vm9 }
 0x64d   : > { %vm3125_vm15 = vmmov %vm3112_vm4 }
 0x650   : > { %v1620_v12 = vpop.permute.xlu0 %1619  ;;  %v1623_v29 = vpop.permute.xlu1 %1622 }
 0x651   : > { %v1675_v34 = vsel %vm324_vm0, %v1620_v12, %v1623_v29 }
 0x654   : > { %v1626_v9 = vpop.permute.xlu0 %1625  ;;  %v1632_v62 = vpop.permute.xlu1 %1631 }
 0x655   : > { %v1676_v33 = vsel %vm3115_vm7, %v1675_v34, %v1626_v9 }
 0x658   : > { %v1629_v2 = vpop.permute.xlu0 %1628  ;;  %v1929_v3 = vpop.permute.xlu1 %1928 }
 0x659   : > { %v1931_v10 = vunpack.i.h.bf16 %v1929_v3  ;;  %v1930_v11 = vunpack.i.l.bf16 %v1929_v3  ;;  %v1677_v44 = vsel %vm3117_vm11, %v1676_v33, %v1629_v2 }
 0x65a   : > { %v1678_v49 = vsel %vm3120_vm5, %v1677_v44, %v1632_v62 }
 0x65b   : > { %v1600_v15 = vsel %vm3110_vm3, %v1930_v11, %v1931_v10 }
 0x65c   : > { %v1648_v16 = vpop.permute.xlu0 %1647  ;;  %v1603_v17 = vpop.permute.xlu1 %1602  ;;  %v1617_v18 = vsel %vm3111_vm2, %v1616_v60, %v1600_v15 }
 0x65d   : > { %v1618_v19 = vsel %vm3112_vm4, %v1617_v18, %v1603_v17 }
 0x65e   : > { %v1690_v55 = vmax.f32 %v1618_v19, 0.0 }
 0x660   : > { %v1795_v50 = vpack.c.bf16 %v1690_v55, %v1689_v20  ;;  %v1934_v21 = vpop.permute.xlu0 %1933  ;;  %v1651_v22 = vpop.permute.xlu1 %1650 }
 0x661   : > { %v1682_v25 = vsel %vm324_vm0, %v1648_v16, %v1651_v22  ;;  %v1936_v26 = vunpack.i.h.bf16 %v1934_v21  ;;  %v1935_v27 = vunpack.i.l.bf16 %v1934_v21  ;;  %vm3121_vm0 = vmmov %vm3119_vm14 }
 0x662   : > { %1709 = vst [vmem:[%s2848_s17] sm:$0xff] %v1795_v50 }
 0x663   : > { %v1639_v47 = vsel %vm3118_vm12, %v1935_v27, %v1936_v26 }
 0x664   : > { %v1939_v40 = vpop.permute.xlu0 %1938  ;;  %v1654_v37 = vpop.permute.xlu1 %1653  ;;  %v1679_v61 = vsel %vm3121_vm0, %v1678_v49, %v1639_v47 }
 0x665   : > { %v1941_v23 = vunpack.i.h.bf16 %v1939_v40  ;;  %v1940_v24 = vunpack.i.l.bf16 %v1939_v40  ;;  %v1683_v28 = vsel %vm3099_vm1, %v1682_v25, %v1654_v37 }
 0x667   : > { %v1664_v38 = vsel %vm264_vm13, %v1940_v24, %v1941_v23  ;;  %vm3122_vm13 = vmmov %vm3111_vm2 }
 0x668   : > { %v1667_v30 = vpop.permute.xlu0 %1666  ;;  %v1657_v32 = vpop.permute.xlu1 %1656 }
 0x669   : > { %v1684_v39 = vsel %vm3114_vm6, %v1683_v28, %v1657_v32 }
 0x66a   : > { %v1685_v43 = vsel %vm3116_vm9, %v1684_v39, %v1664_v38 }
 0x66b   : > { %v1686_v36 = vsel %vm3119_vm14, %v1685_v43, %v1667_v30 }
 0x66c   : > { %v1670_v46 = vpop.permute.xlu0 %1669  ;;  %v1642_v41 = vpop.permute.xlu1 %1641 }
 0x66d   : > { %v1687_v51 = vsel %vm3122_vm13, %v1686_v36, %v1670_v46  ;;  %v1680_v52 = vsel %vm3123_vm10, %v1679_v61, %v1642_v41 }
 0x670   : > { %v1645_v45 = vpop.permute.xlu0 %1644  ;;  %v1673_v53 = vpop.permute.xlu1 %1672 }
 0x671   : > { %v1681_v54 = vsel %vm3124_vm8, %v1680_v52, %v1645_v45  ;;  %v1688_v5 = vsel %vm3125_vm15, %v1687_v51, %v1673_v53 }
 0x672   : > { %v1691_v56 = vmax.f32 %v1681_v54, 0.0  ;;  %v1692_v57 = vmax.f32 %v1688_v5, 0.0 }
 0x674   : > { %v1796_v7 = vpack.c.bf16 %v1692_v57, %v1691_v56 }
 0x676   : > { %1710 = vst [vmem:[%s2848_s17 + $0x8] sm:$0xff] %v1796_v7 }
 0x677 PF: > { %s15_s18 = sadd.s32 1, %s1952_s18  }
 0x678   : > { %p12_p4 = scmp.ge.s32.totalorder %s15_s18, 4  }
 0x67a   :  { %14 = sbr.rel (!%p12_p4) target bundleno = 1 (0x1), region = 70 }

// kernel: resnet_forward.11
= control target key start
LH: loop header
LB: loop body
LE: loop exit
PB: predicated region body
PF: predicated region fallthrough
CT: control target
= control target key end

     0   :  { %s700_s12 = smov 0   ;;  %s819_s0 = inlined_call_operand.vmem [shape: bf16[2,8,128], index: 0, kind: input, shape index: {}]   ;;  %s820_s1 = inlined_call_operand.vmem [shape: bf16[8,72], index: 1, kind: input, shape index: {}]   ;;  %s821_s2 = inlined_call_operand.vmem [shape: f32[8,1], index: 2, kind: input, shape index: {}]   ;;  %s822_s3 = inlined_call_operand.vmem [shape: bf16[2,8,128], index: 3, kind: output, shape index: {}]  }
   0x1 LB: > { %s573_s13 = sadd.s32 4294967295, %s640_s12   ;;  %p577_p0 = scmp.ge.s32.totalorder %s640_s12, 1  ;;  %s640_s12 = sphi %s700_s12, %s13_s12  }
   0x2   : > { %p136_p1 = scmp.lt.s32.totalorder %s640_s12, 3 }
   0x4   : > { %p137_p2 = pnand %p577_p0, %p136_p1 }
   0x5   : > { %p158_p3 = scmp.lt.s32.totalorder (!%p137_p2), %s573_s13, 1  ;;  %s642_s18 = smov (!%p137_p2), 91  }
   0x6   : > { %140 = sbr.rel (%p137_p2) target bundleno = 761 (0x2f9), region = 32  ;;  %s643_s19 = smov (!%p137_p2), 89  }
   0x7   : > { %s644_s20 = smov (!%p137_p2), 50   ;;  %s645_s21 = smov (!%p137_p2), 48  }
   0x8   : > { %s646_s22 = smov (!%p137_p2), 52   ;;  %s647_s23 = smov (!%p137_p2), 93  }
   0x9   : > { %s649_s24 = smov (!%p137_p2), 54   ;;  %s650_s25 = smov (!%p137_p2), 95  }
   0xa   : > { %s651_s26 = smov (!%p137_p2), 56   ;;  %s652_s27 = smov (!%p137_p2), 97  }
   0xb   : > { %s824_s13 = smov (!%p158_p3, %s573_s13), 1  ;;  %v648_v1 = vmov 0   ;;  %s653_s28 = smov 58   ;;  %vm228_vm0 = vcmask 7168   ;;  %vm231_vm1 = vcmask 72704   ;;  %vm183_vm2 = vcmask 80896  }
   0xc   : > { %s578_s14 = sshll.u32 %s824_s13, 2  ;;  %435 = vmatprep.mubr.bf16.mxu0 %v648_v1  ;;  %631 = vset.pattern.permute.xlu1 %v648_v1  ;;  %s654_s29 = smov 11   ;;  %vm185_vm3 = vcmask 89088   ;;  %vm262_vm4 = vcmask 64512   ;;  %vm188_vm5 = vcmask 154624   ;;  %vm268_vm6 = vcmask 146432  }
   0xd   : > { %s161_s17 = scalar_lea.vmem %s819_s0, %s578_s14  ;;  %632 = vset.pattern.permute.xlu0 %v648_v1  ;;  %s655_s30 = smov 13   ;;  %vm190_vm7 = vcmask 162816   ;;  %vm192_vm8 = vcmask 171008   ;;  %vm195_vm9 = vcmask 236544   ;;  %vm273_vm10 = vcmask 228352  }
   0xe   : > { %v633_v0 = vld [vmem:[%s161_s17] ss:$0 sps:$4 sm:$0xff]   ;;  %s656_s4 = smov 15   ;;  %s657_s5 = smov 17   ;;  %vm197_vm11 = vcmask 244736   ;;  %vm199_vm12 = vcmask 252928  }
   0xf   : > { %220 = vrot.lane.b32.xlu1 %v633_v0, %s642_s18  ;;  %218 = vrot.lane.b32.xlu0 %v633_v0, %s643_s19  ;;  %s658_s6 = smov 19   ;;  %vm202_vm13 = vcmask 318464   ;;  %vm278_vm14 = vcmask 310272   ;;  %vm204_vm15 = vcmask 326656   ;;  %s659_s7 = smov 60  }
  0x10   : > { %s660_s8 = smov 111   ;;  %s661_s9 = smov 41  }
  0x11   : > { %s662_s10 = smov 106   ;;  %s663_s11 = smov 108  }
  0x12   : > { %s664_s15 = smov 117   ;;  %s665_s16 = smov 126  }
  0x13   : > { %252 = vrot.lane.b32.xlu1 %v633_v0, %s644_s20  ;;  %250 = vrot.lane.b32.xlu0 %v633_v0, %s645_s21  ;;  %s666_s17 = smov 107   ;;  %s667_s18 = smov 116  }
  0x14   : > { %s668_s19 = smov 118   ;;  %s669_s20 = smov 127  }
  0x17   : > { %254 = vrot.lane.b32.xlu1 %v633_v0, %s646_s22  ;;  %222 = vrot.lane.b32.xlu0 %v633_v0, %s647_s23 }
  0x1b   : > { %256 = vrot.lane.b32.xlu1 %v633_v0, %s649_s24  ;;  %224 = vrot.lane.b32.xlu0 %v633_v0, %s650_s25  ;;  %s670_s25 = smov 124  }
  0x1f   : > { %258 = vrot.lane.b32.xlu1 %v633_v0, %s651_s26  ;;  %226 = vrot.lane.b32.xlu0 %v633_v0, %s652_s27  ;;  %s671_s26 = smov 120   ;;  %s672_s27 = smov 122  }
  0x23   : > { %260 = vrot.lane.b32.xlu0 %v633_v0, %s653_s28  ;;  %173 = vrot.lane.b32.xlu1 %v633_v0, %s654_s29  ;;  %s673_s28 = smov 112   ;;  %s674_s29 = smov 114  }
  0x27   : > { %175 = vrot.lane.b32.xlu0 %v633_v0, %s655_s30  ;;  %177 = vrot.lane.b32.xlu1 %v633_v0, %s656_s4  ;;  %s675_s30 = smov 110   ;;  %s676_s4 = smov 104  }
  0x2b   : > { %179 = vrot.lane.b32.xlu0 %v633_v0, %s657_s5  ;;  %181 = vrot.lane.b32.xlu1 %v633_v0, %s658_s6  ;;  %s677_s5 = smov 100   ;;  %s678_s6 = smov 102  }
  0x81   : > { %v221_v2 = vpop.permute.xlu1 %220  ;;  %v219_v3 = vpop.permute.xlu0 %218 }
  0x82   : > { %v230_v4 = vsel %vm228_vm0, 0, %v219_v3  ;;  %vm206_vm0 = vcmask 334848  }
  0x83   : > { %v232_v5 = vsel %vm231_vm1, %v230_v4, 0 }
  0x84   : > { %v233_v6 = vsel %vm183_vm2, %v232_v5, 0 }
  0x85   : > { %v235_v7 = vsel %vm185_vm3, %v233_v6, %v221_v2  ;;  %v253_v8 = vpop.permute.xlu1 %252  ;;  %v251_v9 = vpop.permute.xlu0 %250  ;;  %v169_v6 = vld [vmem:[%s821_s2] sm:$0xff] }
  0x86   : > { %v264_v10 = vsel %vm262_vm4, %v251_v9, 0  ;;  %v236_v11 = vsel %vm188_vm5, %v235_v7, 0 }
  0x87   : > { %v265_v12 = vsel %vm231_vm1, %v264_v10, 0  ;;  %v237_v16 = vsel %vm190_vm7, %v236_v11, 0  ;;  %vm209_vm1 = vcmask 400384  }
  0x88   : > { %v267_v13 = vsel %vm183_vm2, %v265_v12, %v253_v8  ;;  %vm283_vm2 = vcmask 392192  }
  0x89   : > { %v269_v14 = vsel %vm268_vm6, %v267_v13, 0  ;;  %v255_v15 = vpop.permute.xlu1 %254  ;;  %v223_v17 = vpop.permute.xlu0 %222  ;;  %vm211_vm6 = vcmask 408576  }
  0x8a   : > { %v270_v18 = vsel %vm188_vm5, %v269_v14, 0  ;;  %v239_v19 = vsel %vm192_vm8, %v237_v16, %v223_v17 }
  0x8b   : > { %v272_v20 = vsel %vm190_vm7, %v270_v18, %v255_v15  ;;  %v240_v21 = vsel %vm195_vm9, %v239_v19, 0 }
  0x8c   : > { %v274_v22 = vsel %vm273_vm10, %v272_v20, 0  ;;  %v241_v23 = vsel %vm197_vm11, %v240_v21, 0  ;;  %vm355_vm10 = vcmask 867328  }
  0x8d   : > { %v275_v24 = vsel %vm195_vm9, %v274_v22, 0  ;;  %v257_v25 = vpop.permute.xlu1 %256  ;;  %v225_v26 = vpop.permute.xlu0 %224 }
  0x8e   : > { %v277_v27 = vsel %vm197_vm11, %v275_v24, %v257_v25  ;;  %v243_v28 = vsel %vm199_vm12, %v241_v23, %v225_v26 }
  0x8f   : > { %v279_v29 = vsel %vm278_vm14, %v277_v27, 0  ;;  %v244_v30 = vsel %vm202_vm13, %v243_v28, 0  ;;  %vm337_vm14 = vcmask 949248  }
  0x90   : > { %v280_v31 = vsel %vm202_vm13, %v279_v29, 0  ;;  %v245_v32 = vsel %vm204_vm15, %v244_v30, 0 }
  0x91   : > { %v259_v33 = vpop.permute.xlu1 %258  ;;  %v227_v34 = vpop.permute.xlu0 %226 }
  0x92   : > { %v282_v35 = vsel %vm204_vm15, %v280_v31, %v259_v33  ;;  %v247_v36 = vsel %vm206_vm0, %v245_v32, %v227_v34 }
  0x93   : > { %v284_v37 = vsel %vm283_vm2, %v282_v35, 0  ;;  %v248_v38 = vsel %vm209_vm1, %v247_v36, 0 }
  0x94   : > { %v285_v39 = vsel %vm209_vm1, %v284_v37, 0  ;;  %v249_v40 = vsel %vm211_vm6, %v248_v38, 0 }
  0x95   : > { %289 = vrot.lane.b32.xlu0 %v249_v40, %s659_s7  ;;  %v261_v41 = vpop.permute.xlu0 %260  ;;  %v174_v42 = vpop.permute.xlu1 %173  ;;  %v168_v40 = vld [vmem:[%s820_s1] sm:$0xf]  ;;  %s679_s7 = smov 98  }
  0x96   : > { %v287_v43 = vsel %vm211_vm6, %v285_v39, %v261_v41  ;;  %v187_v44 = vsel %vm185_vm3, 0, %v174_v42  ;;  %vm213_vm3 = vcmask 416768  }
  0x97   : > { %292 = vrot.lane.b32.xlu1 %v287_v43, %s660_s8  ;;  %v189_v45 = vsel %vm188_vm5, %v187_v44, 0  ;;  %vm216_vm5 = vcmask 482304  }
  0x98   : > { %v191_v46 = vsel %vm190_vm7, %v189_v45, 0  ;;  %vm297_vm7 = vcmask 490496  }
  0x99   : > { %295 = vrot.lane.b32.xlu0 %v648_v1, %s661_s9  ;;  %v176_v47 = vpop.permute.xlu0 %175  ;;  %v178_v49 = vpop.permute.xlu1 %177 }
  0x9a   : > { %v194_v48 = vsel %vm192_vm8, %v191_v46, %v176_v47  ;;  %vm300_vm8 = vcmask 908288  }
  0x9b   : > { %v196_v50 = vsel %vm195_vm9, %v194_v48, 0  ;;  %vm357_vm9 = vcmask 1043456  }
  0x9c   : > { %v198_v51 = vsel %vm197_vm11, %v196_v50, 0  ;;  %vm343_vm11 = vcmask 883712  }
  0x9d   : > { %v201_v52 = vsel %vm199_vm12, %v198_v51, %v178_v49  ;;  %v180_v53 = vpop.permute.xlu0 %179  ;;  %v182_v59 = vpop.permute.xlu1 %181  ;;  %vm349_vm12 = vcmask 875520  }
  0x9e   : > { %v203_v54 = vsel %vm202_vm13, %v201_v52, 0  ;;  %vm331_vm13 = vcmask 957440  }
  0x9f   : > { %v205_v55 = vsel %vm204_vm15, %v203_v54, 0 }
  0xa0   : > { %v208_v56 = vsel %vm206_vm0, %v205_v55, %v180_v53 }
  0xa1   : > { %v210_v57 = vsel %vm209_vm1, %v208_v56, 0  ;;  %vm325_vm1 = vcmask 965632  }
  0xa2   : > { %v212_v58 = vsel %vm211_vm6, %v210_v57, 0  ;;  %vm313_vm6 = vcmask 1039360  }
  0xa3   : > { %v215_v60 = vsel %vm213_vm3, %v212_v58, %v182_v59  ;;  %vm393_vm3 = vcmask 588800  }
  0xa4   : > { %v217_v61 = vsel %vm216_vm5, %v215_v60, 0  ;;  %vm492_vm5 = vcmask 130048  }
 0x107   : > { %v290_v62 = vpop.permute.xlu0 %289 }
 0x108   : > { %v299_v63 = vsel %vm297_vm7, %v217_v61, %v290_v62  ;;  %vm494_vm7 = vcmask 195584  }
 0x109   : > { %v293_v0 = vpop.permute.xlu1 %292 }
 0x10a   : > { %v758_v1 = vsel %vm300_vm8, %v299_v63, %v293_v0  ;;  %vm496_vm8 = vcmask 261120  }
 0x10b   : > { %351 = vrot.lane.b32.xlu1 %v758_v1, %s662_s10  ;;  %v296_v2 = vpop.permute.xlu0 %295  ;;  %v307_v4 = vrot.slane %v758_v1, 4 }
 0x10c   : > { %v763_v3 = vsel %vm206_vm0, %v293_v0, %v296_v2  ;;  %vm319_vm0 = vcmask 1031168  }
 0x10d   : > { %353 = vrot.lane.b32.xlu0 %v763_v3, %s662_s10  ;;  %v308_v5 = vrot.slane %v763_v3, 4 }
 0x10f   : > { %339 = vrot.lane.b32.xlu1 %v758_v1, %s663_s11 }
 0x111   : > { %341 = vrot.lane.b32.xlu0 %v763_v3, %s663_s11 }
 0x113   : > { %327 = vrot.lane.b32.xlu1 %v758_v1, %s664_s15 }
 0x115   : > { %329 = vrot.lane.b32.xlu0 %v763_v3, %s664_s15 }
 0x117   : > { %315 = vrot.lane.b32.xlu1 %v758_v1, %s665_s16 }
 0x119   : > { %317 = vrot.lane.b32.xlu0 %v763_v3, %s665_s16 }
 0x11b   : > { %345 = vrot.lane.b32.xlu1 %v307_v4, %s666_s17 }
 0x11d   : > { %347 = vrot.lane.b32.xlu0 %v308_v5, %s666_s17 }
 0x11f   : > { %333 = vrot.lane.b32.xlu1 %v307_v4, %s667_s18 }
 0x121   : > { %335 = vrot.lane.b32.xlu0 %v308_v5, %s667_s18 }
 0x123   : > { %321 = vrot.lane.b32.xlu1 %v307_v4, %s668_s19 }
 0x125   : > { %323 = vrot.lane.b32.xlu0 %v308_v5, %s668_s19 }
 0x127   : > { %309 = vrot.lane.b32.xlu1 %v307_v4, %s669_s20 }
 0x129   : > { %311 = vrot.lane.b32.xlu0 %v308_v5, %s669_s20 }
 0x12b   : > { %390 = vperm.xlu1 %631, %v169_v6  }
 0x17d   : > { %v352_v7 = vpop.permute.xlu1 %351 }
 0x17f   : > { %v354_v8 = vpop.permute.xlu0 %353 }
 0x180   : > { %581 = vmatprep.subr.msk.bf16.mxu0 %vm357_vm9, %v354_v8  ;;  %v356_v9 = vsel %vm355_vm10, %v352_v7, %v354_v8  ;;  %vm502_vm10 = vcmask 523264  }
 0x181   : > { %v340_v10 = vpop.permute.xlu1 %339  ;;  %v398_v11 = vsel %vm357_vm9, %v356_v9, 0 }
 0x182   : > { %410 = vmatpush1.bf16.msra.mxu0 %v398_v11 }
 0x183   : > { %v342_v12 = vpop.permute.xlu0 %341 }
 0x184   : > { %v344_v19 = vsel %vm343_vm11, %v340_v10, %v342_v12  ;;  %vm507_vm11 = vcmask 719872  }
 0x185   : > { %v328_v13 = vpop.permute.xlu1 %327 }
 0x187   : > { %v330_v14 = vpop.permute.xlu0 %329 }
 0x188   : > { %v332_v25 = vsel %vm331_vm13, %v328_v13, %v330_v14  ;;  %vm515_vm13 = vcmask 982016  }
 0x189   : > { %v316_v15 = vpop.permute.xlu1 %315 }
 0x18b   : > { %v318_v16 = vpop.permute.xlu0 %317 }
 0x18c   : > { %v320_v31 = vsel %vm319_vm0, %v316_v15, %v318_v16 }
 0x18d   : > { %v346_v17 = vpop.permute.xlu1 %345 }
 0x18f   : > { %v348_v18 = vpop.permute.xlu0 %347 }
 0x190   : > { %v350_v20 = vsel %vm349_vm12, %v346_v17, %v348_v18  ;;  %v386_v21 = vsel %vm357_vm9, %v342_v12, %v348_v18  ;;  %vm511_vm12 = vcmask 850944  }
 0x191   : > { %v334_v22 = vpop.permute.xlu1 %333  ;;  %411 = vmatprep.subr.bf16.mxu0 %v386_v21  ;;  %v382_v23 = vsel %vm357_vm9, %v344_v19, %v350_v20 }
 0x192   : > { %412 = vmatpush1.bf16.msra.mxu0 %v382_v23 }
 0x193   : > { %v336_v24 = vpop.permute.xlu0 %335 }
 0x194   : > { %v338_v26 = vsel %vm337_vm14, %v334_v22, %v336_v24  ;;  %v378_v27 = vsel %vm357_vm9, %v330_v14, %v336_v24 }
 0x195   : > { %v322_v28 = vpop.permute.xlu1 %321  ;;  %413 = vmatprep.subr.bf16.mxu0 %v378_v27  ;;  %v374_v29 = vsel %vm357_vm9, %v332_v25, %v338_v26 }
 0x196   : > { %414 = vmatpush1.bf16.msra.mxu0 %v374_v29 }
 0x197   : > { %v324_v30 = vpop.permute.xlu0 %323 }
 0x198   : > { %v326_v32 = vsel %vm325_vm1, %v322_v28, %v324_v30  ;;  %v370_v33 = vsel %vm357_vm9, %v318_v16, %v324_v30 }
 0x199   : > { %415 = vmatprep.subr.bf16.mxu0 %v370_v33  ;;  %v366_v34 = vsel %vm357_vm9, %v320_v31, %v326_v32  ;;  %v310_v35 = vpop.permute.xlu1 %309 }
 0x19a   : > { %416 = vmatpush1.bf16.msra.mxu0 %v366_v34 }
 0x19b   : > { %v312_v36 = vpop.permute.xlu0 %311 }
 0x19c   : > { %v314_v37 = vsel %vm313_vm6, %v310_v35, %v312_v36  ;;  %v362_v38 = vsel %vm357_vm9, %v763_v3, %v312_v36 }
 0x19d   : > { %417 = vmatprep.subr.bf16.mxu0 %v362_v38  ;;  %v359_v39 = vsel %vm357_vm9, %v758_v1, %v314_v37  ;;  %vm500_vm9 = vcmask 457728  }
 0x19e   : > { %418 = vmatpush1.bf16.msra.mxu0 %v359_v39 }
 0x1a1   : > { %582 = vmatmul.mubr.msk.bf16.vlgmr.msra.gmra.mxu0 %vm393_vm3, %v168_v40 }
 0x1a6   : > { %v391_v41 = vpop.permute.xlu1 %390 }
 0x261   : > { %v437_v42 = vpop.f32.mrf.mxu0 }
 0x262   : > { %v438_v43 = vadd.f32 %v437_v42, %v391_v41 }
 0x263   : > { %v439_v44 = vpop.f32.mrf.mxu0 }
 0x264   : > { %448 = vrot.lane.b32.xlu1 %v438_v43, %s670_s25  ;;  %445 = vrot.lane.b32.xlu0 %v438_v43, %s665_s16  ;;  %v440_v47 = vadd.f32 %v439_v44, %v391_v41 }
 0x265   : > { %v441_v45 = vpop.f32.mrf.mxu0 }
 0x267   : > { %v442_v46 = vpop.f32.mrf.mxu0 }
 0x268   : > { %454 = vrot.lane.b32.xlu1 %v438_v43, %s671_s26  ;;  %451 = vrot.lane.b32.xlu0 %v438_v43, %s672_s27 }
 0x26c   : > { %460 = vrot.lane.b32.xlu1 %v438_v43, %s667_s18  ;;  %457 = vrot.lane.b32.xlu0 %v438_v43, %s668_s19 }
 0x270   : > { %466 = vrot.lane.b32.xlu1 %v438_v43, %s673_s28  ;;  %463 = vrot.lane.b32.xlu0 %v438_v43, %s674_s29 }
 0x274   : > { %472 = vrot.lane.b32.xlu1 %v438_v43, %s663_s11  ;;  %469 = vrot.lane.b32.xlu0 %v438_v43, %s675_s30 }
 0x278   : > { %478 = vrot.lane.b32.xlu1 %v438_v43, %s676_s4  ;;  %475 = vrot.lane.b32.xlu0 %v438_v43, %s662_s10  ;;  %s165_s10 = scalar_lea.vmem %s822_s3, %s578_s14 }
 0x27c   : > { %485 = vrot.lane.b32.xlu1 %v440_v47, %s677_s5  ;;  %482 = vrot.lane.b32.xlu0 %v440_v47, %s678_s6 }
 0x280   : > { %488 = vrot.lane.b32.xlu0 %v440_v47, %s679_s7 }
 0x2d6   : > { %v449_v48 = vpop.permute.xlu1 %448  ;;  %v446_v49 = vpop.permute.xlu0 %445 }
 0x2d7   : > { %v491_v50 = vsel %vm262_vm4, %v438_v43, %v446_v49  ;;  %vm505_vm4 = vcmask 654336  }
 0x2d8   : > { %v493_v52 = vsel %vm492_vm5, %v491_v50, %v449_v48 }
 0x2da   : > { %v455_v51 = vpop.permute.xlu1 %454  ;;  %v452_v53 = vpop.permute.xlu0 %451 }
 0x2db   : > { %v495_v54 = vsel %vm494_vm7, %v493_v52, %v452_v53 }
 0x2dc   : > { %v497_v56 = vsel %vm496_vm8, %v495_v54, %v455_v51 }
 0x2de   : > { %v461_v55 = vpop.permute.xlu1 %460  ;;  %v458_v57 = vpop.permute.xlu0 %457 }
 0x2df   : > { %v498_v58 = vsel %vm204_vm15, %v497_v56, %v458_v57  ;;  %vm509_vm15 = vcmask 785408  }
 0x2e0   : > { %v499_v60 = vsel %vm283_vm2, %v498_v58, %v461_v55  ;;  %vm513_vm2 = vcmask 916480  }
 0x2e2   : > { %v467_v59 = vpop.permute.xlu1 %466  ;;  %v464_v61 = vpop.permute.xlu0 %463 }
 0x2e3   : > { %v501_v62 = vsel %vm500_vm9, %v499_v60, %v464_v61 }
 0x2e4   : > { %v503_v0 = vsel %vm502_vm10, %v501_v62, %v467_v59 }
 0x2e6   : > { %v473_v63 = vpop.permute.xlu1 %472  ;;  %v470_v1 = vpop.permute.xlu0 %469 }
 0x2e7   : > { %v504_v2 = vsel %vm393_vm3, %v503_v0, %v470_v1 }
 0x2e8   : > { %v506_v4 = vsel %vm505_vm4, %v504_v2, %v473_v63 }
 0x2ea   : > { %v479_v3 = vpop.permute.xlu1 %478  ;;  %v476_v5 = vpop.permute.xlu0 %475 }
 0x2eb   : > { %v508_v6 = vsel %vm507_vm11, %v506_v4, %v476_v5 }
 0x2ec   : > { %v510_v7 = vsel %vm509_vm15, %v508_v6, %v479_v3 }
 0x2ee   : > { %v483_v8 = vpop.permute.xlu0 %482  ;;  %v486_v9 = vpop.permute.xlu1 %485 }
 0x2ef   : > { %v512_v10 = vsel %vm511_vm12, %v510_v7, %v483_v8 }
 0x2f0   : > { %v514_v11 = vsel %vm513_vm2, %v512_v10, %v486_v9 }
 0x2f2   : > { %v489_v12 = vpop.permute.xlu0 %488 }
 0x2f3   : > { %v516_v13 = vsel %vm515_vm13, %v514_v11, %v489_v12 }
 0x2f4   : > { %v517_v14 = vmax.f32 %v516_v13, 0.0 }
 0x2f6   : > { %v518_v15 = vpack.c.bf16 %v517_v14, %v517_v14 }
 0x2f8   : > { %519 = vst [vmem:[%s165_s10] sm:$0xf] %v518_v15 }
 0x2f9 PF: > { %s13_s12 = sadd.s32 1, %s640_s12  }
 0x2fa   : > { %p10_p4 = scmp.ge.s32.totalorder %s13_s12, 4  }
 0x2fc   :  { %12 = sbr.rel (!%p10_p4) target bundleno = 1 (0x1), region = 62 }

// kernel: resnet_forward.10
= control target key start
LH: loop header
LB: loop body
LE: loop exit
PB: predicated region body
PF: predicated region fallthrough
CT: control target
= control target key end

     0   :  { %s1196_s24 = smov 0   ;;  %s1549_s0 = inlined_call_operand.vmem [shape: bf16[2,8,128], index: 0, kind: input, shape index: {}]   ;;  %s1550_s1 = inlined_call_operand.vmem [shape: bf16[8,72], index: 1, kind: input, shape index: {}]   ;;  %s1551_s2 = inlined_call_operand.vmem [shape: f32[8,1], index: 2, kind: input, shape index: {}]   ;;  %s1552_s3 = inlined_call_operand.vmem [shape: bf16[8,72], index: 3, kind: input, shape index: {}]   ;;  %s1553_s4 = inlined_call_operand.vmem [shape: f32[8,1], index: 4, kind: input, shape index: {}]   ;;  %s1554_s5 = inlined_call_operand.vmem [shape: bf16[8,8], index: 5, kind: input, shape index: {}]   ;;  %s1555_s6 = inlined_call_operand.vmem [shape: f32[8,1], index: 6, kind: input, shape index: {}]   ;;  %s1556_s7 = inlined_call_operand.vmem [shape: bf16[2,8,128], index: 7, kind: output, shape index: {}]  }
   0x1 LB: > { %s1034_s25 = sadd.s32 4294967295, %s1114_s24   ;;  %p1038_p0 = scmp.ge.s32.totalorder %s1114_s24, 1  ;;  %s1114_s24 = sphi %s1196_s24, %s17_s24  }
   0x2   : > { %p236_p1 = scmp.lt.s32.totalorder %s1114_s24, 3 }
   0x4   : > { %p237_p2 = pnand %p1038_p0, %p236_p1 }
   0x5   : > { %p266_p3 = scmp.lt.s32.totalorder (!%p237_p2), %s1034_s25, 1  ;;  %s1116_s30 = smov (!%p237_p2), 91  }
   0x6   : > { %240 = sbr.rel (%p237_p2) target bundleno = 1509 (0x5e5), region = 48  ;;  %s1117_s8 = smov (!%p237_p2), 89  }
   0x7   : > { %s1118_s9 = smov (!%p237_p2), 50   ;;  %s1119_s10 = smov (!%p237_p2), 48  }
   0x8   : > { %s1120_s11 = smov (!%p237_p2), 52   ;;  %s1121_s12 = smov (!%p237_p2), 93  }
   0x9   : > { %s1123_s13 = smov (!%p237_p2), 54   ;;  %s1124_s14 = smov (!%p237_p2), 95  }
   0xa   : > { %s1125_s15 = smov (!%p237_p2), 56   ;;  %s1126_s16 = smov (!%p237_p2), 97  }
   0xb   : > { %s1675_s25 = smov (!%p266_p3, %s1034_s25), 1  ;;  %v1122_v2 = vmov 0   ;;  %s1588_s17 = smov 58   ;;  %vm336_vm0 = vcmask 7168   ;;  %vm1560_vm1 = vcmask 72704   ;;  %vm1559_vm2 = vcmask 80896  }
   0xc   : > { %s1565_s26 = sshll.u32 %s1675_s25, 2  ;;  %543 = vmatprep.mubr.bf16.mxu0 %v1122_v2  ;;  %1105 = vset.pattern.permute.xlu1 %v1122_v2  ;;  %s1128_s18 = smov 11   ;;  %vm293_vm3 = vcmask 89088   ;;  %vm370_vm4 = vcmask 64512   ;;  %vm296_vm5 = vcmask 154624   ;;  %vm298_vm6 = vcmask 162816  }
   0xd   : > { %s269_s29 = scalar_lea.vmem %s1549_s0, %s1565_s26  ;;  %853 = vmatprep.mubr.bf16.mxu1 %v1122_v2  ;;  %1106 = vset.pattern.permute.xlu0 %v1122_v2  ;;  %s1572_s19 = smov 13   ;;  %vm1557_vm7 = vcmask 146432   ;;  %vm1562_vm8 = vcmask 171008   ;;  %vm303_vm9 = vcmask 236544   ;;  %vm1558_vm10 = vcmask 228352  }
   0xe   : > { %v1212_v0 = vld [vmem:[%s269_s29] sm:$0xf]  ;;  %s1573_s20 = smov 15   ;;  %s1568_s21 = smov 17   ;;  %vm1563_vm11 = vcmask 244736   ;;  %vm1564_vm12 = vcmask 252928  }
   0xf   : > { %v1041_v1 = vcombine.low %v1212_v0, %v1212_v0  ;;  %s1571_s22 = smov 19   ;;  %vm310_vm13 = vcmask 318464   ;;  %vm1561_vm14 = vcmask 310272   ;;  %vm312_vm15 = vcmask 326656   ;;  %s1567_s23 = smov 60  }
  0x10   : > { %s1566_s27 = smov 111   ;;  %s1135_s28 = smov 41  }
  0x11   : > { %328 = vrot.lane.b32.xlu1 %v1041_v1, %s1116_s30  ;;  %326 = vrot.lane.b32.xlu0 %v1041_v1, %s1117_s8  ;;  %s1136_s29 = smov 106   ;;  %s1569_s26 = smov 117  }
  0x15   : > { %360 = vrot.lane.b32.xlu1 %v1041_v1, %s1118_s9  ;;  %358 = vrot.lane.b32.xlu0 %v1041_v1, %s1119_s10 }
  0x19   : > { %362 = vrot.lane.b32.xlu1 %v1041_v1, %s1120_s11  ;;  %330 = vrot.lane.b32.xlu0 %v1041_v1, %s1121_s12 }
  0x1d   : > { %364 = vrot.lane.b32.xlu1 %v1041_v1, %s1123_s13  ;;  %332 = vrot.lane.b32.xlu0 %v1041_v1, %s1124_s14 }
  0x21   : > { %366 = vrot.lane.b32.xlu1 %v1041_v1, %s1125_s15  ;;  %334 = vrot.lane.b32.xlu0 %v1041_v1, %s1126_s16 }
  0x25   : > { %368 = vrot.lane.b32.xlu0 %v1041_v1, %s1588_s17  ;;  %281 = vrot.lane.b32.xlu1 %v1041_v1, %s1128_s18  ;;  %s1592_s17 = smov 122  }
  0x29   : > { %283 = vrot.lane.b32.xlu0 %v1041_v1, %s1572_s19  ;;  %285 = vrot.lane.b32.xlu1 %v1041_v1, %s1573_s20  ;;  %s1594_s19 = smov 112   ;;  %s1148_s20 = smov 114  }
  0x2d   : > { %287 = vrot.lane.b32.xlu0 %v1041_v1, %s1568_s21  ;;  %289 = vrot.lane.b32.xlu1 %v1041_v1, %s1571_s22  ;;  %s1141_s21 = smov 116   ;;  %s1584_s22 = smov 127  }
  0x83   : > { %v329_v3 = vpop.permute.xlu1 %328  ;;  %v327_v4 = vpop.permute.xlu0 %326 }
  0x84   : > { %v338_v5 = vsel %vm336_vm0, 0, %v327_v4 }
  0x85   : > { %v340_v6 = vsel %vm1560_vm1, %v338_v5, 0 }
  0x86   : > { %v341_v7 = vsel %vm1559_vm2, %v340_v6, 0 }
  0x87   : > { %v361_v8 = vpop.permute.xlu1 %360  ;;  %v359_v9 = vpop.permute.xlu0 %358  ;;  %v343_v10 = vsel %vm293_vm3, %v341_v7, %v329_v3 }
  0x88   : > { %v372_v11 = vsel %vm370_vm4, %v359_v9, 0  ;;  %v344_v12 = vsel %vm296_vm5, %v343_v10, 0 }
  0x89   : > { %v373_v13 = vsel %vm1560_vm1, %v372_v11, 0  ;;  %v345_v17 = vsel %vm298_vm6, %v344_v12, 0  ;;  %vm1579_vm1 = vcmask 408576  }
  0x8a   : > { %v375_v14 = vsel %vm1559_vm2, %v373_v13, %v361_v8  ;;  %vm1603_vm2 = vcmask 392192   ;;  %v277_v8 = vld [vmem:[%s1551_s2] sm:$0xff] }
  0x8b   : > { %v363_v15 = vpop.permute.xlu1 %362  ;;  %v377_v16 = vsel %vm1557_vm7, %v375_v14, 0  ;;  %v331_v18 = vpop.permute.xlu0 %330  ;;  %vm1599_vm7 = vcmask 334848  }
  0x8c   : > { %v378_v19 = vsel %vm296_vm5, %v377_v16, 0  ;;  %v347_v20 = vsel %vm1562_vm8, %v345_v17, %v331_v18 }
  0x8d   : > { %v380_v21 = vsel %vm298_vm6, %v378_v19, %v363_v15  ;;  %v348_v22 = vsel %vm303_vm9, %v347_v20, 0 }
  0x8e   : > { %v382_v23 = vsel %vm1558_vm10, %v380_v21, 0  ;;  %v349_v24 = vsel %vm1563_vm11, %v348_v22, 0  ;;  %vm1580_vm10 = vcmask 400384  }
  0x8f   : > { %v383_v25 = vsel %vm303_vm9, %v382_v23, 0  ;;  %v365_v26 = vpop.permute.xlu1 %364  ;;  %v333_v27 = vpop.permute.xlu0 %332 }
  0x90   : > { %v385_v28 = vsel %vm1563_vm11, %v383_v25, %v365_v26  ;;  %v351_v29 = vsel %vm1564_vm12, %v349_v24, %v333_v27 }
  0x91   : > { %v387_v30 = vsel %vm1561_vm14, %v385_v28, 0  ;;  %v352_v31 = vsel %vm310_vm13, %v351_v29, 0  ;;  %vm1577_vm14 = vcmask 416768  }
  0x92   : > { %v388_v32 = vsel %vm310_vm13, %v387_v30, 0  ;;  %v353_v33 = vsel %vm312_vm15, %v352_v31, 0 }
  0x93   : > { %v367_v34 = vpop.permute.xlu1 %366  ;;  %v335_v35 = vpop.permute.xlu0 %334 }
  0x94   : > { %v390_v36 = vsel %vm312_vm15, %v388_v32, %v367_v34  ;;  %v355_v37 = vsel %vm1599_vm7, %v353_v33, %v335_v35 }
  0x95   : > { %v392_v38 = vsel %vm1603_vm2, %v390_v36, 0  ;;  %v356_v39 = vsel %vm1580_vm10, %v355_v37, 0 }
  0x96   : > { %v393_v40 = vsel %vm1580_vm10, %v392_v38, 0  ;;  %v357_v41 = vsel %vm1579_vm1, %v356_v39, 0 }
  0x97   : > { %397 = vrot.lane.b32.xlu0 %v357_v41, %s1567_s23  ;;  %v369_v42 = vpop.permute.xlu0 %368  ;;  %v282_v44 = vpop.permute.xlu1 %281  ;;  %s1586_s23 = smov 107  }
  0x98   : > { %v395_v43 = vsel %vm1579_vm1, %v393_v40, %v369_v42  ;;  %v295_v45 = vsel %vm293_vm3, 0, %v282_v44  ;;  %v276_v42 = vld [vmem:[%s1550_s1] sm:$0xf] }
  0x99   : > { %400 = vrot.lane.b32.xlu1 %v395_v43, %s1566_s27  ;;  %v297_v46 = vsel %vm296_vm5, %v295_v45, 0  ;;  %s1590_s27 = smov 126  }
  0x9a   : > { %v299_v47 = vsel %vm298_vm6, %v297_v46, 0 }
  0x9b   : > { %403 = vrot.lane.b32.xlu0 %v1122_v2, %s1135_s28  ;;  %v284_v48 = vpop.permute.xlu0 %283  ;;  %v286_v52 = vpop.permute.xlu1 %285  ;;  %s1137_s28 = smov 108  }
  0x9c   : > { %v302_v49 = vsel %vm1562_vm8, %v299_v47, %v284_v48  ;;  %vm1576_vm8 = vcmask 482304  }
  0x9d   : > { %v304_v50 = vsel %vm303_vm9, %v302_v49, 0 }
  0x9e   : > { %v306_v51 = vsel %vm1563_vm11, %v304_v50, 0  ;;  %vm1575_vm11 = vcmask 490496  }
  0x9f   : > { %v309_v53 = vsel %vm1564_vm12, %v306_v51, %v286_v52  ;;  %v288_v56 = vpop.permute.xlu0 %287  ;;  %v290_v60 = vpop.permute.xlu1 %289  ;;  %vm1574_vm12 = vcmask 908288  }
  0xa0   : > { %v311_v54 = vsel %vm310_vm13, %v309_v53, 0 }
  0xa1   : > { %v313_v55 = vsel %vm312_vm15, %v311_v54, 0 }
  0xa2   : > { %v316_v57 = vsel %vm1599_vm7, %v313_v55, %v288_v56 }
  0xa3   : > { %v318_v58 = vsel %vm1580_vm10, %v316_v57, 0  ;;  %vm1596_vm10 = vcmask 1031168  }
  0xa4   : > { %v320_v59 = vsel %vm1579_vm1, %v318_v58, 0  ;;  %vm1582_vm1 = vcmask 949248  }
  0xa5   : > { %v323_v61 = vsel %vm1577_vm14, %v320_v59, %v290_v60  ;;  %vm1581_vm14 = vcmask 875520  }
  0xa6   : > { %v325_v62 = vsel %vm1576_vm8, %v323_v61, 0  ;;  %vm1598_vm8 = vcmask 883712  }
 0x109   : > { %v398_v63 = vpop.permute.xlu0 %397 }
 0x10a   : > { %v407_v1 = vsel %vm1575_vm11, %v325_v62, %v398_v63  ;;  %vm1578_vm11 = vcmask 867328  }
 0x10b   : > { %v401_v2 = vpop.permute.xlu1 %400 }
 0x10c   : > { %v1285_v3 = vsel %vm1574_vm12, %v407_v1, %v401_v2  ;;  %vm465_vm12 = vcmask 1043456  }
 0x10d   : > { %459 = vrot.lane.b32.xlu1 %v1285_v3, %s1136_s29  ;;  %v1289_v4 = vpop.permute.xlu0 %403  ;;  %v415_v6 = vrot.slane %v1285_v3, 4 }
 0x10e   : > { %v1293_v5 = vsel %vm1599_vm7, %v401_v2, %v1289_v4  ;;  %vm1604_vm7 = vcmask 523264  }
 0x10f   : > { %461 = vrot.lane.b32.xlu0 %v1293_v5, %s1136_s29  ;;  %v416_v7 = vrot.slane %v1293_v5, 4 }
 0x111   : > { %447 = vrot.lane.b32.xlu1 %v1285_v3, %s1137_s28 }
 0x113   : > { %449 = vrot.lane.b32.xlu0 %v1293_v5, %s1137_s28 }
 0x115   : > { %435 = vrot.lane.b32.xlu1 %v1285_v3, %s1569_s26 }
 0x117   : > { %437 = vrot.lane.b32.xlu0 %v1293_v5, %s1569_s26  ;;  %s1142_s26 = smov 118  }
 0x119   : > { %423 = vrot.lane.b32.xlu1 %v1285_v3, %s1590_s27 }
 0x11b   : > { %425 = vrot.lane.b32.xlu0 %v1293_v5, %s1590_s27 }
 0x11d   : > { %453 = vrot.lane.b32.xlu1 %v415_v6, %s1586_s23 }
 0x11f   : > { %455 = vrot.lane.b32.xlu0 %v416_v7, %s1586_s23  ;;  %s1593_s23 = smov 120  }
 0x121   : > { %441 = vrot.lane.b32.xlu1 %v415_v6, %s1141_s21 }
 0x123   : > { %443 = vrot.lane.b32.xlu0 %v416_v7, %s1141_s21 }
 0x125   : > { %429 = vrot.lane.b32.xlu1 %v415_v6, %s1142_s26 }
 0x127   : > { %431 = vrot.lane.b32.xlu0 %v416_v7, %s1142_s26 }
 0x129   : > { %417 = vrot.lane.b32.xlu1 %v415_v6, %s1584_s22 }
 0x12b   : > { %419 = vrot.lane.b32.xlu0 %v416_v7, %s1584_s22  ;;  %s1589_s22 = smov 124  }
 0x12d   : > { %498 = vperm.xlu1 %1105, %v277_v8  }
 0x17f   : > { %v460_v9 = vpop.permute.xlu1 %459 }
 0x181   : > { %v462_v10 = vpop.permute.xlu0 %461 }
 0x182   : > { %1042 = vmatprep.subr.msk.bf16.mxu0 %vm465_vm12, %v462_v10  ;;  %v464_v11 = vsel %vm1578_vm11, %v460_v9, %v462_v10  ;;  %vm1597_vm11 = vcmask 957440  }
 0x183   : > { %v448_v12 = vpop.permute.xlu1 %447  ;;  %v506_v13 = vsel %vm465_vm12, %v464_v11, 0 }
 0x184   : > { %518 = vmatpush1.bf16.msra.mxu0 %v506_v13 }
 0x185   : > { %v450_v14 = vpop.permute.xlu0 %449 }
 0x186   : > { %v452_v21 = vsel %vm1598_vm8, %v448_v12, %v450_v14  ;;  %vm1605_vm8 = vcmask 457728  }
 0x187   : > { %v436_v15 = vpop.permute.xlu1 %435 }
 0x189   : > { %v438_v16 = vpop.permute.xlu0 %437 }
 0x18a   : > { %v440_v27 = vsel %vm1597_vm11, %v436_v15, %v438_v16  ;;  %vm1602_vm11 = vcmask 261120  }
 0x18b   : > { %v424_v17 = vpop.permute.xlu1 %423 }
 0x18d   : > { %v426_v18 = vpop.permute.xlu0 %425 }
 0x18e   : > { %v428_v33 = vsel %vm1596_vm10, %v424_v17, %v426_v18  ;;  %vm1600_vm10 = vcmask 195584  }
 0x18f   : > { %v454_v19 = vpop.permute.xlu1 %453 }
 0x191   : > { %v456_v20 = vpop.permute.xlu0 %455 }
 0x192   : > { %v458_v22 = vsel %vm1581_vm14, %v454_v19, %v456_v20  ;;  %v494_v23 = vsel %vm465_vm12, %v450_v14, %v456_v20  ;;  %vm1583_vm14 = vcmask 965632   ;;  %v935_v20 = vsel %vm465_vm12, %v1212_v0, 0 }
 0x193   : > { %v442_v24 = vpop.permute.xlu1 %441  ;;  %519 = vmatprep.subr.bf16.mxu0 %v494_v23  ;;  %v490_v25 = vsel %vm465_vm12, %v452_v21, %v458_v22  ;;  %v1154_v21 = vmov 0.0   ;;  %v924_v22 = vld [vmem:[%s1554_s5] sm:$0xf] }
 0x194   : > { %520 = vmatpush1.bf16.msra.mxu0 %v490_v25 }
 0x195   : > { %v444_v26 = vpop.permute.xlu0 %443 }
 0x196   : > { %v446_v28 = vsel %vm1582_vm1, %v442_v24, %v444_v26  ;;  %v486_v29 = vsel %vm465_vm12, %v438_v16, %v444_v26  ;;  %vm1595_vm1 = vcmask 1039360  }
 0x197   : > { %v430_v30 = vpop.permute.xlu1 %429  ;;  %521 = vmatprep.subr.bf16.mxu0 %v486_v29  ;;  %v482_v31 = vsel %vm465_vm12, %v440_v27, %v446_v28 }
 0x198   : > { %522 = vmatpush1.bf16.msra.mxu0 %v482_v31 }
 0x199   : > { %v432_v32 = vpop.permute.xlu0 %431 }
 0x19a   : > { %v434_v34 = vsel %vm1583_vm14, %v430_v30, %v432_v32  ;;  %v478_v35 = vsel %vm465_vm12, %v426_v18, %v432_v32  ;;  %vm501_vm14 = vcmask 588800  }
 0x19b   : > { %523 = vmatprep.subr.bf16.mxu0 %v478_v35  ;;  %v474_v36 = vsel %vm465_vm12, %v428_v33, %v434_v34  ;;  %v418_v37 = vpop.permute.xlu1 %417 }
 0x19c   : > { %524 = vmatpush1.bf16.msra.mxu0 %v474_v36 }
 0x19d   : > { %v420_v38 = vpop.permute.xlu0 %419 }
 0x19e   : > { %v422_v39 = vsel %vm1595_vm1, %v418_v37, %v420_v38  ;;  %v470_v40 = vsel %vm465_vm12, %v1293_v5, %v420_v38  ;;  %vm1601_vm1 = vcmask 130048  }
 0x19f   : > { %525 = vmatprep.subr.bf16.mxu0 %v470_v40  ;;  %v467_v41 = vsel %vm465_vm12, %v1285_v3, %v422_v39 }
 0x1a0   : > { %526 = vmatpush1.bf16.msra.mxu0 %v467_v41 }
 0x1a1   : > { %1051 = vmatprep.subr.bf16.mxu0 %v1154_v21 }
 0x1a3   : > { %1043 = vmatmul.mubr.msk.bf16.vlgmr.msra.gmra.mxu0 %vm501_vm14, %v276_v42 }
 0x1a4   : > { %1052 = vmatpush3.bf16.msra.mxu0 %v935_v20 }
 0x1a8   : > { %v499_v43 = vpop.permute.xlu1 %498 }
 0x263   : > { %v545_v44 = vpop.f32.mrf.mxu0 }
 0x264   : > { %v546_v45 = vadd.f32 %v545_v44, %v499_v43 }
 0x265   : > { %v547_v46 = vpop.f32.mrf.mxu0 }
 0x266   : > { %556 = vrot.lane.b32.xlu1 %v546_v45, %s1589_s22  ;;  %553 = vrot.lane.b32.xlu0 %v546_v45, %s1590_s27  ;;  %s1149_s22 = smov 110   ;;  %s1150_s27 = smov 104   ;;  %v548_v49 = vadd.f32 %v547_v46, %v499_v43 }
 0x267   : > { %v549_v47 = vpop.f32.mrf.mxu0 }
 0x269   : > { %v550_v48 = vpop.f32.mrf.mxu0 }
 0x26a   : > { %562 = vrot.lane.b32.xlu1 %v546_v45, %s1593_s23  ;;  %559 = vrot.lane.b32.xlu0 %v546_v45, %s1592_s17  ;;  %s1151_s17 = smov 100   ;;  %s1152_s23 = smov 102  }
 0x26e   : > { %568 = vrot.lane.b32.xlu1 %v546_v45, %s1141_s21  ;;  %565 = vrot.lane.b32.xlu0 %v546_v45, %s1142_s26 }
 0x272   : > { %574 = vrot.lane.b32.xlu1 %v546_v45, %s1594_s19  ;;  %571 = vrot.lane.b32.xlu0 %v546_v45, %s1148_s20  ;;  %s1153_s19 = smov 98  }
 0x276   : > { %580 = vrot.lane.b32.xlu1 %v546_v45, %s1137_s28  ;;  %577 = vrot.lane.b32.xlu0 %v546_v45, %s1149_s22 }
 0x27a   : > { %586 = vrot.lane.b32.xlu1 %v546_v45, %s1150_s27  ;;  %583 = vrot.lane.b32.xlu0 %v546_v45, %s1136_s29 }
 0x27e   : > { %593 = vrot.lane.b32.xlu1 %v548_v49, %s1151_s17  ;;  %590 = vrot.lane.b32.xlu0 %v548_v49, %s1152_s23 }
 0x282   : > { %596 = vrot.lane.b32.xlu0 %v548_v49, %s1153_s19 }
 0x2d8   : > { %v557_v50 = vpop.permute.xlu1 %556  ;;  %v554_v51 = vpop.permute.xlu0 %553 }
 0x2d9   : > { %v599_v52 = vsel %vm370_vm4, %v546_v45, %v554_v51 }
 0x2da   : > { %v601_v54 = vsel %vm1601_vm1, %v599_v52, %v557_v50  ;;  %vm1610_vm1 = vcmask 719872  }
 0x2dc   : > { %v563_v53 = vpop.permute.xlu1 %562  ;;  %v560_v55 = vpop.permute.xlu0 %559 }
 0x2dd   : > { %v603_v56 = vsel %vm1600_vm10, %v601_v54, %v560_v55  ;;  %vm613_vm10 = vcmask 654336  }
 0x2de   : > { %v605_v58 = vsel %vm1602_vm11, %v603_v56, %v563_v53  ;;  %vm1609_vm11 = vcmask 785408  }
 0x2e0   : > { %v569_v57 = vpop.permute.xlu1 %568  ;;  %v566_v59 = vpop.permute.xlu0 %565 }
 0x2e1   : > { %v606_v60 = vsel %vm312_vm15, %v605_v58, %v566_v59 }
 0x2e2   : > { %v607_v62 = vsel %vm1603_vm2, %v606_v60, %v569_v57  ;;  %vm1608_vm2 = vcmask 850944  }
 0x2e4   : > { %v575_v61 = vpop.permute.xlu1 %574  ;;  %v572_v63 = vpop.permute.xlu0 %571 }
 0x2e5   : > { %v609_v1 = vsel %vm1605_vm8, %v607_v62, %v572_v63  ;;  %vm1606_vm8 = vcmask 982016  }
 0x2e6   : > { %v611_v3 = vsel %vm1604_vm7, %v609_v1, %v575_v61  ;;  %vm1607_vm7 = vcmask 916480  }
 0x2e8   : > { %v581_v2 = vpop.permute.xlu1 %580  ;;  %v578_v5 = vpop.permute.xlu0 %577 }
 0x2e9   : > { %v612_v6 = vsel %vm501_vm14, %v611_v3, %v578_v5 }
 0x2ea   : > { %v614_v8 = vsel %vm613_vm10, %v612_v6, %v581_v2 }
 0x2ec   : > { %v587_v7 = vpop.permute.xlu1 %586  ;;  %v584_v9 = vpop.permute.xlu0 %583 }
 0x2ed   : > { %v616_v10 = vsel %vm1610_vm1, %v614_v8, %v584_v9  ;;  %vm1620_vm1 = vcmask 146432  }
 0x2ee   : > { %v618_v11 = vsel %vm1609_vm11, %v616_v10, %v587_v7 }
 0x2f0   : > { %v591_v12 = vpop.permute.xlu0 %590  ;;  %v594_v13 = vpop.permute.xlu1 %593 }
 0x2f1   : > { %v620_v14 = vsel %vm1608_vm2, %v618_v11, %v591_v12 }
 0x2f2   : > { %v622_v15 = vsel %vm1607_vm7, %v620_v14, %v594_v13  ;;  %vm1617_vm7 = vcmask 80896  }
 0x2f3   : > { %vm1619_vm11 = vmmov %vm1617_vm7 }
 0x2f4   : > { %v597_v16 = vpop.permute.xlu0 %596 }
 0x2f5   : > { %v624_v17 = vsel %vm1606_vm8, %v622_v15, %v597_v16  ;;  %vm1155_vm8 = vmmov 0  }
 0x2f6   : > { %v625_v18 = vmax.f32 %v624_v17, 0.0  ;;  %1053 = vmatprep.mubr.msk.bf16.mxu0 %vm1155_vm8, %v1154_v21  ;;  %vm1616_vm8 = vcmask 72704  }
 0x2f7   : > { %1054 = vmatmul.mubr.msk.bf16.vlgmr.msra.gmra.mxu0 %vm370_vm4, %v924_v22  ;;  %vm1618_vm2 = vmmov %vm1616_vm8 }
 0x2f8   : > { %v626_v19 = vpack.c.bf16 %v625_v18, %v625_v18 }
 0x2fa   : > { %689 = vrot.lane.b32.xlu0 %v626_v19, %s1119_s10  ;;  %659 = vrot.lane.b32.xlu1 %v626_v19, %s1117_s8  ;;  %s1611_s8 = smov 58   ;;  %s1612_s10 = smov 15  }
 0x2fe   : > { %691 = vrot.lane.b32.xlu0 %v626_v19, %s1118_s9  ;;  %661 = vrot.lane.b32.xlu1 %v626_v19, %s1116_s30  ;;  %s1649_s30 = smov 127  }
 0x302   : > { %693 = vrot.lane.b32.xlu0 %v626_v19, %s1120_s11  ;;  %663 = vrot.lane.b32.xlu1 %v626_v19, %s1121_s12  ;;  %s1613_s11 = smov 13   ;;  %s1614_s12 = smov 19  }
 0x306   : > { %695 = vrot.lane.b32.xlu0 %v626_v19, %s1123_s13  ;;  %665 = vrot.lane.b32.xlu1 %v626_v19, %s1124_s14  ;;  %s1615_s13 = smov 17   ;;  %s1632_s14 = smov 60  }
 0x30a   : > { %697 = vrot.lane.b32.xlu0 %v626_v19, %s1125_s15  ;;  %667 = vrot.lane.b32.xlu1 %v626_v19, %s1126_s16  ;;  %s1634_s15 = smov 111   ;;  %s1646_s16 = smov 117  }
 0x30e   : > { %630 = vrot.lane.b32.xlu0 %v626_v19, %s1128_s18  ;;  %699 = vrot.lane.b32.xlu1 %v626_v19, %s1611_s8  ;;  %s1647_s18 = smov 126   ;;  %s1648_s8 = smov 107  }
 0x312   : > { %634 = vrot.lane.b32.xlu0 %v626_v19, %s1612_s10  ;;  %632 = vrot.lane.b32.xlu1 %v626_v19, %s1613_s11 }
 0x316   : > { %638 = vrot.lane.b32.xlu0 %v626_v19, %s1614_s12  ;;  %636 = vrot.lane.b32.xlu1 %v626_v19, %s1615_s13 }
 0x36c   : > { %v690_v0 = vpop.permute.xlu0 %689  ;;  %v660_v23 = vpop.permute.xlu1 %659 }
 0x36d   : > { %v702_v24 = vsel %vm370_vm4, %v690_v0, 0  ;;  %v670_v25 = vsel %vm336_vm0, 0, %v660_v23  ;;  %vm1621_vm0 = vcmask 171008  }
 0x36e   : > { %v671_v26 = vsel %vm1616_vm8, %v670_v25, 0  ;;  %v703_v28 = vsel %vm1618_vm2, %v702_v24, 0  ;;  %vm1622_vm2 = vcmask 228352   ;;  %vm1626_vm8 = vcmask 310272  }
 0x36f   : > { %v672_v27 = vsel %vm1617_vm7, %v671_v26, 0  ;;  %vm1623_vm7 = vcmask 244736   ;;  %v628_v26 = vld [vmem:[%s1553_s4] sm:$0xff] }
 0x370   : > { %v692_v29 = vpop.permute.xlu0 %691  ;;  %v662_v30 = vpop.permute.xlu1 %661 }
 0x371   : > { %v705_v31 = vsel %vm1619_vm11, %v703_v28, %v692_v29  ;;  %v674_v32 = vsel %vm293_vm3, %v672_v27, %v662_v30  ;;  %vm1625_vm11 = vcmask 252928   ;;  %v925_v29 = vld [vmem:[%s1555_s6] sm:$0xff] }
 0x372   : > { %v706_v33 = vsel %vm1620_vm1, %v705_v31, 0  ;;  %v675_v34 = vsel %vm296_vm5, %v674_v32, 0  ;;  %vm1624_vm1 = vmmov %vm1623_vm7 }
 0x373   : > { %v707_v35 = vsel %vm296_vm5, %v706_v33, 0  ;;  %v676_v36 = vsel %vm298_vm6, %v675_v34, 0 }
 0x374   : > { %v694_v37 = vpop.permute.xlu0 %693  ;;  %v664_v38 = vpop.permute.xlu1 %663 }
 0x375   : > { %v709_v39 = vsel %vm298_vm6, %v707_v35, %v694_v37  ;;  %v678_v40 = vsel %vm1621_vm0, %v676_v36, %v664_v38  ;;  %vm1627_vm0 = vcmask 334848  }
 0x376   : > { %v710_v41 = vsel %vm1622_vm2, %v709_v39, 0  ;;  %v679_v42 = vsel %vm303_vm9, %v678_v40, 0  ;;  %vm1628_vm2 = vcmask 392192  }
 0x377   : > { %v711_v43 = vsel %vm303_vm9, %v710_v41, 0  ;;  %v680_v44 = vsel %vm1623_vm7, %v679_v42, 0  ;;  %vm1629_vm7 = vcmask 400384  }
 0x378   : > { %v696_v45 = vpop.permute.xlu0 %695  ;;  %v666_v46 = vpop.permute.xlu1 %665 }
 0x379   : > { %v713_v47 = vsel %vm1624_vm1, %v711_v43, %v696_v45  ;;  %v682_v48 = vsel %vm1625_vm11, %v680_v44, %v666_v46  ;;  %vm1630_vm1 = vmmov %vm1629_vm7  ;;  %vm1631_vm11 = vcmask 408576  }
 0x37a   : > { %v714_v49 = vsel %vm1626_vm8, %v713_v47, 0  ;;  %v683_v50 = vsel %vm310_vm13, %v682_v48, 0  ;;  %vm1633_vm8 = vmmov %vm1631_vm11 }
 0x37b   : > { %v715_v51 = vsel %vm310_vm13, %v714_v49, 0  ;;  %v684_v52 = vsel %vm312_vm15, %v683_v50, 0 }
 0x37c   : > { %v698_v53 = vpop.permute.xlu0 %697  ;;  %v668_v54 = vpop.permute.xlu1 %667 }
 0x37d   : > { %v717_v55 = vsel %vm312_vm15, %v715_v51, %v698_v53  ;;  %v686_v56 = vsel %vm1627_vm0, %v684_v52, %v668_v54  ;;  %vm1635_vm0 = vcmask 171008  }
 0x37e   : > { %v718_v57 = vsel %vm1628_vm2, %v717_v55, 0  ;;  %v687_v58 = vsel %vm1629_vm7, %v686_v56, 0  ;;  %vm1636_vm2 = vcmask 244736   ;;  %vm1637_vm7 = vcmask 252928  }
 0x37f   : > { %v719_v59 = vsel %vm1630_vm1, %v718_v57, 0  ;;  %v688_v60 = vsel %vm1631_vm11, %v687_v58, 0  ;;  %vm1643_vm11 = vcmask 490496  }
 0x380   : > { %723 = vrot.lane.b32.xlu1 %v688_v60, %s1632_s14  ;;  %v700_v61 = vpop.permute.xlu1 %699  ;;  %v631_v63 = vpop.permute.xlu0 %630 }
 0x381   : > { %v721_v62 = vsel %vm1633_vm8, %v719_v59, %v700_v61  ;;  %v641_v1 = vsel %vm293_vm3, 0, %v631_v63  ;;  %vm1638_vm3 = vcmask 334848  }
 0x382   : > { %726 = vrot.lane.b32.xlu0 %v721_v62, %s1634_s15  ;;  %v642_v2 = vsel %vm296_vm5, %v641_v1, 0  ;;  %vm1639_vm5 = vmmov %vm1630_vm1  ;;  %vm1641_vm1 = vcmask 416768   ;;  %v627_v1 = vld [vmem:[%s1552_s3] sm:$0xf]  ;;  %s1658_s15 = smov 124  }
 0x383   : > { %v643_v3 = vsel %vm298_vm6, %v642_v2, 0  ;;  %vm1640_vm6 = vmmov %vm1633_vm8  ;;  %vm1644_vm8 = vcmask 908288  }
 0x384   : > { %v633_v5 = vpop.permute.xlu1 %632  ;;  %v635_v9 = vpop.permute.xlu0 %634 }
 0x385   : > { %v645_v6 = vsel %vm1635_vm0, %v643_v3, %v633_v5  ;;  %vm1650_vm0 = vcmask 867328  }
 0x386   : > { %v646_v7 = vsel %vm303_vm9, %v645_v6, 0  ;;  %vm1642_vm9 = vcmask 482304  }
 0x387   : > { %v647_v8 = vsel %vm1636_vm2, %v646_v7, 0  ;;  %vm1651_vm2 = vcmask 883712  }
 0x388   : > { %v649_v10 = vsel %vm1637_vm7, %v647_v8, %v635_v9  ;;  %v637_v13 = vpop.permute.xlu1 %636  ;;  %v639_v17 = vpop.permute.xlu0 %638  ;;  %vm1652_vm7 = vcmask 875520  }
 0x389   : > { %v650_v11 = vsel %vm310_vm13, %v649_v10, 0  ;;  %vm1645_vm13 = vmmov %vm1638_vm3 }
 0x38a   : > { %v651_v12 = vsel %vm312_vm15, %v650_v11, 0 }
 0x38b   : > { %v653_v14 = vsel %vm1638_vm3, %v651_v12, %v637_v13  ;;  %vm1653_vm3 = vcmask 957440  }
 0x38c   : > { %v654_v15 = vsel %vm1639_vm5, %v653_v14, 0  ;;  %vm1654_vm5 = vcmask 949248  }
 0x38d   : > { %v655_v16 = vsel %vm1640_vm6, %v654_v15, 0  ;;  %vm1655_vm6 = vcmask 1031168  }
 0x38e   : > { %v657_v18 = vsel %vm1641_vm1, %v655_v16, %v639_v17  ;;  %vm1656_vm1 = vcmask 965632  }
 0x38f   : > { %v658_v19 = vsel %vm1642_vm9, %v657_v18, 0  ;;  %vm1657_vm9 = vcmask 1039360  }
 0x3b7   : > { %v1476_v25 = vpop.f32.mrf.mxu0 }
 0x3b9   : > { %v1055_v27 = vpop.f32.mrf.mxu0 }
 0x3bb   : > { %v974_v28 = vpop.f32.mrf.mxu0 }
 0x3bd   : > { %v1056_v30 = vpop.f32.mrf.mxu0 }
 0x3f2   : > { %v724_v20 = vpop.permute.xlu1 %723 }
 0x3f3   : > { %v729_v21 = vsel %vm1643_vm11, %v658_v19, %v724_v20  ;;  %vm1663_vm11 = vcmask 195584  }
 0x3f4   : > { %v727_v22 = vpop.permute.xlu0 %726 }
 0x3f5   : > { %v1446_v0 = vsel %vm1644_vm8, %v729_v21, %v727_v22  ;;  %v1450_v23 = vsel %vm1645_vm13, %v727_v22, %v1289_v4  ;;  %vm1664_vm8 = vcmask 261120   ;;  %vm1665_vm13 = vcmask 392192  }
 0x3f6   : > { %774 = vrot.lane.b32.xlu0 %v1450_v23, %s1136_s29  ;;  %772 = vrot.lane.b32.xlu1 %v1446_v0, %s1136_s29  ;;  %v736_v4 = vrot.slane %v1450_v23, 4  ;;  %v735_v24 = vrot.slane %v1446_v0, 4 }
 0x3fa   : > { %764 = vrot.lane.b32.xlu0 %v1450_v23, %s1137_s28  ;;  %762 = vrot.lane.b32.xlu1 %v1446_v0, %s1137_s28 }
 0x3fe   : > { %754 = vrot.lane.b32.xlu0 %v1450_v23, %s1646_s16  ;;  %752 = vrot.lane.b32.xlu1 %v1446_v0, %s1646_s16  ;;  %s1659_s16 = smov 120  }
 0x402   : > { %744 = vrot.lane.b32.xlu0 %v1450_v23, %s1647_s18  ;;  %742 = vrot.lane.b32.xlu1 %v1446_v0, %s1647_s18 }
 0x406   : > { %769 = vrot.lane.b32.xlu0 %v736_v4, %s1648_s8  ;;  %767 = vrot.lane.b32.xlu1 %v735_v24, %s1648_s8  ;;  %s1660_s8 = smov 122  }
 0x40a   : > { %759 = vrot.lane.b32.xlu0 %v736_v4, %s1141_s21  ;;  %757 = vrot.lane.b32.xlu1 %v735_v24, %s1141_s21 }
 0x40e   : > { %749 = vrot.lane.b32.xlu0 %v736_v4, %s1142_s26  ;;  %747 = vrot.lane.b32.xlu1 %v735_v24, %s1142_s26 }
 0x412   : > { %739 = vrot.lane.b32.xlu0 %v736_v4, %s1649_s30  ;;  %737 = vrot.lane.b32.xlu1 %v735_v24, %s1649_s30  ;;  %s1661_s30 = smov 112  }
 0x416   : > { %809 = vperm.xlu1 %1105, %v628_v26  }
 0x41a   : > { %928 = vperm.xlu1 %1105, %v925_v29  }
 0x468   : > { %v775_v31 = vpop.permute.xlu0 %774  ;;  %v773_v32 = vpop.permute.xlu1 %772 }
 0x469   : > { %1044 = vmatprep.subr.msk.bf16.mxu1 %vm465_vm12, %v775_v31  ;;  %v776_v33 = vsel %vm1650_vm0, %v773_v32, %v775_v31  ;;  %vm1666_vm0 = vcmask 457728  }
 0x46a   : > { %v816_v34 = vsel %vm465_vm12, %v776_v33, 0 }
 0x46b   : > { %828 = vmatpush1.bf16.msra.mxu1 %v816_v34 }
 0x46c   : > { %v765_v35 = vpop.permute.xlu0 %764  ;;  %v763_v36 = vpop.permute.xlu1 %762 }
 0x46d   : > { %v766_v43 = vsel %vm1651_vm2, %v763_v36, %v765_v35  ;;  %vm1668_vm2 = vcmask 719872  }
 0x470   : > { %v755_v37 = vpop.permute.xlu0 %754  ;;  %v753_v38 = vpop.permute.xlu1 %752 }
 0x471   : > { %v756_v49 = vsel %vm1653_vm3, %v753_v38, %v755_v37  ;;  %vm1671_vm3 = vcmask 916480  }
 0x474   : > { %v745_v39 = vpop.permute.xlu0 %744  ;;  %v743_v40 = vpop.permute.xlu1 %742 }
 0x475   : > { %v746_v55 = vsel %vm1655_vm6, %v743_v40, %v745_v39 }
 0x478   : > { %v770_v41 = vpop.permute.xlu0 %769  ;;  %v768_v42 = vpop.permute.xlu1 %767 }
 0x479   : > { %v771_v44 = vsel %vm1652_vm7, %v768_v42, %v770_v41  ;;  %v805_v45 = vsel %vm465_vm12, %v765_v35, %v770_v41  ;;  %vm1670_vm7 = vcmask 850944  }
 0x47a   : > { %829 = vmatprep.subr.bf16.mxu1 %v805_v45  ;;  %v801_v46 = vsel %vm465_vm12, %v766_v43, %v771_v44 }
 0x47b   : > { %830 = vmatpush1.bf16.msra.mxu1 %v801_v46 }
 0x47c   : > { %v760_v47 = vpop.permute.xlu0 %759  ;;  %v758_v48 = vpop.permute.xlu1 %757 }
 0x47d   : > { %v761_v50 = vsel %vm1654_vm5, %v758_v48, %v760_v47  ;;  %v797_v51 = vsel %vm465_vm12, %v755_v37, %v760_v47  ;;  %vm1672_vm5 = vcmask 982016  }
 0x47e   : > { %831 = vmatprep.subr.bf16.mxu1 %v797_v51  ;;  %v793_v52 = vsel %vm465_vm12, %v756_v49, %v761_v50 }
 0x47f   : > { %832 = vmatpush1.bf16.msra.mxu1 %v793_v52 }
 0x480   : > { %v750_v53 = vpop.permute.xlu0 %749  ;;  %v748_v54 = vpop.permute.xlu1 %747 }
 0x481   : > { %v751_v56 = vsel %vm1656_vm1, %v748_v54, %v750_v53  ;;  %v789_v57 = vsel %vm465_vm12, %v745_v39, %v750_v53 }
 0x482   : > { %833 = vmatprep.subr.bf16.mxu1 %v789_v57  ;;  %v785_v58 = vsel %vm465_vm12, %v746_v55, %v751_v56 }
 0x483   : > { %834 = vmatpush1.bf16.msra.mxu1 %v785_v58 }
 0x484   : > { %v740_v59 = vpop.permute.xlu0 %739  ;;  %v738_v60 = vpop.permute.xlu1 %737 }
 0x485   : > { %v741_v61 = vsel %vm1657_vm9, %v738_v60, %v740_v59  ;;  %v781_v62 = vsel %vm465_vm12, %v1450_v23, %v740_v59 }
 0x486   : > { %835 = vmatprep.subr.bf16.mxu1 %v781_v62  ;;  %v778_v63 = vsel %vm465_vm12, %v1446_v0, %v741_v61  ;;  %vm1662_vm12 = vcmask 130048  }
 0x487   : > { %836 = vmatpush1.bf16.msra.mxu1 %v778_v63 }
 0x48a   : > { %1045 = vmatmul.mubr.msk.bf16.vlgmr.msra.gmra.mxu1 %vm501_vm14, %v627_v1 }
 0x491   : > { %v810_v2 = vpop.permute.xlu1 %809 }
 0x495   : > { %v929_v10 = vpop.permute.xlu1 %928 }
 0x496   : > { %v972_v37 = vadd.f32 %v1476_v25, %v929_v10 }
 0x54a   : > { %v855_v3 = vpop.f32.mrf.mxu1 }
 0x54b   : > { %v856_v5 = vadd.f32 %v855_v3, %v810_v2 }
 0x54c   : > { %v857_v6 = vpop.f32.mrf.mxu1 }
 0x54d   : > { %866 = vrot.lane.b32.xlu1 %v856_v5, %s1658_s15  ;;  %863 = vrot.lane.b32.xlu0 %v856_v5, %s1647_s18  ;;  %v858_v9 = vadd.f32 %v857_v6, %v810_v2 }
 0x54e   : > { %v859_v7 = vpop.f32.mrf.mxu1 }
 0x550   : > { %v860_v8 = vpop.f32.mrf.mxu1 }
 0x551   : > { %872 = vrot.lane.b32.xlu1 %v856_v5, %s1659_s16  ;;  %869 = vrot.lane.b32.xlu0 %v856_v5, %s1660_s8 }
 0x555   : > { %878 = vrot.lane.b32.xlu1 %v856_v5, %s1141_s21  ;;  %875 = vrot.lane.b32.xlu0 %v856_v5, %s1142_s26  ;;  %s1673_s26 = sshll.u32 %s1675_s25, 2 }
 0x559   : > { %884 = vrot.lane.b32.xlu1 %v856_v5, %s1661_s30  ;;  %881 = vrot.lane.b32.xlu0 %v856_v5, %s1148_s20 }
 0x55d   : > { %893 = vrot.lane.b32.xlu1 %v856_v5, %s1136_s29  ;;  %887 = vrot.lane.b32.xlu0 %v856_v5, %s1149_s22  ;;  %s273_s22 = scalar_lea.vmem %s1556_s7, %s1673_s26 }
 0x561   : > { %900 = vrot.lane.b32.xlu1 %v858_v9, %s1152_s23  ;;  %890 = vrot.lane.b32.xlu0 %v856_v5, %s1137_s28 }
 0x565   : > { %906 = vrot.lane.b32.xlu1 %v858_v9, %s1153_s19  ;;  %896 = vrot.lane.b32.xlu0 %v856_v5, %s1150_s27 }
 0x569   : > { %903 = vrot.lane.b32.xlu0 %v858_v9, %s1151_s17 }
 0x5bf   : > { %v864_v11 = vpop.permute.xlu0 %863  ;;  %v867_v12 = vpop.permute.xlu1 %866 }
 0x5c0   : > { %v909_v13 = vsel %vm370_vm4, %v856_v5, %v864_v11  ;;  %vm1667_vm4 = vcmask 523264  }
 0x5c1   : > { %v910_v16 = vsel %vm1662_vm12, %v909_v13, %v867_v12 }
 0x5c3   : > { %v870_v14 = vpop.permute.xlu0 %869  ;;  %v873_v15 = vpop.permute.xlu1 %872 }
 0x5c4   : > { %v911_v17 = vsel %vm1663_vm11, %v910_v16, %v870_v14 }
 0x5c5   : > { %v912_v20 = vsel %vm1664_vm8, %v911_v17, %v873_v15 }
 0x5c7   : > { %v876_v18 = vpop.permute.xlu0 %875  ;;  %v879_v19 = vpop.permute.xlu1 %878 }
 0x5c8   : > { %v913_v21 = vsel %vm312_vm15, %v912_v20, %v876_v18  ;;  %vm1669_vm15 = vcmask 785408  }
 0x5c9   : > { %v914_v23 = vsel %vm1665_vm13, %v913_v21, %v879_v19 }
 0x5cb   : > { %v882_v22 = vpop.permute.xlu0 %881  ;;  %v885_v0 = vpop.permute.xlu1 %884 }
 0x5cc   : > { %v915_v4 = vsel %vm1666_vm0, %v914_v23, %v882_v22 }
 0x5cd   : > { %v916_v27 = vsel %vm1667_vm4, %v915_v4, %v885_v0 }
 0x5cf   : > { %v888_v24 = vpop.permute.xlu0 %887  ;;  %v894_v26 = vpop.permute.xlu1 %893 }
 0x5d0   : > { %v917_v28 = vsel %vm501_vm14, %v916_v27, %v888_v24 }
 0x5d3   : > { %v891_v29 = vpop.permute.xlu0 %890  ;;  %v901_v31 = vpop.permute.xlu1 %900 }
 0x5d4   : > { %v918_v30 = vsel %vm613_vm10, %v917_v28, %v891_v29 }
 0x5d5   : > { %v919_v33 = vsel %vm1668_vm2, %v918_v30, %v894_v26 }
 0x5d7   : > { %v897_v32 = vpop.permute.xlu0 %896  ;;  %v907_v38 = vpop.permute.xlu1 %906 }
 0x5d8   : > { %v920_v34 = vsel %vm1669_vm15, %v919_v33, %v897_v32 }
 0x5d9   : > { %v921_v36 = vsel %vm1670_vm7, %v920_v34, %v901_v31 }
 0x5db   : > { %v904_v35 = vpop.permute.xlu0 %903 }
 0x5dc   : > { %v922_v39 = vsel %vm1671_vm3, %v921_v36, %v904_v35 }
 0x5dd   : > { %v923_v40 = vsel %vm1672_vm5, %v922_v39, %v907_v38 }
 0x5de   : > { %v977_v41 = vadd.f32 %v972_v37, %v923_v40 }
 0x5e0   : > { %v978_v42 = vmax.f32 %v977_v41, 0.0 }
 0x5e2   : > { %v979_v43 = vpack.c.bf16 %v978_v42, %v978_v42 }
 0x5e4   : > { %980 = vst [vmem:[%s273_s22] sm:$0xf] %v979_v43 }
 0x5e5 PF: > { %s17_s24 = sadd.s32 1, %s1114_s24  }
 0x5e6   : > { %p14_p4 = scmp.ge.s32.totalorder %s17_s24, 4  }
 0x5e8   :  { %16 = sbr.rel (!%p14_p4) target bundleno = 1 (0x1), region = 78 }

// kernel: resnet_forward.13
= control target key start
LH: loop header
LB: loop body
LE: loop exit
PB: predicated region body
PF: predicated region fallthrough
CT: control target
= control target key end

     0   :  { %s612_s12 = smov 0   ;;  %s679_s0 = inlined_call_operand.vmem [shape: bf16[2,16,32], index: 0, kind: input, shape index: {}]   ;;  %s680_s1 = inlined_call_operand.vmem [shape: bf16[16,144], index: 1, kind: input, shape index: {}]   ;;  %s681_s2 = inlined_call_operand.vmem [shape: f32[16,1], index: 2, kind: input, shape index: {}]   ;;  %s682_s3 = inlined_call_operand.vmem [shape: bf16[2,16,32], index: 3, kind: output, shape index: {}]  }
   0x1 LB: > { %s474_s13 = sadd.s32 4294967295, %s570_s12   ;;  %p478_p0 = scmp.ge.s32.totalorder %s570_s12, 1  ;;  %s570_s12 = sphi %s612_s12, %s13_s12  }
   0x2   : > { %p137_p1 = scmp.lt.s32.totalorder %s570_s12, 3 }
   0x4   : > { %p138_p2 = pnand %p478_p0, %p137_p1 }
   0x5   : > { %p161_p3 = scmp.lt.s32.totalorder (!%p138_p2), %s474_s13, 1  ;;  %s572_s18 = smov (!%p138_p2), 109  }
   0x6   : > { %141 = sbr.rel (%p138_p2) target bundleno = 743 (0x2e7), region = 32  ;;  %s573_s19 = smov (!%p138_p2), 113  }
   0x7   : > { %s574_s20 = smov (!%p138_p2), 111   ;;  %s575_s21 = smov (!%p138_p2), 7  }
   0x8   : > { %s576_s22 = smov (!%p138_p2), 9   ;;  %s577_s23 = smov (!%p138_p2), 11  }
   0x9   : > { %s578_s24 = smov (!%p138_p2), 13   ;;  %s579_s25 = smov (!%p138_p2), 15  }
   0xa   : > { %s580_s26 = smov (!%p138_p2), 36   ;;  %s582_s27 = smov (!%p138_p2), 116  }
   0xb   : > { %s684_s13 = smov (!%p161_p3, %s474_s13), 1  ;;  %vm234_vm0 = vcmask 7168   ;;  %vm237_vm1 = vcmask 39936   ;;  %vm193_vm2 = vcmask 48128   ;;  %vm195_vm3 = vcmask 56320   ;;  %s583_s28 = smov 115  }
   0xc   : > { %s491_s14 = sshll.u32 %s684_s13, 3  ;;  %vm198_vm4 = vcmask 89088   ;;  %vm200_vm5 = vcmask 97280   ;;  %vm202_vm6 = vcmask 105472   ;;  %vm205_vm7 = vcmask 138240   ;;  %s584_s29 = smov 121  }
   0xd   : > { %s165_s17 = scalar_lea.vmem %s679_s0, %s491_s14  ;;  %vm207_vm8 = vcmask 146432   ;;  %v581_v21 = vmov 0   ;;  %vm209_vm9 = vcmask 154624   ;;  %vm212_vm10 = vcmask 187392   ;;  %s585_s30 = smov 120   ;;  %v176_v36 = vld [vmem:[%s681_s2] sm:$0xff] }
   0xe   : > { %v560_v0 = vld [vmem:[%s165_s17] sm:$0xff]   ;;  %303 = vmatprep.subr.bf16.mxu0 %v581_v21  ;;  %523 = vset.pattern.permute.xlu1 %v581_v21  ;;  %vm214_vm11 = vcmask 195584   ;;  %vm216_vm12 = vcmask 203776   ;;  %vm219_vm13 = vcmask 236544   ;;  %vm221_vm14 = vcmask 244736   ;;  %s586_s4 = smov 126  }
   0xf   : > { %228 = vrot.lane.b32.xlu0 %v560_v0, %s572_s18  ;;  %232 = vrot.lane.b32.xlu1 %v560_v0, %s573_s19  ;;  %vm223_vm15 = vcmask 252928   ;;  %s587_s5 = smov 122   ;;  %s588_s6 = smov 114   ;;  %v563_v35 = vld [vmem:[%s680_s1 + $0x4] ss:$8 sps:$4 sm:$0xff]  }
  0x10   : > { %524 = vset.pattern.permute.xlu0 %v581_v21  ;;  %s589_s7 = smov 127   ;;  %v177_v37 = vld [vmem:[%s681_s2 + $0x8] sm:$0xff]  ;;  %s590_s19 = smov 118  }
  0x11   : > { %v561_v46 = vld [vmem:[%s680_s1] ss:$8 sps:$4 sm:$0xff]  }
  0x13   : > { %230 = vrot.lane.b32.xlu0 %v560_v0, %s574_s20  ;;  %183 = vrot.lane.b32.xlu1 %v560_v0, %s575_s21  ;;  %s591_s20 = smov 124  }
  0x17   : > { %185 = vrot.lane.b32.xlu0 %v560_v0, %s576_s22  ;;  %187 = vrot.lane.b32.xlu1 %v560_v0, %s577_s23  ;;  %s170_s23 = scalar_lea.vmem %s682_s3, %s491_s14 }
  0x1b   : > { %189 = vrot.lane.b32.xlu0 %v560_v0, %s578_s24  ;;  %191 = vrot.lane.b32.xlu1 %v560_v0, %s579_s25 }
  0x81   : > { %v229_v1 = vpop.permute.xlu0 %228  ;;  %v233_v2 = vpop.permute.xlu1 %232 }
  0x82   : > { %v236_v3 = vsel %vm234_vm0, 0, %v229_v1  ;;  %vm226_vm0 = vcmask 285696  }
  0x83   : > { %v238_v4 = vsel %vm237_vm1, %v236_v3, 0  ;;  %vm251_vm1 = vcmask 293888  }
  0x84   : > { %v239_v5 = vsel %vm193_vm2, %v238_v4, 0  ;;  %vm299_vm2 = vcmask 130048  }
  0x85   : > { %v231_v6 = vpop.permute.xlu0 %230  ;;  %v184_v7 = vpop.permute.xlu1 %183  ;;  %486 = vmatprep.mubr.msk.bf16.mxu0 %vm299_vm2, %v563_v35 }
  0x86   : > { %v241_v8 = vsel %vm195_vm3, %v239_v5, %v231_v6  ;;  %v197_v9 = vsel %vm195_vm3, 0, %v184_v7  ;;  %vm388_vm3 = vcmask 31744  }
  0x87   : > { %v242_v10 = vsel %vm198_vm4, %v241_v8, 0  ;;  %v199_v11 = vsel %vm198_vm4, %v197_v9, 0  ;;  %vm391_vm4 = vcmask 64512  }
  0x88   : > { %v243_v12 = vsel %vm200_vm5, %v242_v10, 0  ;;  %v201_v13 = vsel %vm200_vm5, %v199_v11, 0 }
  0x89   : > { %v245_v14 = vsel %vm202_vm6, %v243_v12, %v233_v2  ;;  %v186_v15 = vpop.permute.xlu0 %185  ;;  %v188_v22 = vpop.permute.xlu1 %187 }
  0x8a   : > { %v246_v16 = vsel %vm205_vm7, %v245_v14, 0  ;;  %v204_v17 = vsel %vm202_vm6, %v201_v13, %v186_v15  ;;  %vm398_vm6 = vcmask 162816  }
  0x8b   : > { %v247_v18 = vsel %vm207_vm8, %v246_v16, 0  ;;  %v206_v19 = vsel %vm205_vm7, %v204_v17, 0  ;;  %vm403_vm7 = vcmask 228352  }
  0x8c   : > { %249 = vrot.lane.b32.xlu0 %v247_v18, %s580_s26  ;;  %v208_v20 = vsel %vm207_vm8, %v206_v19, 0 }
  0x8d   : > { %v211_v23 = vsel %vm209_vm9, %v208_v20, %v188_v22  ;;  %v190_v26 = vpop.permute.xlu0 %189  ;;  %v192_v30 = vpop.permute.xlu1 %191 }
  0x8e   : > { %v213_v24 = vsel %vm212_vm10, %v211_v23, 0 }
  0x8f   : > { %v215_v25 = vsel %vm214_vm11, %v213_v24, 0 }
  0x90   : > { %v218_v27 = vsel %vm216_vm12, %v215_v25, %v190_v26 }
  0x91   : > { %v220_v28 = vsel %vm219_vm13, %v218_v27, 0 }
  0x92   : > { %v222_v29 = vsel %vm221_vm14, %v220_v28, 0 }
  0x93   : > { %v225_v31 = vsel %vm223_vm15, %v222_v29, %v192_v30 }
  0x94   : > { %v227_v32 = vsel %vm226_vm0, %v225_v31, 0 }
  0xfe   : > { %v250_v33 = vpop.permute.xlu0 %249 }
  0xff   : > { %v253_v34 = vsel %vm251_vm1, %v227_v32, %v250_v33 }
 0x100   : > { %271 = vrot.lane.b32.xlu0 %v253_v34, %s582_s27  ;;  %274 = vrot.lane.b32.xlu1 %v253_v34, %s583_s28 }
 0x104   : > { %265 = vrot.lane.b32.xlu0 %v253_v34, %s584_s29  ;;  %268 = vrot.lane.b32.xlu1 %v253_v34, %s585_s30 }
 0x108   : > { %259 = vrot.lane.b32.xlu0 %v253_v34, %s586_s4  ;;  %262 = vrot.lane.b32.xlu1 %v253_v34, %s587_s5 }
 0x10c   : > { %277 = vrot.lane.b32.xlu0 %v253_v34, %s588_s6  ;;  %256 = vrot.lane.b32.xlu1 %v253_v34, %s589_s7 }
 0x110   : > { %282 = vperm.xlu1 %523, %v176_v36   ;;  %287 = vperm.xlu0 %524, %v177_v37  }
 0x172   : > { %v275_v38 = vpop.permute.xlu1 %274  ;;  %v272_v39 = vpop.permute.xlu0 %271 }
 0x173   : > { %304 = vmatpush1.bf16.msra.mxu0 %v275_v38 }
 0x174   : > { %305 = vmatprep.subr.bf16.mxu0 %v581_v21 }
 0x176   : > { %v269_v40 = vpop.permute.xlu1 %268  ;;  %v266_v41 = vpop.permute.xlu0 %265 }
 0x177   : > { %306 = vmatpush1.bf16.msra.mxu0 %v272_v39 }
 0x178   : > { %307 = vmatprep.subr.bf16.mxu0 %v581_v21 }
 0x17a   : > { %v263_v42 = vpop.permute.xlu1 %262  ;;  %v260_v43 = vpop.permute.xlu0 %259 }
 0x17b   : > { %308 = vmatpush1.bf16.msra.mxu0 %v269_v40 }
 0x17c   : > { %309 = vmatprep.subr.bf16.mxu0 %v581_v21 }
 0x17e   : > { %v257_v44 = vpop.permute.xlu1 %256  ;;  %v278_v45 = vpop.permute.xlu0 %277 }
 0x17f   : > { %310 = vmatpush1.bf16.msra.mxu0 %v266_v41 }
 0x180   : > { %311 = vmatprep.subr.bf16.mxu0 %v581_v21 }
 0x183   : > { %312 = vmatpush1.bf16.msra.mxu0 %v263_v42 }
 0x184   : > { %313 = vmatprep.subr.bf16.mxu0 %v581_v21 }
 0x187   : > { %314 = vmatpush1.bf16.msra.mxu0 %v260_v43 }
 0x188   : > { %315 = vmatprep.subr.bf16.mxu0 %v581_v21 }
 0x18b   : > { %316 = vmatpush1.bf16.msra.mxu0 %v257_v44  ;;  %v283_v48 = vpop.permute.xlu1 %282  ;;  %v288_v50 = vpop.permute.xlu0 %287 }
 0x18c   : > { %317 = vmatprep.subr.bf16.mxu0 %v581_v21 }
 0x18f   : > { %318 = vmatpush1.bf16.msra.mxu0 %v253_v34 }
 0x190   : > { %333 = vmatprep.subr.bf16.mxu0 %v581_v21 }
 0x193   : > { %334 = vmatpush2.bf16.msra.mxu0 %v278_v45 }
 0x196   : > { %336 = vmatmul.mubr.bf16.vlgmr.msra.gmra.mxu0 %v561_v46 }
 0x256   : > { %v337_v47 = vpop.f32.mrf.mxu0 }
 0x257   : > { %v338_v52 = vadd.f32 %v337_v47, %v283_v48 }
 0x258   : > { %v339_v49 = vpop.f32.mrf.mxu0 }
 0x25a   : > { %v340_v51 = vpop.f32.mrf.mxu0 }
 0x25b   : > { %v341_v53 = vadd.f32 %v340_v51, %v288_v50 }
 0x25c   : > { %v342_v54 = vpop.f32.mrf.mxu0 }
 0x25d   : > { %v535_v55 = vpack.i.bf16 %v341_v53, %v338_v52 }
 0x25f   : > { %536 = vrot.lane.b32.xlu0 %v535_v55, %s587_s5  ;;  %526 = vrot.lane.b32.xlu1 %v535_v55, %s586_s4 }
 0x263   : > { %546 = vrot.lane.b32.xlu0 %v535_v55, %s590_s19  ;;  %531 = vrot.lane.b32.xlu1 %v535_v55, %s591_s20 }
 0x267   : > { %556 = vrot.lane.b32.xlu0 %v535_v55, %s588_s6  ;;  %541 = vrot.lane.b32.xlu1 %v535_v55, %s585_s30 }
 0x26b   : > { %551 = vrot.lane.b32.xlu1 %v535_v55, %s582_s27 }
 0x2d1   : > { %v537_v56 = vpop.permute.xlu0 %536  ;;  %v527_v57 = vpop.permute.xlu1 %526 }
 0x2d2   : > { %v529_v58 = vunpack.i.h.bf16 %v527_v57  ;;  %v528_v59 = vunpack.i.l.bf16 %v527_v57  ;;  %v539_v4 = vunpack.i.h.bf16 %v537_v56  ;;  %v538_v5 = vunpack.i.l.bf16 %v537_v56 }
 0x2d4   : > { %v390_v0 = vsel %vm388_vm3, %v341_v53, %v529_v58  ;;  %v389_v1 = vsel %vm388_vm3, %v338_v52, %v528_v59 }
 0x2d5   : > { %v532_v60 = vpop.permute.xlu1 %531  ;;  %v547_v61 = vpop.permute.xlu0 %546 }
 0x2d6   : > { %v534_v62 = vunpack.i.h.bf16 %v532_v60  ;;  %v533_v63 = vunpack.i.l.bf16 %v532_v60  ;;  %v549_v14 = vunpack.i.h.bf16 %v547_v61  ;;  %v548_v15 = vunpack.i.l.bf16 %v547_v61 }
 0x2d8   : > { %v392_v2 = vsel %vm391_vm4, %v389_v1, %v533_v63  ;;  %v393_v3 = vsel %vm391_vm4, %v390_v0, %v534_v62 }
 0x2d9   : > { %v542_v6 = vpop.permute.xlu1 %541  ;;  %v394_v9 = vsel %vm200_vm5, %v392_v2, %v538_v5  ;;  %v395_v10 = vsel %vm200_vm5, %v393_v3, %v539_v4  ;;  %v557_v11 = vpop.permute.xlu0 %556  ;;  %vm416_vm5 = vcmask 257024  }
 0x2da   : > { %v544_v7 = vunpack.i.h.bf16 %v542_v6  ;;  %v543_v8 = vunpack.i.l.bf16 %v542_v6  ;;  %v559_v19 = vunpack.i.h.bf16 %v557_v11  ;;  %v558_v20 = vunpack.i.l.bf16 %v557_v11 }
 0x2dc   : > { %v396_v12 = vsel %vm299_vm2, %v394_v9, %v543_v8  ;;  %v397_v13 = vsel %vm299_vm2, %v395_v10, %v544_v7 }
 0x2dd   : > { %v552_v16 = vpop.permute.xlu1 %551  ;;  %v399_v21 = vsel %vm398_vm6, %v396_v12, %v548_v15  ;;  %v400_v22 = vsel %vm398_vm6, %v397_v13, %v549_v14 }
 0x2de   : > { %v554_v17 = vunpack.i.h.bf16 %v552_v16  ;;  %v553_v18 = vunpack.i.l.bf16 %v552_v16 }
 0x2e0   : > { %v401_v23 = vsel %vm214_vm11, %v399_v21, %v553_v18  ;;  %v402_v24 = vsel %vm214_vm11, %v400_v22, %v554_v17 }
 0x2e1   : > { %v404_v25 = vsel %vm403_vm7, %v401_v23, %v558_v20  ;;  %v405_v26 = vsel %vm403_vm7, %v402_v24, %v559_v19 }
 0x2e2   : > { %v406_v27 = vmax.f32 %v404_v25, 0.0  ;;  %v407_v28 = vmax.f32 %v405_v26, 0.0 }
 0x2e4   : > { %v493_v29 = vpack.c.bf16 %v406_v27, %v406_v27  ;;  %v494_v30 = vpack.c.bf16 %v407_v28, %v407_v28 }
 0x2e6   : > { %417 = vst.msk [vmem:[%s170_s23] sm:$0xf] %vm416_vm5, %v493_v29  ;;  %418 = vst.msk [vmem:[%s170_s23 + $0x4] sm:$0xf] %vm416_vm5, %v494_v30 }
 0x2e7 PF: > { %s13_s12 = sadd.s32 1, %s570_s12  }
 0x2e8   : > { %p10_p4 = scmp.ge.s32.totalorder %s13_s12, 4  }
 0x2ea   :  { %12 = sbr.rel (!%p10_p4) target bundleno = 1 (0x1), region = 62 }

// kernel: resnet_forward.12
= control target key start
LH: loop header
LB: loop body
LE: loop exit
PB: predicated region body
PF: predicated region fallthrough
CT: control target
= control target key end

     0   :  { %s1053_s24 = smov 0   ;;  %s1275_s0 = inlined_call_operand.vmem [shape: bf16[2,8,32], index: 0, kind: input, shape index: {}]   ;;  %s1276_s1 = inlined_call_operand.vmem [shape: bf16[16,72], index: 1, kind: input, shape index: {}]   ;;  %s1277_s2 = inlined_call_operand.vmem [shape: f32[16,1], index: 2, kind: input, shape index: {}]   ;;  %s1278_s3 = inlined_call_operand.vmem [shape: bf16[16,144], index: 3, kind: input, shape index: {}]   ;;  %s1279_s4 = inlined_call_operand.vmem [shape: f32[16,1], index: 4, kind: input, shape index: {}]   ;;  %s1280_s5 = inlined_call_operand.vmem [shape: bf16[16,8], index: 5, kind: input, shape index: {}]   ;;  %s1281_s6 = inlined_call_operand.vmem [shape: f32[16,1], index: 6, kind: input, shape index: {}]   ;;  %s1282_s7 = inlined_call_operand.vmem [shape: bf16[2,16,32], index: 7, kind: output, shape index: {}]  }
   0x1 LB: > { %s859_s25 = sadd.s32 4294967295, %s989_s24   ;;  %p863_p0 = scmp.ge.s32.totalorder %s989_s24, 1  ;;  %s989_s24 = sphi %s1053_s24, %s17_s24  }
   0x2   : > { %p236_p1 = scmp.lt.s32.totalorder %s989_s24, 3 }
   0x4   : > { %p237_p2 = pnand %p863_p0, %p236_p1 }
   0x5   : > { %p267_p3 = scmp.lt.s32.totalorder (!%p237_p2), %s859_s25, 1  ;;  %s991_s30 = smov (!%p237_p2), 109  }
   0x6   : > { %240 = sbr.rel (%p237_p2) target bundleno = 1465 (0x5b9), region = 48  ;;  %s992_s8 = smov (!%p237_p2), 113  }
   0x7   : > { %s993_s9 = smov (!%p237_p2), 111   ;;  %s994_s10 = smov (!%p237_p2), 7  }
   0x8   : > { %s995_s11 = smov (!%p237_p2), 9   ;;  %s996_s12 = smov (!%p237_p2), 11  }
   0x9   : > { %s997_s13 = smov (!%p237_p2), 13   ;;  %s998_s14 = smov (!%p237_p2), 15  }
   0xa   : > { %s999_s15 = smov (!%p237_p2), 36   ;;  %s1001_s16 = smov (!%p237_p2), 116  }
   0xb   : > { %s1301_s25 = smov (!%p267_p3, %s859_s25), 1  ;;  %vm336_vm0 = vcmask 7168   ;;  %vm339_vm1 = vcmask 39936   ;;  %vm295_vm2 = vcmask 48128   ;;  %vm297_vm3 = vcmask 56320   ;;  %s1002_s17 = smov 114  }
   0xc   : > { %s864_s26 = sshll.u32 %s1301_s25, 2  ;;  %vm300_vm4 = vcmask 89088   ;;  %vm302_vm5 = vcmask 97280   ;;  %vm304_vm6 = vcmask 105472   ;;  %vm307_vm7 = vcmask 138240   ;;  %s1003_s18 = smov 121  }
   0xd   : > { %s270_s29 = scalar_lea.vmem %s1275_s0, %s864_s26  ;;  %vm309_vm8 = vcmask 146432   ;;  %vm1283_vm9 = vcmask 154624   ;;  %vm1284_vm10 = vcmask 187392   ;;  %vm316_vm11 = vcmask 195584   ;;  %s1004_s19 = smov 115   ;;  %v280_v38 = vld [vmem:[%s1277_s2] sm:$0xff] }
   0xe   : > { %v1067_v0 = vld [vmem:[%s270_s29] sm:$0xf]  ;;  %vm318_vm12 = vcmask 203776   ;;  %vm1290_vm13 = vcmask 236544   ;;  %vm1288_vm14 = vcmask 244736   ;;  %v1000_v29 = vmov 0.0  }
   0xf   : > { %v867_v1 = vcombine.low %v1067_v0, %v1067_v0  ;;  %890 = vmatprep.subr.bf16.mxu0 %v1000_v29  ;;  %vm1285_vm15 = vcmask 252928   ;;  %s1006_s20 = smov 126   ;;  %s1007_s21 = smov 120   ;;  %v1008_v37 = vmov 0   ;;  %v281_v39 = vld [vmem:[%s1277_s2 + $0x8] sm:$0xff]  ;;  %v978_v53 = vld [vmem:[%s1276_s1] sm:$0xff]  }
  0x10   : > { %940 = vset.pattern.permute.xlu1 %v1008_v37  ;;  %941 = vset.pattern.permute.xlu0 %v1008_v37  ;;  %s1009_s22 = smov 127   ;;  %s1010_s23 = smov 122  }
  0x11   : > { %330 = vrot.lane.b32.xlu0 %v867_v1, %s991_s30  ;;  %334 = vrot.lane.b32.xlu1 %v867_v1, %s992_s8  ;;  %s1011_s28 = smov 118   ;;  %s1012_s29 = smov 124  }
  0x12   : > { %624 = vmatprep.subr.bf16.mxu1 %v1008_v37 }
  0x15   : > { %332 = vrot.lane.b32.xlu0 %v867_v1, %s993_s9  ;;  %285 = vrot.lane.b32.xlu1 %v867_v1, %s994_s10 }
  0x19   : > { %287 = vrot.lane.b32.xlu0 %v867_v1, %s995_s11  ;;  %289 = vrot.lane.b32.xlu1 %v867_v1, %s996_s12 }
  0x1d   : > { %291 = vrot.lane.b32.xlu0 %v867_v1, %s997_s13  ;;  %293 = vrot.lane.b32.xlu1 %v867_v1, %s998_s14 }
  0x83   : > { %v331_v2 = vpop.permute.xlu0 %330  ;;  %v335_v8 = vpop.permute.xlu1 %334 }
  0x84   : > { %v338_v3 = vsel %vm336_vm0, 0, %v331_v2 }
  0x85   : > { %v340_v4 = vsel %vm339_vm1, %v338_v3, 0 }
  0x86   : > { %v341_v5 = vsel %vm295_vm2, %v340_v4, 0 }
  0x87   : > { %v333_v6 = vpop.permute.xlu0 %332  ;;  %v286_v14 = vpop.permute.xlu1 %285 }
  0x88   : > { %v343_v7 = vsel %vm297_vm3, %v341_v5, %v333_v6  ;;  %v299_v15 = vsel %vm297_vm3, 0, %v286_v14 }
  0x89   : > { %v344_v9 = vsel %vm300_vm4, %v343_v7, 0  ;;  %v301_v16 = vsel %vm300_vm4, %v299_v15, 0 }
  0x8a   : > { %v345_v10 = vsel %vm302_vm5, %v344_v9, 0  ;;  %v303_v17 = vsel %vm302_vm5, %v301_v16, 0 }
  0x8b   : > { %v347_v11 = vsel %vm304_vm6, %v345_v10, %v335_v8  ;;  %v288_v18 = vpop.permute.xlu0 %287  ;;  %v290_v22 = vpop.permute.xlu1 %289 }
  0x8c   : > { %v348_v12 = vsel %vm307_vm7, %v347_v11, 0  ;;  %v306_v19 = vsel %vm304_vm6, %v303_v17, %v288_v18 }
  0x8d   : > { %v349_v13 = vsel %vm309_vm8, %v348_v12, 0  ;;  %v308_v20 = vsel %vm307_vm7, %v306_v19, 0 }
  0x8e   : > { %351 = vrot.lane.b32.xlu0 %v349_v13, %s999_s15  ;;  %v310_v21 = vsel %vm309_vm8, %v308_v20, 0 }
  0x8f   : > { %v313_v23 = vsel %vm1283_vm9, %v310_v21, %v290_v22  ;;  %v292_v26 = vpop.permute.xlu0 %291  ;;  %v294_v31 = vpop.permute.xlu1 %293  ;;  %vm1287_vm9 = vcmask 285696  }
  0x90   : > { %v315_v24 = vsel %vm1284_vm10, %v313_v23, 0  ;;  %vm1286_vm10 = vcmask 293888  }
  0x91   : > { %v317_v25 = vsel %vm316_vm11, %v315_v24, 0 }
  0x92   : > { %v320_v27 = vsel %vm318_vm12, %v317_v25, %v292_v26 }
  0x93   : > { %v322_v28 = vsel %vm1290_vm13, %v320_v27, 0  ;;  %vm513_vm13 = vcmask 228352  }
  0x94   : > { %v324_v30 = vsel %vm1288_vm14, %v322_v28, 0  ;;  %vm505_vm14 = vcmask 130048  }
  0x95   : > { %v327_v32 = vsel %vm1285_vm15, %v324_v30, %v294_v31  ;;  %vm1005_vm15 = vmmov 0  }
  0x96   : > { %v329_v33 = vsel %vm1287_vm9, %v327_v32, 0  ;;  %900 = vmatprep.mubr.msk.bf16.mxu0 %vm1005_vm15, %v1000_v29  ;;  %vm405_vm9 = vcmask 588800  }
 0x100   : > { %v352_v34 = vpop.permute.xlu0 %351 }
 0x101   : > { %v355_v35 = vsel %vm1286_vm10, %v329_v33, %v352_v34  ;;  %vm374_vm10 = vcmask 1043456  }
 0x102   : > { %368 = vrot.lane.b32.xlu0 %v355_v35, %s1001_s16  ;;  %372 = vrot.lane.b32.xlu1 %v355_v35, %s1002_s17  ;;  %v357_v36 = vrot.slane %v355_v35, 4 }
 0x106   : > { %364 = vrot.lane.b32.xlu0 %v355_v35, %s1003_s18  ;;  %370 = vrot.lane.b32.xlu1 %v357_v36, %s1004_s19 }
 0x10a   : > { %360 = vrot.lane.b32.xlu0 %v355_v35, %s1006_s20  ;;  %366 = vrot.lane.b32.xlu1 %v357_v36, %s1007_s21 }
 0x10e   : > { %358 = vrot.lane.b32.xlu0 %v357_v36, %s1009_s22  ;;  %362 = vrot.lane.b32.xlu1 %v357_v36, %s1010_s23 }
 0x112   : > { %392 = vperm.xlu1 %940, %v280_v38   ;;  %397 = vperm.xlu0 %941, %v281_v39   ;;  %v746_v39 = vsel %vm374_vm10, %v1067_v0, 0 }
 0x174   : > { %v369_v40 = vpop.permute.xlu0 %368  ;;  %v373_v41 = vpop.permute.xlu1 %372 }
 0x175   : > { %v410_v42 = vsel %vm374_vm10, %v373_v41, 0 }
 0x176   : > { %891 = vmatpush3.bf16.msra.mxu0 %v410_v42 }
 0x177   : > { %892 = vmatprep.subr.bf16.mxu0 %v1000_v29 }
 0x178   : > { %v365_v43 = vpop.permute.xlu0 %364  ;;  %v371_v44 = vpop.permute.xlu1 %370 }
 0x179   : > { %v388_v45 = vsel %vm374_vm10, %v369_v40, %v371_v44  ;;  %v979_v40 = vld [vmem:[%s1280_s5] sm:$0xff]  }
 0x17a   : > { %893 = vmatpush3.bf16.msra.mxu0 %v388_v45 }
 0x17b   : > { %894 = vmatprep.subr.bf16.mxu0 %v1000_v29 }
 0x17c   : > { %v361_v46 = vpop.permute.xlu0 %360  ;;  %v367_v47 = vpop.permute.xlu1 %366 }
 0x17d   : > { %v384_v48 = vsel %vm374_vm10, %v365_v43, %v367_v47 }
 0x17e   : > { %895 = vmatpush3.bf16.msra.mxu0 %v384_v48 }
 0x17f   : > { %896 = vmatprep.subr.bf16.mxu0 %v1000_v29 }
 0x180   : > { %v363_v49 = vpop.permute.xlu1 %362  ;;  %v359_v51 = vpop.permute.xlu0 %358 }
 0x181   : > { %v380_v50 = vsel %vm374_vm10, %v361_v46, %v363_v49  ;;  %v376_v52 = vsel %vm374_vm10, %v355_v35, %v359_v51 }
 0x182   : > { %897 = vmatpush3.bf16.msra.mxu0 %v380_v50 }
 0x183   : > { %898 = vmatprep.subr.bf16.mxu0 %v1000_v29 }
 0x186   : > { %899 = vmatpush3.bf16.msra.mxu0 %v376_v52 }
 0x187   : > { %904 = vmatprep.subr.bf16.mxu0 %v1000_v29 }
 0x189   : > { %901 = vmatmul.mubr.msk.bf16.vlgmr.msra.gmra.mxu0 %vm405_vm9, %v978_v53  ;;  %vm1289_vm9 = vcmask 31744  }
 0x18a   : > { %906 = vmatprep.mubr.msk.bf16.mxu0 %vm1005_vm15, %v1000_v29  ;;  %vm500_vm15 = vcmask 64512   ;;  %905 = vmatpush3.bf16.msra.mxu0 %v746_v39 }
 0x18d   : > { %v393_v55 = vpop.permute.xlu1 %392  ;;  %v398_v57 = vpop.permute.xlu0 %397 }
 0x191   : > { %907 = vmatmul.mubr.msk.bf16.vlgmr.msra.gmra.mxu0 %vm500_vm15, %v979_v40 }
 0x249   : > { %v446_v54 = vpop.f32.mrf.mxu0 }
 0x24a   : > { %v447_v59 = vadd.f32 %v446_v54, %v393_v55 }
 0x24b   : > { %v902_v56 = vpop.f32.mrf.mxu0 }
 0x24d   : > { %v449_v58 = vpop.f32.mrf.mxu0 }
 0x24e   : > { %v450_v60 = vadd.f32 %v449_v58, %v398_v57 }
 0x24f   : > { %v903_v61 = vpop.f32.mrf.mxu0 }
 0x250   : > { %v952_v62 = vpack.i.bf16 %v450_v60, %v447_v59 }
 0x252   : > { %953 = vrot.lane.b32.xlu0 %v952_v62, %s1010_s23  ;;  %943 = vrot.lane.b32.xlu1 %v952_v62, %s1006_s20 }
 0x256   : > { %963 = vrot.lane.b32.xlu0 %v952_v62, %s1011_s28  ;;  %948 = vrot.lane.b32.xlu1 %v952_v62, %s1012_s29 }
 0x25a   : > { %973 = vrot.lane.b32.xlu0 %v952_v62, %s1002_s17  ;;  %958 = vrot.lane.b32.xlu1 %v952_v62, %s1007_s21 }
 0x25e   : > { %968 = vrot.lane.b32.xlu1 %v952_v62, %s1001_s16 }
 0x2c4   : > { %v954_v63 = vpop.permute.xlu0 %953  ;;  %v944_v1 = vpop.permute.xlu1 %943 }
 0x2c5   : > { %v946_v2 = vunpack.i.h.bf16 %v944_v1  ;;  %v945_v3 = vunpack.i.l.bf16 %v944_v1  ;;  %v956_v12 = vunpack.i.h.bf16 %v954_v63  ;;  %v955_v13 = vunpack.i.l.bf16 %v954_v63 }
 0x2c7   : > { %v499_v8 = vsel %vm1289_vm9, %v450_v60, %v946_v2  ;;  %v498_v9 = vsel %vm1289_vm9, %v447_v59, %v945_v3  ;;  %vm508_vm9 = vcmask 162816  }
 0x2c8   : > { %v949_v4 = vpop.permute.xlu1 %948  ;;  %v964_v5 = vpop.permute.xlu0 %963 }
 0x2c9   : > { %v951_v6 = vunpack.i.h.bf16 %v949_v4  ;;  %v950_v7 = vunpack.i.l.bf16 %v949_v4  ;;  %v966_v22 = vunpack.i.h.bf16 %v964_v5  ;;  %v965_v23 = vunpack.i.l.bf16 %v964_v5 }
 0x2cb   : > { %v501_v10 = vsel %vm500_vm15, %v498_v9, %v950_v7  ;;  %v502_v11 = vsel %vm500_vm15, %v499_v8, %v951_v6 }
 0x2cc   : > { %v959_v14 = vpop.permute.xlu1 %958  ;;  %v503_v17 = vsel %vm302_vm5, %v501_v10, %v955_v13  ;;  %v504_v18 = vsel %vm302_vm5, %v502_v11, %v956_v12  ;;  %v974_v19 = vpop.permute.xlu0 %973  ;;  %v522_v13 = vld [vmem:[%s1279_s4 + $0x8] sm:$0xff] }
 0x2cd   : > { %v961_v15 = vunpack.i.h.bf16 %v959_v14  ;;  %v960_v16 = vunpack.i.l.bf16 %v959_v14  ;;  %v976_v27 = vunpack.i.h.bf16 %v974_v19  ;;  %v975_v28 = vunpack.i.l.bf16 %v974_v19  ;;  %v1205_v10 = vpop.f32.mrf.mxu0  ;;  %v521_v14 = vld [vmem:[%s1279_s4] sm:$0xff] }
 0x2cf   : > { %v506_v20 = vsel %vm505_vm14, %v503_v17, %v960_v16  ;;  %v507_v21 = vsel %vm505_vm14, %v504_v18, %v961_v15  ;;  %v908_v11 = vpop.f32.mrf.mxu0  ;;  %v726_v16 = vld [vmem:[%s1281_s6 + $0x8] sm:$0xff]  ;;  %v725_v17 = vld [vmem:[%s1281_s6] sm:$0xff] }
 0x2d0   : > { %v969_v24 = vpop.permute.xlu1 %968  ;;  %v509_v29 = vsel %vm508_vm9, %v506_v20, %v965_v23  ;;  %v510_v30 = vsel %vm508_vm9, %v507_v21, %v966_v22  ;;  %v982_v18 = vld [vmem:[%s1278_s3 + $0x4] ss:$8 sps:$4 sm:$0xff]  }
 0x2d1   : > { %v971_v25 = vunpack.i.h.bf16 %v969_v24  ;;  %v970_v26 = vunpack.i.l.bf16 %v969_v24  ;;  %v1209_v12 = vpop.f32.mrf.mxu0  ;;  %872 = vmatprep.mubr.msk.bf16.mxu1 %vm505_vm14, %v982_v18 }
 0x2d3   : > { %v511_v31 = vsel %vm316_vm11, %v509_v29, %v970_v26  ;;  %v512_v32 = vsel %vm316_vm11, %v510_v30, %v971_v25  ;;  %v909_v15 = vpop.f32.mrf.mxu0 }
 0x2d4   : > { %v514_v33 = vsel %vm513_vm13, %v511_v31, %v975_v28  ;;  %v515_v34 = vsel %vm513_vm13, %v512_v32, %v976_v27  ;;  %v980_v27 = vld [vmem:[%s1278_s3] ss:$8 sps:$4 sm:$0xff]  }
 0x2d5   : > { %v516_v35 = vmax.f32 %v514_v33, 0.0  ;;  %v517_v36 = vmax.f32 %v515_v34, 0.0 }
 0x2d7   : > { %v518_v38 = vpack.c.bf16 %v517_v36, %v516_v35 }
 0x2d9   : > { %555 = vrot.lane.b32.xlu0 %v518_v38, %s993_s9  ;;  %553 = vrot.lane.b32.xlu1 %v518_v38, %s991_s30 }
 0x2dd   : > { %524 = vrot.lane.b32.xlu0 %v518_v38, %s994_s10  ;;  %557 = vrot.lane.b32.xlu1 %v518_v38, %s992_s8 }
 0x2e1   : > { %528 = vrot.lane.b32.xlu0 %v518_v38, %s996_s12  ;;  %526 = vrot.lane.b32.xlu1 %v518_v38, %s995_s11 }
 0x2e5   : > { %532 = vrot.lane.b32.xlu0 %v518_v38, %s998_s14  ;;  %530 = vrot.lane.b32.xlu1 %v518_v38, %s997_s13 }
 0x34b   : > { %v554_v0 = vpop.permute.xlu1 %553  ;;  %v556_v43 = vpop.permute.xlu0 %555 }
 0x34c   : > { %v560_v41 = vsel %vm336_vm0, 0, %v554_v0  ;;  %vm1291_vm0 = vcmask 154624  }
 0x34d   : > { %v561_v42 = vsel %vm339_vm1, %v560_v41, 0  ;;  %vm1292_vm1 = vcmask 187392  }
 0x34e   : > { %v562_v44 = vsel %vm295_vm2, %v561_v42, 0  ;;  %vm1293_vm2 = vcmask 236544  }
 0x34f   : > { %v564_v45 = vsel %vm297_vm3, %v562_v44, %v556_v43  ;;  %v558_v48 = vpop.permute.xlu1 %557  ;;  %v525_v52 = vpop.permute.xlu0 %524 }
 0x350   : > { %v565_v46 = vsel %vm300_vm4, %v564_v45, 0  ;;  %v535_v53 = vsel %vm297_vm3, 0, %v525_v52  ;;  %vm1294_vm3 = vcmask 244736  }
 0x351   : > { %v566_v47 = vsel %vm302_vm5, %v565_v46, 0  ;;  %v536_v54 = vsel %vm300_vm4, %v535_v53, 0  ;;  %vm1295_vm4 = vcmask 252928  }
 0x352   : > { %v568_v49 = vsel %vm304_vm6, %v566_v47, %v558_v48  ;;  %v537_v55 = vsel %vm302_vm5, %v536_v54, 0 }
 0x353   : > { %v569_v50 = vsel %vm307_vm7, %v568_v49, 0  ;;  %v527_v56 = vpop.permute.xlu1 %526  ;;  %v529_v60 = vpop.permute.xlu0 %528 }
 0x354   : > { %v570_v51 = vsel %vm309_vm8, %v569_v50, 0  ;;  %v539_v57 = vsel %vm304_vm6, %v537_v55, %v527_v56  ;;  %vm1296_vm6 = vcmask 285696  }
 0x355   : > { %572 = vrot.lane.b32.xlu1 %v570_v51, %s999_s15  ;;  %v540_v58 = vsel %vm307_vm7, %v539_v57, 0  ;;  %vm1297_vm7 = vcmask 293888  }
 0x356   : > { %v541_v59 = vsel %vm309_vm8, %v540_v58, 0  ;;  %vm1298_vm8 = vcmask 31744  }
 0x357   : > { %v543_v61 = vsel %vm1291_vm0, %v541_v59, %v529_v60  ;;  %v531_v1 = vpop.permute.xlu1 %530  ;;  %v533_v5 = vpop.permute.xlu0 %532  ;;  %vm1299_vm10 = vmmov %vm1298_vm8 }
 0x358   : > { %v544_v62 = vsel %vm1292_vm1, %v543_v61, 0 }
 0x359   : > { %v545_v63 = vsel %vm316_vm11, %v544_v62, 0 }
 0x35a   : > { %v547_v2 = vsel %vm318_vm12, %v545_v63, %v531_v1  ;;  %vm801_vm12 = vcmask 257024  }
 0x35b   : > { %v548_v3 = vsel %vm1293_vm2, %v547_v2, 0 }
 0x35c   : > { %v549_v4 = vsel %vm1294_vm3, %v548_v3, 0 }
 0x35d   : > { %v551_v6 = vsel %vm1295_vm4, %v549_v4, %v533_v5 }
 0x35e   : > { %v552_v7 = vsel %vm1296_vm6, %v551_v6, 0 }
 0x3c7   : > { %v573_v8 = vpop.permute.xlu1 %572 }
 0x3c8   : > { %v575_v9 = vsel %vm1297_vm7, %v552_v7, %v573_v8 }
 0x3c9   : > { %593 = vrot.lane.b32.xlu1 %v575_v9, %s1001_s16  ;;  %596 = vrot.lane.b32.xlu0 %v575_v9, %s1004_s19 }
 0x3cd   : > { %587 = vrot.lane.b32.xlu1 %v575_v9, %s1003_s18  ;;  %590 = vrot.lane.b32.xlu0 %v575_v9, %s1007_s21 }
 0x3d1   : > { %581 = vrot.lane.b32.xlu1 %v575_v9, %s1006_s20  ;;  %584 = vrot.lane.b32.xlu0 %v575_v9, %s1010_s23 }
 0x3d5   : > { %599 = vrot.lane.b32.xlu1 %v575_v9, %s1002_s17  ;;  %578 = vrot.lane.b32.xlu0 %v575_v9, %s1009_s22 }
 0x3d9   : > { %609 = vperm.xlu1 %940, %v522_v13   ;;  %604 = vperm.xlu0 %941, %v521_v14  }
 0x3dd   : > { %734 = vperm.xlu1 %940, %v726_v16   ;;  %729 = vperm.xlu0 %941, %v725_v17  }
 0x43b   : > { %v597_v19 = vpop.permute.xlu0 %596  ;;  %v594_v20 = vpop.permute.xlu1 %593 }
 0x43c   : > { %625 = vmatpush1.bf16.msra.mxu1 %v597_v19 }
 0x43d   : > { %626 = vmatprep.subr.bf16.mxu1 %v1008_v37 }
 0x43f   : > { %v591_v21 = vpop.permute.xlu0 %590  ;;  %v588_v22 = vpop.permute.xlu1 %587 }
 0x440   : > { %627 = vmatpush1.bf16.msra.mxu1 %v594_v20 }
 0x441   : > { %628 = vmatprep.subr.bf16.mxu1 %v1008_v37 }
 0x443   : > { %v585_v23 = vpop.permute.xlu0 %584  ;;  %v582_v24 = vpop.permute.xlu1 %581 }
 0x444   : > { %629 = vmatpush1.bf16.msra.mxu1 %v591_v21 }
 0x445   : > { %630 = vmatprep.subr.bf16.mxu1 %v1008_v37 }
 0x447   : > { %v579_v25 = vpop.permute.xlu0 %578  ;;  %v600_v26 = vpop.permute.xlu1 %599 }
 0x448   : > { %631 = vmatpush1.bf16.msra.mxu1 %v588_v22 }
 0x449   : > { %632 = vmatprep.subr.bf16.mxu1 %v1008_v37 }
 0x44c   : > { %633 = vmatpush1.bf16.msra.mxu1 %v585_v23 }
 0x44d   : > { %634 = vmatprep.subr.bf16.mxu1 %v1008_v37 }
 0x450   : > { %635 = vmatpush1.bf16.msra.mxu1 %v582_v24 }
 0x451   : > { %636 = vmatprep.subr.bf16.mxu1 %v1008_v37 }
 0x454   : > { %637 = vmatpush1.bf16.msra.mxu1 %v579_v25  ;;  %v605_v28 = vpop.permute.xlu0 %604  ;;  %v610_v32 = vpop.permute.xlu1 %609 }
 0x455   : > { %638 = vmatprep.subr.bf16.mxu1 %v1008_v37 }
 0x458   : > { %639 = vmatpush1.bf16.msra.mxu1 %v575_v9  ;;  %v735_v36 = vpop.permute.xlu1 %734 }
 0x459   : > { %654 = vmatprep.subr.bf16.mxu1 %v1008_v37  ;;  %v730_v37 = vpop.permute.xlu0 %729  ;;  %v786_v1 = vadd.f32 %v1209_v12, %v735_v36 }
 0x45a   : > { %v783_v54 = vadd.f32 %v1205_v10, %v730_v37 }
 0x45c   : > { %655 = vmatpush2.bf16.msra.mxu1 %v600_v26 }
 0x45f   : > { %657 = vmatmul.mubr.bf16.vlgmr.msra.gmra.mxu1 %v980_v27 }
 0x51f   : > { %v658_v29 = vpop.f32.mrf.mxu1 }
 0x520   : > { %v659_v30 = vadd.f32 %v658_v29, %v605_v28 }
 0x521   : > { %v660_v31 = vpop.f32.mrf.mxu1 }
 0x522   : > { %667 = vrot.lane.b32.xlu0 %v659_v30, %s1006_s20 }
 0x523   : > { %v661_v33 = vpop.f32.mrf.mxu1 }
 0x524   : > { %v662_v34 = vadd.f32 %v661_v33, %v610_v32 }
 0x525   : > { %v663_v35 = vpop.f32.mrf.mxu1 }
 0x526   : > { %669 = vrot.lane.b32.xlu1 %v662_v34, %s1006_s20  ;;  %673 = vrot.lane.b32.xlu0 %v659_v30, %s1012_s29 }
 0x52a   : > { %675 = vrot.lane.b32.xlu1 %v662_v34, %s1012_s29  ;;  %679 = vrot.lane.b32.xlu0 %v659_v30, %s1010_s23 }
 0x52e   : > { %681 = vrot.lane.b32.xlu1 %v662_v34, %s1010_s23  ;;  %685 = vrot.lane.b32.xlu0 %v659_v30, %s1007_s21 }
 0x532   : > { %687 = vrot.lane.b32.xlu1 %v662_v34, %s1007_s21  ;;  %691 = vrot.lane.b32.xlu0 %v659_v30, %s1011_s28 }
 0x536   : > { %693 = vrot.lane.b32.xlu1 %v662_v34, %s1011_s28  ;;  %697 = vrot.lane.b32.xlu0 %v659_v30, %s1001_s16 }
 0x53a   : > { %699 = vrot.lane.b32.xlu1 %v662_v34, %s1001_s16  ;;  %703 = vrot.lane.b32.xlu0 %v659_v30, %s1002_s17  ;;  %s879_s16 = sshll.u32 %s1301_s25, 3 }
 0x53b   : > { %s275_s21 = scalar_lea.vmem %s1282_s7, %s879_s16 }
 0x53e   : > { %705 = vrot.lane.b32.xlu1 %v662_v34, %s1002_s17 }
 0x594   : > { %v668_v38 = vpop.permute.xlu0 %667 }
 0x595   : > { %v709_v46 = vsel %vm1298_vm8, %v659_v30, %v668_v38 }
 0x598   : > { %v670_v39 = vpop.permute.xlu1 %669  ;;  %v674_v40 = vpop.permute.xlu0 %673 }
 0x599   : > { %v711_v47 = vsel %vm500_vm15, %v709_v46, %v674_v40  ;;  %v710_v52 = vsel %vm1299_vm10, %v662_v34, %v670_v39 }
 0x59c   : > { %v676_v0 = vpop.permute.xlu1 %675  ;;  %v680_v41 = vpop.permute.xlu0 %679 }
 0x59d   : > { %v713_v50 = vsel %vm302_vm5, %v711_v47, %v680_v41  ;;  %v712_v55 = vsel %vm500_vm15, %v710_v52, %v676_v0 }
 0x5a0   : > { %v682_v42 = vpop.permute.xlu1 %681  ;;  %v686_v43 = vpop.permute.xlu0 %685 }
 0x5a1   : > { %v715_v51 = vsel %vm505_vm14, %v713_v50, %v686_v43  ;;  %v714_v59 = vsel %vm302_vm5, %v712_v55, %v682_v42 }
 0x5a4   : > { %v688_v44 = vpop.permute.xlu1 %687  ;;  %v692_v45 = vpop.permute.xlu0 %691 }
 0x5a5   : > { %v717_v53 = vsel %vm508_vm9, %v715_v51, %v692_v45  ;;  %v716_v61 = vsel %vm505_vm14, %v714_v59, %v688_v44 }
 0x5a8   : > { %v694_v48 = vpop.permute.xlu1 %693  ;;  %v698_v49 = vpop.permute.xlu0 %697 }
 0x5a9   : > { %v719_v56 = vsel %vm316_vm11, %v717_v53, %v698_v49  ;;  %v718_v63 = vsel %vm508_vm9, %v716_v61, %v694_v48 }
 0x5ac   : > { %v700_v57 = vpop.permute.xlu1 %699  ;;  %v704_v58 = vpop.permute.xlu0 %703 }
 0x5ad   : > { %v721_v60 = vsel %vm513_vm13, %v719_v56, %v704_v58  ;;  %v720_v2 = vsel %vm316_vm11, %v718_v63, %v700_v57 }
 0x5ae   : > { %v789_v62 = vadd.f32 %v783_v54, %v721_v60 }
 0x5b0   : > { %v791_v3 = vmax.f32 %v789_v62, 0.0  ;;  %v706_v4 = vpop.permute.xlu1 %705 }
 0x5b1   : > { %v722_v5 = vsel %vm513_vm13, %v720_v2, %v706_v4 }
 0x5b2   : > { %v880_v6 = vpack.c.bf16 %v791_v3, %v791_v3  ;;  %v790_v7 = vadd.f32 %v786_v1, %v722_v5 }
 0x5b4   : > { %802 = vst.msk [vmem:[%s275_s21] sm:$0xf] %vm801_vm12, %v880_v6  ;;  %v792_v8 = vmax.f32 %v790_v7, 0.0 }
 0x5b6   : > { %v881_v9 = vpack.c.bf16 %v792_v8, %v792_v8 }
 0x5b8   : > { %803 = vst.msk [vmem:[%s275_s21 + $0x4] sm:$0xf] %vm801_vm12, %v881_v9 }
 0x5b9 PF: > { %s17_s24 = sadd.s32 1, %s989_s24  }
 0x5ba   : > { %p14_p4 = scmp.ge.s32.totalorder %s17_s24, 4  }
 0x5bc   :  { %16 = sbr.rel (!%p14_p4) target bundleno = 1 (0x1), region = 78 }

// kernel: resnet_forward.14
= control target key start
LH: loop header
LB: loop body
LE: loop exit
PB: predicated region body
PF: predicated region fallthrough
CT: control target
= control target key end

     0   :  { %s1235_s24 = smov 0   ;;  %s1491_s0 = inlined_call_operand.vmem [shape: bf16[2,16,20], index: 0, kind: input, shape index: {}]   ;;  %s1492_s1 = inlined_call_operand.vmem [shape: bf16[32,144], index: 1, kind: input, shape index: {}]   ;;  %s1493_s2 = inlined_call_operand.vmem [shape: f32[32,1], index: 2, kind: input, shape index: {}]   ;;  %s1494_s3 = inlined_call_operand.vmem [shape: bf16[32,288], index: 3, kind: input, shape index: {}]   ;;  %s1495_s4 = inlined_call_operand.vmem [shape: f32[32,1], index: 4, kind: input, shape index: {}]   ;;  %s1496_s5 = inlined_call_operand.vmem [shape: bf16[32,16], index: 5, kind: input, shape index: {}]   ;;  %s1497_s6 = inlined_call_operand.vmem [shape: f32[32,1], index: 6, kind: input, shape index: {}]   ;;  %s1498_s7 = inlined_call_operand.vmem [shape: bf16[2,32,20], index: 7, kind: output, shape index: {}]  }
   0x1 LB: > { %s1011_s25 = sadd.s32 4294967295, %s1178_s24   ;;  %p1015_p0 = scmp.ge.s32.totalorder %s1178_s24, 1  ;;  %s1178_s24 = sphi %s1235_s24, %s17_s24  }
   0x2   : > { %p237_p1 = scmp.lt.s32.totalorder %s1178_s24, 3 }
   0x4   : > { %p238_p2 = pnand %p1015_p0, %p237_p1 }
   0x5   : > { %p269_p3 = scmp.lt.s32.totalorder (!%p238_p2), %s1011_s25, 1  ;;  %s1180_s30 = smov (!%p238_p2), 8  }
   0x6   : > { %241 = sbr.rel (%p238_p2) target bundleno = 1263 (0x4ef), region = 48  ;;  %s1181_s8 = smov (!%p238_p2), 12  }
   0x7   : > { %s1182_s9 = smov (!%p238_p2), 10   ;;  %s1183_s10 = smov (!%p238_p2), 14  }
   0x8   : > { %s1185_s11 = smov (!%p238_p2), 114   ;;  %s1186_s12 = smov (!%p238_p2), 113  }
   0x9   : > { %s1187_s13 = smov (!%p238_p2), 120   ;;  %s1188_s14 = smov (!%p238_p2), 119  }
   0xa   : > { %s1189_s15 = smov (!%p238_p2), 126   ;;  %s1190_s16 = smov (!%p238_p2), 121  }
   0xb   : > { %s1500_s25 = smov (!%p269_p3, %s1011_s25), 1  ;;  %v1184_v1 = vmov 0   ;;  %vm304_vm0 = vcmask 64512   ;;  %vm307_vm1 = vcmask 105472   ;;  %vm309_vm2 = vcmask 113664   ;;  %s1191_s17 = smov 112  }
   0xc   : > { %s1045_s26 = sshll.u32 %s1500_s25, 3  ;;  %403 = vmatprep.subr.bf16.mxu0 %v1184_v1  ;;  %1124 = vset.pattern.permute.xlu1 %v1184_v1  ;;  %vm311_vm3 = vcmask 121856   ;;  %vm314_vm4 = vcmask 162816   ;;  %vm316_vm5 = vcmask 171008   ;;  %vm318_vm6 = vcmask 179200   ;;  %s1192_s18 = smov 127  }
   0xd   : > { %s273_s29 = scalar_lea.vmem %s1491_s0, %s1045_s26  ;;  %1123 = vset.pattern.permute.xlu0 %v1184_v1  ;;  %vm321_vm7 = vcmask 220160   ;;  %vm323_vm8 = vcmask 228352   ;;  %vm325_vm9 = vcmask 236544   ;;  %vm328_vm10 = vcmask 277504   ;;  %v1158_v18 = vld [vmem:[%s1492_s1 + $0x4] ss:$8 sps:$4 sm:$0xff]  }
   0xe   : > { %v1249_v0 = vld [vmem:[%s273_s29] sm:$0xff]   ;;  %vm330_vm11 = vcmask 285696   ;;  %vm396_vm12 = vcmask 130048   ;;  %v289_v19 = vld [vmem:[%s1493_s2 + $0x18] sm:$0xff]  ;;  %v288_v20 = vld [vmem:[%s1493_s2 + $0x10] sm:$0xff]  ;;  %s1193_s28 = smov 124  }
   0xf   : > { %295 = vrot.lane.b32.xlu0 %v1249_v0, %s1180_s30  ;;  %299 = vrot.lane.b32.xlu1 %v1249_v0, %s1181_s8  ;;  %v286_v21 = vld [vmem:[%s1493_s2] sm:$0xff]  ;;  %v287_v22 = vld [vmem:[%s1493_s2 + $0x8] sm:$0xff]  ;;  %s1194_s29 = smov 122   ;;  %vm492_vm13 = vcmask 39936   ;;  %vm497_vm14 = vcmask 80896   ;;  %vm676_vm15 = vcmask 261120  }
  0x10   : > { %1025 = vmatprep.mubr.msk.bf16.mxu0 %vm396_vm12, %v1158_v18  ;;  %v1156_v31 = vld [vmem:[%s1492_s1] ss:$8 sps:$4 sm:$0xff]   ;;  %v1159_v32 = vld [vmem:[%s1492_s1 + $0x14] ss:$8 sps:$4 sm:$0xff]   ;;  %v1161_v33 = vld [vmem:[%s1492_s1 + $0x10] ss:$8 sps:$4 sm:$0xff]  }
  0x11   : > { %v1162_v52 = vld [vmem:[%s1496_s5] sm:$0xff]   ;;  %v1163_v53 = vld [vmem:[%s1496_s5 + $0x8] sm:$0xff]  }
  0x13   : > { %297 = vrot.lane.b32.xlu0 %v1249_v0, %s1182_s9  ;;  %301 = vrot.lane.b32.xlu1 %v1249_v0, %s1183_s10 }
  0x81   : > { %v296_v2 = vpop.permute.xlu0 %295  ;;  %v300_v5 = vpop.permute.xlu1 %299 }
  0x82   : > { %v306_v3 = vsel %vm304_vm0, 0, %v296_v2 }
  0x83   : > { %v308_v4 = vsel %vm307_vm1, %v306_v3, 0 }
  0x84   : > { %v310_v6 = vsel %vm309_vm2, %v308_v4, 0 }
  0x85   : > { %v298_v7 = vpop.permute.xlu0 %297  ;;  %v302_v12 = vpop.permute.xlu1 %301 }
  0x86   : > { %v313_v8 = vsel %vm311_vm3, %v310_v6, %v298_v7 }
  0x87   : > { %v315_v9 = vsel %vm314_vm4, %v313_v8, 0 }
  0x88   : > { %v317_v10 = vsel %vm316_vm5, %v315_v9, 0 }
  0x89   : > { %v320_v11 = vsel %vm318_vm6, %v317_v10, %v300_v5 }
  0x8a   : > { %v322_v13 = vsel %vm321_vm7, %v320_v11, 0 }
  0x8b   : > { %v324_v14 = vsel %vm323_vm8, %v322_v13, 0 }
  0x8c   : > { %v327_v15 = vsel %vm325_vm9, %v324_v14, %v302_v12 }
  0x8d   : > { %v329_v16 = vsel %vm328_vm10, %v327_v15, 0 }
  0x8e   : > { %v331_v17 = vsel %vm330_vm11, %v329_v16, 0 }
  0x8f   : > { %349 = vrot.lane.b32.xlu1 %v331_v17, %s1185_s11  ;;  %352 = vrot.lane.b32.xlu0 %v331_v17, %s1186_s12 }
  0x93   : > { %343 = vrot.lane.b32.xlu1 %v331_v17, %s1187_s13  ;;  %346 = vrot.lane.b32.xlu0 %v331_v17, %s1188_s14 }
  0x97   : > { %337 = vrot.lane.b32.xlu1 %v331_v17, %s1189_s15  ;;  %340 = vrot.lane.b32.xlu0 %v331_v17, %s1190_s16 }
  0x9b   : > { %355 = vrot.lane.b32.xlu1 %v331_v17, %s1191_s17  ;;  %334 = vrot.lane.b32.xlu0 %v331_v17, %s1192_s18 }
  0x9f   : > { %375 = vperm.xlu1 %1124, %v289_v19   ;;  %370 = vperm.xlu0 %1123, %v288_v20  }
  0xa3   : > { %360 = vperm.xlu1 %1124, %v286_v21   ;;  %365 = vperm.xlu0 %1123, %v287_v22  }
 0x101   : > { %v353_v23 = vpop.permute.xlu0 %352  ;;  %v350_v24 = vpop.permute.xlu1 %349 }
 0x102   : > { %404 = vmatpush1.bf16.msra.mxu0 %v353_v23 }
 0x103   : > { %405 = vmatprep.subr.bf16.mxu0 %v1184_v1 }
 0x105   : > { %v347_v25 = vpop.permute.xlu0 %346  ;;  %v344_v26 = vpop.permute.xlu1 %343 }
 0x106   : > { %406 = vmatpush1.bf16.msra.mxu0 %v350_v24 }
 0x107   : > { %407 = vmatprep.subr.bf16.mxu0 %v1184_v1 }
 0x109   : > { %v341_v27 = vpop.permute.xlu0 %340  ;;  %v338_v28 = vpop.permute.xlu1 %337 }
 0x10a   : > { %408 = vmatpush1.bf16.msra.mxu0 %v347_v25 }
 0x10b   : > { %409 = vmatprep.subr.bf16.mxu0 %v1184_v1 }
 0x10d   : > { %v335_v29 = vpop.permute.xlu0 %334  ;;  %v356_v30 = vpop.permute.xlu1 %355 }
 0x10e   : > { %410 = vmatpush1.bf16.msra.mxu0 %v344_v26 }
 0x10f   : > { %411 = vmatprep.subr.bf16.mxu0 %v1184_v1 }
 0x112   : > { %412 = vmatpush1.bf16.msra.mxu0 %v341_v27 }
 0x113   : > { %413 = vmatprep.subr.bf16.mxu0 %v1184_v1 }
 0x116   : > { %414 = vmatpush1.bf16.msra.mxu0 %v338_v28 }
 0x117   : > { %415 = vmatprep.subr.bf16.mxu0 %v1184_v1 }
 0x11a   : > { %416 = vmatpush1.bf16.msra.mxu0 %v335_v29  ;;  %v371_v37 = vpop.permute.xlu0 %370  ;;  %v376_v39 = vpop.permute.xlu1 %375 }
 0x11b   : > { %417 = vmatprep.subr.bf16.mxu0 %v1184_v1 }
 0x11e   : > { %418 = vmatpush1.bf16.msra.mxu0 %v331_v17  ;;  %v366_v42 = vpop.permute.xlu0 %365  ;;  %v361_v46 = vpop.permute.xlu1 %360 }
 0x11f   : > { %433 = vmatprep.subr.bf16.mxu0 %v1184_v1 }
 0x122   : > { %434 = vmatpush2.bf16.msra.mxu0 %v356_v30 }
 0x123   : > { %1094 = vmatprep.subr.bf16.mxu0 %v1249_v0 }
 0x125   : > { %436 = vmatmul.mubr.bf16.vlgmr.msra.gmra.mxu0 %v1156_v31 }
 0x126   : > { %1026 = vmatprep.mubr.msk.bf16.mxu0 %vm396_vm12, %v1159_v32  ;;  %1095 = vmatpush3.bf16.msra.mxu0 %v1249_v0 }
 0x12d   : > { %444 = vmatmul.mubr.bf16.gmra.mxu0 %v1161_v33 }
 0x12e   : > { %1096 = vmatprep.mubr.msk.bf16.mxu0 %vm396_vm12, %v1162_v52 }
 0x135   : > { %1097 = vmatmul.mubr.msk.bf16.vlgmr.msra.gmra.mxu0 %vm396_vm12, %v1163_v53 }
 0x1e5   : > { %v437_v34 = vpop.f32.mrf.mxu0 }
 0x1e6   : > { %v438_v50 = vadd.f32 %v437_v34, %v361_v46 }
 0x1e7   : > { %v439_v35 = vpop.f32.mrf.mxu0 }
 0x1e9   : > { %v440_v36 = vpop.f32.mrf.mxu0 }
 0x1ea   : > { %v441_v48 = vadd.f32 %v440_v36, %v366_v42 }
 0x1eb   : > { %v442_v38 = vpop.f32.mrf.mxu0 }
 0x1ec   : > { %v1135_v51 = vpack.i.bf16 %v441_v48, %v438_v50 }
 0x1ed   : > { %v445_v40 = vpop.f32.mrf.mxu0 }
 0x1ee   : > { %v446_v44 = vadd.f32 %v445_v40, %v371_v37 }
 0x1ef   : > { %v447_v41 = vpop.f32.mrf.mxu0 }
 0x1f1   : > { %v448_v43 = vpop.f32.mrf.mxu0 }
 0x1f2   : > { %v449_v45 = vadd.f32 %v448_v43, %v376_v39 }
 0x1f3   : > { %v450_v47 = vpop.f32.mrf.mxu0 }
 0x1f4   : > { %v1130_v49 = vpack.i.bf16 %v449_v45, %v446_v44 }
 0x1f6   : > { %1131 = vrot.lane.b32.xlu0 %v1130_v49, %s1193_s28  ;;  %1126 = vrot.lane.b32.xlu1 %v1130_v49, %s1189_s15 }
 0x1fa   : > { %1141 = vrot.lane.b32.xlu1 %v1130_v49, %s1194_s29  ;;  %1136 = vrot.lane.b32.xlu0 %v1135_v51, %s1189_s15 }
 0x1fe   : > { %1146 = vrot.lane.b32.xlu1 %v1135_v51, %s1193_s28  ;;  %1151 = vrot.lane.b32.xlu0 %v1135_v51, %s1194_s29 }
 0x268   : > { %v1127_v54 = vpop.permute.xlu1 %1126  ;;  %v1132_v55 = vpop.permute.xlu0 %1131 }
 0x269   : > { %v1129_v56 = vunpack.i.h.bf16 %v1127_v54  ;;  %v1128_v57 = vunpack.i.l.bf16 %v1127_v54  ;;  %v1134_v58 = vunpack.i.h.bf16 %v1132_v55  ;;  %v1133_v59 = vunpack.i.l.bf16 %v1132_v55 }
 0x26b   : > { %v496_v60 = vsel %vm492_vm13, %v449_v45, %v1129_v56  ;;  %v495_v61 = vsel %vm492_vm13, %v446_v44, %v1128_v57 }
 0x26c   : > { %v1142_v62 = vpop.permute.xlu1 %1141  ;;  %v1137_v63 = vpop.permute.xlu0 %1136  ;;  %v501_v2 = vsel %vm497_vm14, %v496_v60, %v1134_v58  ;;  %v500_v3 = vsel %vm497_vm14, %v495_v61, %v1133_v59  ;;  %v1166_v58 = vld [vmem:[%s1494_s3 + $0x4] ss:$12 sps:$4 sm:$0xff]   ;;  %v521_v59 = vld [vmem:[%s1495_s4 + $0x8] sm:$0xff]  ;;  %v523_v61 = vld [vmem:[%s1495_s4 + $0x18] sm:$0xff] }
 0x26d   : > { %v1144_v0 = vunpack.i.h.bf16 %v1142_v62  ;;  %v1143_v1 = vunpack.i.l.bf16 %v1142_v62  ;;  %v1139_v4 = vunpack.i.h.bf16 %v1137_v63  ;;  %v1138_v5 = vunpack.i.l.bf16 %v1137_v63  ;;  %715 = vmatprep.mubr.bf16.mxu1 %v1166_v58  ;;  %v520_v60 = vld [vmem:[%s1495_s4] sm:$0xff]  ;;  %v522_v62 = vld [vmem:[%s1495_s4 + $0x10] sm:$0xff]  ;;  %v838_v63 = vld [vmem:[%s1497_s6 + $0x8] sm:$0xff] }
 0x26f   : > { %v504_v6 = vsel %vm311_vm3, %v500_v3, %v1143_v1  ;;  %v505_v7 = vsel %vm311_vm3, %v501_v2, %v1144_v0  ;;  %v494_v16 = vsel %vm492_vm13, %v441_v48, %v1139_v4  ;;  %v493_v17 = vsel %vm492_vm13, %v438_v50, %v1138_v5  ;;  %v837_v0 = vld [vmem:[%s1497_s6] sm:$0xff]  ;;  %v840_v1 = vld [vmem:[%s1497_s6 + $0x18] sm:$0xff]  ;;  %v839_v2 = vld [vmem:[%s1497_s6 + $0x10] sm:$0xff] }
 0x270   : > { %v508_v8 = vmax.f32 %v504_v6, 0.0  ;;  %v509_v9 = vmax.f32 %v505_v7, 0.0  ;;  %v1147_v10 = vpop.permute.xlu1 %1146  ;;  %v1152_v11 = vpop.permute.xlu0 %1151 }
 0x271   : > { %v1149_v12 = vunpack.i.h.bf16 %v1147_v10  ;;  %v1148_v13 = vunpack.i.l.bf16 %v1147_v10  ;;  %v1154_v14 = vunpack.i.h.bf16 %v1152_v11  ;;  %v1153_v15 = vunpack.i.l.bf16 %v1152_v11 }
 0x272   : > { %v511_v18 = vpack.c.bf16 %v509_v9, %v508_v8 }
 0x273   : > { %v498_v19 = vsel %vm497_vm14, %v493_v17, %v1148_v13  ;;  %v499_v20 = vsel %vm497_vm14, %v494_v16, %v1149_v12  ;;  %v1164_v17 = vld [vmem:[%s1494_s3] ss:$12 sps:$4 sm:$0xff]  }
 0x274   : > { %v502_v21 = vsel %vm311_vm3, %v498_v19, %v1153_v15  ;;  %v503_v22 = vsel %vm311_vm3, %v499_v20, %v1154_v14  ;;  %532 = vrot.lane.b32.xlu0 %v511_v18, %s1182_s9  ;;  %528 = vrot.lane.b32.xlu1 %v511_v18, %s1180_s30  ;;  %v1167_v19 = vld [vmem:[%s1494_s3 + $0x1c] ss:$12 sps:$4 sm:$0xff]  }
 0x275   : > { %v506_v23 = vmax.f32 %v502_v21, 0.0  ;;  %v507_v24 = vmax.f32 %v503_v22, 0.0  ;;  %v1169_v21 = vld [vmem:[%s1494_s3 + $0x18] ss:$12 sps:$4 sm:$0xff]   ;;  %v1170_v22 = vld [vmem:[%s1494_s3 + $0x8] ss:$12 sps:$4 sm:$0xff]  }
 0x277   : > { %v510_v25 = vpack.c.bf16 %v507_v24, %v506_v23  ;;  %v1171_v23 = vld [vmem:[%s1494_s3 + $0x20] ss:$12 sps:$4 sm:$0xff]  }
 0x278   : > { %536 = vrot.lane.b32.xlu0 %v511_v18, %s1181_s8 }
 0x279   : > { %526 = vrot.lane.b32.xlu1 %v510_v25, %s1180_s30 }
 0x27c   : > { %540 = vrot.lane.b32.xlu0 %v511_v18, %s1183_s10 }
 0x27d   : > { %530 = vrot.lane.b32.xlu1 %v510_v25, %s1182_s9 }
 0x280   : > { %538 = vrot.lane.b32.xlu0 %v510_v25, %s1183_s10 }
 0x281   : > { %534 = vrot.lane.b32.xlu1 %v510_v25, %s1181_s8 }
 0x2e6   : > { %v533_v26 = vpop.permute.xlu0 %532  ;;  %v529_v27 = vpop.permute.xlu1 %528 }
 0x2e7   : > { %v545_v28 = vsel %vm304_vm0, 0, %v529_v27 }
 0x2e8   : > { %v547_v29 = vsel %vm307_vm1, %v545_v28, 0 }
 0x2e9   : > { %v549_v30 = vsel %vm309_vm2, %v547_v29, 0 }
 0x2ea   : > { %v553_v31 = vsel %vm311_vm3, %v549_v30, %v533_v26  ;;  %v537_v32 = vpop.permute.xlu0 %536 }
 0x2eb   : > { %v555_v33 = vsel %vm314_vm4, %v553_v31, 0  ;;  %v527_v34 = vpop.permute.xlu1 %526 }
 0x2ec   : > { %v557_v35 = vsel %vm316_vm5, %v555_v33, 0  ;;  %v543_v36 = vsel %vm304_vm0, 0, %v527_v34  ;;  %vm951_vm0 = vcmask 158720  }
 0x2ed   : > { %v561_v37 = vsel %vm318_vm6, %v557_v35, %v537_v32  ;;  %v546_v38 = vsel %vm307_vm1, %v543_v36, 0 }
 0x2ee   : > { %v563_v39 = vsel %vm321_vm7, %v561_v37, 0  ;;  %v548_v40 = vsel %vm309_vm2, %v546_v38, 0  ;;  %v541_v41 = vpop.permute.xlu0 %540 }
 0x2ef   : > { %v565_v42 = vsel %vm323_vm8, %v563_v39, 0  ;;  %v531_v43 = vpop.permute.xlu1 %530 }
 0x2f0   : > { %v569_v44 = vsel %vm325_vm9, %v565_v42, %v541_v41  ;;  %v551_v45 = vsel %vm311_vm3, %v548_v40, %v531_v43 }
 0x2f1   : > { %v571_v46 = vsel %vm328_vm10, %v569_v44, 0  ;;  %v554_v47 = vsel %vm314_vm4, %v551_v45, 0 }
 0x2f2   : > { %v1369_v48 = vsel %vm330_vm11, %v571_v46, 0  ;;  %v556_v49 = vsel %vm316_vm5, %v554_v47, 0  ;;  %v539_v53 = vpop.permute.xlu0 %538 }
 0x2f3   : > { %592 = vrot.lane.b32.xlu0 %v1369_v48, %s1190_s16  ;;  %616 = vrot.lane.b32.xlu1 %v1369_v48, %s1186_s12  ;;  %v535_v50 = vpop.permute.xlu1 %534 }
 0x2f4   : > { %v559_v51 = vsel %vm318_vm6, %v556_v49, %v535_v50 }
 0x2f5   : > { %v562_v52 = vsel %vm321_vm7, %v559_v51, 0 }
 0x2f6   : > { %v564_v54 = vsel %vm323_vm8, %v562_v52, 0 }
 0x2f7   : > { %v567_v55 = vsel %vm325_vm9, %v564_v54, %v539_v53 }
 0x2f8   : > { %v570_v56 = vsel %vm328_vm10, %v567_v55, 0 }
 0x2f9   : > { %v1382_v57 = vsel %vm330_vm11, %v570_v56, 0 }
 0x2fa   : > { %590 = vrot.lane.b32.xlu0 %v1382_v57, %s1190_s16  ;;  %614 = vrot.lane.b32.xlu1 %v1382_v57, %s1186_s12 }
 0x2fe   : > { %586 = vrot.lane.b32.xlu0 %v1369_v48, %s1189_s15  ;;  %610 = vrot.lane.b32.xlu1 %v1369_v48, %s1185_s11 }
 0x302   : > { %584 = vrot.lane.b32.xlu0 %v1382_v57, %s1189_s15  ;;  %608 = vrot.lane.b32.xlu1 %v1382_v57, %s1185_s11 }
 0x306   : > { %580 = vrot.lane.b32.xlu0 %v1369_v48, %s1192_s18  ;;  %604 = vrot.lane.b32.xlu1 %v1369_v48, %s1188_s14 }
 0x30a   : > { %578 = vrot.lane.b32.xlu0 %v1382_v57, %s1192_s18  ;;  %602 = vrot.lane.b32.xlu1 %v1382_v57, %s1188_s14 }
 0x30e   : > { %596 = vrot.lane.b32.xlu0 %v1382_v57, %s1187_s13  ;;  %598 = vrot.lane.b32.xlu1 %v1369_v48, %s1187_s13 }
 0x312   : > { %620 = vrot.lane.b32.xlu0 %v1382_v57, %s1191_s17  ;;  %622 = vrot.lane.b32.xlu1 %v1369_v48, %s1191_s17 }
 0x316   : > { %633 = vperm.xlu0 %1123, %v521_v59   ;;  %628 = vperm.xlu1 %1124, %v520_v60  }
 0x31a   : > { %643 = vperm.xlu0 %1123, %v523_v61   ;;  %638 = vperm.xlu1 %1124, %v522_v62  }
 0x31e   : > { %848 = vperm.xlu0 %1123, %v838_v63   ;;  %843 = vperm.xlu1 %1124, %v837_v0  }
 0x322   : > { %858 = vperm.xlu0 %1123, %v840_v1   ;;  %853 = vperm.xlu1 %1124, %v839_v2  }
 0x365   : > { %v593_v3 = vpop.permute.xlu0 %592  ;;  %v617_v4 = vpop.permute.xlu1 %616 }
 0x366   : > { %1051 = vmatprep.subr.bf16.mxu1 %v617_v4 }
 0x367   : > { %1052 = vmatpush3.bf16.msra.mxu1 %v593_v3 }
 0x36c   : > { %v591_v5 = vpop.permute.xlu0 %590  ;;  %v615_v6 = vpop.permute.xlu1 %614 }
 0x36d   : > { %1053 = vmatprep.subr.bf16.mxu1 %v615_v6 }
 0x36e   : > { %1054 = vmatpush3.bf16.msra.mxu1 %v591_v5 }
 0x370   : > { %v587_v7 = vpop.permute.xlu0 %586  ;;  %v611_v8 = vpop.permute.xlu1 %610 }
 0x371   : > { %1055 = vmatprep.subr.bf16.mxu1 %v611_v8 }
 0x372   : > { %1056 = vmatpush3.bf16.msra.mxu1 %v587_v7 }
 0x374   : > { %v585_v9 = vpop.permute.xlu0 %584  ;;  %v609_v10 = vpop.permute.xlu1 %608 }
 0x375   : > { %1057 = vmatprep.subr.bf16.mxu1 %v609_v10 }
 0x376   : > { %1058 = vmatpush3.bf16.msra.mxu1 %v585_v9 }
 0x378   : > { %v581_v11 = vpop.permute.xlu0 %580  ;;  %v605_v12 = vpop.permute.xlu1 %604 }
 0x379   : > { %1059 = vmatprep.subr.bf16.mxu1 %v605_v12 }
 0x37a   : > { %1060 = vmatpush3.bf16.msra.mxu1 %v581_v11 }
 0x37c   : > { %v579_v13 = vpop.permute.xlu0 %578  ;;  %v603_v14 = vpop.permute.xlu1 %602 }
 0x37d   : > { %1061 = vmatprep.subr.bf16.mxu1 %v603_v14 }
 0x37e   : > { %1062 = vmatpush3.bf16.msra.mxu1 %v579_v13 }
 0x380   : > { %v599_v15 = vpop.permute.xlu1 %598  ;;  %v597_v16 = vpop.permute.xlu0 %596 }
 0x381   : > { %1063 = vmatprep.subr.bf16.mxu1 %v599_v15 }
 0x382   : > { %1064 = vmatpush3.bf16.msra.mxu1 %v1369_v48 }
 0x383   : > { %1065 = vmatprep.subr.bf16.mxu1 %v597_v16 }
 0x384   : > { %v623_v18 = vpop.permute.xlu1 %622  ;;  %v621_v20 = vpop.permute.xlu0 %620 }
 0x386   : > { %1066 = vmatpush3.bf16.msra.mxu1 %v1382_v57  ;;  %v1098_v57 = vpop.f32.mrf.mxu0 }
 0x387   : > { %1086 = vmatprep.subr.bf16.mxu1 %v623_v18 }
 0x388   : > { %v912_v60 = vpop.f32.mrf.mxu0 }
 0x389   : > { %716 = vmatmul.mubr.bf16.vlgmr.msra.gmra.mxu1 %v1164_v17 }
 0x38a   : > { %1087 = vmatpush3.bf16.msra.mxu1 %v623_v18  ;;  %723 = vmatprep.mubr.bf16.mxu1 %v1167_v19  ;;  %v1099_v63 = vpop.f32.mrf.mxu0 }
 0x38b   : > { %1088 = vmatprep.subr.bf16.mxu1 %v621_v20 }
 0x38c   : > { %v915_v2 = vpop.f32.mrf.mxu0 }
 0x38e   : > { %1089 = vmatpush3.bf16.msra.mxu1 %v621_v20 }
 0x391   : > { %724 = vmatmul.mubr.bf16.gmra.mxu1 %v1169_v21  ;;  %v629_v28 = vpop.permute.xlu1 %628  ;;  %v634_v32 = vpop.permute.xlu0 %633 }
 0x392   : > { %1090 = vmatprep.mubr.msk.bf16.mxu1 %vm676_vm15, %v1170_v22 }
 0x395   : > { %v639_v34 = vpop.permute.xlu1 %638  ;;  %v644_v40 = vpop.permute.xlu0 %643 }
 0x399   : > { %1091 = vmatmul.mubr.msk.bf16.vlgmr.msra.gmra.mxu1 %vm676_vm15, %v1171_v23  ;;  %v844_v52 = vpop.permute.xlu1 %843  ;;  %v849_v53 = vpop.permute.xlu0 %848 }
 0x39a   : > { %v913_v4 = vadd.f32 %v912_v60, %v844_v52  ;;  %v916_v10 = vadd.f32 %v915_v2, %v849_v53 }
 0x39d   : > { %v854_v54 = vpop.permute.xlu1 %853  ;;  %v859_v55 = vpop.permute.xlu0 %858 }
 0x39e   : > { %v921_v13 = vadd.f32 %v1098_v57, %v854_v54 }
 0x449   : > { %v1067_v24 = vpop.f32.mrf.mxu1 }
 0x44b   : > { %v1068_v25 = vpop.f32.mrf.mxu1 }
 0x44c   : > { %v1069_v42 = vadd.f32 %v1068_v25, %v1067_v24  ;;  %v924_v25 = vadd.f32 %v1099_v63, %v859_v55 }
 0x44d   : > { %v1070_v26 = vpop.f32.mrf.mxu1 }
 0x44e   : > { %v718_v47 = vadd.f32 %v1069_v42, %v629_v28 }
 0x44f   : > { %v1071_v27 = vpop.f32.mrf.mxu1 }
 0x450   : > { %v1072_v46 = vadd.f32 %v1071_v27, %v1070_v26 }
 0x451   : > { %v1073_v29 = vpop.f32.mrf.mxu1 }
 0x452   : > { %v721_v50 = vadd.f32 %v1072_v46, %v634_v32 }
 0x453   : > { %v1074_v30 = vpop.f32.mrf.mxu1 }
 0x454   : > { %v1075_v31 = vadd.f32 %v1074_v30, %v1073_v29 }
 0x455   : > { %v1076_v33 = vpop.f32.mrf.mxu1 }
 0x456   : > { %v726_v37 = vadd.f32 %v1075_v31, %v639_v34 }
 0x457   : > { %v1077_v35 = vpop.f32.mrf.mxu1 }
 0x458   : > { %v1078_v36 = vadd.f32 %v1077_v35, %v1076_v33 }
 0x459   : > { %v1092_v38 = vpop.f32.mrf.mxu1 }
 0x45a   : > { %v775_v39 = vadd.f32 %v1092_v38, %v726_v37  ;;  %v729_v43 = vadd.f32 %v1078_v36, %v644_v40 }
 0x45b   : > { %v766_v41 = vpop.f32.mrf.mxu1 }
 0x45c   : > { %789 = vrot.lane.b32.xlu1 %v775_v39, %s1189_s15  ;;  %v767_v48 = vadd.f32 %v766_v41, %v718_v47 }
 0x45d   : > { %v1093_v44 = vpop.f32.mrf.mxu1 }
 0x45e   : > { %v778_v45 = vadd.f32 %v1093_v44, %v729_v43 }
 0x45f   : > { %v769_v49 = vpop.f32.mrf.mxu1 }
 0x460   : > { %791 = vrot.lane.b32.xlu0 %v778_v45, %s1189_s15  ;;  %801 = vrot.lane.b32.xlu1 %v775_v39, %s1193_s28  ;;  %v770_v51 = vadd.f32 %v769_v49, %v721_v50 }
 0x464   : > { %803 = vrot.lane.b32.xlu0 %v778_v45, %s1193_s28  ;;  %785 = vrot.lane.b32.xlu1 %v767_v48, %s1189_s15 }
 0x468   : > { %787 = vrot.lane.b32.xlu0 %v770_v51, %s1189_s15  ;;  %797 = vrot.lane.b32.xlu1 %v767_v48, %s1193_s28  ;;  %s1046_s15 = sshll.u32 %s1500_s25, 4 }
 0x469   : > { %s278_s17 = scalar_lea.vmem %s1498_s7, %s1046_s15 }
 0x46c   : > { %799 = vrot.lane.b32.xlu0 %v770_v51, %s1193_s28  ;;  %809 = vrot.lane.b32.xlu1 %v767_v48, %s1194_s29 }
 0x470   : > { %811 = vrot.lane.b32.xlu0 %v770_v51, %s1194_s29  ;;  %813 = vrot.lane.b32.xlu1 %v775_v39, %s1194_s29 }
 0x474   : > { %815 = vrot.lane.b32.xlu0 %v778_v45, %s1194_s29 }
 0x4ce   : > { %v790_v56 = vpop.permute.xlu1 %789 }
 0x4cf   : > { %v823_v11 = vsel %vm492_vm13, %v775_v39, %v790_v56 }
 0x4d2   : > { %v792_v58 = vpop.permute.xlu0 %791  ;;  %v802_v59 = vpop.permute.xlu1 %801 }
 0x4d3   : > { %v827_v14 = vsel %vm497_vm14, %v823_v11, %v802_v59  ;;  %v824_v24 = vsel %vm492_vm13, %v778_v45, %v792_v58 }
 0x4d6   : > { %v804_v61 = vpop.permute.xlu0 %803  ;;  %v786_v62 = vpop.permute.xlu1 %785 }
 0x4d7   : > { %v821_v3 = vsel %vm492_vm13, %v767_v48, %v786_v62  ;;  %v828_v26 = vsel %vm497_vm14, %v824_v24, %v804_v61 }
 0x4da   : > { %v788_v0 = vpop.permute.xlu0 %787  ;;  %v798_v1 = vpop.permute.xlu1 %797 }
 0x4db   : > { %v825_v5 = vsel %vm497_vm14, %v821_v3, %v798_v1  ;;  %v822_v12 = vsel %vm492_vm13, %v770_v51, %v788_v0 }
 0x4de   : > { %v800_v6 = vpop.permute.xlu0 %799  ;;  %v810_v7 = vpop.permute.xlu1 %809 }
 0x4df   : > { %v829_v8 = vsel %vm311_vm3, %v825_v5, %v810_v7  ;;  %v826_v15 = vsel %vm497_vm14, %v822_v12, %v800_v6 }
 0x4e0   : > { %v927_v9 = vadd.f32 %v913_v4, %v829_v8 }
 0x4e2   : > { %v931_v16 = vmax.f32 %v927_v9, 0.0  ;;  %v812_v17 = vpop.permute.xlu0 %811  ;;  %v814_v18 = vpop.permute.xlu1 %813 }
 0x4e3   : > { %v830_v19 = vsel %vm311_vm3, %v826_v15, %v812_v17  ;;  %v831_v20 = vsel %vm311_vm3, %v827_v14, %v814_v18 }
 0x4e4   : > { %v1047_v21 = vpack.c.bf16 %v931_v16, %v931_v16  ;;  %v928_v22 = vadd.f32 %v916_v10, %v830_v19  ;;  %v929_v23 = vadd.f32 %v921_v13, %v831_v20 }
 0x4e6   : > { %952 = vst.msk [vmem:[%s278_s17] sm:$0xf] %vm951_vm0, %v1047_v21  ;;  %v932_v27 = vmax.f32 %v928_v22, 0.0  ;;  %v933_v28 = vmax.f32 %v929_v23, 0.0  ;;  %v816_v29 = vpop.permute.xlu0 %815 }
 0x4e7   : > { %v832_v30 = vsel %vm311_vm3, %v828_v26, %v816_v29 }
 0x4e8   : > { %v1048_v31 = vpack.c.bf16 %v932_v27, %v932_v27  ;;  %v1049_v32 = vpack.c.bf16 %v933_v28, %v933_v28  ;;  %v930_v33 = vadd.f32 %v924_v25, %v832_v30 }
 0x4ea   : > { %953 = vst.msk [vmem:[%s278_s17 + $0x4] sm:$0xf] %vm951_vm0, %v1048_v31  ;;  %954 = vst.msk [vmem:[%s278_s17 + $0x8] sm:$0xf] %vm951_vm0, %v1049_v32  ;;  %v934_v34 = vmax.f32 %v930_v33, 0.0 }
 0x4ec   : > { %v1050_v35 = vpack.c.bf16 %v934_v34, %v934_v34 }
 0x4ee   : > { %955 = vst.msk [vmem:[%s278_s17 + $0xc] sm:$0xf] %vm951_vm0, %v1050_v35 }
 0x4ef PF: > { %s17_s24 = sadd.s32 1, %s1178_s24  }
 0x4f0   : > { %p14_p4 = scmp.ge.s32.totalorder %s17_s24, 4  }
 0x4f2   :  { %16 = sbr.rel (!%p14_p4) target bundleno = 1 (0x1), region = 78 }

// kernel: resnet_forward.15
= control target key start
LH: loop header
LB: loop body
LE: loop exit
PB: predicated region body
PF: predicated region fallthrough
CT: control target
= control target key end

     0   :  { %s779_s12 = smov 0   ;;  %s897_s0 = inlined_call_operand.vmem [shape: bf16[2,32,20], index: 0, kind: input, shape index: {}]   ;;  %s898_s1 = inlined_call_operand.vmem [shape: bf16[32,288], index: 1, kind: input, shape index: {}]   ;;  %s899_s2 = inlined_call_operand.vmem [shape: f32[32,1], index: 2, kind: input, shape index: {}]   ;;  %s900_s3 = inlined_call_operand.vmem [shape: bf16[2,32,20], index: 3, kind: output, shape index: {}]  }
   0x1 LB: > { %s600_s13 = sadd.s32 4294967295, %s742_s12   ;;  %p604_p0 = scmp.ge.s32.totalorder %s742_s12, 1  ;;  %s742_s12 = sphi %s779_s12, %s13_s12  }
   0x2   : > { %p137_p1 = scmp.lt.s32.totalorder %s742_s12, 3 }
   0x4   : > { %p138_p2 = pnand %p604_p0, %p137_p1 }
   0x5   : > { %p161_p3 = scmp.lt.s32.totalorder (!%p138_p2), %s600_s13, 1  ;;  %s744_s18 = smov (!%p138_p2), 8  }
   0x6   : > { %141 = sbr.rel (%p138_p2) target bundleno = 637 (0x27d), region = 32  ;;  %s745_s19 = smov (!%p138_p2), 10  }
   0x7   : > { %s746_s20 = smov (!%p138_p2), 12   ;;  %s747_s21 = smov (!%p138_p2), 14  }
   0x8   : > { %s748_s22 = smov (!%p138_p2), 121   ;;  %s749_s23 = smov (!%p138_p2), 113  }
   0x9   : > { %s750_s24 = smov (!%p138_p2), 126   ;;  %s751_s25 = smov (!%p138_p2), 114  }
   0xa   : > { %s752_s26 = smov (!%p138_p2), 127   ;;  %s753_s27 = smov (!%p138_p2), 119  }
   0xb   : > { %s902_s13 = smov (!%p161_p3, %s600_s13), 1  ;;  %vm215_vm0 = vcmask 64512   ;;  %vm220_vm1 = vcmask 105472   ;;  %vm223_vm2 = vcmask 113664   ;;  %vm226_vm3 = vcmask 121856   ;;  %s754_s5 = smov 120  }
   0xc   : > { %s625_s14 = sshll.u32 %s902_s13, 4  ;;  %vm231_vm4 = vcmask 162816   ;;  %vm234_vm5 = vcmask 171008   ;;  %vm237_vm6 = vcmask 179200   ;;  %vm242_vm7 = vcmask 220160   ;;  %s755_s6 = smov 112  }
   0xd   : > { %s165_s17 = scalar_lea.vmem %s897_s0, %s625_s14  ;;  %vm245_vm8 = vcmask 228352   ;;  %vm248_vm9 = vcmask 236544   ;;  %vm253_vm10 = vcmask 277504   ;;  %vm256_vm11 = vcmask 285696   ;;  %v730_v34 = vld [vmem:[%s898_s1 + $0x4] ss:$12 sps:$4 sm:$0xff]   ;;  %s170_s30 = scalar_lea.vmem %s900_s3, %s625_s14 }
   0xe   : > { %v726_v0 = vld [vmem:[%s165_s17 + $0x8] sm:$0xff]   ;;  %v727_v1 = vld [vmem:[%s165_s17] sm:$0xff]   ;;  %400 = vmatprep.mubr.bf16.mxu0 %v730_v34  ;;  %vm361_vm12 = vcmask 261120   ;;  %v756_v36 = vmov 0   ;;  %v186_v39 = vld [vmem:[%s899_s2 + $0x10] sm:$0xff]  ;;  %s758_s28 = smov 122  }
   0xf   : > { %200 = vrot.lane.b32.xlu0 %v726_v0, %s744_s18  ;;  %198 = vrot.lane.b32.xlu1 %v727_v1, %s744_s18  ;;  %v731_v35 = vld [vmem:[%s898_s1 + $0x8] ss:$12 sps:$4 sm:$0xff]   ;;  %v184_v37 = vld [vmem:[%s899_s2] sm:$0xff]  ;;  %vm506_vm13 = vcmask 39936   ;;  %vm511_vm14 = vcmask 80896   ;;  %vm540_vm15 = vcmask 158720  }
  0x10   : > { %667 = vmatprep.mubr.msk.bf16.mxu1 %vm361_vm12, %v731_v35  ;;  %694 = vset.pattern.permute.xlu0 %v756_v36  ;;  %v185_v38 = vld [vmem:[%s899_s2 + $0x8] sm:$0xff]  ;;  %v187_v40 = vld [vmem:[%s899_s2 + $0x18] sm:$0xff] }
  0x11   : > { %695 = vset.pattern.permute.xlu1 %v756_v36  ;;  %v728_v56 = vld [vmem:[%s898_s1] ss:$12 sps:$4 sm:$0xff]   ;;  %v733_v58 = vld [vmem:[%s898_s1 + $0x1c] ss:$12 sps:$4 sm:$0xff]   ;;  %v735_v60 = vld [vmem:[%s898_s1 + $0x18] ss:$12 sps:$4 sm:$0xff]  }
  0x12   : > { %v732_v59 = vld [vmem:[%s898_s1 + $0x20] ss:$12 sps:$4 sm:$0xff]  }
  0x13   : > { %204 = vrot.lane.b32.xlu0 %v726_v0, %s745_s19  ;;  %208 = vrot.lane.b32.xlu1 %v726_v0, %s746_s20 }
  0x17   : > { %202 = vrot.lane.b32.xlu0 %v727_v1, %s745_s19  ;;  %212 = vrot.lane.b32.xlu1 %v726_v0, %s747_s21 }
  0x1b   : > { %206 = vrot.lane.b32.xlu0 %v727_v1, %s746_s20  ;;  %210 = vrot.lane.b32.xlu1 %v727_v1, %s747_s21 }
  0x81   : > { %v201_v2 = vpop.permute.xlu0 %200  ;;  %v199_v4 = vpop.permute.xlu1 %198 }
  0x82   : > { %v219_v3 = vsel %vm215_vm0, 0, %v201_v2  ;;  %v217_v6 = vsel %vm215_vm0, 0, %v199_v4 }
  0x83   : > { %v222_v5 = vsel %vm220_vm1, %v219_v3, 0  ;;  %v221_v9 = vsel %vm220_vm1, %v217_v6, 0 }
  0x84   : > { %v225_v7 = vsel %vm223_vm2, %v222_v5, 0  ;;  %v224_v14 = vsel %vm223_vm2, %v221_v9, 0 }
  0x85   : > { %v205_v8 = vpop.permute.xlu0 %204  ;;  %v209_v11 = vpop.permute.xlu1 %208 }
  0x86   : > { %v230_v10 = vsel %vm226_vm3, %v225_v7, %v205_v8 }
  0x87   : > { %v233_v12 = vsel %vm231_vm4, %v230_v10, 0 }
  0x88   : > { %v236_v13 = vsel %vm234_vm5, %v233_v12, 0 }
  0x89   : > { %v241_v15 = vsel %vm237_vm6, %v236_v13, %v209_v11  ;;  %v203_v16 = vpop.permute.xlu0 %202  ;;  %v213_v19 = vpop.permute.xlu1 %212 }
  0x8a   : > { %v244_v17 = vsel %vm242_vm7, %v241_v15, 0  ;;  %v228_v18 = vsel %vm226_vm3, %v224_v14, %v203_v16 }
  0x8b   : > { %v247_v20 = vsel %vm245_vm8, %v244_v17, 0  ;;  %v232_v21 = vsel %vm231_vm4, %v228_v18, 0 }
  0x8c   : > { %v235_v22 = vsel %vm234_vm5, %v232_v21, 0  ;;  %v252_v23 = vsel %vm248_vm9, %v247_v20, %v213_v19 }
  0x8d   : > { %v255_v24 = vsel %vm253_vm10, %v252_v23, 0  ;;  %v207_v25 = vpop.permute.xlu0 %206  ;;  %v211_v28 = vpop.permute.xlu1 %210 }
  0x8e   : > { %v809_v26 = vsel %vm256_vm11, %v255_v24, 0  ;;  %v239_v27 = vsel %vm237_vm6, %v235_v22, %v207_v25 }
  0x8f   : > { %v243_v29 = vsel %vm242_vm7, %v239_v27, 0  ;;  %277 = vrot.lane.b32.xlu1 %v809_v26, %s748_s22  ;;  %301 = vrot.lane.b32.xlu0 %v809_v26, %s749_s23 }
  0x90   : > { %v246_v30 = vsel %vm245_vm8, %v243_v29, 0 }
  0x91   : > { %v250_v31 = vsel %vm248_vm9, %v246_v30, %v211_v28 }
  0x92   : > { %v254_v32 = vsel %vm253_vm10, %v250_v31, 0 }
  0x93   : > { %v819_v33 = vsel %vm256_vm11, %v254_v32, 0 }
  0x94   : > { %275 = vrot.lane.b32.xlu1 %v819_v33, %s748_s22  ;;  %299 = vrot.lane.b32.xlu0 %v819_v33, %s749_s23 }
  0x98   : > { %271 = vrot.lane.b32.xlu1 %v809_v26, %s750_s24  ;;  %295 = vrot.lane.b32.xlu0 %v809_v26, %s751_s25 }
  0x9c   : > { %269 = vrot.lane.b32.xlu1 %v819_v33, %s750_s24  ;;  %293 = vrot.lane.b32.xlu0 %v819_v33, %s751_s25 }
  0xa0   : > { %265 = vrot.lane.b32.xlu1 %v809_v26, %s752_s26  ;;  %289 = vrot.lane.b32.xlu0 %v809_v26, %s753_s27 }
  0xa4   : > { %263 = vrot.lane.b32.xlu1 %v819_v33, %s752_s26  ;;  %287 = vrot.lane.b32.xlu0 %v819_v33, %s753_s27  ;;  %s757_s27 = smov 124  }
  0xa8   : > { %281 = vrot.lane.b32.xlu1 %v819_v33, %s754_s5  ;;  %283 = vrot.lane.b32.xlu0 %v809_v26, %s754_s5 }
  0xac   : > { %305 = vrot.lane.b32.xlu1 %v819_v33, %s755_s6  ;;  %307 = vrot.lane.b32.xlu0 %v809_v26, %s755_s6 }
  0xb0   : > { %313 = vperm.xlu0 %694, %v184_v37   ;;  %318 = vperm.xlu1 %695, %v185_v38  }
  0xb4   : > { %323 = vperm.xlu1 %695, %v186_v39   ;;  %328 = vperm.xlu0 %694, %v187_v40  }
 0x101   : > { %v302_v41 = vpop.permute.xlu0 %301  ;;  %v278_v42 = vpop.permute.xlu1 %277 }
 0x102   : > { %631 = vmatprep.subr.bf16.mxu0 %v302_v41 }
 0x103   : > { %632 = vmatpush3.bf16.msra.mxu0 %v278_v42 }
 0x106   : > { %v300_v43 = vpop.permute.xlu0 %299  ;;  %v276_v44 = vpop.permute.xlu1 %275 }
 0x107   : > { %633 = vmatprep.subr.bf16.mxu0 %v300_v43 }
 0x108   : > { %634 = vmatpush3.bf16.msra.mxu0 %v276_v44 }
 0x10a   : > { %v296_v45 = vpop.permute.xlu0 %295  ;;  %v272_v46 = vpop.permute.xlu1 %271 }
 0x10b   : > { %635 = vmatprep.subr.bf16.mxu0 %v296_v45 }
 0x10c   : > { %636 = vmatpush3.bf16.msra.mxu0 %v272_v46 }
 0x10e   : > { %v294_v47 = vpop.permute.xlu0 %293  ;;  %v270_v48 = vpop.permute.xlu1 %269 }
 0x10f   : > { %637 = vmatprep.subr.bf16.mxu0 %v294_v47 }
 0x110   : > { %638 = vmatpush3.bf16.msra.mxu0 %v270_v48 }
 0x112   : > { %v290_v49 = vpop.permute.xlu0 %289  ;;  %v266_v50 = vpop.permute.xlu1 %265 }
 0x113   : > { %639 = vmatprep.subr.bf16.mxu0 %v290_v49 }
 0x114   : > { %640 = vmatpush3.bf16.msra.mxu0 %v266_v50 }
 0x116   : > { %v288_v51 = vpop.permute.xlu0 %287  ;;  %v264_v52 = vpop.permute.xlu1 %263 }
 0x117   : > { %641 = vmatprep.subr.bf16.mxu0 %v288_v51 }
 0x118   : > { %642 = vmatpush3.bf16.msra.mxu0 %v264_v52 }
 0x11a   : > { %v284_v53 = vpop.permute.xlu0 %283  ;;  %v282_v54 = vpop.permute.xlu1 %281 }
 0x11b   : > { %643 = vmatprep.subr.bf16.mxu0 %v284_v53 }
 0x11c   : > { %644 = vmatpush3.bf16.msra.mxu0 %v809_v26 }
 0x11d   : > { %645 = vmatprep.subr.bf16.mxu0 %v282_v54 }
 0x11e   : > { %v308_v55 = vpop.permute.xlu0 %307  ;;  %v306_v57 = vpop.permute.xlu1 %305 }
 0x11f   : > { %663 = vmatprep.subr.bf16.mxu1 %v308_v55 }
 0x120   : > { %646 = vmatpush3.bf16.msra.mxu0 %v819_v33  ;;  %664 = vmatpush3.bf16.msra.mxu1 %v308_v55 }
 0x121   : > { %665 = vmatprep.subr.bf16.mxu1 %v306_v57 }
 0x123   : > { %401 = vmatmul.mubr.bf16.vlgmr.msra.gmra.mxu0 %v728_v56 }
 0x124   : > { %666 = vmatpush3.bf16.msra.mxu1 %v306_v57  ;;  %408 = vmatprep.mubr.bf16.mxu0 %v733_v58 }
 0x127   : > { %668 = vmatmul.mubr.msk.bf16.vlgmr.msra.gmra.mxu1 %vm361_vm12, %v732_v59 }
 0x12b   : > { %409 = vmatmul.mubr.bf16.gmra.mxu0 %v735_v60  ;;  %v314_v0 = vpop.permute.xlu0 %313  ;;  %v319_v3 = vpop.permute.xlu1 %318 }
 0x12f   : > { %v324_v17 = vpop.permute.xlu1 %323  ;;  %v329_v22 = vpop.permute.xlu0 %328 }
 0x1e3   : > { %v647_v61 = vpop.f32.mrf.mxu0 }
 0x1e5   : > { %v648_v62 = vpop.f32.mrf.mxu0 }
 0x1e6   : > { %v649_v63 = vadd.f32 %v648_v62, %v647_v61 }
 0x1e7   : > { %v650_v1 = vpop.f32.mrf.mxu0  ;;  %v669_v2 = vpop.f32.mrf.mxu1 }
 0x1e8   : > { %v403_v6 = vadd.f32 %v649_v63, %v314_v0 }
 0x1e9   : > { %v651_v4 = vpop.f32.mrf.mxu0  ;;  %v451_v5 = vpop.f32.mrf.mxu1 }
 0x1ea   : > { %v652_v7 = vadd.f32 %v651_v4, %v650_v1  ;;  %v452_v13 = vadd.f32 %v451_v5, %v403_v6 }
 0x1eb   : > { %v653_v8 = vpop.f32.mrf.mxu0  ;;  %v670_v9 = vpop.f32.mrf.mxu1 }
 0x1ec   : > { %v406_v10 = vadd.f32 %v652_v7, %v319_v3 }
 0x1ed   : > { %v654_v11 = vpop.f32.mrf.mxu0  ;;  %v454_v12 = vpop.f32.mrf.mxu1 }
 0x1ee   : > { %v655_v14 = vadd.f32 %v654_v11, %v653_v8  ;;  %v455_v15 = vadd.f32 %v454_v12, %v406_v10 }
 0x1ef   : > { %v656_v16 = vpop.f32.mrf.mxu0 }
 0x1f0   : > { %v696_v18 = vpack.i.bf16 %v455_v15, %v452_v13  ;;  %v411_v20 = vadd.f32 %v655_v14, %v324_v17 }
 0x1f1   : > { %v657_v19 = vpop.f32.mrf.mxu0 }
 0x1f2   : > { %v658_v21 = vadd.f32 %v657_v19, %v656_v16  ;;  %697 = vrot.lane.b32.xlu1 %v696_v18, %s750_s24  ;;  %v460_v24 = vadd.f32 %v669_v2, %v411_v20 }
 0x1f4   : > { %v414_v23 = vadd.f32 %v658_v21, %v329_v22 }
 0x1f6   : > { %v463_v25 = vadd.f32 %v670_v9, %v414_v23  ;;  %702 = vrot.lane.b32.xlu1 %v696_v18, %s757_s27 }
 0x1f8   : > { %v706_v26 = vpack.i.bf16 %v463_v25, %v460_v24 }
 0x1fa   : > { %717 = vrot.lane.b32.xlu1 %v696_v18, %s758_s28  ;;  %707 = vrot.lane.b32.xlu0 %v706_v26, %s750_s24 }
 0x1fe   : > { %712 = vrot.lane.b32.xlu0 %v706_v26, %s757_s27 }
 0x202   : > { %722 = vrot.lane.b32.xlu0 %v706_v26, %s758_s28 }
 0x264   : > { %v698_v27 = vpop.permute.xlu1 %697 }
 0x265   : > { %v700_v29 = vunpack.i.h.bf16 %v698_v27  ;;  %v699_v30 = vunpack.i.l.bf16 %v698_v27 }
 0x267   : > { %v508_v35 = vsel %vm506_vm13, %v455_v15, %v700_v29  ;;  %v507_v36 = vsel %vm506_vm13, %v452_v13, %v699_v30 }
 0x268   : > { %v703_v28 = vpop.permute.xlu1 %702 }
 0x269   : > { %v705_v31 = vunpack.i.h.bf16 %v703_v28  ;;  %v704_v32 = vunpack.i.l.bf16 %v703_v28 }
 0x26b   : > { %v512_v39 = vsel %vm511_vm14, %v507_v36, %v704_v32  ;;  %v513_v40 = vsel %vm511_vm14, %v508_v35, %v705_v31 }
 0x26c   : > { %v708_v33 = vpop.permute.xlu0 %707  ;;  %v718_v34 = vpop.permute.xlu1 %717 }
 0x26d   : > { %v720_v37 = vunpack.i.h.bf16 %v718_v34  ;;  %v719_v38 = vunpack.i.l.bf16 %v718_v34  ;;  %v710_v46 = vunpack.i.h.bf16 %v708_v33  ;;  %v709_v47 = vunpack.i.l.bf16 %v708_v33 }
 0x26f   : > { %v516_v41 = vsel %vm226_vm3, %v512_v39, %v719_v38  ;;  %v517_v42 = vsel %vm226_vm3, %v513_v40, %v720_v37  ;;  %v510_v53 = vsel %vm506_vm13, %v463_v25, %v710_v46  ;;  %v509_v54 = vsel %vm506_vm13, %v460_v24, %v709_v47 }
 0x270   : > { %v520_v43 = vmax.f32 %v516_v41, 0.0  ;;  %v521_v44 = vmax.f32 %v517_v42, 0.0  ;;  %v713_v45 = vpop.permute.xlu0 %712 }
 0x271   : > { %v715_v50 = vunpack.i.h.bf16 %v713_v45  ;;  %v714_v51 = vunpack.i.l.bf16 %v713_v45 }
 0x272   : > { %v627_v48 = vpack.c.bf16 %v520_v43, %v520_v43  ;;  %v628_v49 = vpack.c.bf16 %v521_v44, %v521_v44 }
 0x273   : > { %v514_v57 = vsel %vm511_vm14, %v509_v54, %v714_v51  ;;  %v515_v58 = vsel %vm511_vm14, %v510_v53, %v715_v50 }
 0x274   : > { %541 = vst.msk [vmem:[%s170_s30] sm:$0xf] %vm540_vm15, %v627_v48  ;;  %542 = vst.msk [vmem:[%s170_s30 + $0x4] sm:$0xf] %vm540_vm15, %v628_v49  ;;  %v723_v52 = vpop.permute.xlu0 %722 }
 0x275   : > { %v725_v55 = vunpack.i.h.bf16 %v723_v52  ;;  %v724_v56 = vunpack.i.l.bf16 %v723_v52 }
 0x277   : > { %v518_v59 = vsel %vm226_vm3, %v514_v57, %v724_v56  ;;  %v519_v60 = vsel %vm226_vm3, %v515_v58, %v725_v55 }
 0x278   : > { %v522_v61 = vmax.f32 %v518_v59, 0.0  ;;  %v523_v62 = vmax.f32 %v519_v60, 0.0 }
 0x27a   : > { %v629_v63 = vpack.c.bf16 %v522_v61, %v522_v61  ;;  %v630_v0 = vpack.c.bf16 %v523_v62, %v523_v62 }
 0x27c   : > { %543 = vst.msk [vmem:[%s170_s30 + $0x8] sm:$0xf] %vm540_vm15, %v629_v63  ;;  %544 = vst.msk [vmem:[%s170_s30 + $0xc] sm:$0xf] %vm540_vm15, %v630_v0 }
 0x27d PF: > { %s13_s12 = sadd.s32 1, %s742_s12  }
 0x27e   : > { %p10_p4 = scmp.ge.s32.totalorder %s13_s12, 4  }
 0x280   :  { %12 = sbr.rel (!%p10_p4) target bundleno = 1 (0x1), region = 62 }

// kernel: resnet_forward.16
= control target key start
LH: loop header
LB: loop body
LE: loop exit
PB: predicated region body
PF: predicated region fallthrough
CT: control target
= control target key end

     0   :  { %s1235_s18 = smov 0   ;;  %s1514_s0 = inlined_call_operand.vmem [shape: bf16[2,32,20], index: 0, kind: input, shape index: {}]   ;;  %s1515_s1 = inlined_call_operand.vmem [shape: bf16[32,288], index: 1, kind: input, shape index: {}]   ;;  %s1516_s2 = inlined_call_operand.vmem [shape: f32[32,1], index: 2, kind: input, shape index: {}]   ;;  %s1517_s3 = inlined_call_operand.vmem [shape: bf16[32,288], index: 3, kind: input, shape index: {}]   ;;  %s1518_s4 = inlined_call_operand.vmem [shape: f32[32,1], index: 4, kind: input, shape index: {}]   ;;  %s1519_s5 = inlined_call_operand.vmem [shape: bf16[2,32,20], index: 5, kind: output, shape index: {}]  }
   0x1 LB: > { %s988_s19 = sadd.s32 4294967295, %s1188_s18   ;;  %p992_p0 = scmp.ge.s32.totalorder %s1188_s18, 1  ;;  %s1188_s18 = sphi %s1235_s18, %s15_s18  }
   0x2   : > { %p187_p1 = scmp.lt.s32.totalorder %s1188_s18, 3 }
   0x4   : > { %p188_p2 = pnand %p992_p0, %p187_p1 }
   0x5   : > { %p215_p3 = scmp.lt.s32.totalorder (!%p188_p2), %s988_s19, 1  ;;  %s1190_s24 = smov (!%p188_p2), 8  }
   0x6   : > { %191 = sbr.rel (%p188_p2) target bundleno = 1257 (0x4e9), region = 40  ;;  %s1191_s25 = smov (!%p188_p2), 10  }
   0x7   : > { %s1192_s26 = smov (!%p188_p2), 12   ;;  %s1193_s27 = smov (!%p188_p2), 14  }
   0x8   : > { %s1194_s28 = smov (!%p188_p2), 121   ;;  %s1195_s29 = smov (!%p188_p2), 113  }
   0x9   : > { %s1196_s30 = smov (!%p188_p2), 126   ;;  %s1197_s6 = smov (!%p188_p2), 114  }
   0xa   : > { %s1198_s7 = smov (!%p188_p2), 127   ;;  %s1199_s8 = smov (!%p188_p2), 119  }
   0xb   : > { %s1521_s19 = smov (!%p215_p3, %s988_s19), 1  ;;  %vm269_vm0 = vcmask 64512   ;;  %vm274_vm1 = vcmask 105472   ;;  %vm277_vm2 = vcmask 113664   ;;  %vm280_vm3 = vcmask 121856   ;;  %s1200_s13 = smov 120  }
   0xc   : > { %s1021_s20 = sshll.u32 %s1521_s19, 4  ;;  %vm285_vm4 = vcmask 162816   ;;  %vm288_vm5 = vcmask 171008   ;;  %vm291_vm6 = vcmask 179200   ;;  %vm296_vm7 = vcmask 220160   ;;  %s1201_s14 = smov 112  }
   0xd   : > { %s219_s23 = scalar_lea.vmem %s1514_s0, %s1021_s20  ;;  %vm299_vm8 = vcmask 228352   ;;  %vm302_vm9 = vcmask 236544   ;;  %vm307_vm10 = vcmask 277504   ;;  %vm310_vm11 = vcmask 285696   ;;  %v1166_v34 = vld [vmem:[%s1515_s1 + $0x4] ss:$12 sps:$4 sm:$0xff]  }
   0xe   : > { %v1251_v0 = vld [vmem:[%s219_s23 + $0x8] sm:$0xff]   ;;  %v1253_v1 = vld [vmem:[%s219_s23] sm:$0xff]   ;;  %454 = vmatprep.mubr.bf16.mxu0 %v1166_v34  ;;  %vm415_vm12 = vcmask 261120   ;;  %v1202_v36 = vmov 0   ;;  %v241_v37 = vld [vmem:[%s1516_s2 + $0x18] sm:$0xff]  ;;  %s1203_s9 = smov 124  }
   0xf   : > { %254 = vrot.lane.b32.xlu0 %v1251_v0, %s1190_s24  ;;  %252 = vrot.lane.b32.xlu1 %v1253_v1, %s1190_s24  ;;  %v1167_v35 = vld [vmem:[%s1515_s1 + $0x8] ss:$12 sps:$4 sm:$0xff]   ;;  %v238_v39 = vld [vmem:[%s1516_s2] sm:$0xff]  ;;  %s1204_s10 = smov 122   ;;  %vm560_vm13 = vcmask 39936   ;;  %vm565_vm14 = vcmask 80896  }
  0x10   : > { %1095 = vmatprep.mubr.msk.bf16.mxu1 %vm415_vm12, %v1167_v35  ;;  %1131 = vset.pattern.permute.xlu1 %v1202_v36  ;;  %v240_v38 = vld [vmem:[%s1516_s2 + $0x10] sm:$0xff]  ;;  %v239_v40 = vld [vmem:[%s1516_s2 + $0x8] sm:$0xff]  ;;  %v1171_v60 = vld [vmem:[%s1515_s1 + $0x18] ss:$12 sps:$4 sm:$0xff]   ;;  %vm928_vm15 = vcmask 158720  }
  0x11   : > { %1130 = vset.pattern.permute.xlu0 %v1202_v36  ;;  %v1164_v56 = vld [vmem:[%s1515_s1] ss:$12 sps:$4 sm:$0xff]   ;;  %v1169_v58 = vld [vmem:[%s1515_s1 + $0x1c] ss:$12 sps:$4 sm:$0xff]  }
  0x12   : > { %v1168_v59 = vld [vmem:[%s1515_s1 + $0x20] ss:$12 sps:$4 sm:$0xff]  }
  0x13   : > { %258 = vrot.lane.b32.xlu0 %v1251_v0, %s1191_s25  ;;  %262 = vrot.lane.b32.xlu1 %v1251_v0, %s1192_s26 }
  0x17   : > { %256 = vrot.lane.b32.xlu0 %v1253_v1, %s1191_s25  ;;  %266 = vrot.lane.b32.xlu1 %v1251_v0, %s1193_s27 }
  0x1b   : > { %260 = vrot.lane.b32.xlu0 %v1253_v1, %s1192_s26  ;;  %264 = vrot.lane.b32.xlu1 %v1253_v1, %s1193_s27 }
  0x81   : > { %v255_v2 = vpop.permute.xlu0 %254  ;;  %v253_v3 = vpop.permute.xlu1 %252 }
  0x82   : > { %v273_v4 = vsel %vm269_vm0, 0, %v255_v2  ;;  %v271_v6 = vsel %vm269_vm0, 0, %v253_v3 }
  0x83   : > { %v276_v5 = vsel %vm274_vm1, %v273_v4, 0  ;;  %v275_v10 = vsel %vm274_vm1, %v271_v6, 0 }
  0x84   : > { %v279_v7 = vsel %vm277_vm2, %v276_v5, 0  ;;  %v278_v14 = vsel %vm277_vm2, %v275_v10, 0 }
  0x85   : > { %v259_v8 = vpop.permute.xlu0 %258  ;;  %v263_v9 = vpop.permute.xlu1 %262 }
  0x86   : > { %v284_v11 = vsel %vm280_vm3, %v279_v7, %v259_v8 }
  0x87   : > { %v287_v12 = vsel %vm285_vm4, %v284_v11, 0 }
  0x88   : > { %v290_v13 = vsel %vm288_vm5, %v287_v12, 0 }
  0x89   : > { %v295_v15 = vsel %vm291_vm6, %v290_v13, %v263_v9  ;;  %v257_v16 = vpop.permute.xlu0 %256  ;;  %v267_v17 = vpop.permute.xlu1 %266 }
  0x8a   : > { %v298_v18 = vsel %vm296_vm7, %v295_v15, 0  ;;  %v282_v19 = vsel %vm280_vm3, %v278_v14, %v257_v16 }
  0x8b   : > { %v301_v20 = vsel %vm299_vm8, %v298_v18, 0  ;;  %v286_v21 = vsel %vm285_vm4, %v282_v19, 0 }
  0x8c   : > { %v289_v22 = vsel %vm288_vm5, %v286_v21, 0  ;;  %v306_v23 = vsel %vm302_vm9, %v301_v20, %v267_v17 }
  0x8d   : > { %v309_v24 = vsel %vm307_vm10, %v306_v23, 0  ;;  %v261_v25 = vpop.permute.xlu0 %260  ;;  %v265_v28 = vpop.permute.xlu1 %264 }
  0x8e   : > { %v1289_v26 = vsel %vm310_vm11, %v309_v24, 0  ;;  %v293_v27 = vsel %vm291_vm6, %v289_v22, %v261_v25 }
  0x8f   : > { %v297_v29 = vsel %vm296_vm7, %v293_v27, 0  ;;  %331 = vrot.lane.b32.xlu1 %v1289_v26, %s1194_s28  ;;  %355 = vrot.lane.b32.xlu0 %v1289_v26, %s1195_s29 }
  0x90   : > { %v300_v30 = vsel %vm299_vm8, %v297_v29, 0 }
  0x91   : > { %v304_v31 = vsel %vm302_vm9, %v300_v30, %v265_v28 }
  0x92   : > { %v308_v32 = vsel %vm307_vm10, %v304_v31, 0 }
  0x93   : > { %v1301_v33 = vsel %vm310_vm11, %v308_v32, 0 }
  0x94   : > { %329 = vrot.lane.b32.xlu1 %v1301_v33, %s1194_s28  ;;  %353 = vrot.lane.b32.xlu0 %v1301_v33, %s1195_s29 }
  0x98   : > { %325 = vrot.lane.b32.xlu1 %v1289_v26, %s1196_s30  ;;  %349 = vrot.lane.b32.xlu0 %v1289_v26, %s1197_s6 }
  0x9c   : > { %323 = vrot.lane.b32.xlu1 %v1301_v33, %s1196_s30  ;;  %347 = vrot.lane.b32.xlu0 %v1301_v33, %s1197_s6 }
  0xa0   : > { %319 = vrot.lane.b32.xlu1 %v1289_v26, %s1198_s7  ;;  %343 = vrot.lane.b32.xlu0 %v1289_v26, %s1199_s8 }
  0xa4   : > { %317 = vrot.lane.b32.xlu1 %v1301_v33, %s1198_s7  ;;  %341 = vrot.lane.b32.xlu0 %v1301_v33, %s1199_s8 }
  0xa8   : > { %335 = vrot.lane.b32.xlu1 %v1301_v33, %s1200_s13  ;;  %337 = vrot.lane.b32.xlu0 %v1289_v26, %s1200_s13 }
  0xac   : > { %359 = vrot.lane.b32.xlu1 %v1301_v33, %s1201_s14  ;;  %361 = vrot.lane.b32.xlu0 %v1289_v26, %s1201_s14 }
  0xb0   : > { %382 = vperm.xlu1 %1131, %v241_v37   ;;  %377 = vperm.xlu0 %1130, %v240_v38  }
  0xb4   : > { %367 = vperm.xlu1 %1131, %v238_v39   ;;  %372 = vperm.xlu0 %1130, %v239_v40  }
 0x101   : > { %v356_v41 = vpop.permute.xlu0 %355  ;;  %v332_v42 = vpop.permute.xlu1 %331 }
 0x102   : > { %1027 = vmatprep.subr.bf16.mxu0 %v356_v41 }
 0x103   : > { %1028 = vmatpush3.bf16.msra.mxu0 %v332_v42 }
 0x106   : > { %v354_v43 = vpop.permute.xlu0 %353  ;;  %v330_v44 = vpop.permute.xlu1 %329 }
 0x107   : > { %1029 = vmatprep.subr.bf16.mxu0 %v354_v43 }
 0x108   : > { %1030 = vmatpush3.bf16.msra.mxu0 %v330_v44 }
 0x10a   : > { %v350_v45 = vpop.permute.xlu0 %349  ;;  %v326_v46 = vpop.permute.xlu1 %325 }
 0x10b   : > { %1031 = vmatprep.subr.bf16.mxu0 %v350_v45 }
 0x10c   : > { %1032 = vmatpush3.bf16.msra.mxu0 %v326_v46 }
 0x10e   : > { %v348_v47 = vpop.permute.xlu0 %347  ;;  %v324_v48 = vpop.permute.xlu1 %323 }
 0x10f   : > { %1033 = vmatprep.subr.bf16.mxu0 %v348_v47 }
 0x110   : > { %1034 = vmatpush3.bf16.msra.mxu0 %v324_v48 }
 0x112   : > { %v344_v49 = vpop.permute.xlu0 %343  ;;  %v320_v50 = vpop.permute.xlu1 %319 }
 0x113   : > { %1035 = vmatprep.subr.bf16.mxu0 %v344_v49 }
 0x114   : > { %1036 = vmatpush3.bf16.msra.mxu0 %v320_v50 }
 0x116   : > { %v342_v51 = vpop.permute.xlu0 %341  ;;  %v318_v52 = vpop.permute.xlu1 %317 }
 0x117   : > { %1037 = vmatprep.subr.bf16.mxu0 %v342_v51 }
 0x118   : > { %1038 = vmatpush3.bf16.msra.mxu0 %v318_v52 }
 0x11a   : > { %v338_v53 = vpop.permute.xlu0 %337  ;;  %v336_v54 = vpop.permute.xlu1 %335 }
 0x11b   : > { %1039 = vmatprep.subr.bf16.mxu0 %v338_v53 }
 0x11c   : > { %1040 = vmatpush3.bf16.msra.mxu0 %v1289_v26 }
 0x11d   : > { %1041 = vmatprep.subr.bf16.mxu0 %v336_v54 }
 0x11e   : > { %v362_v55 = vpop.permute.xlu0 %361  ;;  %v360_v57 = vpop.permute.xlu1 %359 }
 0x11f   : > { %1091 = vmatprep.subr.bf16.mxu1 %v362_v55 }
 0x120   : > { %1042 = vmatpush3.bf16.msra.mxu0 %v1301_v33  ;;  %1092 = vmatpush3.bf16.msra.mxu1 %v362_v55 }
 0x121   : > { %1093 = vmatprep.subr.bf16.mxu1 %v360_v57 }
 0x123   : > { %455 = vmatmul.mubr.bf16.vlgmr.msra.gmra.mxu0 %v1164_v56 }
 0x124   : > { %1094 = vmatpush3.bf16.msra.mxu1 %v360_v57  ;;  %462 = vmatprep.mubr.bf16.mxu0 %v1169_v58 }
 0x127   : > { %1096 = vmatmul.mubr.msk.bf16.vlgmr.msra.gmra.mxu1 %vm415_vm12, %v1168_v59 }
 0x12b   : > { %463 = vmatmul.mubr.bf16.gmra.mxu0 %v1171_v60  ;;  %v378_v4 = vpop.permute.xlu0 %377  ;;  %v383_v6 = vpop.permute.xlu1 %382 }
 0x12f   : > { %v373_v12 = vpop.permute.xlu0 %372  ;;  %v368_v18 = vpop.permute.xlu1 %367 }
 0x1e3   : > { %v1043_v61 = vpop.f32.mrf.mxu0 }
 0x1e5   : > { %v1044_v62 = vpop.f32.mrf.mxu0 }
 0x1e6   : > { %v1045_v15 = vadd.f32 %v1044_v62, %v1043_v61 }
 0x1e7   : > { %v1046_v63 = vpop.f32.mrf.mxu0  ;;  %v1097_v2 = vpop.f32.mrf.mxu1 }
 0x1e8   : > { %v457_v22 = vadd.f32 %v1045_v15, %v368_v18 }
 0x1e9   : > { %v1047_v3 = vpop.f32.mrf.mxu0  ;;  %v505_v7 = vpop.f32.mrf.mxu1 }
 0x1ea   : > { %v1048_v11 = vadd.f32 %v1047_v3, %v1046_v63  ;;  %v506_v27 = vadd.f32 %v505_v7, %v457_v22 }
 0x1eb   : > { %v1049_v5 = vpop.f32.mrf.mxu0  ;;  %v1098_v13 = vpop.f32.mrf.mxu1 }
 0x1ec   : > { %v460_v19 = vadd.f32 %v1048_v11, %v373_v12 }
 0x1ed   : > { %v1050_v8 = vpop.f32.mrf.mxu0  ;;  %v508_v21 = vpop.f32.mrf.mxu1 }
 0x1ee   : > { %v1051_v9 = vadd.f32 %v1050_v8, %v1049_v5  ;;  %v509_v25 = vadd.f32 %v508_v21, %v460_v19 }
 0x1ef   : > { %v1052_v10 = vpop.f32.mrf.mxu0 }
 0x1f0   : > { %v465_v16 = vadd.f32 %v1051_v9, %v378_v4  ;;  %v1142_v28 = vpack.i.bf16 %v509_v25, %v506_v27 }
 0x1f1   : > { %v1053_v14 = vpop.f32.mrf.mxu0 }
 0x1f2   : > { %v1054_v17 = vadd.f32 %v1053_v14, %v1052_v10  ;;  %v514_v23 = vadd.f32 %v1097_v2, %v465_v16 }
 0x1f4   : > { %v468_v20 = vadd.f32 %v1054_v17, %v383_v6 }
 0x1f6   : > { %v517_v24 = vadd.f32 %v1098_v13, %v468_v20 }
 0x1f8   : > { %v1137_v26 = vpack.i.bf16 %v517_v24, %v514_v23 }
 0x1fa   : > { %1138 = vrot.lane.b32.xlu0 %v1137_v26, %s1203_s9  ;;  %1133 = vrot.lane.b32.xlu1 %v1137_v26, %s1196_s30 }
 0x1fe   : > { %1148 = vrot.lane.b32.xlu1 %v1137_v26, %s1204_s10  ;;  %1143 = vrot.lane.b32.xlu0 %v1142_v28, %s1196_s30 }
 0x202   : > { %1153 = vrot.lane.b32.xlu1 %v1142_v28, %s1203_s9  ;;  %1158 = vrot.lane.b32.xlu0 %v1142_v28, %s1204_s10 }
 0x26c   : > { %v1139_v29 = vpop.permute.xlu0 %1138  ;;  %v1134_v30 = vpop.permute.xlu1 %1133 }
 0x26d   : > { %v1136_v31 = vunpack.i.h.bf16 %v1134_v30  ;;  %v1135_v32 = vunpack.i.l.bf16 %v1134_v30  ;;  %v1141_v33 = vunpack.i.h.bf16 %v1139_v29  ;;  %v1140_v34 = vunpack.i.l.bf16 %v1139_v29 }
 0x26f   : > { %v564_v35 = vsel %vm560_vm13, %v517_v24, %v1136_v31  ;;  %v563_v36 = vsel %vm560_vm13, %v514_v23, %v1135_v32 }
 0x270   : > { %v1144_v37 = vpop.permute.xlu0 %1143  ;;  %v1149_v38 = vpop.permute.xlu1 %1148  ;;  %v568_v43 = vsel %vm565_vm14, %v563_v36, %v1140_v34  ;;  %v569_v44 = vsel %vm565_vm14, %v564_v35, %v1141_v33  ;;  %v1174_v35 = vld [vmem:[%s1517_s3 + $0x4] ss:$12 sps:$4 sm:$0xff]   ;;  %v1175_v36 = vld [vmem:[%s1517_s3 + $0x8] ss:$12 sps:$4 sm:$0xff]  }
 0x271   : > { %v1151_v39 = vunpack.i.h.bf16 %v1149_v38  ;;  %v1150_v40 = vunpack.i.l.bf16 %v1149_v38  ;;  %v1146_v41 = vunpack.i.h.bf16 %v1144_v37  ;;  %v1145_v42 = vunpack.i.l.bf16 %v1144_v37  ;;  %782 = vmatprep.mubr.bf16.mxu1 %v1174_v35  ;;  %1103 = vmatprep.mubr.msk.bf16.mxu0 %vm415_vm12, %v1175_v36  ;;  %v589_v37 = vld [vmem:[%s1518_s4 + $0x8] sm:$0xff]  ;;  %v588_v38 = vld [vmem:[%s1518_s4] sm:$0xff] }
 0x273   : > { %v572_v45 = vsel %vm280_vm3, %v568_v43, %v1150_v40  ;;  %v573_v46 = vsel %vm280_vm3, %v569_v44, %v1151_v39  ;;  %v562_v55 = vsel %vm560_vm13, %v509_v25, %v1146_v41  ;;  %v561_v56 = vsel %vm560_vm13, %v506_v27, %v1145_v42  ;;  %v591_v39 = vld [vmem:[%s1518_s4 + $0x18] sm:$0xff]  ;;  %v590_v40 = vld [vmem:[%s1518_s4 + $0x10] sm:$0xff] }
 0x274   : > { %v576_v47 = vmax.f32 %v572_v45, 0.0  ;;  %v577_v48 = vmax.f32 %v573_v46, 0.0  ;;  %v1159_v49 = vpop.permute.xlu0 %1158  ;;  %v1154_v50 = vpop.permute.xlu1 %1153 }
 0x275   : > { %v1161_v51 = vunpack.i.h.bf16 %v1159_v49  ;;  %v1160_v52 = vunpack.i.l.bf16 %v1159_v49  ;;  %v1156_v53 = vunpack.i.h.bf16 %v1154_v50  ;;  %v1155_v54 = vunpack.i.l.bf16 %v1154_v50 }
 0x276   : > { %v579_v57 = vpack.c.bf16 %v577_v48, %v576_v47 }
 0x277   : > { %v567_v58 = vsel %vm565_vm14, %v562_v55, %v1156_v53  ;;  %v566_v59 = vsel %vm565_vm14, %v561_v56, %v1155_v54  ;;  %v1172_v56 = vld [vmem:[%s1517_s3] ss:$12 sps:$4 sm:$0xff]  }
 0x278   : > { %v571_v60 = vsel %vm280_vm3, %v567_v58, %v1161_v51  ;;  %v570_v61 = vsel %vm280_vm3, %v566_v59, %v1160_v52  ;;  %600 = vrot.lane.b32.xlu0 %v579_v57, %s1191_s25  ;;  %596 = vrot.lane.b32.xlu1 %v579_v57, %s1190_s24  ;;  %v1177_v58 = vld [vmem:[%s1517_s3 + $0x1c] ss:$12 sps:$4 sm:$0xff]   ;;  %v1176_v59 = vld [vmem:[%s1517_s3 + $0x20] ss:$12 sps:$4 sm:$0xff]  }
 0x279   : > { %v575_v62 = vmax.f32 %v571_v60, 0.0  ;;  %v574_v63 = vmax.f32 %v570_v61, 0.0  ;;  %v1179_v60 = vld [vmem:[%s1517_s3 + $0x18] ss:$12 sps:$4 sm:$0xff]  }
 0x27b   : > { %v578_v2 = vpack.c.bf16 %v575_v62, %v574_v63 }
 0x27c   : > { %604 = vrot.lane.b32.xlu0 %v579_v57, %s1192_s26 }
 0x27d   : > { %594 = vrot.lane.b32.xlu1 %v578_v2, %s1190_s24 }
 0x280   : > { %608 = vrot.lane.b32.xlu0 %v579_v57, %s1193_s27 }
 0x281   : > { %598 = vrot.lane.b32.xlu1 %v578_v2, %s1191_s25 }
 0x284   : > { %606 = vrot.lane.b32.xlu0 %v578_v2, %s1193_s27 }
 0x285   : > { %602 = vrot.lane.b32.xlu1 %v578_v2, %s1192_s26 }
 0x2ea   : > { %v601_v3 = vpop.permute.xlu0 %600  ;;  %v597_v4 = vpop.permute.xlu1 %596 }
 0x2eb   : > { %v613_v5 = vsel %vm269_vm0, 0, %v597_v4 }
 0x2ec   : > { %v615_v6 = vsel %vm274_vm1, %v613_v5, 0 }
 0x2ed   : > { %v617_v7 = vsel %vm277_vm2, %v615_v6, 0 }
 0x2ee   : > { %v621_v8 = vsel %vm280_vm3, %v617_v7, %v601_v3  ;;  %v605_v9 = vpop.permute.xlu0 %604 }
 0x2ef   : > { %v623_v10 = vsel %vm285_vm4, %v621_v8, 0  ;;  %v595_v11 = vpop.permute.xlu1 %594 }
 0x2f0   : > { %v625_v12 = vsel %vm288_vm5, %v623_v10, 0  ;;  %v611_v13 = vsel %vm269_vm0, 0, %v595_v11 }
 0x2f1   : > { %v629_v14 = vsel %vm291_vm6, %v625_v12, %v605_v9  ;;  %v614_v15 = vsel %vm274_vm1, %v611_v13, 0 }
 0x2f2   : > { %v631_v16 = vsel %vm296_vm7, %v629_v14, 0  ;;  %v616_v17 = vsel %vm277_vm2, %v614_v15, 0  ;;  %v609_v18 = vpop.permute.xlu0 %608 }
 0x2f3   : > { %v633_v19 = vsel %vm299_vm8, %v631_v16, 0  ;;  %v599_v20 = vpop.permute.xlu1 %598 }
 0x2f4   : > { %v637_v21 = vsel %vm302_vm9, %v633_v19, %v609_v18  ;;  %v619_v22 = vsel %vm280_vm3, %v616_v17, %v599_v20 }
 0x2f5   : > { %v639_v23 = vsel %vm307_vm10, %v637_v21, 0  ;;  %v622_v24 = vsel %vm285_vm4, %v619_v22, 0 }
 0x2f6   : > { %v1408_v25 = vsel %vm310_vm11, %v639_v23, 0  ;;  %v624_v26 = vsel %vm288_vm5, %v622_v24, 0  ;;  %v607_v30 = vpop.permute.xlu0 %606 }
 0x2f7   : > { %660 = vrot.lane.b32.xlu0 %v1408_v25, %s1194_s28  ;;  %684 = vrot.lane.b32.xlu1 %v1408_v25, %s1195_s29  ;;  %v603_v27 = vpop.permute.xlu1 %602 }
 0x2f8   : > { %v627_v28 = vsel %vm291_vm6, %v624_v26, %v603_v27 }
 0x2f9   : > { %v630_v29 = vsel %vm296_vm7, %v627_v28, 0 }
 0x2fa   : > { %v632_v31 = vsel %vm299_vm8, %v630_v29, 0 }
 0x2fb   : > { %v635_v32 = vsel %vm302_vm9, %v632_v31, %v607_v30  ;;  %v900_v30 = vunpack.c.l.bf16 %v1253_v1 }
 0x2fc   : > { %v638_v33 = vsel %vm307_vm10, %v635_v32, 0 }
 0x2fd   : > { %v640_v34 = vsel %vm310_vm11, %v638_v33, 0 }
 0x2fe   : > { %658 = vrot.lane.b32.xlu0 %v640_v34, %s1194_s28  ;;  %682 = vrot.lane.b32.xlu1 %v640_v34, %s1195_s29 }
 0x302   : > { %654 = vrot.lane.b32.xlu0 %v1408_v25, %s1196_s30  ;;  %678 = vrot.lane.b32.xlu1 %v1408_v25, %s1197_s6 }
 0x306   : > { %652 = vrot.lane.b32.xlu0 %v640_v34, %s1196_s30  ;;  %676 = vrot.lane.b32.xlu1 %v640_v34, %s1197_s6 }
 0x30a   : > { %648 = vrot.lane.b32.xlu0 %v1408_v25, %s1198_s7  ;;  %672 = vrot.lane.b32.xlu1 %v1408_v25, %s1199_s8 }
 0x30e   : > { %646 = vrot.lane.b32.xlu0 %v640_v34, %s1198_s7  ;;  %670 = vrot.lane.b32.xlu1 %v640_v34, %s1199_s8 }
 0x312   : > { %664 = vrot.lane.b32.xlu0 %v640_v34, %s1200_s13  ;;  %666 = vrot.lane.b32.xlu1 %v1408_v25, %s1200_s13 }
 0x316   : > { %688 = vrot.lane.b32.xlu0 %v640_v34, %s1201_s14  ;;  %690 = vrot.lane.b32.xlu1 %v1408_v25, %s1201_s14 }
 0x31a   : > { %701 = vperm.xlu0 %1130, %v589_v37   ;;  %696 = vperm.xlu1 %1131, %v588_v38   ;;  %v901_v37 = vunpack.c.h.bf16 %v1253_v1 }
 0x31e   : > { %711 = vperm.xlu0 %1130, %v591_v39   ;;  %706 = vperm.xlu1 %1131, %v590_v40  }
 0x369   : > { %v661_v41 = vpop.permute.xlu0 %660  ;;  %v685_v42 = vpop.permute.xlu1 %684 }
 0x36a   : > { %1059 = vmatprep.subr.bf16.mxu1 %v685_v42 }
 0x36b   : > { %1060 = vmatpush3.bf16.msra.mxu1 %v661_v41 }
 0x370   : > { %v659_v43 = vpop.permute.xlu0 %658  ;;  %v683_v44 = vpop.permute.xlu1 %682 }
 0x371   : > { %1061 = vmatprep.subr.bf16.mxu1 %v683_v44 }
 0x372   : > { %1062 = vmatpush3.bf16.msra.mxu1 %v659_v43 }
 0x374   : > { %v655_v45 = vpop.permute.xlu0 %654  ;;  %v679_v46 = vpop.permute.xlu1 %678 }
 0x375   : > { %1063 = vmatprep.subr.bf16.mxu1 %v679_v46 }
 0x376   : > { %1064 = vmatpush3.bf16.msra.mxu1 %v655_v45 }
 0x378   : > { %v653_v47 = vpop.permute.xlu0 %652  ;;  %v677_v48 = vpop.permute.xlu1 %676 }
 0x379   : > { %1065 = vmatprep.subr.bf16.mxu1 %v677_v48 }
 0x37a   : > { %1066 = vmatpush3.bf16.msra.mxu1 %v653_v47 }
 0x37c   : > { %v649_v49 = vpop.permute.xlu0 %648  ;;  %v673_v50 = vpop.permute.xlu1 %672 }
 0x37d   : > { %1067 = vmatprep.subr.bf16.mxu1 %v673_v50 }
 0x37e   : > { %1068 = vmatpush3.bf16.msra.mxu1 %v649_v49  ;;  %v902_v49 = vunpack.c.l.bf16 %v1251_v0 }
 0x380   : > { %v647_v51 = vpop.permute.xlu0 %646  ;;  %v671_v52 = vpop.permute.xlu1 %670 }
 0x381   : > { %1069 = vmatprep.subr.bf16.mxu1 %v671_v52 }
 0x382   : > { %1070 = vmatpush3.bf16.msra.mxu1 %v647_v51 }
 0x384   : > { %v665_v53 = vpop.permute.xlu0 %664  ;;  %v667_v54 = vpop.permute.xlu1 %666 }
 0x385   : > { %1071 = vmatprep.subr.bf16.mxu1 %v667_v54 }
 0x386   : > { %1072 = vmatpush3.bf16.msra.mxu1 %v1408_v25 }
 0x387   : > { %1073 = vmatprep.subr.bf16.mxu1 %v665_v53 }
 0x388   : > { %v691_v55 = vpop.permute.xlu1 %690  ;;  %v689_v57 = vpop.permute.xlu0 %688 }
 0x389   : > { %1099 = vmatprep.subr.bf16.mxu0 %v691_v55 }
 0x38a   : > { %1074 = vmatpush3.bf16.msra.mxu1 %v640_v34  ;;  %1100 = vmatpush3.bf16.msra.mxu0 %v691_v55 }
 0x38b   : > { %1101 = vmatprep.subr.bf16.mxu0 %v689_v57 }
 0x38d   : > { %783 = vmatmul.mubr.bf16.vlgmr.msra.gmra.mxu1 %v1172_v56  ;;  %v903_v56 = vunpack.c.h.bf16 %v1251_v0 }
 0x38e   : > { %1102 = vmatpush3.bf16.msra.mxu0 %v689_v57  ;;  %790 = vmatprep.mubr.bf16.mxu1 %v1177_v58 }
 0x391   : > { %1104 = vmatmul.mubr.msk.bf16.vlgmr.msra.gmra.mxu0 %vm415_vm12, %v1176_v59 }
 0x395   : > { %791 = vmatmul.mubr.bf16.gmra.mxu1 %v1179_v60  ;;  %v697_v63 = vpop.permute.xlu1 %696  ;;  %v702_v8 = vpop.permute.xlu0 %701 }
 0x399   : > { %v707_v19 = vpop.permute.xlu1 %706  ;;  %v712_v23 = vpop.permute.xlu0 %711 }
 0x44d   : > { %v1075_v61 = vpop.f32.mrf.mxu1 }
 0x44f   : > { %v1076_v62 = vpop.f32.mrf.mxu1 }
 0x450   : > { %v1077_v2 = vadd.f32 %v1076_v62, %v1075_v61 }
 0x451   : > { %v1078_v3 = vpop.f32.mrf.mxu1  ;;  %v1105_v4 = vpop.f32.mrf.mxu0 }
 0x452   : > { %v785_v5 = vadd.f32 %v1077_v2, %v697_v63 }
 0x453   : > { %v1079_v6 = vpop.f32.mrf.mxu1  ;;  %v833_v7 = vpop.f32.mrf.mxu0 }
 0x454   : > { %v1080_v9 = vadd.f32 %v1079_v6, %v1078_v3  ;;  %v834_v10 = vadd.f32 %v833_v7, %v785_v5 }
 0x455   : > { %v1081_v11 = vpop.f32.mrf.mxu1  ;;  %v1106_v12 = vpop.f32.mrf.mxu0 }
 0x456   : > { %852 = vrot.lane.b32.xlu1 %v834_v10, %s1196_s30  ;;  %v788_v13 = vadd.f32 %v1080_v9, %v702_v8 }
 0x457   : > { %v1082_v14 = vpop.f32.mrf.mxu1  ;;  %v836_v15 = vpop.f32.mrf.mxu0 }
 0x458   : > { %v1083_v16 = vadd.f32 %v1082_v14, %v1081_v11  ;;  %v837_v17 = vadd.f32 %v836_v15, %v788_v13 }
 0x459   : > { %v1084_v18 = vpop.f32.mrf.mxu1 }
 0x45a   : > { %854 = vrot.lane.b32.xlu0 %v837_v17, %s1196_s30  ;;  %864 = vrot.lane.b32.xlu1 %v834_v10, %s1203_s9  ;;  %v793_v21 = vadd.f32 %v1083_v16, %v707_v19 }
 0x45b   : > { %v1085_v20 = vpop.f32.mrf.mxu1 }
 0x45c   : > { %v1086_v22 = vadd.f32 %v1085_v20, %v1084_v18  ;;  %v842_v24 = vadd.f32 %v1105_v4, %v793_v21 }
 0x45e   : > { %866 = vrot.lane.b32.xlu0 %v837_v17, %s1203_s9  ;;  %876 = vrot.lane.b32.xlu1 %v834_v10, %s1204_s10  ;;  %v796_v25 = vadd.f32 %v1086_v22, %v712_v23 }
 0x460   : > { %v845_v26 = vadd.f32 %v1106_v12, %v796_v25 }
 0x462   : > { %878 = vrot.lane.b32.xlu0 %v837_v17, %s1204_s10  ;;  %856 = vrot.lane.b32.xlu1 %v842_v24, %s1196_s30 }
 0x466   : > { %858 = vrot.lane.b32.xlu0 %v845_v26, %s1196_s30  ;;  %868 = vrot.lane.b32.xlu1 %v842_v24, %s1203_s9 }
 0x46a   : > { %870 = vrot.lane.b32.xlu0 %v845_v26, %s1203_s9  ;;  %880 = vrot.lane.b32.xlu1 %v842_v24, %s1204_s10 }
 0x46e   : > { %882 = vrot.lane.b32.xlu0 %v845_v26, %s1204_s10  ;;  %s224_s10 = scalar_lea.vmem %s1519_s5, %s1021_s20 }
 0x4c8   : > { %v853_v27 = vpop.permute.xlu1 %852 }
 0x4c9   : > { %v888_v31 = vsel %vm560_vm13, %v834_v10, %v853_v27 }
 0x4cc   : > { %v855_v28 = vpop.permute.xlu0 %854  ;;  %v865_v29 = vpop.permute.xlu1 %864 }
 0x4cd   : > { %v892_v32 = vsel %vm565_vm14, %v888_v31, %v865_v29  ;;  %v889_v38 = vsel %vm560_vm13, %v837_v17, %v855_v28 }
 0x4d0   : > { %v867_v33 = vpop.permute.xlu0 %866  ;;  %v877_v34 = vpop.permute.xlu1 %876 }
 0x4d1   : > { %v896_v35 = vsel %vm280_vm3, %v892_v32, %v877_v34  ;;  %v893_v39 = vsel %vm565_vm14, %v889_v38, %v867_v33 }
 0x4d2   : > { %v904_v36 = vadd.f32 %v900_v30, %v896_v35 }
 0x4d4   : > { %v908_v40 = vmax.f32 %v904_v36, 0.0  ;;  %v879_v41 = vpop.permute.xlu0 %878  ;;  %v857_v42 = vpop.permute.xlu1 %856 }
 0x4d5   : > { %v897_v43 = vsel %vm280_vm3, %v893_v39, %v879_v41  ;;  %v890_v50 = vsel %vm560_vm13, %v842_v24, %v857_v42 }
 0x4d6   : > { %v1023_v44 = vpack.c.bf16 %v908_v40, %v908_v40  ;;  %v905_v45 = vadd.f32 %v901_v37, %v897_v43 }
 0x4d8   : > { %929 = vst.msk [vmem:[%s224_s10] sm:$0xf] %vm928_vm15, %v1023_v44  ;;  %v909_v1 = vmax.f32 %v905_v45, 0.0  ;;  %v859_v46 = vpop.permute.xlu0 %858  ;;  %v869_v47 = vpop.permute.xlu1 %868 }
 0x4d9   : > { %v894_v51 = vsel %vm565_vm14, %v890_v50, %v869_v47  ;;  %v891_v57 = vsel %vm560_vm13, %v845_v26, %v859_v46 }
 0x4da   : > { %v1024_v48 = vpack.c.bf16 %v909_v1, %v909_v1 }
 0x4dc   : > { %930 = vst.msk [vmem:[%s224_s10 + $0x4] sm:$0xf] %vm928_vm15, %v1024_v48  ;;  %v871_v52 = vpop.permute.xlu0 %870  ;;  %v881_v53 = vpop.permute.xlu1 %880 }
 0x4dd   : > { %v898_v54 = vsel %vm280_vm3, %v894_v51, %v881_v53  ;;  %v895_v58 = vsel %vm565_vm14, %v891_v57, %v871_v52 }
 0x4de   : > { %v906_v55 = vadd.f32 %v902_v49, %v898_v54 }
 0x4e0   : > { %v910_v59 = vmax.f32 %v906_v55, 0.0  ;;  %v883_v60 = vpop.permute.xlu0 %882 }
 0x4e1   : > { %v899_v61 = vsel %vm280_vm3, %v895_v58, %v883_v60 }
 0x4e2   : > { %v1025_v62 = vpack.c.bf16 %v910_v59, %v910_v59  ;;  %v907_v63 = vadd.f32 %v903_v56, %v899_v61 }
 0x4e4   : > { %931 = vst.msk [vmem:[%s224_s10 + $0x8] sm:$0xf] %vm928_vm15, %v1025_v62  ;;  %v911_v2 = vmax.f32 %v907_v63, 0.0 }
 0x4e6   : > { %v1026_v3 = vpack.c.bf16 %v911_v2, %v911_v2 }
 0x4e8   : > { %932 = vst.msk [vmem:[%s224_s10 + $0xc] sm:$0xf] %vm928_vm15, %v1026_v3 }
 0x4e9 PF: > { %s15_s18 = sadd.s32 1, %s1188_s18  }
 0x4ea   : > { %p12_p4 = scmp.ge.s32.totalorder %s15_s18, 4  }
 0x4ec   :  { %14 = sbr.rel (!%p12_p4) target bundleno = 1 (0x1), region = 70 }

// kernel: resnet_forward.17
= control target key start
LH: loop header
LB: loop body
LE: loop exit
PB: predicated region body
PF: predicated region fallthrough
CT: control target
= control target key end

     0   :  { %s795_s18 = smov 0   ;;  %s893_s0 = inlined_call_operand.vmem [shape: bf16[2,32,20], index: 0, kind: input, shape index: {}]   ;;  %s894_s1 = inlined_call_operand.vmem [shape: bf16[32,128], index: 1, kind: input, shape index: {}]   ;;  %s895_s2 = inlined_call_operand.vmem [shape: f32[32,1], index: 2, kind: input, shape index: {}]   ;;  %s896_s3 = inlined_call_operand.vmem [shape: bf16[32,128], index: 3, kind: input, shape index: {}]   ;;  %s897_s4 = inlined_call_operand.vmem [shape: f32[32,1], index: 4, kind: input, shape index: {}]   ;;  %s898_s5 = inlined_call_operand.vmem [shape: bf16[2,32,5], index: 5, kind: output, shape index: {}]  }
   0x1 LB: > { %s624_s19 = sadd.s32 4294967295, %s754_s18   ;;  %p628_p0 = scmp.ge.s32.totalorder %s754_s18, 1  ;;  %s754_s18 = sphi %s795_s18, %s15_s18  }
   0x2   : > { %p187_p1 = scmp.lt.s32.totalorder %s754_s18, 3 }
   0x4   : > { %p188_p2 = pnand %p628_p0, %p187_p1 }
   0x5   : > { %p215_p3 = scmp.lt.s32.totalorder (!%p188_p2), %s624_s19, 1  ;;  %s756_s24 = smov (!%p188_p2), 1  }
   0x6   : > { %191 = sbr.rel (%p188_p2) target bundleno = 966 (0x3c6), region = 40  ;;  %s757_s25 = smov (!%p188_p2), 3  }
   0x7   : > { %s758_s26 = smov (!%p188_p2), 5   ;;  %s759_s27 = smov (!%p188_p2), 7  }
   0x8   : > { %s760_s28 = smov (!%p188_p2), 120   ;;  %s761_s29 = smov (!%p188_p2), 121  }
   0x9   : > { %s762_s30 = smov (!%p188_p2), 127   ;;  %s764_s21 = smov (!%p188_p2), 122  }
   0xb   : > { %s900_s19 = smov (!%p215_p3, %s624_s19), 1  ;;  %vm264_vm0 = vcmask 7168   ;;  %vm270_vm1 = vcmask 48128   ;;  %vm273_vm2 = vcmask 56320   ;;  %vm276_vm3 = vcmask 64512   ;;  %v744_v32 = vld [vmem:[%s894_s1] sm:$0xff]  }
   0xc   : > { %s645_s20 = sshll.u32 %s900_s19, 4  ;;  %vm281_vm4 = vcmask 105472   ;;  %vm284_vm5 = vcmask 113664   ;;  %vm287_vm6 = vcmask 121856   ;;  %vm292_vm7 = vcmask 162816   ;;  %687 = vmatprep.mubr.bf16.mxu0 %v744_v32  ;;  %v237_v33 = vld [vmem:[%s895_s2 + $0x18] sm:$0xff] }
   0xd   : > { %s219_s23 = scalar_lea.vmem %s893_s0, %s645_s20  ;;  %vm295_vm8 = vcmask 171008   ;;  %vm298_vm9 = vcmask 179200   ;;  %vm303_vm10 = vcmask 220160   ;;  %v236_v34 = vld [vmem:[%s895_s2 + $0x10] sm:$0xff]  ;;  %v763_v35 = vmov 0   ;;  %v234_v36 = vld [vmem:[%s895_s2] sm:$0xff]  ;;  %s224_s11 = scalar_lea.vmem %s898_s5, %s645_s20 }
   0xe   : > { %v742_v0 = vld [vmem:[%s219_s23 + $0x8] sm:$0xff]   ;;  %v743_v1 = vld [vmem:[%s219_s23] sm:$0xff]   ;;  %731 = vset.pattern.permute.xlu1 %v763_v35  ;;  %730 = vset.pattern.permute.xlu0 %v763_v35  ;;  %vm564_vm11 = vcmask 35840  }
   0xf   : > { %250 = vrot.lane.b32.xlu0 %v742_v0, %s756_s24  ;;  %248 = vrot.lane.b32.xlu1 %v743_v1, %s756_s24  ;;  %v235_v37 = vld [vmem:[%s895_s2 + $0x8] sm:$0xff] }
  0x10   : > { %v745_v44 = vld [vmem:[%s894_s1 + $0x8] sm:$0xff]  }
  0x13   : > { %254 = vrot.lane.b32.xlu0 %v742_v0, %s757_s25  ;;  %258 = vrot.lane.b32.xlu1 %v742_v0, %s758_s26 }
  0x17   : > { %252 = vrot.lane.b32.xlu0 %v743_v1, %s757_s25  ;;  %262 = vrot.lane.b32.xlu1 %v742_v0, %s759_s27 }
  0x1b   : > { %256 = vrot.lane.b32.xlu0 %v743_v1, %s758_s26  ;;  %260 = vrot.lane.b32.xlu1 %v743_v1, %s759_s27 }
  0x81   : > { %v251_v2 = vpop.permute.xlu0 %250  ;;  %v249_v4 = vpop.permute.xlu1 %248 }
  0x82   : > { %v269_v3 = vsel %vm264_vm0, 0, %v251_v2  ;;  %v267_v6 = vsel %vm264_vm0, 0, %v249_v4 }
  0x83   : > { %v272_v5 = vsel %vm270_vm1, %v269_v3, 0  ;;  %v271_v9 = vsel %vm270_vm1, %v267_v6, 0 }
  0x84   : > { %v275_v7 = vsel %vm273_vm2, %v272_v5, 0  ;;  %v274_v14 = vsel %vm273_vm2, %v271_v9, 0 }
  0x85   : > { %v255_v8 = vpop.permute.xlu0 %254  ;;  %v259_v11 = vpop.permute.xlu1 %258 }
  0x86   : > { %v280_v10 = vsel %vm276_vm3, %v275_v7, %v255_v8 }
  0x87   : > { %v283_v12 = vsel %vm281_vm4, %v280_v10, 0 }
  0x88   : > { %v286_v13 = vsel %vm284_vm5, %v283_v12, 0  ;;  %v440_v12 = vld [vmem:[%s897_s4 + $0x8] sm:$0xff] }
  0x89   : > { %v291_v15 = vsel %vm287_vm6, %v286_v13, %v259_v11  ;;  %v253_v16 = vpop.permute.xlu0 %252  ;;  %v263_v19 = vpop.permute.xlu1 %262  ;;  %v439_v11 = vld [vmem:[%s897_s4] sm:$0xff]  ;;  %v441_v13 = vld [vmem:[%s897_s4 + $0x10] sm:$0xff] }
  0x8a   : > { %v294_v17 = vsel %vm292_vm7, %v291_v15, 0  ;;  %v278_v18 = vsel %vm276_vm3, %v274_v14, %v253_v16  ;;  %v442_v14 = vld [vmem:[%s897_s4 + $0x18] sm:$0xff]  ;;  %v746_v15 = vld [vmem:[%s896_s3] sm:$0xff]  }
  0x8b   : > { %v297_v20 = vsel %vm295_vm8, %v294_v17, 0  ;;  %v282_v21 = vsel %vm281_vm4, %v278_v18, 0  ;;  %707 = vmatprep.mubr.bf16.mxu1 %v746_v15 }
  0x8c   : > { %v285_v22 = vsel %vm284_vm5, %v282_v21, 0  ;;  %v302_v23 = vsel %vm298_vm9, %v297_v20, %v263_v19 }
  0x8d   : > { %v306_v24 = vsel %vm303_vm10, %v302_v23, 0  ;;  %v257_v25 = vpop.permute.xlu0 %256  ;;  %v261_v27 = vpop.permute.xlu1 %260 }
  0x8e   : > { %v289_v26 = vsel %vm287_vm6, %v285_v22, %v257_v25  ;;  %324 = vrot.lane.b32.xlu0 %v306_v24, %s760_s28  ;;  %v747_v22 = vld [vmem:[%s896_s3 + $0x8] sm:$0xff]  }
  0x8f   : > { %v293_v28 = vsel %vm292_vm7, %v289_v26, 0 }
  0x90   : > { %v296_v29 = vsel %vm295_vm8, %v293_v28, 0 }
  0x91   : > { %v300_v30 = vsel %vm298_vm9, %v296_v29, %v261_v27 }
  0x92   : > { %v304_v31 = vsel %vm303_vm10, %v300_v30, 0  ;;  %318 = vrot.lane.b32.xlu0 %v306_v24, %s761_s29 }
  0x93   : > { %322 = vrot.lane.b32.xlu1 %v304_v31, %s760_s28 }
  0x96   : > { %312 = vrot.lane.b32.xlu0 %v306_v24, %s762_s30 }
  0x97   : > { %316 = vrot.lane.b32.xlu1 %v304_v31, %s761_s29 }
  0x9a   : > { %340 = vperm.xlu0 %730, %v236_v34  }
  0x9b   : > { %310 = vrot.lane.b32.xlu1 %v304_v31, %s762_s30 }
  0x9e   : > { %335 = vperm.xlu0 %730, %v235_v37  }
  0x9f   : > { %345 = vperm.xlu1 %731, %v237_v33  }
  0xa3   : > { %330 = vperm.xlu1 %731, %v234_v36  }
 0x100   : > { %v325_v38 = vpop.permute.xlu0 %324 }
 0x101   : > { %671 = vmatprep.subr.bf16.mxu0 %v325_v38 }
 0x102   : > { %672 = vmatpush3.bf16.msra.mxu0 %v325_v38 }
 0x104   : > { %v319_v40 = vpop.permute.xlu0 %318 }
 0x105   : > { %v323_v39 = vpop.permute.xlu1 %322 }
 0x106   : > { %673 = vmatprep.subr.bf16.mxu0 %v323_v39 }
 0x107   : > { %674 = vmatpush3.bf16.msra.mxu0 %v323_v39 }
 0x108   : > { %675 = vmatprep.subr.bf16.mxu0 %v319_v40  ;;  %v313_v42 = vpop.permute.xlu0 %312 }
 0x109   : > { %v317_v41 = vpop.permute.xlu1 %316 }
 0x10b   : > { %676 = vmatpush3.bf16.msra.mxu0 %v319_v40 }
 0x10c   : > { %677 = vmatprep.subr.bf16.mxu0 %v317_v41 }
 0x10d   : > { %v311_v43 = vpop.permute.xlu1 %310 }
 0x10f   : > { %678 = vmatpush3.bf16.msra.mxu0 %v317_v41 }
 0x110   : > { %679 = vmatprep.subr.bf16.mxu0 %v313_v42 }
 0x113   : > { %680 = vmatpush3.bf16.msra.mxu0 %v313_v42 }
 0x114   : > { %681 = vmatprep.subr.bf16.mxu0 %v311_v43 }
 0x115   : > { %v341_v46 = vpop.permute.xlu0 %340 }
 0x117   : > { %682 = vmatpush3.bf16.msra.mxu0 %v311_v43 }
 0x118   : > { %711 = vmatprep.subr.msk.bf16.mxu0 %vm303_vm10, %v302_v23 }
 0x119   : > { %v336_v53 = vpop.permute.xlu0 %335 }
 0x11a   : > { %v346_v45 = vpop.permute.xlu1 %345 }
 0x11b   : > { %684 = vmatpush3.bf16.msra.mxu0 %v306_v24 }
 0x11c   : > { %712 = vmatprep.subr.msk.bf16.mxu0 %vm303_vm10, %v300_v30 }
 0x11e   : > { %v331_v49 = vpop.permute.xlu1 %330 }
 0x11f   : > { %686 = vmatpush3.bf16.msra.mxu0 %v304_v31 }
 0x122   : > { %688 = vmatmul.mubr.bf16.vlgmr.msra.gmra.mxu0 %v745_v44 }
 0x1e2   : > { %v689_v47 = vpop.f32.mrf.mxu0 }
 0x1e3   : > { %v403_v51 = vadd.f32 %v689_v47, %v341_v46 }
 0x1e4   : > { %v394_v48 = vpop.f32.mrf.mxu0 }
 0x1e5   : > { %v395_v55 = vadd.f32 %v394_v48, %v331_v49 }
 0x1e6   : > { %v690_v50 = vpop.f32.mrf.mxu0 }
 0x1e7   : > { %v406_v52 = vadd.f32 %v690_v50, %v346_v45 }
 0x1e8   : > { %v397_v54 = vpop.f32.mrf.mxu0 }
 0x1e9   : > { %v732_v56 = vpack.i.bf16 %v406_v52, %v403_v51  ;;  %v398_v57 = vadd.f32 %v397_v54, %v336_v53 }
 0x1eb   : > { %v737_v58 = vpack.i.bf16 %v398_v57, %v395_v55  ;;  %733 = vrot.lane.b32.xlu1 %v732_v56, %s760_s28 }
 0x1ed   : > { %738 = vrot.lane.b32.xlu0 %v737_v58, %s760_s28 }
 0x25d   : > { %v734_v59 = vpop.permute.xlu1 %733 }
 0x25e   : > { %v736_v60 = vunpack.i.h.bf16 %v734_v59  ;;  %v735_v61 = vunpack.i.l.bf16 %v734_v59 }
 0x25f   : > { %v739_v62 = vpop.permute.xlu0 %738 }
 0x260   : > { %v428_v63 = vsel %vm270_vm1, %v406_v52, %v736_v60  ;;  %v427_v0 = vsel %vm270_vm1, %v403_v51, %v735_v61  ;;  %v741_v1 = vunpack.i.h.bf16 %v739_v62  ;;  %v740_v2 = vunpack.i.l.bf16 %v739_v62 }
 0x261   : > { %v432_v3 = vmax.f32 %v428_v63, 0.0  ;;  %v431_v4 = vmax.f32 %v427_v0, 0.0 }
 0x262   : > { %v426_v5 = vsel %vm270_vm1, %v398_v57, %v741_v1  ;;  %v425_v6 = vsel %vm270_vm1, %v395_v55, %v740_v2 }
 0x263   : > { %v434_v7 = vpack.c.bf16 %v432_v3, %v431_v4  ;;  %v430_v8 = vmax.f32 %v426_v5, 0.0  ;;  %v429_v9 = vmax.f32 %v425_v6, 0.0 }
 0x265   : > { %v433_v10 = vpack.c.bf16 %v430_v8, %v429_v9  ;;  %459 = vrot.lane.b32.xlu1 %v434_v7, %s761_s29 }
 0x267   : > { %457 = vrot.lane.b32.xlu0 %v433_v10, %s761_s29 }
 0x269   : > { %453 = vrot.lane.b32.xlu1 %v434_v7, %s764_s21 }
 0x26b   : > { %451 = vrot.lane.b32.xlu0 %v433_v10, %s764_s21 }
 0x26d   : > { %447 = vrot.lane.b32.xlu1 %v434_v7, %s762_s30 }
 0x26f   : > { %445 = vrot.lane.b32.xlu0 %v433_v10, %s762_s30 }
 0x271   : > { %465 = vperm.xlu1 %731, %v439_v11  }
 0x273   : > { %470 = vperm.xlu0 %730, %v440_v12  }
 0x275   : > { %475 = vperm.xlu1 %731, %v441_v13  }
 0x277   : > { %480 = vperm.xlu0 %730, %v442_v14  }
 0x2d7   : > { %v460_v16 = vpop.permute.xlu1 %459 }
 0x2d8   : > { %691 = vmatprep.subr.bf16.mxu1 %v460_v16 }
 0x2d9   : > { %v458_v17 = vpop.permute.xlu0 %457  ;;  %692 = vmatpush3.bf16.msra.mxu1 %v460_v16 }
 0x2da   : > { %693 = vmatprep.subr.bf16.mxu1 %v458_v17 }
 0x2db   : > { %v454_v18 = vpop.permute.xlu1 %453 }
 0x2dd   : > { %694 = vmatpush3.bf16.msra.mxu1 %v458_v17  ;;  %v452_v19 = vpop.permute.xlu0 %451 }
 0x2de   : > { %695 = vmatprep.subr.bf16.mxu1 %v454_v18 }
 0x2df   : > { %v448_v20 = vpop.permute.xlu1 %447 }
 0x2e1   : > { %696 = vmatpush3.bf16.msra.mxu1 %v454_v18  ;;  %v446_v21 = vpop.permute.xlu0 %445 }
 0x2e2   : > { %697 = vmatprep.subr.bf16.mxu1 %v452_v19 }
 0x2e5   : > { %698 = vmatpush3.bf16.msra.mxu1 %v452_v19 }
 0x2e6   : > { %699 = vmatprep.subr.bf16.mxu1 %v448_v20 }
 0x2e9   : > { %700 = vmatpush3.bf16.msra.mxu1 %v448_v20 }
 0x2ea   : > { %701 = vmatprep.subr.bf16.mxu1 %v446_v21 }
 0x2ec   : > { %v466_v23 = vpop.permute.xlu1 %465 }
 0x2ed   : > { %702 = vmatpush3.bf16.msra.mxu1 %v446_v21 }
 0x2ee   : > { %703 = vmatprep.subr.bf16.mxu1 %v434_v7  ;;  %v471_v24 = vpop.permute.xlu0 %470 }
 0x2f0   : > { %v476_v25 = vpop.permute.xlu1 %475 }
 0x2f1   : > { %704 = vmatpush3.bf16.msra.mxu1 %v434_v7 }
 0x2f2   : > { %705 = vmatprep.subr.bf16.mxu1 %v433_v10  ;;  %v481_v31 = vpop.permute.xlu0 %480 }
 0x2f5   : > { %706 = vmatpush3.bf16.msra.mxu1 %v433_v10 }
 0x2f8   : > { %708 = vmatmul.mubr.bf16.vlgmr.msra.gmra.mxu1 %v747_v22 }
 0x3b8   : > { %v709_v26 = vpop.f32.mrf.mxu1 }
 0x3b9   : > { %v538_v27 = vadd.f32 %v709_v26, %v476_v25 }
 0x3ba   : > { %v529_v28 = vpop.f32.mrf.mxu1 }
 0x3bb   : > { %v546_v29 = vmax.f32 %v538_v27, 0.0  ;;  %v530_v30 = vadd.f32 %v529_v28, %v466_v23 }
 0x3bc   : > { %v710_v32 = vpop.f32.mrf.mxu1 }
 0x3bd   : > { %v649_v33 = vpack.c.bf16 %v546_v29, %v546_v29  ;;  %v544_v34 = vmax.f32 %v530_v30, 0.0  ;;  %v541_v35 = vadd.f32 %v710_v32, %v481_v31 }
 0x3be   : > { %v532_v36 = vpop.f32.mrf.mxu1 }
 0x3bf   : > { %567 = vst.msk [vmem:[%s224_s11 + $0x8] sm:$0xf] %vm564_vm11, %v649_v33  ;;  %v647_v37 = vpack.c.bf16 %v544_v34, %v544_v34  ;;  %v547_v38 = vmax.f32 %v541_v35, 0.0  ;;  %v533_v39 = vadd.f32 %v532_v36, %v471_v24 }
 0x3c1   : > { %565 = vst.msk [vmem:[%s224_s11] sm:$0xf] %vm564_vm11, %v647_v37  ;;  %v650_v40 = vpack.c.bf16 %v547_v38, %v547_v38  ;;  %v545_v41 = vmax.f32 %v533_v39, 0.0 }
 0x3c3   : > { %568 = vst.msk [vmem:[%s224_s11 + $0xc] sm:$0xf] %vm564_vm11, %v650_v40  ;;  %v648_v42 = vpack.c.bf16 %v545_v41, %v545_v41 }
 0x3c5   : > { %566 = vst.msk [vmem:[%s224_s11 + $0x4] sm:$0xf] %vm564_vm11, %v648_v42 }
 0x3c6 PF: > { %s15_s18 = sadd.s32 1, %s754_s18  }
 0x3c7   : > { %p12_p4 = scmp.ge.s32.totalorder %s15_s18, 4  }
 0x3c9   :  { %14 = sbr.rel (!%p12_p4) target bundleno = 1 (0x1), region = 70 }

</bundles_post_ra>
